<compile_context>
chip_gen: v5e
topology: v5e:2x2
jax: 0.10.0
libtpu: 0.0.40
codegen_flags: <defaults>
</compile_context>

<pallas_src>
import functools

import jax
import jax.numpy as jnp
from jax.experimental import pallas as pl
from jax.experimental.pallas import tpu as pltpu


def _leaky(v):
    return jnp.where(v > 0, v, 0.2 * v)


def _bn_scale_shift(h, gamma_t, beta_t, npix, cc, eps=1e-5):
    """BatchNorm (training mode) factors on a lane-dense (rows, W*cc) slab.

    Lane L holds channel (L % cc).  gamma_t / beta_t are already lane-tiled
    (1, W*cc) f32.  One pass: sum + sum-of-squares, then a cyclic-roll tree
    folds the W lane-groups; the result is the per-channel stat replicated at
    every lane.  Returns (scale, shift) so the caller applies h*scale + shift.
    """
    wc = h.shape[1]
    s1 = jnp.sum(h, axis=0, keepdims=True)
    s2 = jnp.sum(h * h, axis=0, keepdims=True)
    shift = wc // 2
    while shift >= cc:                       # requires W = wc // cc power of 2
        s1 = s1 + pltpu.roll(s1, shift, axis=1)
        s2 = s2 + pltpu.roll(s2, shift, axis=1)
        shift //= 2
    inv_n = 1.0 / float(npix)
    mean = s1 * inv_n
    var = s2 * inv_n - mean * mean           # biased variance (matches torch)
    scale = gamma_t * jax.lax.rsqrt(var + eps)
    return scale, beta_t - mean * scale


def _banded_conv(pad_ref, wexp_ref):
    """'Same' conv as KH deep-K matmuls against block-banded expanded weights.

    pad_ref : (B, H + KH - 1, W*Cin) f32, H-halo rows are zero.
    wexp_ref: (KH, W*Cin, W*Cout) bf16 (band clipped at the W boundary).
    returns : (B*H, W*Cout) f32 accumulator.
    """
    kh_total = wexp_ref.shape[0]
    b, hp, k = pad_ref.shape
    h = hp - (kh_total - 1)

    def lhs(kh):
        # Cast activations to the weight dtype (bf16) right at the MXU input.
        return pad_ref[:, kh:kh + h, :].reshape(b * h, k).astype(wexp_ref.dtype)

    acc = jnp.dot(lhs(0), wexp_ref[0], preferred_element_type=jnp.float32)
    for kh in range(1, kh_total):
        acc = acc + jnp.dot(lhs(kh), wexp_ref[kh],
                            preferred_element_type=jnp.float32)
    return acc


def _dis_initial_block_kernel(ypad_ref, wexp_in_ref, gin_ref, bin_ref,
                              wexp1_ref, g1_ref, b1_ref,
                              wexp2_ref, g2_ref, b2_ref,
                              out_ref, pad3_ref, *, cc):
    B = ypad_ref.shape[0]
    wcc = out_ref.shape[1]                    # W * cc
    W = wcc // cc
    H = pad3_ref.shape[1] - 2
    npix = B * H * W
    k3 = pad3_ref.shape[2]
    f32 = jnp.float32

    # Zero the H-halo rows of the shared 3x3 pad scratch exactly once.  Both
    # residual convs reuse it: interior rows are overwritten each time and the
    # halo rows stay zero.  There is no W halo (the W boundary is folded into
    # the banded expanded weights).
    pad3_ref[:, 0:1, :] = jnp.zeros((B, 1, k3), f32)
    pad3_ref[:, H + 1:H + 2, :] = jnp.zeros((B, 1, k3), f32)

    # conv_in (5x5, pad 2) -> BN -> LeakyReLU(0.2).  The input arrives already
    # H-padded from the wrapper and is consumed directly as the MXU LHS.
    h0 = _banded_conv(ypad_ref, wexp_in_ref)                   # (B*H, W*cc) f32
    s, t = _bn_scale_shift(h0, gin_ref[...], bin_ref[...], npix, cc)
    h0 = _leaky(h0 * s + t)

    # Residual_Block(cc, cc): conv_expand is None -> identity is h0.
    pad3_ref[:, 1:1 + H, :] = h0.reshape(B, H, wcc)
    h1 = _banded_conv(pad3_ref, wexp1_ref)
    s, t = _bn_scale_shift(h1, g1_ref[...], b1_ref[...], npix, cc)
    h1 = _leaky(h1 * s + t)

    pad3_ref[:, 1:1 + H, :] = h1.reshape(B, H, wcc)
    h2 = _banded_conv(pad3_ref, wexp2_ref)
    s, t = _bn_scale_shift(h2, g2_ref[...], b2_ref[...], npix, cc)

    out_ref[...] = _leaky(h2 * s + t + h0)


def _expand_banded(w, W):
    """(KH, KW, Cin, Cout) -> (KH, W*Cin, W*Cout) block-banded matrices.

    wexp[kh, w'*Cin + ci, w*Cout + co] = w[kh, w'-w+p, ci, co] when the tap is
    in range, else 0 (p = (KW-1)//2).  The clipped band reproduces the zero
    padding of a 'same' conv along W, so the kernel needs no W halo.
    """
    KH, KW, Cin, Cout = w.shape
    p = (KW - 1) // 2
    cols = []
    for wpos in range(W):                     # small trace-time loop
        blk = jnp.zeros((KH, W, Cin, Cout), w.dtype)
        lo = max(0, wpos - p)
        hi = min(W, wpos + p + 1)
        blk = blk.at[:, lo:hi, :, :].set(w[:, lo - wpos + p:hi - wpos + p, :, :])
        cols.append(blk)
    wexp = jnp.stack(cols, axis=3)            # (KH, W, Cin, W, Cout)
    return wexp.reshape(KH, W * Cin, W * Cout)


@jax.jit
def dis_initial_block(x_nchw, rgb, label, params):
    del rgb                                   # unused by the PyTorch forward
    B, cdim, H, W = x_nchw.shape
    cn = label.shape[1]
    c0 = cdim + cn
    cc = params["w_in"].shape[-1]
    assert W > 0 and (W & (W - 1)) == 0, "W must be a power of two (BN lane fold)"

    # NCHW -> lane-dense (B, H+4, W*c0) H-padded rows (label broadcast+concat).
    # TODO(synk): the label concat could be folded into the kernel analytically
    # (spatially-constant term + border corrections); at this size the tiny
    # (B,H,W,c0) materialization is negligible, so it stays wrapper-side glue.
    x = jnp.transpose(x_nchw, (0, 2, 3, 1)).astype(jnp.float32)
    lab = jnp.broadcast_to(label[:, None, None, :].astype(jnp.float32),
                           (B, H, W, cn))
    y_rows = jnp.concatenate([x, lab], axis=-1).reshape(B, H, W * c0)
    y_pad = jnp.pad(y_rows, ((0, 0), (2, 2), (0, 0)))          # 5x5 H halo

    # Block-banded expanded conv weights, stored bf16 (MXU operand dtype).
    wexp_in = _expand_banded(params["w_in"], W).astype(jnp.bfloat16)
    wexp1 = _expand_banded(params["w1"], W).astype(jnp.bfloat16)
    wexp2 = _expand_banded(params["w2"], W).astype(jnp.bfloat16)

    def lane_tile(v):                         # (1, cc) -> (1, W*cc) f32
        return jnp.tile(v.reshape(1, cc).astype(jnp.float32), (1, W))

    gin_t, bin_t = lane_tile(params["g_in"]), lane_tile(params["b_in"])
    g1_t, b1_t = lane_tile(params["g1"]), lane_tile(params["b1"])
    g2_t, b2_t = lane_tile(params["g2"]), lane_tile(params["b2"])

    inputs = (y_pad, wexp_in, gin_t, bin_t, wexp1, g1_t, b1_t, wexp2, g2_t, b2_t)

    flops = 2 * (B * H) * (W * cc) * (5 * W * c0 + 2 * 3 * W * cc)
    bytes_accessed = sum(int(a.size) * a.dtype.itemsize for a in inputs)
    bytes_accessed += (B * H) * (W * cc) * 4                    # output
    cost = pl.CostEstimate(flops=int(flops), transcendentals=int(3 * W * cc),
                           bytes_accessed=int(bytes_accessed))

    vspec = pl.BlockSpec(memory_space=pltpu.MemorySpace.VMEM)
    out_rows = pl.pallas_call(
        functools.partial(_dis_initial_block_kernel, cc=cc),
        out_shape=jax.ShapeDtypeStruct((B * H, W * cc), jnp.float32),
        in_specs=[vspec] * len(inputs),
        out_specs=vspec,
        scratch_shapes=[
            pltpu.VMEM((B, H + 2, W * cc), jnp.float32),   # 3x3 H-padded rows
        ],
        cost_estimate=cost,
    )(*inputs)

    # (B*H, W*cc) slab -> NCHW to match the PyTorch output convention.
    return jnp.transpose(out_rows.reshape(B, H, W, cc), (0, 3, 1, 2))


# ---------------- pure-JAX f32 reference (correctness check) ----------------
def _conv_ref(x, w, pad):
    return jax.lax.conv_general_dilated(
        x, w, window_strides=(1, 1), padding=[(pad, pad), (pad, pad)],
        dimension_numbers=("NHWC", "HWIO", "NHWC"))


def _bn_ref(x, gamma, beta, eps=1e-5):
    mean = jnp.mean(x, axis=(0, 1, 2), keepdims=True)
    var = jnp.mean((x - mean) ** 2, axis=(0, 1, 2), keepdims=True)
    return ((x - mean) * jax.lax.rsqrt(var + eps) * gamma.reshape(1, 1, 1, -1)
            + beta.reshape(1, 1, 1, -1))


def dis_initial_block_ref(x_nchw, label, params):
    B, _, H, W = x_nchw.shape
    x = jnp.transpose(x_nchw, (0, 2, 3, 1)).astype(jnp.float32)
    cn = label.shape[1]
    lab = jnp.broadcast_to(label[:, None, None, :].astype(jnp.float32),
                           (B, H, W, cn))
    y = jnp.concatenate([x, lab], axis=-1)
    h0 = _leaky(_bn_ref(_conv_ref(y, params["w_in"], 2),
                        params["g_in"], params["b_in"]))
    h1 = _leaky(_bn_ref(_conv_ref(h0, params["w1"], 1),
                        params["g1"], params["b1"]))
    h2 = _bn_ref(_conv_ref(h1, params["w2"], 1), params["g2"], params["b2"])
    return jnp.transpose(_leaky(h2 + h0), (0, 3, 1, 2))


if __name__ == "__main__":
    # Small shapes consistent with the module.
    B, cdim, H, W = 2, 3, 16, 16
    class_num = 10
    cc = 32                       # out_channels / feature channels
    c0 = cdim + class_num         # conv_in input channels

    key = jax.random.PRNGKey(0)
    ks = jax.random.split(key, 12)

    def bf16_round(a):
        # The kernel feeds bf16 operands to the MXU; pre-rounding the test data
        # to bf16 keeps those casts lossless so the f32 reference comparison
        # mainly exercises the kernel structure (remaining divergence comes from
        # bf16 rounding of intermediate activations at the residual convs).
        return a.astype(jnp.bfloat16).astype(jnp.float32)

    x = bf16_round(jax.random.normal(ks[0], (B, cdim, H, W), jnp.float32))
    rgb = jax.random.normal(ks[1], (B, cdim, H, W), jnp.float32)    # unused
    label = bf16_round(jax.random.normal(ks[2], (B, class_num), jnp.float32))

    params = {
        "w_in": bf16_round(0.1 * jax.random.normal(ks[3], (5, 5, c0, cc), jnp.float32)),
        "g_in": 1.0 + 0.1 * jax.random.normal(ks[4], (1, cc), jnp.float32),
        "b_in": 0.1 * jax.random.normal(ks[5], (1, cc), jnp.float32),
        "w1":   bf16_round(0.1 * jax.random.normal(ks[6], (3, 3, cc, cc), jnp.float32)),
        "g1":   1.0 + 0.1 * jax.random.normal(ks[7], (1, cc), jnp.float32),
        "b1":   0.1 * jax.random.normal(ks[8], (1, cc), jnp.float32),
        "w2":   bf16_round(0.1 * jax.random.normal(ks[9], (3, 3, cc, cc), jnp.float32)),
        "g2":   1.0 + 0.1 * jax.random.normal(ks[10], (1, cc), jnp.float32),
        "b2":   0.1 * jax.random.normal(ks[11], (1, cc), jnp.float32),
    }

    out = jax.block_until_ready(dis_initial_block(x, rgb, label, params))
    ref = jax.block_until_ready(dis_initial_block_ref(x, label, params))

    assert out.shape == (B, cc, H, W), out.shape
    # Tolerance covers the intended bf16 MXU-operand rounding of the (f32)
    # intermediate activations at the two residual convs; stats stay f32.
    if not jnp.allclose(out, ref, atol=5e-2, rtol=5e-2):
        max_err = jnp.max(jnp.abs(out - ref))
        raise AssertionError(f"mismatch vs reference, max abs err = {max_err}")

    print("KERNEL_OK")
</pallas_src>

<mosaic_0001>
module attributes {stable_mosaic.version = 11 : i64} {
  func.func @_dis_initial_block_kernel(%arg0: memref<2x20x208xf32, #tpu.memory_space<vmem>>, %arg1: memref<5x208x512xbf16, #tpu.memory_space<vmem>>, %arg2: memref<1x512xf32, #tpu.memory_space<vmem>>, %arg3: memref<1x512xf32, #tpu.memory_space<vmem>>, %arg4: memref<3x512x512xbf16, #tpu.memory_space<vmem>>, %arg5: memref<1x512xf32, #tpu.memory_space<vmem>>, %arg6: memref<1x512xf32, #tpu.memory_space<vmem>>, %arg7: memref<3x512x512xbf16, #tpu.memory_space<vmem>>, %arg8: memref<1x512xf32, #tpu.memory_space<vmem>>, %arg9: memref<1x512xf32, #tpu.memory_space<vmem>>, %arg10: memref<32x512xf32, #tpu.memory_space<vmem>>, %arg11: memref<2x18x512xf32, #tpu.memory_space<vmem>>) attributes {dimension_semantics = [], scalar_prefetch = 0 : i64, scratch_operands = 1 : i64, tpu.core_type = #tpu.core_type<tc>} {
    %cst = arith.constant 0.000000e+00 : f32
    %0 = vector.broadcast %cst : f32 to vector<2x1x512xf32>
    %c0 = arith.constant 0 : index
    %c0_0 = arith.constant 0 : index
    %c0_1 = arith.constant 0 : index
    %1 = vector.load %arg11[%c0, %c0_0, %c0_1] : memref<2x18x512xf32, #tpu.memory_space<vmem>>, vector<2x1x512xf32>
    tpu.vector_store %arg11[%c0, %c0_0, %c0_1], %0 {strides = array<i32>} : memref<2x18x512xf32, #tpu.memory_space<vmem>>, vector<2x1x512xf32>,
    %cst_2 = arith.constant 0.000000e+00 : f32
    %2 = vector.broadcast %cst_2 : f32 to vector<2x1x512xf32>
    %c0_3 = arith.constant 0 : index
    %c17 = arith.constant 17 : index
    %c0_4 = arith.constant 0 : index
    %3 = vector.load %arg11[%c0_3, %c17, %c0_4] : memref<2x18x512xf32, #tpu.memory_space<vmem>>, vector<2x1x512xf32>
    tpu.vector_store %arg11[%c0_3, %c17, %c0_4], %2 {strides = array<i32>} : memref<2x18x512xf32, #tpu.memory_space<vmem>>, vector<2x1x512xf32>,
    %c0_5 = arith.constant 0 : index
    %c0_6 = arith.constant 0 : index
    %c0_7 = arith.constant 0 : index
    %4 = vector.load %arg0[%c0_5, %c0_6, %c0_7] : memref<2x20x208xf32, #tpu.memory_space<vmem>>, vector<2x16x208xf32>
    %5 = vector.shape_cast %4 : vector<2x16x208xf32> to vector<32x208xf32>
    %6 = arith.truncf %5 : vector<32x208xf32> to vector<32x208xbf16>
    %c0_8 = arith.constant 0 : index
    %c0_9 = arith.constant 0 : index
    %c0_10 = arith.constant 0 : index
    %7 = vector.load %arg1[%c0_8, %c0_9, %c0_10] : memref<5x208x512xbf16, #tpu.memory_space<vmem>>, vector<1x208x512xbf16>
    %8 = vector.shape_cast %7 : vector<1x208x512xbf16> to vector<208x512xbf16>
    %cst_11 = arith.constant dense<0.000000e+00> : vector<32x512xf32>
    %9 = tpu.matmul %6, %8, %cst_11 {dimension_numbers = #tpu.dot_dimension_numbers<[1], [0], [0], [1], [0, 0, 1, 1], [], []>} : vector<32x208xbf16>, vector<208x512xbf16>, vector<32x512xf32> -> vector<32x512xf32>
    %c0_12 = arith.constant 0 : index
    %c1 = arith.constant 1 : index
    %c0_13 = arith.constant 0 : index
    %10 = vector.load %arg0[%c0_12, %c1, %c0_13] : memref<2x20x208xf32, #tpu.memory_space<vmem>>, vector<2x16x208xf32>
    %11 = vector.shape_cast %10 : vector<2x16x208xf32> to vector<32x208xf32>
    %12 = arith.truncf %11 : vector<32x208xf32> to vector<32x208xbf16>
    %c1_14 = arith.constant 1 : index
    %c0_15 = arith.constant 0 : index
    %c0_16 = arith.constant 0 : index
    %13 = vector.load %arg1[%c1_14, %c0_15, %c0_16] : memref<5x208x512xbf16, #tpu.memory_space<vmem>>, vector<1x208x512xbf16>
    %14 = vector.shape_cast %13 : vector<1x208x512xbf16> to vector<208x512xbf16>
    %cst_17 = arith.constant dense<0.000000e+00> : vector<32x512xf32>
    %15 = tpu.matmul %12, %14, %cst_17 {dimension_numbers = #tpu.dot_dimension_numbers<[1], [0], [0], [1], [0, 0, 1, 1], [], []>} : vector<32x208xbf16>, vector<208x512xbf16>, vector<32x512xf32> -> vector<32x512xf32>
    %16 = arith.addf %9, %15 : vector<32x512xf32>
    %c0_18 = arith.constant 0 : index
    %c2 = arith.constant 2 : index
    %c0_19 = arith.constant 0 : index
    %17 = vector.load %arg0[%c0_18, %c2, %c0_19] : memref<2x20x208xf32, #tpu.memory_space<vmem>>, vector<2x16x208xf32>
    %18 = vector.shape_cast %17 : vector<2x16x208xf32> to vector<32x208xf32>
    %19 = arith.truncf %18 : vector<32x208xf32> to vector<32x208xbf16>
    %c2_20 = arith.constant 2 : index
    %c0_21 = arith.constant 0 : index
    %c0_22 = arith.constant 0 : index
    %20 = vector.load %arg1[%c2_20, %c0_21, %c0_22] : memref<5x208x512xbf16, #tpu.memory_space<vmem>>, vector<1x208x512xbf16>
    %21 = vector.shape_cast %20 : vector<1x208x512xbf16> to vector<208x512xbf16>
    %cst_23 = arith.constant dense<0.000000e+00> : vector<32x512xf32>
    %22 = tpu.matmul %19, %21, %cst_23 {dimension_numbers = #tpu.dot_dimension_numbers<[1], [0], [0], [1], [0, 0, 1, 1], [], []>} : vector<32x208xbf16>, vector<208x512xbf16>, vector<32x512xf32> -> vector<32x512xf32>
    %23 = arith.addf %16, %22 : vector<32x512xf32>
    %c0_24 = arith.constant 0 : index
    %c3 = arith.constant 3 : index
    %c0_25 = arith.constant 0 : index
    %24 = vector.load %arg0[%c0_24, %c3, %c0_25] : memref<2x20x208xf32, #tpu.memory_space<vmem>>, vector<2x16x208xf32>
    %25 = vector.shape_cast %24 : vector<2x16x208xf32> to vector<32x208xf32>
    %26 = arith.truncf %25 : vector<32x208xf32> to vector<32x208xbf16>
    %c3_26 = arith.constant 3 : index
    %c0_27 = arith.constant 0 : index
    %c0_28 = arith.constant 0 : index
    %27 = vector.load %arg1[%c3_26, %c0_27, %c0_28] : memref<5x208x512xbf16, #tpu.memory_space<vmem>>, vector<1x208x512xbf16>
    %28 = vector.shape_cast %27 : vector<1x208x512xbf16> to vector<208x512xbf16>
    %cst_29 = arith.constant dense<0.000000e+00> : vector<32x512xf32>
    %29 = tpu.matmul %26, %28, %cst_29 {dimension_numbers = #tpu.dot_dimension_numbers<[1], [0], [0], [1], [0, 0, 1, 1], [], []>} : vector<32x208xbf16>, vector<208x512xbf16>, vector<32x512xf32> -> vector<32x512xf32>
    %30 = arith.addf %23, %29 : vector<32x512xf32>
    %c0_30 = arith.constant 0 : index
    %c4 = arith.constant 4 : index
    %c0_31 = arith.constant 0 : index
    %31 = vector.load %arg0[%c0_30, %c4, %c0_31] : memref<2x20x208xf32, #tpu.memory_space<vmem>>, vector<2x16x208xf32>
    %32 = vector.shape_cast %31 : vector<2x16x208xf32> to vector<32x208xf32>
    %33 = arith.truncf %32 : vector<32x208xf32> to vector<32x208xbf16>
    %c4_32 = arith.constant 4 : index
    %c0_33 = arith.constant 0 : index
    %c0_34 = arith.constant 0 : index
    %34 = vector.load %arg1[%c4_32, %c0_33, %c0_34] : memref<5x208x512xbf16, #tpu.memory_space<vmem>>, vector<1x208x512xbf16>
    %35 = vector.shape_cast %34 : vector<1x208x512xbf16> to vector<208x512xbf16>
    %cst_35 = arith.constant dense<0.000000e+00> : vector<32x512xf32>
    %36 = tpu.matmul %33, %35, %cst_35 {dimension_numbers = #tpu.dot_dimension_numbers<[1], [0], [0], [1], [0, 0, 1, 1], [], []>} : vector<32x208xbf16>, vector<208x512xbf16>, vector<32x512xf32> -> vector<32x512xf32>
    %37 = arith.addf %30, %36 : vector<32x512xf32>
    %c0_36 = arith.constant 0 : index
    %c0_37 = arith.constant 0 : index
    %38 = vector.load %arg2[%c0_36, %c0_37] : memref<1x512xf32, #tpu.memory_space<vmem>>, vector<1x512xf32>
    %c0_38 = arith.constant 0 : index
    %c0_39 = arith.constant 0 : index
    %39 = vector.load %arg3[%c0_38, %c0_39] : memref<1x512xf32, #tpu.memory_space<vmem>>, vector<1x512xf32>
    %cst_40 = arith.constant dense<0.000000e+00> : vector<512xf32>
    %40 = vector.multi_reduction <add>, %37, %cst_40 [0] : vector<32x512xf32> to vector<512xf32>
    %41 = vector.shape_cast %40 : vector<512xf32> to vector<1x512xf32>
    %42 = arith.mulf %37, %37 : vector<32x512xf32>
    %cst_41 = arith.constant dense<0.000000e+00> : vector<512xf32>
    %43 = vector.multi_reduction <add>, %42, %cst_41 [0] : vector<32x512xf32> to vector<512xf32>
    %44 = vector.shape_cast %43 : vector<512xf32> to vector<1x512xf32>
    %c256_i32 = arith.constant 256 : i32
    %45 = tpu.dynamic_rotate %41 by %c256_i32 dim 1 : vector<1x512xf32>, i32 -> vector<1x512xf32>
    %46 = arith.addf %41, %45 : vector<1x512xf32>
    %c256_i32_42 = arith.constant 256 : i32
    %47 = tpu.dynamic_rotate %44 by %c256_i32_42 dim 1 : vector<1x512xf32>, i32 -> vector<1x512xf32>
    %48 = arith.addf %44, %47 : vector<1x512xf32>
    %c128_i32 = arith.constant 128 : i32
    %49 = tpu.dynamic_rotate %46 by %c128_i32 dim 1 : vector<1x512xf32>, i32 -> vector<1x512xf32>
    %50 = arith.addf %46, %49 : vector<1x512xf32>
    %c128_i32_43 = arith.constant 128 : i32
    %51 = tpu.dynamic_rotate %48 by %c128_i32_43 dim 1 : vector<1x512xf32>, i32 -> vector<1x512xf32>
    %52 = arith.addf %48, %51 : vector<1x512xf32>
    %c64_i32 = arith.constant 64 : i32
    %53 = tpu.dynamic_rotate %50 by %c64_i32 dim 1 : vector<1x512xf32>, i32 -> vector<1x512xf32>
    %54 = arith.addf %50, %53 : vector<1x512xf32>
    %c64_i32_44 = arith.constant 64 : i32
    %55 = tpu.dynamic_rotate %52 by %c64_i32_44 dim 1 : vector<1x512xf32>, i32 -> vector<1x512xf32>
    %56 = arith.addf %52, %55 : vector<1x512xf32>
    %c32_i32 = arith.constant 32 : i32
    %57 = tpu.dynamic_rotate %54 by %c32_i32 dim 1 : vector<1x512xf32>, i32 -> vector<1x512xf32>
    %58 = arith.addf %54, %57 : vector<1x512xf32>
    %c32_i32_45 = arith.constant 32 : i32
    %59 = tpu.dynamic_rotate %56 by %c32_i32_45 dim 1 : vector<1x512xf32>, i32 -> vector<1x512xf32>
    %60 = arith.addf %56, %59 : vector<1x512xf32>
    %cst_46 = arith.constant 0.001953125 : f32
    %61 = vector.broadcast %cst_46 : f32 to vector<1x512xf32>
    %62 = arith.mulf %58, %61 : vector<1x512xf32>
    %cst_47 = arith.constant 0.001953125 : f32
    %63 = vector.broadcast %cst_47 : f32 to vector<1x512xf32>
    %64 = arith.mulf %60, %63 : vector<1x512xf32>
    %65 = arith.mulf %62, %62 : vector<1x512xf32>
    %66 = arith.subf %64, %65 : vector<1x512xf32>
    %cst_48 = arith.constant 9.99999974E-6 : f32
    %67 = vector.broadcast %cst_48 : f32 to vector<1x512xf32>
    %68 = arith.addf %66, %67 : vector<1x512xf32>
    %69 = math.rsqrt %68 : vector<1x512xf32>
    %70 = arith.mulf %38, %69 : vector<1x512xf32>
    %71 = arith.mulf %62, %70 : vector<1x512xf32>
    %72 = arith.subf %39, %71 : vector<1x512xf32>
    %73 = vector.broadcast %70 : vector<1x512xf32> to vector<32x512xf32>
    %74 = arith.mulf %37, %73 : vector<32x512xf32>
    %75 = vector.broadcast %72 : vector<1x512xf32> to vector<32x512xf32>
    %76 = arith.addf %74, %75 : vector<32x512xf32>
    %cst_49 = arith.constant 0.000000e+00 : f32
    %77 = vector.broadcast %cst_49 : f32 to vector<32x512xf32>
    %78 = arith.cmpf ogt, %76, %77 : vector<32x512xf32>
    %cst_50 = arith.constant 2.000000e-01 : f32
    %79 = vector.broadcast %cst_50 : f32 to vector<32x512xf32>
    %80 = arith.mulf %79, %76 : vector<32x512xf32>
    %81 = arith.select %78, %76, %80 : vector<32x512xi1>, vector<32x512xf32>
    %82 = vector.shape_cast %81 : vector<32x512xf32> to vector<2x16x512xf32>
    %c0_51 = arith.constant 0 : index
    %c1_52 = arith.constant 1 : index
    %c0_53 = arith.constant 0 : index
    %83 = vector.load %arg11[%c0_51, %c1_52, %c0_53] : memref<2x18x512xf32, #tpu.memory_space<vmem>>, vector<2x16x512xf32>
    tpu.vector_store %arg11[%c0_51, %c1_52, %c0_53], %82 {strides = array<i32>} : memref<2x18x512xf32, #tpu.memory_space<vmem>>, vector<2x16x512xf32>,
    %c0_54 = arith.constant 0 : index
    %c0_55 = arith.constant 0 : index
    %c0_56 = arith.constant 0 : index
    %84 = vector.load %arg11[%c0_54, %c0_55, %c0_56] : memref<2x18x512xf32, #tpu.memory_space<vmem>>, vector<2x16x512xf32>
    %85 = vector.shape_cast %84 : vector<2x16x512xf32> to vector<32x512xf32>
    %86 = arith.truncf %85 : vector<32x512xf32> to vector<32x512xbf16>
    %c0_57 = arith.constant 0 : index
    %c0_58 = arith.constant 0 : index
    %c0_59 = arith.constant 0 : index
    %87 = vector.load %arg4[%c0_57, %c0_58, %c0_59] : memref<3x512x512xbf16, #tpu.memory_space<vmem>>, vector<1x512x512xbf16>
    %88 = vector.shape_cast %87 : vector<1x512x512xbf16> to vector<512x512xbf16>
    %cst_60 = arith.constant dense<0.000000e+00> : vector<32x512xf32>
    %89 = tpu.matmul %86, %88, %cst_60 {dimension_numbers = #tpu.dot_dimension_numbers<[1], [0], [0], [1], [0, 0, 1, 1], [], []>} : vector<32x512xbf16>, vector<512x512xbf16>, vector<32x512xf32> -> vector<32x512xf32>
    %c0_61 = arith.constant 0 : index
    %c1_62 = arith.constant 1 : index
    %c0_63 = arith.constant 0 : index
    %90 = vector.load %arg11[%c0_61, %c1_62, %c0_63] : memref<2x18x512xf32, #tpu.memory_space<vmem>>, vector<2x16x512xf32>
    %91 = vector.shape_cast %90 : vector<2x16x512xf32> to vector<32x512xf32>
    %92 = arith.truncf %91 : vector<32x512xf32> to vector<32x512xbf16>
    %c1_64 = arith.constant 1 : index
    %c0_65 = arith.constant 0 : index
    %c0_66 = arith.constant 0 : index
    %93 = vector.load %arg4[%c1_64, %c0_65, %c0_66] : memref<3x512x512xbf16, #tpu.memory_space<vmem>>, vector<1x512x512xbf16>
    %94 = vector.shape_cast %93 : vector<1x512x512xbf16> to vector<512x512xbf16>
    %cst_67 = arith.constant dense<0.000000e+00> : vector<32x512xf32>
    %95 = tpu.matmul %92, %94, %cst_67 {dimension_numbers = #tpu.dot_dimension_numbers<[1], [0], [0], [1], [0, 0, 1, 1], [], []>} : vector<32x512xbf16>, vector<512x512xbf16>, vector<32x512xf32> -> vector<32x512xf32>
    %96 = arith.addf %89, %95 : vector<32x512xf32>
    %c0_68 = arith.constant 0 : index
    %c2_69 = arith.constant 2 : index
    %c0_70 = arith.constant 0 : index
    %97 = vector.load %arg11[%c0_68, %c2_69, %c0_70] : memref<2x18x512xf32, #tpu.memory_space<vmem>>, vector<2x16x512xf32>
    %98 = vector.shape_cast %97 : vector<2x16x512xf32> to vector<32x512xf32>
    %99 = arith.truncf %98 : vector<32x512xf32> to vector<32x512xbf16>
    %c2_71 = arith.constant 2 : index
    %c0_72 = arith.constant 0 : index
    %c0_73 = arith.constant 0 : index
    %100 = vector.load %arg4[%c2_71, %c0_72, %c0_73] : memref<3x512x512xbf16, #tpu.memory_space<vmem>>, vector<1x512x512xbf16>
    %101 = vector.shape_cast %100 : vector<1x512x512xbf16> to vector<512x512xbf16>
    %cst_74 = arith.constant dense<0.000000e+00> : vector<32x512xf32>
    %102 = tpu.matmul %99, %101, %cst_74 {dimension_numbers = #tpu.dot_dimension_numbers<[1], [0], [0], [1], [0, 0, 1, 1], [], []>} : vector<32x512xbf16>, vector<512x512xbf16>, vector<32x512xf32> -> vector<32x512xf32>
    %103 = arith.addf %96, %102 : vector<32x512xf32>
    %c0_75 = arith.constant 0 : index
    %c0_76 = arith.constant 0 : index
    %104 = vector.load %arg5[%c0_75, %c0_76] : memref<1x512xf32, #tpu.memory_space<vmem>>, vector<1x512xf32>
    %c0_77 = arith.constant 0 : index
    %c0_78 = arith.constant 0 : index
    %105 = vector.load %arg6[%c0_77, %c0_78] : memref<1x512xf32, #tpu.memory_space<vmem>>, vector<1x512xf32>
    %cst_79 = arith.constant dense<0.000000e+00> : vector<512xf32>
    %106 = vector.multi_reduction <add>, %103, %cst_79 [0] : vector<32x512xf32> to vector<512xf32>
    %107 = vector.shape_cast %106 : vector<512xf32> to vector<1x512xf32>
    %108 = arith.mulf %103, %103 : vector<32x512xf32>
    %cst_80 = arith.constant dense<0.000000e+00> : vector<512xf32>
    %109 = vector.multi_reduction <add>, %108, %cst_80 [0] : vector<32x512xf32> to vector<512xf32>
    %110 = vector.shape_cast %109 : vector<512xf32> to vector<1x512xf32>
    %c256_i32_81 = arith.constant 256 : i32
    %111 = tpu.dynamic_rotate %107 by %c256_i32_81 dim 1 : vector<1x512xf32>, i32 -> vector<1x512xf32>
    %112 = arith.addf %107, %111 : vector<1x512xf32>
    %c256_i32_82 = arith.constant 256 : i32
    %113 = tpu.dynamic_rotate %110 by %c256_i32_82 dim 1 : vector<1x512xf32>, i32 -> vector<1x512xf32>
    %114 = arith.addf %110, %113 : vector<1x512xf32>
    %c128_i32_83 = arith.constant 128 : i32
    %115 = tpu.dynamic_rotate %112 by %c128_i32_83 dim 1 : vector<1x512xf32>, i32 -> vector<1x512xf32>
    %116 = arith.addf %112, %115 : vector<1x512xf32>
    %c128_i32_84 = arith.constant 128 : i32
    %117 = tpu.dynamic_rotate %114 by %c128_i32_84 dim 1 : vector<1x512xf32>, i32 -> vector<1x512xf32>
    %118 = arith.addf %114, %117 : vector<1x512xf32>
    %c64_i32_85 = arith.constant 64 : i32
    %119 = tpu.dynamic_rotate %116 by %c64_i32_85 dim 1 : vector<1x512xf32>, i32 -> vector<1x512xf32>
    %120 = arith.addf %116, %119 : vector<1x512xf32>
    %c64_i32_86 = arith.constant 64 : i32
    %121 = tpu.dynamic_rotate %118 by %c64_i32_86 dim 1 : vector<1x512xf32>, i32 -> vector<1x512xf32>
    %122 = arith.addf %118, %121 : vector<1x512xf32>
    %c32_i32_87 = arith.constant 32 : i32
    %123 = tpu.dynamic_rotate %120 by %c32_i32_87 dim 1 : vector<1x512xf32>, i32 -> vector<1x512xf32>
    %124 = arith.addf %120, %123 : vector<1x512xf32>
    %c32_i32_88 = arith.constant 32 : i32
    %125 = tpu.dynamic_rotate %122 by %c32_i32_88 dim 1 : vector<1x512xf32>, i32 -> vector<1x512xf32>
    %126 = arith.addf %122, %125 : vector<1x512xf32>
    %cst_89 = arith.constant 0.001953125 : f32
    %127 = vector.broadcast %cst_89 : f32 to vector<1x512xf32>
    %128 = arith.mulf %124, %127 : vector<1x512xf32>
    %cst_90 = arith.constant 0.001953125 : f32
    %129 = vector.broadcast %cst_90 : f32 to vector<1x512xf32>
    %130 = arith.mulf %126, %129 : vector<1x512xf32>
    %131 = arith.mulf %128, %128 : vector<1x512xf32>
    %132 = arith.subf %130, %131 : vector<1x512xf32>
    %cst_91 = arith.constant 9.99999974E-6 : f32
    %133 = vector.broadcast %cst_91 : f32 to vector<1x512xf32>
    %134 = arith.addf %132, %133 : vector<1x512xf32>
    %135 = math.rsqrt %134 : vector<1x512xf32>
    %136 = arith.mulf %104, %135 : vector<1x512xf32>
    %137 = arith.mulf %128, %136 : vector<1x512xf32>
    %138 = arith.subf %105, %137 : vector<1x512xf32>
    %139 = vector.broadcast %136 : vector<1x512xf32> to vector<32x512xf32>
    %140 = arith.mulf %103, %139 : vector<32x512xf32>
    %141 = vector.broadcast %138 : vector<1x512xf32> to vector<32x512xf32>
    %142 = arith.addf %140, %141 : vector<32x512xf32>
    %cst_92 = arith.constant 0.000000e+00 : f32
    %143 = vector.broadcast %cst_92 : f32 to vector<32x512xf32>
    %144 = arith.cmpf ogt, %142, %143 : vector<32x512xf32>
    %cst_93 = arith.constant 2.000000e-01 : f32
    %145 = vector.broadcast %cst_93 : f32 to vector<32x512xf32>
    %146 = arith.mulf %145, %142 : vector<32x512xf32>
    %147 = arith.select %144, %142, %146 : vector<32x512xi1>, vector<32x512xf32>
    %148 = vector.shape_cast %147 : vector<32x512xf32> to vector<2x16x512xf32>
    %c0_94 = arith.constant 0 : index
    %c1_95 = arith.constant 1 : index
    %c0_96 = arith.constant 0 : index
    %149 = vector.load %arg11[%c0_94, %c1_95, %c0_96] : memref<2x18x512xf32, #tpu.memory_space<vmem>>, vector<2x16x512xf32>
    tpu.vector_store %arg11[%c0_94, %c1_95, %c0_96], %148 {strides = array<i32>} : memref<2x18x512xf32, #tpu.memory_space<vmem>>, vector<2x16x512xf32>,
    %c0_97 = arith.constant 0 : index
    %c0_98 = arith.constant 0 : index
    %c0_99 = arith.constant 0 : index
    %150 = vector.load %arg11[%c0_97, %c0_98, %c0_99] : memref<2x18x512xf32, #tpu.memory_space<vmem>>, vector<2x16x512xf32>
    %151 = vector.shape_cast %150 : vector<2x16x512xf32> to vector<32x512xf32>
    %152 = arith.truncf %151 : vector<32x512xf32> to vector<32x512xbf16>
    %c0_100 = arith.constant 0 : index
    %c0_101 = arith.constant 0 : index
    %c0_102 = arith.constant 0 : index
    %153 = vector.load %arg7[%c0_100, %c0_101, %c0_102] : memref<3x512x512xbf16, #tpu.memory_space<vmem>>, vector<1x512x512xbf16>
    %154 = vector.shape_cast %153 : vector<1x512x512xbf16> to vector<512x512xbf16>
    %cst_103 = arith.constant dense<0.000000e+00> : vector<32x512xf32>
    %155 = tpu.matmul %152, %154, %cst_103 {dimension_numbers = #tpu.dot_dimension_numbers<[1], [0], [0], [1], [0, 0, 1, 1], [], []>} : vector<32x512xbf16>, vector<512x512xbf16>, vector<32x512xf32> -> vector<32x512xf32>
    %c0_104 = arith.constant 0 : index
    %c1_105 = arith.constant 1 : index
    %c0_106 = arith.constant 0 : index
    %156 = vector.load %arg11[%c0_104, %c1_105, %c0_106] : memref<2x18x512xf32, #tpu.memory_space<vmem>>, vector<2x16x512xf32>
    %157 = vector.shape_cast %156 : vector<2x16x512xf32> to vector<32x512xf32>
    %158 = arith.truncf %157 : vector<32x512xf32> to vector<32x512xbf16>
    %c1_107 = arith.constant 1 : index
    %c0_108 = arith.constant 0 : index
    %c0_109 = arith.constant 0 : index
    %159 = vector.load %arg7[%c1_107, %c0_108, %c0_109] : memref<3x512x512xbf16, #tpu.memory_space<vmem>>, vector<1x512x512xbf16>
    %160 = vector.shape_cast %159 : vector<1x512x512xbf16> to vector<512x512xbf16>
    %cst_110 = arith.constant dense<0.000000e+00> : vector<32x512xf32>
    %161 = tpu.matmul %158, %160, %cst_110 {dimension_numbers = #tpu.dot_dimension_numbers<[1], [0], [0], [1], [0, 0, 1, 1], [], []>} : vector<32x512xbf16>, vector<512x512xbf16>, vector<32x512xf32> -> vector<32x512xf32>
    %162 = arith.addf %155, %161 : vector<32x512xf32>
    %c0_111 = arith.constant 0 : index
    %c2_112 = arith.constant 2 : index
    %c0_113 = arith.constant 0 : index
    %163 = vector.load %arg11[%c0_111, %c2_112, %c0_113] : memref<2x18x512xf32, #tpu.memory_space<vmem>>, vector<2x16x512xf32>
    %164 = vector.shape_cast %163 : vector<2x16x512xf32> to vector<32x512xf32>
    %165 = arith.truncf %164 : vector<32x512xf32> to vector<32x512xbf16>
    %c2_114 = arith.constant 2 : index
    %c0_115 = arith.constant 0 : index
    %c0_116 = arith.constant 0 : index
    %166 = vector.load %arg7[%c2_114, %c0_115, %c0_116] : memref<3x512x512xbf16, #tpu.memory_space<vmem>>, vector<1x512x512xbf16>
    %167 = vector.shape_cast %166 : vector<1x512x512xbf16> to vector<512x512xbf16>
    %cst_117 = arith.constant dense<0.000000e+00> : vector<32x512xf32>
    %168 = tpu.matmul %165, %167, %cst_117 {dimension_numbers = #tpu.dot_dimension_numbers<[1], [0], [0], [1], [0, 0, 1, 1], [], []>} : vector<32x512xbf16>, vector<512x512xbf16>, vector<32x512xf32> -> vector<32x512xf32>
    %169 = arith.addf %162, %168 : vector<32x512xf32>
    %c0_118 = arith.constant 0 : index
    %c0_119 = arith.constant 0 : index
    %170 = vector.load %arg8[%c0_118, %c0_119] : memref<1x512xf32, #tpu.memory_space<vmem>>, vector<1x512xf32>
    %c0_120 = arith.constant 0 : index
    %c0_121 = arith.constant 0 : index
    %171 = vector.load %arg9[%c0_120, %c0_121] : memref<1x512xf32, #tpu.memory_space<vmem>>, vector<1x512xf32>
    %cst_122 = arith.constant dense<0.000000e+00> : vector<512xf32>
    %172 = vector.multi_reduction <add>, %169, %cst_122 [0] : vector<32x512xf32> to vector<512xf32>
    %173 = vector.shape_cast %172 : vector<512xf32> to vector<1x512xf32>
    %174 = arith.mulf %169, %169 : vector<32x512xf32>
    %cst_123 = arith.constant dense<0.000000e+00> : vector<512xf32>
    %175 = vector.multi_reduction <add>, %174, %cst_123 [0] : vector<32x512xf32> to vector<512xf32>
    %176 = vector.shape_cast %175 : vector<512xf32> to vector<1x512xf32>
    %c256_i32_124 = arith.constant 256 : i32
    %177 = tpu.dynamic_rotate %173 by %c256_i32_124 dim 1 : vector<1x512xf32>, i32 -> vector<1x512xf32>
    %178 = arith.addf %173, %177 : vector<1x512xf32>
    %c256_i32_125 = arith.constant 256 : i32
    %179 = tpu.dynamic_rotate %176 by %c256_i32_125 dim 1 : vector<1x512xf32>, i32 -> vector<1x512xf32>
    %180 = arith.addf %176, %179 : vector<1x512xf32>
    %c128_i32_126 = arith.constant 128 : i32
    %181 = tpu.dynamic_rotate %178 by %c128_i32_126 dim 1 : vector<1x512xf32>, i32 -> vector<1x512xf32>
    %182 = arith.addf %178, %181 : vector<1x512xf32>
    %c128_i32_127 = arith.constant 128 : i32
    %183 = tpu.dynamic_rotate %180 by %c128_i32_127 dim 1 : vector<1x512xf32>, i32 -> vector<1x512xf32>
    %184 = arith.addf %180, %183 : vector<1x512xf32>
    %c64_i32_128 = arith.constant 64 : i32
    %185 = tpu.dynamic_rotate %182 by %c64_i32_128 dim 1 : vector<1x512xf32>, i32 -> vector<1x512xf32>
    %186 = arith.addf %182, %185 : vector<1x512xf32>
    %c64_i32_129 = arith.constant 64 : i32
    %187 = tpu.dynamic_rotate %184 by %c64_i32_129 dim 1 : vector<1x512xf32>, i32 -> vector<1x512xf32>
    %188 = arith.addf %184, %187 : vector<1x512xf32>
    %c32_i32_130 = arith.constant 32 : i32
    %189 = tpu.dynamic_rotate %186 by %c32_i32_130 dim 1 : vector<1x512xf32>, i32 -> vector<1x512xf32>
    %190 = arith.addf %186, %189 : vector<1x512xf32>
    %c32_i32_131 = arith.constant 32 : i32
    %191 = tpu.dynamic_rotate %188 by %c32_i32_131 dim 1 : vector<1x512xf32>, i32 -> vector<1x512xf32>
    %192 = arith.addf %188, %191 : vector<1x512xf32>
    %cst_132 = arith.constant 0.001953125 : f32
    %193 = vector.broadcast %cst_132 : f32 to vector<1x512xf32>
    %194 = arith.mulf %190, %193 : vector<1x512xf32>
    %cst_133 = arith.constant 0.001953125 : f32
    %195 = vector.broadcast %cst_133 : f32 to vector<1x512xf32>
    %196 = arith.mulf %192, %195 : vector<1x512xf32>
    %197 = arith.mulf %194, %194 : vector<1x512xf32>
    %198 = arith.subf %196, %197 : vector<1x512xf32>
    %cst_134 = arith.constant 9.99999974E-6 : f32
    %199 = vector.broadcast %cst_134 : f32 to vector<1x512xf32>
    %200 = arith.addf %198, %199 : vector<1x512xf32>
    %201 = math.rsqrt %200 : vector<1x512xf32>
    %202 = arith.mulf %170, %201 : vector<1x512xf32>
    %203 = arith.mulf %194, %202 : vector<1x512xf32>
    %204 = arith.subf %171, %203 : vector<1x512xf32>
    %205 = vector.broadcast %202 : vector<1x512xf32> to vector<32x512xf32>
    %206 = arith.mulf %169, %205 : vector<32x512xf32>
    %207 = vector.broadcast %204 : vector<1x512xf32> to vector<32x512xf32>
    %208 = arith.addf %206, %207 : vector<32x512xf32>
    %209 = arith.addf %208, %81 : vector<32x512xf32>
    %cst_135 = arith.constant 0.000000e+00 : f32
    %210 = vector.broadcast %cst_135 : f32 to vector<32x512xf32>
    %211 = arith.cmpf ogt, %209, %210 : vector<32x512xf32>
    %cst_136 = arith.constant 2.000000e-01 : f32
    %212 = vector.broadcast %cst_136 : f32 to vector<32x512xf32>
    %213 = arith.mulf %212, %209 : vector<32x512xf32>
    %214 = arith.select %211, %209, %213 : vector<32x512xi1>, vector<32x512xf32>
    %c0_137 = arith.constant 0 : index
    %c0_138 = arith.constant 0 : index
    %215 = vector.load %arg10[%c0_137, %c0_138] : memref<32x512xf32, #tpu.memory_space<vmem>>, vector<32x512xf32>
    tpu.vector_store %arg10[%c0_137, %c0_138], %214 {strides = array<i32>} : memref<32x512xf32, #tpu.memory_space<vmem>>, vector<32x512xf32>,
    return
  }
}

</mosaic_0001>

<bundles_post_ra>
// kernel: dis_initial_block.1
= control target key start
LH: loop header
LB: loop body
LE: loop exit
PB: predicated region body
PF: predicated region fallthrough
CT: control target
= control target key end

     0   :  { %vm24919_vm0 = vcmask 1046528   ;;  %vm481_vm1 = vcmask 654336   ;;  %vm24918_vm2 = vcmask 1045504   ;;  %vm1610_vm3 = vcmask 1044480   ;;  %s16470_s26 = smov 32   ;;  %s24905_s1 = inlined_call_operand.vmem [shape: bf16[5,208,512], index: 1, kind: input, shape index: {}]   ;;  %s24906_s0 = inlined_call_operand.vmem [shape: f32[2,20,208], index: 0, kind: input, shape index: {}]   ;;  %s24907_s4 = inlined_call_operand.vmem [shape: bf16[3,512,512], index: 4, kind: input, shape index: {}]   ;;  %s24908_s2 = inlined_call_operand.vmem [shape: f32[1,512], index: 2, kind: input, shape index: {}]   ;;  %s24909_s3 = inlined_call_operand.vmem [shape: f32[1,512], index: 3, kind: input, shape index: {}]   ;;  %s24910_s5 = inlined_call_operand.vmem [shape: f32[1,512], index: 5, kind: input, shape index: {}]   ;;  %s24911_s6 = inlined_call_operand.vmem [shape: f32[1,512], index: 6, kind: input, shape index: {}]   ;;  %s24912_s7 = inlined_call_operand.vmem [shape: bf16[3,512,512], index: 7, kind: input, shape index: {}]   ;;  %s24913_s8 = inlined_call_operand.vmem [shape: f32[1,512], index: 8, kind: input, shape index: {}]   ;;  %s24914_s9 = inlined_call_operand.vmem [shape: f32[1,512], index: 9, kind: input, shape index: {}]   ;;  %s24915_s10 = inlined_call_operand.vmem [shape: f32[32,512], index: 10, kind: output, shape index: {}]  }
   0x1   :  { %v10703_v0 = vld [vmem:[%s24905_s1 + $0x280] sm:$0xf]  ;;  %v15491_v1 = vld [vmem:[%s24905_s1 + $0x28c] sm:$0xf0]  ;;  %v15489_v5 = vld [vmem:[%s24905_s1 + $0x284] sm:$0xf] }
   0x2   :  { %v10783_v2 = vld [vmem:[%s24905_s1 + $0x320] sm:$0xf]  ;;  %v10704_v3 = vor.u32 %v15491_v1, %v10703_v0  ;;  %v15511_v4 = vld [vmem:[%s24905_s1 + $0x32c] sm:$0xf0]  ;;  %v10705_v6 = vld [vmem:[%s24905_s1 + $0x290] sm:$0xf0] }
   0x3   :  { %v10784_v7 = vor.u32 %v15511_v4, %v10783_v2  ;;  %v10708_v8 = vor.u32 %v15489_v5, %v10705_v6  ;;  %v15509_v9 = vld [vmem:[%s24905_s1 + $0x324] sm:$0xf]  ;;  %v10785_v10 = vld [vmem:[%s24905_s1 + $0x330] sm:$0xf0]  ;;  %v10687_v11 = vld [vmem:[%s24905_s1 + $0x260] sm:$0xf] }
   0x4   :  { %488 = vmatpush.bf16.msra.mxu0 %v10704_v3  ;;  %v10788_v12 = vor.u32 %v15509_v9, %v10785_v10  ;;  %v15487_v13 = vld [vmem:[%s24905_s1 + $0x26c] sm:$0xf0]  ;;  %v10767_v14 = vld [vmem:[%s24905_s1 + $0x300] sm:$0xf]  ;;  %v15485_v18 = vld [vmem:[%s24905_s1 + $0x264] sm:$0xf] }
   0x5   :  { %v15507_v15 = vld [vmem:[%s24905_s1 + $0x30c] sm:$0xf0]  ;;  %510 = vmatpush.bf16.msra.mxu1 %v10784_v7  ;;  %526 = vmatpush.bf16.msra.mxu2 %v10708_v8  ;;  %v10688_v16 = vor.u32 %v15487_v13, %v10687_v11  ;;  %v10689_v19 = vld [vmem:[%s24905_s1 + $0x270] sm:$0xf0]  ;;  %v15505_v20 = vld [vmem:[%s24905_s1 + $0x304] sm:$0xf] }
   0x6   :  { %v10768_v17 = vor.u32 %v15507_v15, %v10767_v14  ;;  %548 = vmatpush.bf16.msra.mxu3 %v10788_v12  ;;  %v10692_v21 = vor.u32 %v15485_v18, %v10689_v19  ;;  %v10769_v22 = vld [vmem:[%s24905_s1 + $0x310] sm:$0xf0]  ;;  %v10671_v23 = vld [vmem:[%s24905_s1 + $0x240] sm:$0xf]  ;;  %v15483_v24 = vld [vmem:[%s24905_s1 + $0x24c] sm:$0xf0] }
   0x7   :  { %v10772_v25 = vor.u32 %v15505_v20, %v10769_v22  ;;  %v10751_v26 = vld [vmem:[%s24905_s1 + $0x2e0] sm:$0xf]  ;;  %v15503_v27 = vld [vmem:[%s24905_s1 + $0x2ec] sm:$0xf0]  ;;  %v15481_v28 = vld [vmem:[%s24905_s1 + $0x244] sm:$0xf]  ;;  %v10672_v29 = vor.u32 %v15483_v24, %v10671_v23 }
   0x8   :  { %489 = vmatpush.bf16.msra.mxu0 %v10688_v16  ;;  %v10673_v30 = vld [vmem:[%s24905_s1 + $0x250] sm:$0xf0]  ;;  %v15501_v31 = vld [vmem:[%s24905_s1 + $0x2e4] sm:$0xf]  ;;  %v10752_v33 = vor.u32 %v15503_v27, %v10751_v26  ;;  %v10655_v35 = vld [vmem:[%s24905_s1 + $0x220] sm:$0xf] }
   0x9   :  { %v10753_v32 = vld [vmem:[%s24905_s1 + $0x2f0] sm:$0xf0]  ;;  %511 = vmatpush.bf16.msra.mxu1 %v10768_v17  ;;  %527 = vmatpush.bf16.msra.mxu2 %v10692_v21  ;;  %v10676_v34 = vor.u32 %v15481_v28, %v10673_v30  ;;  %v15479_v36 = vld [vmem:[%s24905_s1 + $0x22c] sm:$0xf0]  ;;  %v10735_v37 = vld [vmem:[%s24905_s1 + $0x2c0] sm:$0xf] }
   0xa   :  { %549 = vmatpush.bf16.msra.mxu3 %v10772_v25  ;;  %v10756_v38 = vor.u32 %v15501_v31, %v10753_v32  ;;  %v15499_v39 = vld [vmem:[%s24905_s1 + $0x2cc] sm:$0xf0]  ;;  %v15477_v40 = vld [vmem:[%s24905_s1 + $0x224] sm:$0xf]  ;;  %v10657_v41 = vld [vmem:[%s24905_s1 + $0x230] sm:$0xf0]  ;;  %v10656_v44 = vor.u32 %v15479_v36, %v10655_v35 }
   0xb   :  { %v15497_v42 = vld [vmem:[%s24905_s1 + $0x2c4] sm:$0xf]  ;;  %v10737_v43 = vld [vmem:[%s24905_s1 + $0x2d0] sm:$0xf0]  ;;  %v10639_v45 = vld [vmem:[%s24905_s1 + $0x200] sm:$0xf]  ;;  %v10736_v48 = vor.u32 %v15499_v39, %v10735_v37  ;;  %v10660_v49 = vor.u32 %v15477_v40, %v10657_v41 }
   0xc   :  { %490 = vmatpush.bf16.msra.mxu0 %v10672_v29  ;;  %v15475_v46 = vld [vmem:[%s24905_s1 + $0x20c] sm:$0xf0]  ;;  %v10719_v47 = vld [vmem:[%s24905_s1 + $0x2a0] sm:$0xf]  ;;  %v15473_v51 = vld [vmem:[%s24905_s1 + $0x204] sm:$0xf]  ;;  %v10740_v53 = vor.u32 %v15497_v42, %v10737_v43 }
   0xd   :  { %512 = vmatpush.bf16.msra.mxu1 %v10752_v33  ;;  %528 = vmatpush.bf16.msra.mxu2 %v10676_v34  ;;  %v15495_v50 = vld [vmem:[%s24905_s1 + $0x2ac] sm:$0xf0]  ;;  %v10641_v52 = vld [vmem:[%s24905_s1 + $0x210] sm:$0xf0]  ;;  %v15493_v54 = vld [vmem:[%s24905_s1 + $0x2a4] sm:$0xf]  ;;  %v10640_v61 = vor.u32 %v15475_v46, %v10639_v45 }
   0xe   :  { %550 = vmatpush.bf16.msra.mxu3 %v10756_v38  ;;  %v16647_v55 = vld [vmem:[%s24906_s0 + $0x18] sm:$0xff]  ;;  %v116_v56 = vld [vmem:[%s24906_s0 + $0x8] sm:$0xfe]  ;;  %v10721_v57 = vld [vmem:[%s24905_s1 + $0x2b0] sm:$0xf0]  ;;  %v10720_v0 = vor.u32 %v15495_v50, %v10719_v47  ;;  %v10644_v1 = vor.u32 %v15473_v51, %v10641_v52  ;;  %vm2146_vm4 = vcmask 1043456  }
   0xf   :  { %v118_v58 = vld [vmem:[%s24906_s0 + $0x28] sm:$0x1]  ;;  %v139_v59 = vrot.slane %v116_v56, 1  ;;  %v140_v60 = vrot.slane %v16647_v55, 1  ;;  %v10623_v63 = vld [vmem:[%s24905_s1 + $0x1e0] sm:$0xf]  ;;  %v10724_v6 = vor.u32 %v15493_v54, %v10721_v57 }
  0x10   :  { %491 = vmatpush.bf16.msra.mxu0 %v10656_v44  ;;  %v144_v62 = vrot.slane %v118_v58, 1  ;;  %v15471_v3 = vld [vmem:[%s24905_s1 + $0x1ec] sm:$0xf0]  ;;  %v10711_v4 = vld [vmem:[%s24905_s1 + $0x288] sm:$0xf]  ;;  %vm24920_vm7 = vcmask 1040384  }
  0x11   :  { %513 = vmatpush.bf16.msra.mxu1 %v10736_v48  ;;  %529 = vmatpush.bf16.msra.mxu2 %v10660_v49  ;;  %v141_v2 = vsel %vm24919_vm0, %v139_v59, %v140_v60  ;;  %v15492_v5 = vld [vmem:[%s24905_s1 + $0x294] sm:$0xf0]  ;;  %v15469_v8 = vld [vmem:[%s24905_s1 + $0x1e4] sm:$0xf]  ;;  %v10625_v9 = vld [vmem:[%s24905_s1 + $0x1f0] sm:$0xf0]  ;;  %v10624_v14 = vor.u32 %v15471_v3, %v10623_v63 }
  0x12   :  { %551 = vmatpush.bf16.msra.mxu3 %v10740_v53  ;;  %v145_v7 = vsel %vm24919_vm0, %v140_v60, %v144_v62  ;;  %v10712_v10 = vor.u32 %v15492_v5, %v10711_v4  ;;  %v10695_v11 = vld [vmem:[%s24905_s1 + $0x268] sm:$0xf]  ;;  %v15488_v12 = vld [vmem:[%s24905_s1 + $0x274] sm:$0xf0]  ;;  %v10607_v15 = vld [vmem:[%s24905_s1 + $0x1c0] sm:$0xf]  ;;  %v10628_v17 = vor.u32 %v15469_v8, %v10625_v9 }
  0x13   :  { %v16685_v13 = vpack.c.bf16 %v145_v7, %v141_v2  ;;  %v15467_v16 = vld [vmem:[%s24905_s1 + $0x1cc] sm:$0xf0]  ;;  %v15465_v18 = vld [vmem:[%s24905_s1 + $0x1c4] sm:$0xf]  ;;  %v10609_v19 = vld [vmem:[%s24905_s1 + $0x1d0] sm:$0xf0]  ;;  %v10696_v21 = vor.u32 %v15488_v12, %v10695_v11 }
  0x14   :  { %492 = vmatpush.bf16.msra.mxu0 %v10640_v61  ;;  %v16702_v20 = vld [vmem:[%s24906_s0 + $0x10] sm:$0xff]  ;;  %v10591_v22 = vld [vmem:[%s24905_s1 + $0x1a0] sm:$0xf]  ;;  %v10679_v24 = vld [vmem:[%s24905_s1 + $0x248] sm:$0xf]  ;;  %v10608_v27 = vor.u32 %v15467_v16, %v10607_v15  ;;  %v10612_v37 = vor.u32 %v15465_v18, %v10609_v19  ;;  %vm24917_vm8 = vcmask 1042434  }
  0x15   :  { %514 = vmatpush.bf16.msra.mxu1 %v10720_v0  ;;  %530 = vmatpush.bf16.msra.mxu2 %v10644_v1  ;;  %v15463_v23 = vld [vmem:[%s24905_s1 + $0x1ac] sm:$0xf0]  ;;  %v115_v25 = vld [vmem:[%s24906_s0] sm:$0xfe]  ;;  %v117_v26 = vld [vmem:[%s24906_s0 + $0x20] sm:$0x1] }
  0x16   :  { %552 = vmatpush.bf16.msra.mxu3 %v10724_v6  ;;  %v15461_v28 = vld [vmem:[%s24905_s1 + $0x1a4] sm:$0xf]  ;;  %v15484_v29 = vld [vmem:[%s24905_s1 + $0x254] sm:$0xf0]  ;;  %v10791_v30 = vld [vmem:[%s24905_s1 + $0x328] sm:$0xf]  ;;  %v10592_v45 = vor.u32 %v15463_v23, %v10591_v22 }
  0x17   :  { %v15512_v31 = vld [vmem:[%s24905_s1 + $0x334] sm:$0xf0]  ;;  %v10593_v32 = vld [vmem:[%s24905_s1 + $0x1b0] sm:$0xf0]  ;;  %v136_v33 = vrot.slane %v115_v25, 1  ;;  %v137_v34 = vrot.slane %v16702_v20, 1  ;;  %v10680_v41 = vor.u32 %v15484_v29, %v10679_v24 }
  0x18   :  { %10797 = vmatmul.msk.bf16.vlgmr.msra.gmra.mxu1 %vm481_vm1, %v16685_v13  ;;  %493 = vmatpush.bf16.msra.mxu0 %v10624_v14  ;;  %v142_v35 = vrot.slane %v117_v26, 1  ;;  %v10792_v36 = vor.u32 %v15512_v31, %v10791_v30  ;;  %v15510_v38 = vld [vmem:[%s24905_s1 + $0x32c] sm:$0xf]  ;;  %v10713_v42 = vld [vmem:[%s24905_s1 + $0x298] sm:$0xf0]  ;;  %v10596_v49 = vor.u32 %v15461_v28, %v10593_v32  ;;  %v16836_v25 = vld [vmem:[%s24906_s0 + $0x40] sm:$0xff] }
  0x19   :  { %564 = vmatpush.bf16.msrb.mxu1 %v10712_v10  ;;  %10799 = vmatmul.msk.bf16.vlgmr.msra.gmra.mxu3 %vm481_vm1, %v16685_v13  ;;  %v15490_v39 = vld [vmem:[%s24905_s1 + $0x28c] sm:$0xf]  ;;  %v120_v43 = vld [vmem:[%s24906_s0 + $0x38] sm:$0xfe]  ;;  %v122_v44 = vld [vmem:[%s24906_s0 + $0x58] sm:$0x1]  ;;  %v138_v50 = vsel %vm24919_vm0, %v136_v33, %v137_v34 }
  0x1a   :  { %531 = vmatpush.bf16.msra.mxu2 %v10628_v17  ;;  %v16748_v40 = vld [vmem:[%s24906_s0 + $0x48] sm:$0xff]  ;;  %586 = vmatpush.bf16.msrb.mxu3 %v10792_v36  ;;  %v10793_v46 = vld [vmem:[%s24905_s1 + $0x338] sm:$0xf0]  ;;  %v15480_v48 = vld [vmem:[%s24905_s1 + $0x234] sm:$0xf0]  ;;  %v143_v51 = vsel %vm24919_vm0, %v137_v34, %v142_v35  ;;  %v10716_v56 = vor.u32 %v15490_v39, %v10713_v42  ;;  %v149_v57 = vrot.slane %v120_v43, 1 }
  0x1b   :  { %v10663_v47 = vld [vmem:[%s24905_s1 + $0x228] sm:$0xf]  ;;  %v150_v52 = vrot.slane %v16748_v40, 1  ;;  %v15508_v54 = vld [vmem:[%s24905_s1 + $0x314] sm:$0xf0]  ;;  %v154_v58 = vrot.slane %v122_v44, 1  ;;  %v10796_v62 = vor.u32 %v15510_v38, %v10793_v46  ;;  %v16792_v3 = vpack.c.bf16 %v143_v51, %v138_v50 }
  0x1c   :  { %494 = vmatpush.bf16.msra.mxu0 %v10608_v27  ;;  %v10775_v53 = vld [vmem:[%s24905_s1 + $0x308] sm:$0xf]  ;;  %v15476_v60 = vld [vmem:[%s24905_s1 + $0x214] sm:$0xf0]  ;;  %v10664_v63 = vor.u32 %v15480_v48, %v10663_v47  ;;  %v15486_v0 = vld [vmem:[%s24905_s1 + $0x26c] sm:$0xf] }
  0x1d   :  { %565 = vmatpush.bf16.msrb.mxu1 %v10696_v21  ;;  %v10647_v59 = vld [vmem:[%s24905_s1 + $0x208] sm:$0xf]  ;;  %v10776_v61 = vor.u32 %v15508_v54, %v10775_v53  ;;  %v10697_v1 = vld [vmem:[%s24905_s1 + $0x278] sm:$0xf0]  ;;  %v15506_v4 = vld [vmem:[%s24905_s1 + $0x30c] sm:$0xf]  ;;  %v151_v9 = vsel %vm24919_vm0, %v149_v57, %v150_v52  ;;  %v155_v10 = vsel %vm24919_vm0, %v150_v52, %v154_v58 }
  0x1e   :  { %532 = vmatpush.bf16.msra.mxu2 %v10612_v37  ;;  %v10759_v2 = vld [vmem:[%s24905_s1 + $0x2e8] sm:$0xf]  ;;  %v10777_v5 = vld [vmem:[%s24905_s1 + $0x318] sm:$0xf0]  ;;  %v15504_v6 = vld [vmem:[%s24905_s1 + $0x2f4] sm:$0xf0]  ;;  %v10700_v11 = vor.u32 %v15486_v0, %v10697_v1  ;;  %v10648_v14 = vor.u32 %v15476_v60, %v10647_v59  ;;  %v16831_v24 = vpack.c.bf16 %v155_v10, %v151_v9 }
  0x1f   :  { %587 = vmatpush.bf16.msrb.mxu3 %v10776_v61  ;;  %v10760_v7 = vor.u32 %v15504_v6, %v10759_v2  ;;  %v10743_v8 = vld [vmem:[%s24905_s1 + $0x2c8] sm:$0xf]  ;;  %v15500_v12 = vld [vmem:[%s24905_s1 + $0x2d4] sm:$0xf0]  ;;  %v10780_v15 = vor.u32 %v15506_v4, %v10777_v5  ;;  %v15482_v17 = vld [vmem:[%s24905_s1 + $0x24c] sm:$0xf] }
  0x20   :  { %495 = vmatpush.bf16.msra.mxu0 %v10592_v45  ;;  %v10631_v16 = vld [vmem:[%s24905_s1 + $0x1e8] sm:$0xf]  ;;  %v10681_v18 = vld [vmem:[%s24905_s1 + $0x258] sm:$0xf0]  ;;  %v15472_v19 = vld [vmem:[%s24905_s1 + $0x1f4] sm:$0xf0]  ;;  %v10744_v21 = vor.u32 %v15500_v12, %v10743_v8 }
  0x21   :  { %566 = vmatpush.bf16.msrb.mxu1 %v10680_v41  ;;  %v15502_v22 = vld [vmem:[%s24905_s1 + $0x2ec] sm:$0xf]  ;;  %v10761_v23 = vld [vmem:[%s24905_s1 + $0x2f8] sm:$0xf0]  ;;  %v10727_v26 = vld [vmem:[%s24905_s1 + $0x2a8] sm:$0xf]  ;;  %v10684_v27 = vor.u32 %v15482_v17, %v10681_v18  ;;  %v10632_v31 = vor.u32 %v15472_v19, %v10631_v16 }
  0x22   :  { %533 = vmatpush.bf16.msra.mxu2 %v10596_v49  ;;  %v119_v28 = vld [vmem:[%s24906_s0 + $0x30] sm:$0xfe]  ;;  %v121_v29 = vld [vmem:[%s24906_s0 + $0x50] sm:$0x1]  ;;  %v15496_v30 = vld [vmem:[%s24905_s1 + $0x2b4] sm:$0xf0]  ;;  %v10764_v35 = vor.u32 %v15502_v22, %v10761_v23 }
  0x23   :  { %496 = vmatmul.bf16.vlgmr.msra.gmra.mxu0 %v16792_v3  ;;  %588 = vmatpush.bf16.msrb.mxu3 %v10760_v7  ;;  %v10615_v32 = vld [vmem:[%s24905_s1 + $0x1c8] sm:$0xf]  ;;  %v15478_v33 = vld [vmem:[%s24905_s1 + $0x22c] sm:$0xf]  ;;  %v10665_v34 = vld [vmem:[%s24905_s1 + $0x238] sm:$0xf0]  ;;  %v10728_v37 = vor.u32 %v15496_v30, %v10727_v26 }
  0x24   :  { %602 = vmatpush.bf16.msrb.mxu0 %v10716_v56  ;;  %v15468_v36 = vld [vmem:[%s24905_s1 + $0x1d4] sm:$0xf0]  ;;  %v15498_v38 = vld [vmem:[%s24905_s1 + $0x2cc] sm:$0xf]  ;;  %v10745_v39 = vld [vmem:[%s24905_s1 + $0x2d8] sm:$0xf0]  ;;  %v10668_v44 = vor.u32 %v15478_v33, %v10665_v34 }
  0x25   :  { %567 = vmatpush.bf16.msrb.mxu1 %v10664_v63  ;;  %534 = vmatmul.bf16.vlgmr.msra.gmra.mxu2 %v16792_v3  ;;  %v146_v41 = vrot.slane %v119_v28, 1  ;;  %v147_v42 = vrot.slane %v16836_v25, 1  ;;  %v152_v43 = vrot.slane %v121_v29, 1  ;;  %v10599_v45 = vld [vmem:[%s24905_s1 + $0x1a8] sm:$0xf]  ;;  %v10616_v47 = vor.u32 %v15468_v36, %v10615_v32 }
  0x26   :  { %624 = vmatpush.bf16.msrb.mxu2 %v10796_v62  ;;  %v15464_v46 = vld [vmem:[%s24905_s1 + $0x1b4] sm:$0xf0]  ;;  %v15474_v48 = vld [vmem:[%s24905_s1 + $0x20c] sm:$0xf]  ;;  %v10649_v49 = vld [vmem:[%s24905_s1 + $0x218] sm:$0xf0]  ;;  %v10748_v50 = vor.u32 %v15498_v38, %v10745_v39 }
  0x27   :  { %589 = vmatpush.bf16.msrb.mxu3 %v10744_v21  ;;  %v15494_v51 = vld [vmem:[%s24905_s1 + $0x2ac] sm:$0xf]  ;;  %v10729_v52 = vld [vmem:[%s24905_s1 + $0x2b8] sm:$0xf0]  ;;  %v10999_v53 = vld [vmem:[%s24905_s1 + $0x180] sm:$0xf]  ;;  %v148_v56 = vsel %vm24919_vm0, %v146_v41, %v147_v42  ;;  %v153_v57 = vsel %vm24919_vm0, %v147_v42, %v152_v43  ;;  %v10652_v61 = vor.u32 %v15474_v48, %v10649_v49  ;;  %v10600_v0 = vor.u32 %v15464_v46, %v10599_v45 }
  0x28   :  { %603 = vmatpush.bf16.msrb.mxu0 %v10700_v11  ;;  %10798 = vmatmul.msk.bf16.gmra.mxu1 %vm481_vm1, %v16831_v24  ;;  %v15459_v54 = vld [vmem:[%s24905_s1 + $0x18c] sm:$0xf0]  ;;  %v10919_v58 = vld [vmem:[%s24905_s1 + $0xe0] sm:$0xf]  ;;  %v15470_v62 = vld [vmem:[%s24905_s1 + $0x1ec] sm:$0xf]  ;;  %v10732_v1 = vor.u32 %v15494_v51, %v10729_v52  ;;  %v16920_v6 = vpack.c.bf16 %v153_v57, %v148_v56 }
  0x29   :  { %568 = vmatpush.bf16.msrb.mxu1 %v10648_v14  ;;  %10800 = vmatmul.msk.bf16.gmra.mxu3 %vm481_vm1, %v16831_v24  ;;  %v15439_v59 = vld [vmem:[%s24905_s1 + $0xec] sm:$0xf0]  ;;  %v11000_v60 = vor.u32 %v15459_v54, %v10999_v53  ;;  %v10633_v63 = vld [vmem:[%s24905_s1 + $0x1f8] sm:$0xf0]  ;;  %v15457_v2 = vld [vmem:[%s24905_s1 + $0x184] sm:$0xf] }
  0x2a   :  { %625 = vmatpush.bf16.msrb.mxu2 %v10780_v15  ;;  %v11001_v4 = vld [vmem:[%s24905_s1 + $0x190] sm:$0xf0]  ;;  %v10983_v5 = vld [vmem:[%s24905_s1 + $0x160] sm:$0xf]  ;;  %v10920_v7 = vor.u32 %v15439_v59, %v10919_v58  ;;  %v15455_v8 = vld [vmem:[%s24905_s1 + $0x16c] sm:$0xf0]  ;;  %v10636_v12 = vor.u32 %v15470_v62, %v10633_v63 }
  0x2b   :  { %590 = vmatpush.bf16.msrb.mxu3 %v10728_v37  ;;  %v10903_v9 = vld [vmem:[%s24905_s1 + $0xc0] sm:$0xf]  ;;  %v15435_v10 = vld [vmem:[%s24905_s1 + $0xcc] sm:$0xf0]  ;;  %v10984_v11 = vor.u32 %v15455_v8, %v10983_v5  ;;  %v11004_v14 = vor.u32 %v15457_v2, %v11001_v4  ;;  %v15466_v17 = vld [vmem:[%s24905_s1 + $0x1cc] sm:$0xf] }
  0x2c   :  { %604 = vmatpush.bf16.msrb.mxu0 %v10684_v27  ;;  %v10967_v15 = vld [vmem:[%s24905_s1 + $0x140] sm:$0xf]  ;;  %v15451_v16 = vld [vmem:[%s24905_s1 + $0x14c] sm:$0xf0]  ;;  %v10617_v18 = vld [vmem:[%s24905_s1 + $0x1d8] sm:$0xf0]  ;;  %v10904_v19 = vor.u32 %v15435_v10, %v10903_v9 }
  0x2d   :  { %569 = vmatpush.bf16.msrb.mxu1 %v10632_v31  ;;  %v15453_v21 = vld [vmem:[%s24905_s1 + $0x164] sm:$0xf]  ;;  %v10985_v22 = vld [vmem:[%s24905_s1 + $0x170] sm:$0xf0]  ;;  %v10887_v23 = vld [vmem:[%s24905_s1 + $0xa0] sm:$0xf]  ;;  %v10968_v27 = vor.u32 %v15451_v16, %v10967_v15  ;;  %v10620_v28 = vor.u32 %v15466_v17, %v10617_v18 }
  0x2e   :  { %626 = vmatpush.bf16.msrb.mxu2 %v10764_v35  ;;  %v15431_v26 = vld [vmem:[%s24905_s1 + $0xac] sm:$0xf0]  ;;  %v10951_v29 = vld [vmem:[%s24905_s1 + $0x120] sm:$0xf]  ;;  %v15462_v31 = vld [vmem:[%s24905_s1 + $0x1ac] sm:$0xf]  ;;  %v10988_v34 = vor.u32 %v15453_v21, %v10985_v22 }
  0x2f   :  { %928 = vmatpush.bf16.msra.mxu3 %v11000_v60  ;;  %v15447_v30 = vld [vmem:[%s24905_s1 + $0x12c] sm:$0xf0]  ;;  %v10601_v32 = vld [vmem:[%s24905_s1 + $0x1b8] sm:$0xf0]  ;;  %v15437_v33 = vld [vmem:[%s24905_s1 + $0xe4] sm:$0xf]  ;;  %v10888_v35 = vor.u32 %v15431_v26, %v10887_v23 }
  0x30   :  { %605 = vmatpush.bf16.msrb.mxu0 %v10668_v44  ;;  %v10921_v36 = vld [vmem:[%s24905_s1 + $0xf0] sm:$0xf0]  ;;  %v15449_v37 = vld [vmem:[%s24905_s1 + $0x144] sm:$0xf]  ;;  %v10871_v39 = vld [vmem:[%s24905_s1 + $0x80] sm:$0xf]  ;;  %v10952_v42 = vor.u32 %v15447_v30, %v10951_v29  ;;  %v10604_v43 = vor.u32 %v15462_v31, %v10601_v32 }
  0x31   :  { %570 = vmatpush.bf16.msrb.mxu1 %v10616_v47  ;;  %v10969_v38 = vld [vmem:[%s24905_s1 + $0x150] sm:$0xf0]  ;;  %v15427_v41 = vld [vmem:[%s24905_s1 + $0x8c] sm:$0xf0]  ;;  %v10935_v44 = vld [vmem:[%s24905_s1 + $0x100] sm:$0xf]  ;;  %v10924_v46 = vor.u32 %v15437_v33, %v10921_v36 }
  0x32   :  { %627 = vmatpush.bf16.msrb.mxu2 %v10748_v50  ;;  %v15443_v45 = vld [vmem:[%s24905_s1 + $0x10c] sm:$0xf0]  ;;  %v15433_v47 = vld [vmem:[%s24905_s1 + $0xc4] sm:$0xf]  ;;  %v10972_v48 = vor.u32 %v15449_v37, %v10969_v38  ;;  %v10872_v49 = vor.u32 %v15427_v41, %v10871_v39  ;;  %v10905_v50 = vld [vmem:[%s24905_s1 + $0xd0] sm:$0xf0] }
  0x33   :  { %501 = vmatmul.bf16.gmra.mxu0 %v16920_v6  ;;  %929 = vmatpush.bf16.msra.mxu3 %v10984_v11  ;;  %v15445_v51 = vld [vmem:[%s24905_s1 + $0x124] sm:$0xf]  ;;  %v10953_v52 = vld [vmem:[%s24905_s1 + $0x130] sm:$0xf0]  ;;  %v10855_v53 = vld [vmem:[%s24905_s1 + $0x60] sm:$0xf]  ;;  %v10936_v56 = vor.u32 %v15443_v45, %v10935_v44  ;;  %v10908_v57 = vor.u32 %v15433_v47, %v10905_v50 }
  0x34   :  { %606 = vmatpush.bf16.msrb.mxu0 %v10652_v61  ;;  %v15423_v54 = vld [vmem:[%s24905_s1 + $0x6c] sm:$0xf0]  ;;  %v15429_v58 = vld [vmem:[%s24905_s1 + $0xa4] sm:$0xf]  ;;  %v10956_v59 = vor.u32 %v15445_v51, %v10953_v52  ;;  %v10889_v61 = vld [vmem:[%s24905_s1 + $0xb0] sm:$0xf0] }
  0x35   :  { %571 = vmatpush.bf16.msrb.mxu1 %v10600_v0  ;;  %539 = vmatmul.bf16.gmra.mxu2 %v16920_v6  ;;  %v10856_v60 = vor.u32 %v15423_v54, %v10855_v53  ;;  %v15441_v62 = vld [vmem:[%s24905_s1 + $0x104] sm:$0xf]  ;;  %v10937_v63 = vld [vmem:[%s24905_s1 + $0x110] sm:$0xf0]  ;;  %v10839_v0 = vld [vmem:[%s24905_s1 + $0x40] sm:$0xf]  ;;  %v10892_v2 = vor.u32 %v15429_v58, %v10889_v61 }
  0x36   :  { %628 = vmatpush.bf16.msrb.mxu2 %v10732_v1  ;;  %v15419_v1 = vld [vmem:[%s24905_s1 + $0x4c] sm:$0xf0]  ;;  %v10823_v4 = vld [vmem:[%s24905_s1 + $0x20] sm:$0xf]  ;;  %v15425_v5 = vld [vmem:[%s24905_s1 + $0x84] sm:$0xf] }
  0x37   :  { %930 = vmatpush.bf16.msra.mxu3 %v10968_v27  ;;  %v10840_v8 = vor.u32 %v15419_v1, %v10839_v0  ;;  %v10873_v9 = vld [vmem:[%s24905_s1 + $0x90] sm:$0xf0]  ;;  %v11007_v10 = vld [vmem:[%s24905_s1 + $0x188] sm:$0xf]  ;;  %v15460_v11 = vld [vmem:[%s24905_s1 + $0x194] sm:$0xf0] }
  0x38   :  { %607 = vmatpush.bf16.msrb.mxu0 %v10636_v12  ;;  %572 = vmatmul.bf16.vlgmr.msrb.gmra.mxu1 %v16792_v3  ;;  %v11008_v12 = vor.u32 %v15460_v11, %v11007_v10  ;;  %v11009_v15 = vld [vmem:[%s24905_s1 + $0x198] sm:$0xf0]  ;;  %v10876_v17 = vor.u32 %v15425_v5, %v10873_v9  ;;  %v10857_v21 = vld [vmem:[%s24905_s1 + $0x70] sm:$0xf0]  ;;  %v10991_v22 = vld [vmem:[%s24905_s1 + $0x168] sm:$0xf] }
  0x39   :  { %906 = vmatpush.bf16.msra.mxu1 %v10920_v7  ;;  %10801 = vmatmul.msk.bf16.vlgmr.msrb.gmra.mxu3 %vm481_vm1, %v16685_v13  ;;  %v10940_v7 = vor.u32 %v15441_v62, %v10937_v63  ;;  %v15411_v23 = vld [vmem:[%s24905_s1 + $0xc] sm:$0xf0]  ;;  %v10927_v26 = vld [vmem:[%s24905_s1 + $0xe8] sm:$0xf]  ;;  %v15456_v27 = vld [vmem:[%s24905_s1 + $0x174] sm:$0xf0] }
  0x3a   :  { %966 = vmatpush.bf16.msra.mxu2 %v11004_v14  ;;  %v15458_v14 = vld [vmem:[%s24905_s1 + $0x18c] sm:$0xf]  ;;  %v10992_v29 = vor.u32 %v15456_v27, %v10991_v22  ;;  %v10993_v31 = vld [vmem:[%s24905_s1 + $0x178] sm:$0xf0]  ;;  %v15417_v37 = vld [vmem:[%s24905_s1 + $0x44] sm:$0xf] }
  0x3b   :  { %931 = vmatpush.bf16.msra.mxu3 %v10952_v42  ;;  %v11012_v16 = vor.u32 %v15458_v14, %v11009_v15  ;;  %v15454_v30 = vld [vmem:[%s24905_s1 + $0x16c] sm:$0xf]  ;;  %v10841_v38 = vld [vmem:[%s24905_s1 + $0x50] sm:$0xf0]  ;;  %v10959_v42 = vld [vmem:[%s24905_s1 + $0x128] sm:$0xf] }
  0x3c   :  { %608 = vmatpush.bf16.msrb.mxu0 %v10620_v28  ;;  %v15440_v28 = vld [vmem:[%s24905_s1 + $0xf4] sm:$0xf0]  ;;  %v10996_v33 = vor.u32 %v15454_v30, %v10993_v31  ;;  %v10911_v44 = vld [vmem:[%s24905_s1 + $0xc8] sm:$0xf]  ;;  %v10844_v47 = vor.u32 %v15417_v37, %v10841_v38  ;;  %v10825_v50 = vld [vmem:[%s24905_s1 + $0x30] sm:$0xf0] }
  0x3d   :  { %907 = vmatpush.bf16.msra.mxu1 %v10904_v19  ;;  %v15421_v19 = vld [vmem:[%s24905_s1 + $0x64] sm:$0xf]  ;;  %v10928_v41 = vor.u32 %v15440_v28, %v10927_v26  ;;  %v15436_v45 = vld [vmem:[%s24905_s1 + $0xd4] sm:$0xf0]  ;;  %v10895_v58 = vld [vmem:[%s24905_s1 + $0xa8] sm:$0xf] }
  0x3e   :  { %967 = vmatpush.bf16.msra.mxu2 %v10988_v34  ;;  %v10860_v32 = vor.u32 %v15421_v19, %v10857_v21  ;;  %v10975_v34 = vld [vmem:[%s24905_s1 + $0x148] sm:$0xf]  ;;  %v10912_v53 = vor.u32 %v15436_v45, %v10911_v44  ;;  %v51_v54 = vld [vmem:[%s24906_s0] sm:$0xff]  ;;  %v10809_v61 = vld [vmem:[%s24905_s1 + $0x10] sm:$0xf0]  ;;  %vm24916_vm9 = vcmask 1041408  }
  0x3f   :  { %932 = vmatpush.bf16.msra.mxu3 %v10936_v56  ;;  %v52_v56 = vld [vmem:[%s24906_s0 + $0x8] sm:$0xff]  ;;  %v17153_v63 = vpack.c.bf16 %v16702_v20, %v51_v54  ;;  %v10929_v0 = vld [vmem:[%s24905_s1 + $0xf8] sm:$0xf0]  ;;  %v15444_v1 = vld [vmem:[%s24905_s1 + $0x114] sm:$0xf0] }
  0x40   :  { %609 = vmatpush.bf16.msrb.mxu0 %v10604_v43  ;;  %v15448_v43 = vld [vmem:[%s24905_s1 + $0x134] sm:$0xf0]  ;;  %v10943_v62 = vld [vmem:[%s24905_s1 + $0x108] sm:$0xf]  ;;  %v10913_v9 = vld [vmem:[%s24905_s1 + $0xd8] sm:$0xf0] }
  0x41   :  { %908 = vmatpush.bf16.msra.mxu1 %v10888_v35  ;;  %v15452_v35 = vld [vmem:[%s24905_s1 + $0x154] sm:$0xf0]  ;;  %v10960_v51 = vor.u32 %v15448_v43, %v10959_v42  ;;  %v10879_v5 = vld [vmem:[%s24905_s1 + $0x88] sm:$0xf]  ;;  %v15430_v21 = vld [vmem:[%s24905_s1 + $0xac] sm:$0xf] }
  0x42   :  { %968 = vmatpush.bf16.msra.mxu2 %v10972_v48  ;;  %v10976_v39 = vor.u32 %v15452_v35, %v10975_v34  ;;  %v10977_v48 = vld [vmem:[%s24905_s1 + $0x158] sm:$0xf0]  ;;  %v10863_v11 = vld [vmem:[%s24905_s1 + $0x68] sm:$0xf]  ;;  %v15424_v14 = vld [vmem:[%s24905_s1 + $0x74] sm:$0xf0] }
  0x43   :  { %610 = vmatmul.bf16.vlgmr.msrb.gmra.mxu0 %v16792_v3  ;;  %v15415_v3 = vld [vmem:[%s24905_s1 + $0x2c] sm:$0xf0]  ;;  %1004 = vmatpush.bf16.msrb.mxu3 %v11008_v12  ;;  %v10961_v12 = vld [vmem:[%s24905_s1 + $0x138] sm:$0xf0]  ;;  %v10864_v19 = vor.u32 %v15424_v14, %v10863_v11  ;;  %v15420_v26 = vld [vmem:[%s24905_s1 + $0x54] sm:$0xf0] }
  0x44   :  { %944 = vmatpush.bf16.msra.mxu0 %v10924_v46  ;;  %v10824_v18 = vor.u32 %v15415_v3, %v10823_v4  ;;  %v15450_v46 = vld [vmem:[%s24905_s1 + $0x14c] sm:$0xf]  ;;  %v10944_v4 = vor.u32 %v15444_v1, %v10943_v62  ;;  %v10897_v22 = vld [vmem:[%s24905_s1 + $0xb8] sm:$0xf0]  ;;  %v55_v28 = vld [vmem:[%s24906_s0 + $0x30] sm:$0xff] }
  0x45   :  { %909 = vmatpush.bf16.msra.mxu1 %v10872_v49  ;;  %10803 = vmatmul.msk.bf16.vlgmr.msrb.gmra.mxu2 %vm481_vm1, %v16685_v13  ;;  %v10807_v13 = vld [vmem:[%s24905_s1] sm:$0xf]  ;;  %v15413_v49 = vld [vmem:[%s24905_s1 + $0x24] sm:$0xf]  ;;  %v10980_v52 = vor.u32 %v15450_v46, %v10977_v48  ;;  %v15446_v3 = vld [vmem:[%s24905_s1 + $0x12c] sm:$0xf]  ;;  %v10900_v27 = vor.u32 %v15430_v21, %v10897_v22  ;;  %v17240_v37 = vpack.c.bf16 %v16836_v25, %v55_v28 }
  0x46   :  { %969 = vmatpush.bf16.msra.mxu2 %v10956_v59  ;;  %v10808_v36 = vor.u32 %v15411_v23, %v10807_v13  ;;  %v15432_v59 = vld [vmem:[%s24905_s1 + $0xb4] sm:$0xf0]  ;;  %v10964_v15 = vor.u32 %v15446_v3, %v10961_v12  ;;  %v10847_v23 = vld [vmem:[%s24905_s1 + $0x48] sm:$0xf]  ;;  %v15426_v30 = vld [vmem:[%s24905_s1 + $0x8c] sm:$0xf] }
  0x47   :  { %1005 = vmatpush.bf16.msrb.mxu3 %v10992_v29  ;;  %v10848_v29 = vor.u32 %v15420_v26, %v10847_v23  ;;  %v10881_v31 = vld [vmem:[%s24905_s1 + $0x98] sm:$0xf0]  ;;  %v15416_v34 = vld [vmem:[%s24905_s1 + $0x34] sm:$0xf0]  ;;  %v11267_v35 = vld [vmem:[%s24905_s1 + $0x4c0] sm:$0xf] }
  0x48   :  { %945 = vmatpush.bf16.msra.mxu0 %v10908_v57  ;;  %577 = vmatmul.bf16.gmra.mxu1 %v16920_v6  ;;  %v10828_v57 = vor.u32 %v15413_v49, %v10825_v50  ;;  %v10884_v38 = vor.u32 %v15426_v30, %v10881_v31  ;;  %v11269_v42 = vld [vmem:[%s24905_s1 + $0x4d0] sm:$0xf0]  ;;  %v15422_v45 = vld [vmem:[%s24905_s1 + $0x6c] sm:$0xf]  ;;  %v10865_v46 = vld [vmem:[%s24905_s1 + $0x78] sm:$0xf0] }
  0x49   :  { %910 = vmatpush.bf16.msra.mxu1 %v10856_v60  ;;  %10802 = vmatmul.msk.bf16.gmra.mxu3 %vm481_vm1, %v16831_v24  ;;  %v15409_v60 = vld [vmem:[%s24905_s1 + $0x4] sm:$0xf]  ;;  %v10815_v48 = vld [vmem:[%s24905_s1 + $0x8] sm:$0xf]  ;;  %v11187_v49 = vld [vmem:[%s24905_s1 + $0x420] sm:$0xf] }
  0x4a   :  { %970 = vmatpush.bf16.msra.mxu2 %v10940_v7  ;;  %v10812_v20 = vor.u32 %v15409_v60, %v10809_v61  ;;  %v15428_v7 = vld [vmem:[%s24905_s1 + $0x94] sm:$0xf0]  ;;  %v15543_v50 = vld [vmem:[%s24905_s1 + $0x42c] sm:$0xf0]  ;;  %v11253_v61 = vld [vmem:[%s24905_s1 + $0x4b0] sm:$0xf0] }
  0x4b   :  { %1006 = vmatpush.bf16.msrb.mxu3 %v10976_v39  ;;  %v10880_v10 = vor.u32 %v15428_v7, %v10879_v5  ;;  %v11188_v60 = vor.u32 %v15543_v50, %v11187_v49  ;;  %v11235_v62 = vld [vmem:[%s24905_s1 + $0x480] sm:$0xf]  ;;  %v15539_v1 = vld [vmem:[%s24905_s1 + $0x40c] sm:$0xf0]  ;;  %v11237_v3 = vld [vmem:[%s24905_s1 + $0x490] sm:$0xf0] }
  0x4c   :  { %946 = vmatpush.bf16.msra.mxu0 %v10892_v2  ;;  %v17165_v2 = vpack.c.bf16 %v16647_v55, %v52_v56  ;;  %v15434_v55 = vld [vmem:[%s24905_s1 + $0xcc] sm:$0xf]  ;;  %v11219_v5 = vld [vmem:[%s24905_s1 + $0x460] sm:$0xf]  ;;  %v15551_v7 = vld [vmem:[%s24905_s1 + $0x46c] sm:$0xf0] }
  0x4d   :  { %911 = vmatpush.bf16.msra.mxu1 %v10840_v8  ;;  %v10916_v13 = vor.u32 %v15434_v55, %v10913_v9  ;;  %v10833_v55 = vld [vmem:[%s24905_s1 + $0x38] sm:$0xf0]  ;;  %v15553_v9 = vld [vmem:[%s24905_s1 + $0x484] sm:$0xf]  ;;  %v11220_v11 = vor.u32 %v15551_v7, %v11219_v5  ;;  %v11155_v12 = vld [vmem:[%s24905_s1 + $0x3e0] sm:$0xf] }
  0x4e   :  { %1042 = vmatpush.bf16.msrb.mxu2 %v11012_v16  ;;  %v15442_v16 = vld [vmem:[%s24905_s1 + $0x10c] sm:$0xf]  ;;  %v15535_v14 = vld [vmem:[%s24905_s1 + $0x3ec] sm:$0xf0]  ;;  %v11139_v22 = vld [vmem:[%s24905_s1 + $0x3c0] sm:$0xf] }
  0x4f   :  { %1007 = vmatpush.bf16.msrb.mxu3 %v10960_v51  ;;  %v11251_v51 = vld [vmem:[%s24905_s1 + $0x4a0] sm:$0xf]  ;;  %v11156_v21 = vor.u32 %v15535_v14, %v11155_v12  ;;  %v15531_v23 = vld [vmem:[%s24905_s1 + $0x3cc] sm:$0xf0]  ;;  %v15537_v31 = vld [vmem:[%s24905_s1 + $0x404] sm:$0xf] }
  0x50   :  { %947 = vmatpush.bf16.msra.mxu0 %v10876_v17  ;;  %v10945_v17 = vld [vmem:[%s24905_s1 + $0x118] sm:$0xf0]  ;;  %v11203_v26 = vld [vmem:[%s24905_s1 + $0x440] sm:$0xf]  ;;  %v11205_v49 = vld [vmem:[%s24905_s1 + $0x450] sm:$0xf0] }
  0x51   :  { %912 = vmatpush.bf16.msra.mxu1 %v10824_v18  ;;  %v10948_v18 = vor.u32 %v15442_v16, %v10945_v17  ;;  %v15410_v17 = vld [vmem:[%s24905_s1 + $0xc] sm:$0xf]  ;;  %v15529_v50 = vld [vmem:[%s24905_s1 + $0x3c4] sm:$0xf]  ;;  %v11259_v12 = vld [vmem:[%s24905_s1 + $0x4a8] sm:$0xf] }
  0x52   :  { %1043 = vmatpush.bf16.msrb.mxu2 %v10996_v33  ;;  %v10831_v33 = vld [vmem:[%s24905_s1 + $0x28] sm:$0xf]  ;;  %v15560_v14 = vld [vmem:[%s24905_s1 + $0x4b4] sm:$0xf0] }
  0x53   :  { %615 = vmatmul.bf16.gmra.mxu0 %v16920_v6  ;;  %v15438_v6 = vld [vmem:[%s24905_s1 + $0xec] sm:$0xf]  ;;  %1008 = vmatpush.bf16.msrb.mxu3 %v10944_v4  ;;  %v10832_v44 = vor.u32 %v15416_v34, %v10831_v33  ;;  %v11140_v33 = vor.u32 %v15531_v23, %v11139_v22  ;;  %v11123_v34 = vld [vmem:[%s24905_s1 + $0x3a0] sm:$0xf] }
  0x54   :  { %948 = vmatpush.bf16.msra.mxu0 %v10860_v32  ;;  %v10932_v8 = vor.u32 %v15438_v6, %v10929_v0  ;;  %v56_v32 = vld [vmem:[%s24906_s0 + $0x38] sm:$0xff]  ;;  %v15555_v6 = vld [vmem:[%s24905_s1 + $0x48c] sm:$0xf0]  ;;  %v11171_v0 = vld [vmem:[%s24905_s1 + $0x400] sm:$0xf] }
  0x55   :  { %913 = vmatpush.bf16.msra.mxu1 %v10808_v36  ;;  %10804 = vmatmul.msk.bf16.gmra.mxu2 %vm481_vm1, %v16831_v24  ;;  %v10896_v24 = vor.u32 %v15432_v59, %v10895_v58  ;;  %v15563_v36 = vld [vmem:[%s24905_s1 + $0x4cc] sm:$0xf0]  ;;  %v17249_v43 = vpack.c.bf16 %v16748_v40, %v56_v32  ;;  %v15412_v40 = vld [vmem:[%s24905_s1 + $0x14] sm:$0xf0]  ;;  %v10849_v58 = vld [vmem:[%s24905_s1 + $0x58] sm:$0xf0]  ;;  %v11236_v4 = vor.u32 %v15555_v6, %v11235_v62 }
  0x56   :  { %1044 = vmatpush.bf16.msrb.mxu2 %v10980_v52  ;;  %v11268_v39 = vor.u32 %v15563_v36, %v11267_v35  ;;  %v15559_v52 = vld [vmem:[%s24905_s1 + $0x4ac] sm:$0xf0]  ;;  %v10816_v56 = vor.u32 %v15412_v40, %v10815_v48  ;;  %v15557_v59 = vld [vmem:[%s24905_s1 + $0x4a4] sm:$0xf]  ;;  %v11173_v32 = vld [vmem:[%s24905_s1 + $0x410] sm:$0xf0] }
  0x57   :  { %v11252_v54 = vor.u32 %v15559_v52, %v11251_v51  ;;  %v15527_v35 = vld [vmem:[%s24905_s1 + $0x3ac] sm:$0xf0]  ;;  %v11176_v36 = vor.u32 %v15537_v31, %v11173_v32  ;;  %v15545_v40 = vld [vmem:[%s24905_s1 + $0x444] sm:$0xf]  ;;  %v11141_v51 = vld [vmem:[%s24905_s1 + $0x3d0] sm:$0xf0] }
  0x58   :  { %949 = vmatpush.bf16.msra.mxu0 %v10844_v47  ;;  %914 = vmatmul.bf16.vlgmr.msra.gmra.mxu1 %v17153_v63  ;;  %v15515_v62 = vld [vmem:[%s24905_s1 + $0x34c] sm:$0xf0]  ;;  %v11195_v6 = vld [vmem:[%s24905_s1 + $0x428] sm:$0xf]  ;;  %v1060_v22 = vld [vmem:[%s24906_s0 + $0x20] sm:$0x3] }
  0x59   :  { %982 = vmatpush.bf16.msrb.mxu1 %v10928_v41  ;;  %11013 = vmatmul.msk.bf16.vlgmr.msra.gmra.mxu3 %vm481_vm1, %v17165_v2  ;;  %v15561_v41 = vld [vmem:[%s24905_s1 + $0x4c4] sm:$0xf]  ;;  %v17440_v7 = vld [vmem:[%s24906_s0 + $0x8] sm:$0xfc]  ;;  %v15556_v32 = vld [vmem:[%s24905_s1 + $0x494] sm:$0xf0] }
  0x5a   :  { %1045 = vmatpush.bf16.msrb.mxu2 %v10964_v15  ;;  %v11272_v47 = vor.u32 %v15561_v41, %v11269_v42  ;;  %1448 = vmatpush.bf16.msra.mxu3 %v11268_v39  ;;  %v11240_v15 = vor.u32 %v15553_v9, %v11237_v3  ;;  %v11221_v39 = vld [vmem:[%s24905_s1 + $0x470] sm:$0xf0]  ;;  %v15533_v41 = vld [vmem:[%s24905_s1 + $0x3e4] sm:$0xf]  ;;  %v11243_v31 = vld [vmem:[%s24905_s1 + $0x488] sm:$0xf] }
  0x5b   :  { %v11157_v42 = vld [vmem:[%s24905_s1 + $0x3f0] sm:$0xf0] }
  0x5c   :  { %950 = vmatpush.bf16.msra.mxu0 %v10828_v57  ;;  %v15418_v57 = vld [vmem:[%s24905_s1 + $0x4c] sm:$0xf]  ;;  %v11160_v48 = vor.u32 %v15533_v41, %v11157_v42  ;;  %v11109_v9 = vld [vmem:[%s24905_s1 + $0x390] sm:$0xf0]  ;;  %v1081_v42 = vrot.slane %v1060_v22, 2 }
  0x5d   :  { %983 = vmatpush.bf16.msrb.mxu1 %v10912_v53  ;;  %v10868_v53 = vor.u32 %v15422_v45, %v10865_v46  ;;  %v11107_v46 = vld [vmem:[%s24905_s1 + $0x380] sm:$0xf]  ;;  %v15530_v22 = vld [vmem:[%s24905_s1 + $0x3cc] sm:$0xf] }
  0x5e   :  { %1046 = vmatpush.bf16.msrb.mxu2 %v10948_v18  ;;  %1449 = vmatpush.bf16.msra.mxu3 %v11252_v54  ;;  %v15541_v18 = vld [vmem:[%s24905_s1 + $0x424] sm:$0xf]  ;;  %v11091_v54 = vld [vmem:[%s24905_s1 + $0x360] sm:$0xf] }
  0x60   :  { %951 = vmatpush.bf16.msra.mxu0 %v10812_v20  ;;  %v10852_v20 = vor.u32 %v15418_v57, %v10849_v58  ;;  %v11144_v57 = vor.u32 %v15529_v50, %v11141_v51  ;;  %v15525_v58 = vld [vmem:[%s24905_s1 + $0x3a4] sm:$0xf]  ;;  %v15552_v50 = vld [vmem:[%s24905_s1 + $0x474] sm:$0xf0]  ;;  %v11147_v51 = vld [vmem:[%s24905_s1 + $0x3c8] sm:$0xf] }
  0x61   :  { %984 = vmatpush.bf16.msrb.mxu1 %v10896_v24  ;;  %v11256_v24 = vor.u32 %v15557_v59, %v11253_v61  ;;  %v11125_v59 = vld [vmem:[%s24905_s1 + $0x3b0] sm:$0xf0]  ;;  %v11075_v61 = vld [vmem:[%s24905_s1 + $0x340] sm:$0xf] }
  0x62   :  { %1450 = vmatpush.bf16.msra.mxu3 %v11236_v4  ;;  %v15562_v4 = vld [vmem:[%s24905_s1 + $0x4cc] sm:$0xf]  ;;  %v11128_v5 = vor.u32 %v15525_v58, %v11125_v59  ;;  %v11245_v59 = vld [vmem:[%s24905_s1 + $0x498] sm:$0xf0] }
  0x63   :  { %952 = vmatmul.bf16.vlgmr.msra.gmra.mxu0 %v17153_v63  ;;  %v15554_v58 = vld [vmem:[%s24905_s1 + $0x48c] sm:$0xf] }
  0x64   :  { %1020 = vmatpush.bf16.msrb.mxu0 %v10932_v8  ;;  %v15414_v8 = vld [vmem:[%s24905_s1 + $0x2c] sm:$0xf] }
  0x65   :  { %985 = vmatpush.bf16.msrb.mxu1 %v10880_v10  ;;  %11015 = vmatmul.msk.bf16.vlgmr.msra.gmra.mxu2 %vm481_vm1, %v17165_v2  ;;  %v11172_v10 = vor.u32 %v15539_v1, %v11171_v0  ;;  %v10836_v16 = vor.u32 %v15414_v8, %v10833_v55  ;;  %v11275_v0 = vld [vmem:[%s24905_s1 + $0x4c8] sm:$0xf]  ;;  %v15564_v1 = vld [vmem:[%s24905_s1 + $0x4d4] sm:$0xf0]  ;;  %v15521_v55 = vld [vmem:[%s24905_s1 + $0x384] sm:$0xf] }
  0x66   :  { %1486 = vmatpush.bf16.msra.mxu2 %v11272_v47  ;;  %1451 = vmatpush.bf16.msra.mxu3 %v11220_v11  ;;  %v15523_v47 = vld [vmem:[%s24905_s1 + $0x38c] sm:$0xf0]  ;;  %v17445_v8 = vld [vmem:[%s24906_s0 + $0x28] sm:$0x3]  ;;  %v1058_v11 = vld [vmem:[%s24906_s0] sm:$0xfc] }
  0x67   :  { %v11108_v52 = vor.u32 %v15523_v47, %v11107_v46  ;;  %v1083_v23 = vrot.slane %v17445_v8, 2  ;;  %v11077_v46 = vld [vmem:[%s24905_s1 + $0x350] sm:$0xf0]  ;;  %v15542_v47 = vld [vmem:[%s24905_s1 + $0x42c] sm:$0xf] }
  0x68   :  { %1021 = vmatpush.bf16.msrb.mxu0 %v10916_v13  ;;  %919 = vmatmul.bf16.gmra.mxu1 %v17240_v37  ;;  %v10817_v13 = vld [vmem:[%s24905_s1 + $0x18] sm:$0xf0] }
  0x69   :  { %986 = vmatpush.bf16.msrb.mxu1 %v10864_v19  ;;  %11014 = vmatmul.msk.bf16.gmra.mxu3 %vm481_vm1, %v17249_v43  ;;  %v11189_v19 = vld [vmem:[%s24905_s1 + $0x430] sm:$0xf0]  ;;  %v10820_v28 = vor.u32 %v15410_v17, %v10817_v13  ;;  %v11260_v17 = vor.u32 %v15560_v14, %v11259_v12  ;;  %v1078_v13 = vrot.slane %v17440_v7, 2  ;;  %v15524_v12 = vld [vmem:[%s24905_s1 + $0x394] sm:$0xf0] }
  0x6a   :  { %1487 = vmatpush.bf16.msra.mxu2 %v11256_v24  ;;  %v11192_v30 = vor.u32 %v15541_v18, %v11189_v19  ;;  %v15544_v24 = vld [vmem:[%s24905_s1 + $0x434] sm:$0xf0]  ;;  %v1062_v14 = vld [vmem:[%s24906_s0 + $0x30] sm:$0xfc] }
  0x6b   :  { %v11196_v3 = vor.u32 %v15544_v24, %v11195_v6  ;;  %v17475_v18 = vld [vmem:[%s24906_s0 + $0x18] sm:$0xff]  ;;  %v15538_v6 = vld [vmem:[%s24905_s1 + $0x40c] sm:$0xf] }
  0x6c   :  { %1022 = vmatpush.bf16.msrb.mxu0 %v10900_v27  ;;  %v15547_v27 = vld [vmem:[%s24905_s1 + $0x44c] sm:$0xf0]  ;;  %v1079_v19 = vrot.slane %v17475_v18, 2 }
  0x6d   :  { %987 = vmatpush.bf16.msrb.mxu1 %v10848_v29  ;;  %v11204_v29 = vor.u32 %v15547_v27, %v11203_v26  ;;  %v15517_v26 = vld [vmem:[%s24905_s1 + $0x364] sm:$0xf]  ;;  %v11093_v27 = vld [vmem:[%s24905_s1 + $0x370] sm:$0xf0] }
  0x6e   :  { %1488 = vmatpush.bf16.msra.mxu2 %v11240_v15  ;;  %v11179_v15 = vld [vmem:[%s24905_s1 + $0x408] sm:$0xf] }
  0x6f   :  { %1452 = vmatpush.bf16.msra.mxu3 %v11204_v29 }
  0x70   :  { %1023 = vmatpush.bf16.msrb.mxu0 %v10884_v38  ;;  %v15549_v38 = vld [vmem:[%s24905_s1 + $0x464] sm:$0xf] }
  0x71   :  { %988 = vmatpush.bf16.msrb.mxu1 %v10832_v44  ;;  %v11124_v44 = vor.u32 %v15527_v35, %v11123_v34  ;;  %v11224_v45 = vor.u32 %v15549_v38, %v11221_v39  ;;  %v15558_v34 = vld [vmem:[%s24905_s1 + $0x4ac] sm:$0xf]  ;;  %v11261_v35 = vld [vmem:[%s24905_s1 + $0x4b8] sm:$0xf0]  ;;  %v11096_v38 = vor.u32 %v15517_v26, %v11093_v27  ;;  %v17509_v39 = vld [vmem:[%s24906_s0 + $0x10] sm:$0xff] }
  0x72   :  { %v1076_v41 = vrot.slane %v17509_v39, 2 }
  0x73   :  { %957 = vmatmul.bf16.gmra.mxu0 %v17240_v37  ;;  %1489 = vmatpush.bf16.msra.mxu2 %v11224_v45  ;;  %v15513_v45 = vld [vmem:[%s24905_s1 + $0x344] sm:$0xf] }
  0x74   :  { %1024 = vmatpush.bf16.msrb.mxu0 %v10868_v53  ;;  %v11208_v53 = vor.u32 %v15545_v40, %v11205_v49  ;;  %v11227_v49 = vld [vmem:[%s24905_s1 + $0x468] sm:$0xf] }
  0x75   :  { %989 = vmatpush.bf16.msrb.mxu1 %v10816_v56  ;;  %11016 = vmatmul.msk.bf16.gmra.mxu2 %vm481_vm1, %v17249_v43  ;;  %v15519_v56 = vld [vmem:[%s24905_s1 + $0x36c] sm:$0xf0] }
  0x77   :  { %1490 = vmatpush.bf16.msra.mxu2 %v11208_v53  ;;  %v11228_v53 = vor.u32 %v15552_v50, %v11227_v49  ;;  %v15516_v49 = vld [vmem:[%s24905_s1 + $0x354] sm:$0xf0] }
  0x78   :  { %1025 = vmatpush.bf16.msrb.mxu0 %v10852_v20  ;;  %990 = vmatmul.bf16.vlgmr.msrb.gmra.mxu1 %v17153_v63  ;;  %v11277_v20 = vld [vmem:[%s24905_s1 + $0x4d8] sm:$0xf0] }
  0x79   :  { %1426 = vmatpush.bf16.msra.mxu1 %v11188_v60  ;;  %11017 = vmatmul.msk.bf16.vlgmr.msrb.gmra.mxu3 %vm481_vm1, %v17165_v2  ;;  %v11092_v60 = vor.u32 %v15519_v56, %v11091_v54  ;;  %v1082_v56 = vsel %vm24918_vm2, %v1076_v41, %v1081_v42 }
  0x7c   :  { %1026 = vmatpush.bf16.msrb.mxu0 %v10836_v16  ;;  %v15540_v16 = vld [vmem:[%s24905_s1 + $0x414] sm:$0xf0] }
  0x7d   :  { %1427 = vmatpush.bf16.msra.mxu1 %v11172_v10  ;;  %v11076_v10 = vor.u32 %v15515_v62, %v11075_v61  ;;  %v11180_v29 = vor.u32 %v15540_v16, %v11179_v15  ;;  %v1084_v61 = vsel %vm24918_vm2, %v1079_v19, %v1083_v23  ;;  %v15550_v15 = vld [vmem:[%s24905_s1 + $0x46c] sm:$0xf]  ;;  %v11229_v16 = vld [vmem:[%s24905_s1 + $0x478] sm:$0xf0] }
  0x7e   :  { %v11149_v23 = vld [vmem:[%s24905_s1 + $0x3d8] sm:$0xf0] }
  0x80   :  { %1027 = vmatpush.bf16.msrb.mxu0 %v10820_v28  ;;  %v1075_v28 = vrot.slane %v1058_v11, 2  ;;  %v1063_v11 = vld [vmem:[%s24906_s0 + $0x38] sm:$0xfc] }
  0x81   :  { %1428 = vmatpush.bf16.msra.mxu1 %v11156_v21  ;;  %v11112_v21 = vor.u32 %v15521_v55, %v11109_v9  ;;  %v11165_v9 = vld [vmem:[%s24905_s1 + $0x3f8] sm:$0xf0] }
  0x82   :  { %v1077_v54 = vsel %vm24918_vm2, %v1075_v28, %v1076_v41  ;;  %v1088_v28 = vrot.slane %v1063_v11, 2 }
  0x83   :  { %1028 = vmatmul.bf16.vlgmr.msrb.gmra.mxu0 %v17153_v63  ;;  %v11276_v63 = vor.u32 %v15564_v1, %v11275_v0  ;;  %v11248_v0 = vor.u32 %v15554_v58, %v11245_v59  ;;  %v11181_v1 = vld [vmem:[%s24905_s1 + $0x418] sm:$0xf0]  ;;  %v11455_v58 = vld [vmem:[%s24905_s1 + $0x5c0] sm:$0xf]  ;;  %v15595_v59 = vld [vmem:[%s24905_s1 + $0x5cc] sm:$0xf0] }
  0x84   :  { %1464 = vmatpush.bf16.msra.mxu0 %v11192_v30  ;;  %v11163_v30 = vld [vmem:[%s24905_s1 + $0x3e8] sm:$0xf]  ;;  %v11184_v55 = vor.u32 %v15538_v6, %v11181_v1  ;;  %v15615_v6 = vld [vmem:[%s24905_s1 + $0x66c] sm:$0xf0] }
  0x85   :  { %1429 = vmatpush.bf16.msra.mxu1 %v11140_v33  ;;  %11019 = vmatmul.msk.bf16.vlgmr.msrb.gmra.mxu2 %vm481_vm1, %v17165_v2  ;;  %v11280_v2 = vor.u32 %v15562_v4, %v11277_v20  ;;  %v15536_v33 = vld [vmem:[%s24905_s1 + $0x3f4] sm:$0xf0]  ;;  %v17561_v20 = vpack.c.bf16 %v1082_v56, %v1077_v54 }
  0x86   :  { %1524 = vmatpush.bf16.msrb.mxu3 %v11276_v63  ;;  %v11164_v40 = vor.u32 %v15536_v33, %v11163_v30  ;;  %v11211_v63 = vld [vmem:[%s24905_s1 + $0x448] sm:$0xf]  ;;  %v15548_v4 = vld [vmem:[%s24905_s1 + $0x454] sm:$0xf0]  ;;  %v1086_v33 = vrot.slane %v16836_v25, 2 }
  0x87   :  { %1562 = vmatpush.bf16.msrb.mxu2 %v11280_v2  ;;  %v11212_v7 = vor.u32 %v15548_v4, %v11211_v63  ;;  %v11099_v30 = vld [vmem:[%s24905_s1 + $0x368] sm:$0xf] }
  0x88   :  { %1465 = vmatpush.bf16.msra.mxu0 %v11176_v36  ;;  %995 = vmatmul.bf16.gmra.mxu1 %v17240_v37  ;;  %v11244_v36 = vor.u32 %v15556_v32, %v11243_v31  ;;  %v15520_v31 = vld [vmem:[%s24905_s1 + $0x374] sm:$0xf0] }
  0x89   :  { %1430 = vmatpush.bf16.msra.mxu1 %v11124_v44  ;;  %11018 = vmatmul.msk.bf16.gmra.mxu3 %vm481_vm1, %v17249_v43  ;;  %v11264_v44 = vor.u32 %v15558_v34, %v11261_v35  ;;  %v15546_v35 = vld [vmem:[%s24905_s1 + $0x44c] sm:$0xf] }
  0x8a   :  { %1525 = vmatpush.bf16.msrb.mxu3 %v11260_v17 }
  0x8b   :  { %1563 = vmatpush.bf16.msrb.mxu2 %v11264_v44  ;;  %v11152_v44 = vor.u32 %v15530_v22, %v11149_v23  ;;  %v15514_v22 = vld [vmem:[%s24905_s1 + $0x34c] sm:$0xf]  ;;  %v11423_v23 = vld [vmem:[%s24905_s1 + $0x580] sm:$0xf] }
  0x8c   :  { %1466 = vmatpush.bf16.msra.mxu0 %v11160_v48  ;;  %v11197_v48 = vld [vmem:[%s24905_s1 + $0x438] sm:$0xf0] }
  0x8d   :  { %1431 = vmatpush.bf16.msra.mxu1 %v11108_v52  ;;  %v15532_v52 = vld [vmem:[%s24905_s1 + $0x3d4] sm:$0xf0]  ;;  %v11200_v62 = vor.u32 %v15542_v47, %v11197_v48  ;;  %v11100_v47 = vor.u32 %v15520_v31, %v11099_v30  ;;  %v15593_v31 = vld [vmem:[%s24905_s1 + $0x5c4] sm:$0xf] }
  0x8e   :  { %1526 = vmatpush.bf16.msrb.mxu3 %v11244_v36  ;;  %v11148_v24 = vor.u32 %v15532_v52, %v11147_v51  ;;  %v11213_v36 = vld [vmem:[%s24905_s1 + $0x458] sm:$0xf0] }
  0x8f   :  { %1564 = vmatpush.bf16.msrb.mxu2 %v11248_v0  ;;  %v11216_v25 = vor.u32 %v15546_v35, %v11213_v36  ;;  %v15609_v36 = vld [vmem:[%s24905_s1 + $0x644] sm:$0xf] }
  0x90   :  { %1467 = vmatpush.bf16.msra.mxu0 %v11144_v57  ;;  %v11080_v57 = vor.u32 %v15513_v45, %v11077_v46  ;;  %v15526_v45 = vld [vmem:[%s24905_s1 + $0x3ac] sm:$0xf]  ;;  %v11133_v46 = vld [vmem:[%s24905_s1 + $0x3b8] sm:$0xf0] }
  0x91   :  { %1432 = vmatpush.bf16.msra.mxu1 %v11092_v60  ;;  %v1080_v60 = vsel %vm24918_vm2, %v1078_v13, %v1079_v19  ;;  %v1064_v13 = vld [vmem:[%s24906_s0 + $0x50] sm:$0x3]  ;;  %v11232_v19 = vor.u32 %v15550_v15, %v11229_v16  ;;  %v11136_v56 = vor.u32 %v15526_v45, %v11133_v46 }
  0x92   :  { %1527 = vmatpush.bf16.msrb.mxu3 %v11228_v53  ;;  %v17569_v8 = vpack.c.bf16 %v1084_v61, %v1080_v60  ;;  %v1091_v34 = vrot.slane %v1064_v13, 2  ;;  %v11117_v60 = vld [vmem:[%s24905_s1 + $0x398] sm:$0xf0] }
  0x93   :  { %1033 = vmatmul.bf16.gmra.mxu0 %v17240_v37  ;;  %v11131_v37 = vld [vmem:[%s24905_s1 + $0x3a8] sm:$0xf]  ;;  %1565 = vmatpush.bf16.msrb.mxu2 %v11232_v19 }
  0x94   :  { %1468 = vmatpush.bf16.msra.mxu0 %v11128_v5  ;;  %v15528_v5 = vld [vmem:[%s24905_s1 + $0x3b4] sm:$0xf0]  ;;  %v1092_v52 = vsel %vm24918_vm2, %v1086_v33, %v1091_v34  ;;  %v11457_v34 = vld [vmem:[%s24905_s1 + $0x5d0] sm:$0xf0] }
  0x95   :  { %1433 = vmatpush.bf16.msra.mxu1 %v11076_v10  ;;  %11020 = vmatmul.msk.bf16.gmra.mxu2 %vm481_vm1, %v17249_v43  ;;  %v516_v2 = vpop.f32.mrf.mxu1  ;;  %v15534_v43 = vld [vmem:[%s24905_s1 + $0x3ec] sm:$0xf]  ;;  %v11132_v10 = vor.u32 %v15528_v5, %v11131_v37  ;;  %v11456_v37 = vor.u32 %v15595_v59, %v11455_v58  ;;  %v15613_v5 = vld [vmem:[%s24905_s1 + $0x664] sm:$0xf]  ;;  %v11441_v58 = vld [vmem:[%s24905_s1 + $0x5b0] sm:$0xf0] }
  0x96   :  { %1528 = vmatpush.bf16.msrb.mxu3 %v11212_v7  ;;  %v11168_v17 = vor.u32 %v15534_v43, %v11165_v9  ;;  %v11537_v7 = vld [vmem:[%s24905_s1 + $0x670] sm:$0xf0]  ;;  %v11439_v43 = vld [vmem:[%s24905_s1 + $0x5a0] sm:$0xf]  ;;  %v15591_v9 = vld [vmem:[%s24905_s1 + $0x5ac] sm:$0xf0] }
  0x97   :  { %1566 = vmatpush.bf16.msrb.mxu2 %v11216_v25  ;;  %v11440_v19 = vor.u32 %v15591_v9, %v11439_v43  ;;  %v15583_v25 = vld [vmem:[%s24905_s1 + $0x56c] sm:$0xf0]  ;;  %v11375_v43 = vld [vmem:[%s24905_s1 + $0x520] sm:$0xf] }
  0x98   :  { %1469 = vmatpush.bf16.msra.mxu0 %v11112_v21  ;;  %1434 = vmatmul.bf16.vlgmr.msra.gmra.mxu1 %v17561_v20  ;;  %v1065_v21 = vld [vmem:[%s24906_s0 + $0x58] sm:$0x3]  ;;  %v15575_v9 = vld [vmem:[%s24905_s1 + $0x52c] sm:$0xf0] }
  0x99   :  { %1502 = vmatpush.bf16.msrb.mxu1 %v11196_v3  ;;  %v11115_v3 = vld [vmem:[%s24905_s1 + $0x388] sm:$0xf]  ;;  %11281 = vmatmul.msk.bf16.vlgmr.msra.gmra.mxu3 %vm481_vm1, %v17569_v8  ;;  %v1093_v42 = vrot.slane %v1065_v21, 2 }
  0x9a   :  { %v11116_v26 = vor.u32 %v15524_v12, %v11115_v3  ;;  %v11101_v3 = vld [vmem:[%s24905_s1 + $0x378] sm:$0xf0]  ;;  %v11519_v12 = vld [vmem:[%s24905_s1 + $0x640] sm:$0xf] }
  0x9c   :  { %1470 = vmatpush.bf16.msra.mxu0 %v11096_v38  ;;  %v554_v27 = vpop.f32.mrf.mxu3  ;;  %v17626_v38 = vld [vmem:[%s24906_s0 + $0x48] sm:$0xff] }
  0x9d   :  { %1503 = vmatpush.bf16.msrb.mxu1 %v11180_v29  ;;  %v1085_v29 = vrot.slane %v1062_v14, 2  ;;  %v518_v32 = vpop.f32.mrf.mxu1  ;;  %v1089_v41 = vrot.slane %v17626_v38, 2  ;;  %v15611_v14 = vld [vmem:[%s24905_s1 + $0x64c] sm:$0xf0] }
  0x9f   :  { %v1087_v51 = vsel %vm24918_vm2, %v1085_v29, %v1086_v33  ;;  %v1090_v53 = vsel %vm24918_vm2, %v1088_v28, %v1089_v41  ;;  %v1094_v54 = vsel %vm24918_vm2, %v1089_v41, %v1093_v42  ;;  %v11503_v28 = vld [vmem:[%s24905_s1 + $0x620] sm:$0xf]  ;;  %v15607_v29 = vld [vmem:[%s24905_s1 + $0x62c] sm:$0xf0]  ;;  %v11521_v41 = vld [vmem:[%s24905_s1 + $0x650] sm:$0xf0] }
  0xa0   :  { %1471 = vmatpush.bf16.msra.mxu0 %v11080_v57  ;;  %v497_v48 = vpop.f32.mrf.mxu0  ;;  %v15522_v57 = vld [vmem:[%s24905_s1 + $0x38c] sm:$0xf]  ;;  %v17668_v1 = vpack.c.bf16 %v1092_v52, %v1087_v51  ;;  %v17670_v4 = vpack.c.bf16 %v1094_v54, %v1090_v53  ;;  %v11524_v45 = vor.u32 %v15609_v36, %v11521_v41  ;;  %v11460_v51 = vor.u32 %v15593_v31, %v11457_v34  ;;  %v15605_v53 = vld [vmem:[%s24905_s1 + $0x624] sm:$0xf]  ;;  %v11505_v54 = vld [vmem:[%s24905_s1 + $0x630] sm:$0xf0] }
  0xa1   :  { %1504 = vmatpush.bf16.msrb.mxu1 %v11164_v40  ;;  %v11083_v40 = vld [vmem:[%s24905_s1 + $0x348] sm:$0xf]  ;;  %v17641_v50 = vadd.f32 %v516_v2, %v497_v48  ;;  %v11120_v2 = vor.u32 %v15522_v57, %v11117_v60  ;;  %v15603_v48 = vld [vmem:[%s24905_s1 + $0x60c] sm:$0xf0]  ;;  %v15589_v57 = vld [vmem:[%s24905_s1 + $0x5a4] sm:$0xf]  ;;  %v11508_v60 = vor.u32 %v15605_v53, %v11505_v54 }
  0xa2   :  { %v11084_v61 = vor.u32 %v15516_v49, %v11083_v40  ;;  %v15567_v36 = vld [vmem:[%s24905_s1 + $0x4ec] sm:$0xf0]  ;;  %v15597_v41 = vld [vmem:[%s24905_s1 + $0x5e4] sm:$0xf] }
  0xa3   :  { %1472 = vmatmul.bf16.vlgmr.msra.gmra.mxu0 %v17561_v20 }
  0xa4   :  { %1540 = vmatpush.bf16.msrb.mxu0 %v11200_v62  ;;  %v11535_v62 = vld [vmem:[%s24905_s1 + $0x660] sm:$0xf]  ;;  %v556_v0 = vpop.f32.mrf.mxu3 }
  0xa5   :  { %1505 = vmatpush.bf16.msrb.mxu1 %v11148_v24  ;;  %11283 = vmatmul.msk.bf16.vlgmr.msra.gmra.mxu2 %vm481_vm1, %v17569_v8  ;;  %v11536_v24 = vor.u32 %v15615_v6, %v11535_v62  ;;  %v521_v63 = vpop.f32.mrf.mxu1  ;;  %v15579_v62 = vld [vmem:[%s24905_s1 + $0x54c] sm:$0xf0]  ;;  %v11471_v6 = vld [vmem:[%s24905_s1 + $0x5e0] sm:$0xf] }
  0xa7   :  { %1984 = vmatpush.bf16.msra.mxu3 %v11536_v24 }
  0xa8   :  { %1541 = vmatpush.bf16.msrb.mxu0 %v11184_v55  ;;  %v15518_v55 = vld [vmem:[%s24905_s1 + $0x36c] sm:$0xf]  ;;  %v535_v11 = vpop.f32.mrf.mxu2  ;;  %v499_v16 = vpop.f32.mrf.mxu0  ;;  %1439 = vmatmul.bf16.gmra.mxu1 %v17668_v1 }
  0xa9   :  { %1506 = vmatpush.bf16.msrb.mxu1 %v11132_v10  ;;  %v11540_v10 = vor.u32 %v15613_v5, %v11537_v7  ;;  %v17696_v15 = vadd.f32 %v554_v27, %v535_v11  ;;  %11282 = vmatmul.msk.bf16.gmra.mxu3 %vm481_vm1, %v17670_v4  ;;  %v17701_v13 = vadd.f32 %v518_v32, %v499_v16  ;;  %v11085_v27 = vld [vmem:[%s24905_s1 + $0x358] sm:$0xf0]  ;;  %v15585_v7 = vld [vmem:[%s24905_s1 + $0x584] sm:$0xf] }
  0xaa   :  { %v11104_v21 = vor.u32 %v15518_v55, %v11101_v3  ;;  %v11504_v32 = vor.u32 %v15607_v29, %v11503_v28  ;;  %v11088_v42 = vor.u32 %v15514_v22, %v11085_v27  ;;  %v11489_v22 = vld [vmem:[%s24905_s1 + $0x610] sm:$0xf0] }
  0xab   :  { %2022 = vmatpush.bf16.msra.mxu2 %v11540_v10 }
  0xac   :  { %1542 = vmatpush.bf16.msrb.mxu0 %v11168_v17  ;;  %v11520_v17 = vor.u32 %v15611_v14, %v11519_v12  ;;  %v559_v30 = vpop.f32.mrf.mxu3  ;;  %v15581_v14 = vld [vmem:[%s24905_s1 + $0x564] sm:$0xf] }
  0xad   :  { %1507 = vmatpush.bf16.msrb.mxu1 %v11116_v26  ;;  %v15587_v26 = vld [vmem:[%s24905_s1 + $0x58c] sm:$0xf0]  ;;  %v523_v33 = vpop.f32.mrf.mxu1 }
  0xae   :  { %1985 = vmatpush.bf16.msra.mxu3 %v11520_v17  ;;  %v11424_v35 = vor.u32 %v15587_v26, %v11423_v23  ;;  %v11409_v17 = vld [vmem:[%s24905_s1 + $0x570] sm:$0xf0]  ;;  %v11359_v23 = vld [vmem:[%s24905_s1 + $0x500] sm:$0xf]  ;;  %v15571_v26 = vld [vmem:[%s24905_s1 + $0x50c] sm:$0xf0] }
  0xaf   :  { %2023 = vmatpush.bf16.msra.mxu2 %v11524_v45  ;;  %v11412_v29 = vor.u32 %v15581_v14, %v11409_v17  ;;  %v11360_v34 = vor.u32 %v15571_v26, %v11359_v23  ;;  %v11463_v45 = vld [vmem:[%s24905_s1 + $0x5c8] sm:$0xf]  ;;  %v1594_v23 = vld [vmem:[%s24906_s0] sm:$0xf8]  ;;  %v1596_v26 = vld [vmem:[%s24906_s0 + $0x20] sm:$0x7] }
  0xb0   :  { %1543 = vmatpush.bf16.msrb.mxu0 %v11152_v44  ;;  %v11407_v44 = vld [vmem:[%s24905_s1 + $0x560] sm:$0xf]  ;;  %v537_v46 = vpop.f32.mrf.mxu2  ;;  %v502_v49 = vpop.f32.mrf.mxu0  ;;  %v1597_v17 = vld [vmem:[%s24906_s0 + $0x28] sm:$0x7] }
  0xb1   :  { %1508 = vmatpush.bf16.msrb.mxu1 %v11100_v47  ;;  %v11487_v47 = vld [vmem:[%s24905_s1 + $0x600] sm:$0xf]  ;;  %v17745_v40 = vadd.f32 %v556_v0, %v537_v46  ;;  %v11408_v59 = vor.u32 %v15583_v25, %v11407_v44  ;;  %v15599_v0 = vld [vmem:[%s24905_s1 + $0x5ec] sm:$0xf0]  ;;  %v15596_v46 = vld [vmem:[%s24905_s1 + $0x5d4] sm:$0xf0] }
  0xb2   :  { %1986 = vmatpush.bf16.msra.mxu3 %v11504_v32  ;;  %v11488_v52 = vor.u32 %v15603_v48, %v11487_v47  ;;  %v15577_v32 = vld [vmem:[%s24905_s1 + $0x544] sm:$0xf]  ;;  %v11464_v54 = vor.u32 %v15596_v46, %v11463_v45 }
  0xb3   :  { %1477 = vmatmul.bf16.gmra.mxu0 %v17668_v1  ;;  %2024 = vmatpush.bf16.msra.mxu2 %v11508_v60  ;;  %v15616_v60 = vld [vmem:[%s24905_s1 + $0x674] sm:$0xf0] }
  0xb4   :  { %1544 = vmatpush.bf16.msrb.mxu0 %v11136_v56  ;;  %v17753_v56 = vadd.f32 %v521_v63, %v502_v49  ;;  %v561_v24 = vpop.f32.mrf.mxu3  ;;  %v11444_v63 = vor.u32 %v15589_v57, %v11441_v58  ;;  %v11447_v57 = vld [vmem:[%s24905_s1 + $0x5a8] sm:$0xf]  ;;  %v15592_v58 = vld [vmem:[%s24905_s1 + $0x5b4] sm:$0xf0] }
  0xb5   :  { %1509 = vmatpush.bf16.msrb.mxu1 %v11084_v61  ;;  %v11391_v61 = vld [vmem:[%s24905_s1 + $0x540] sm:$0xf]  ;;  %11284 = vmatmul.msk.bf16.gmra.mxu2 %vm481_vm1, %v17670_v4  ;;  %v573_v5 = vpop.f32.mrf.mxu1 }
  0xb6   :  { %1987 = vmatpush.bf16.msra.mxu3 %v11488_v52  ;;  %v11392_v55 = vor.u32 %v15579_v62, %v11391_v61  ;;  %v11377_v52 = vld [vmem:[%s24905_s1 + $0x530] sm:$0xf0] }
  0xb8   :  { %1545 = vmatpush.bf16.msrb.mxu0 %v11120_v2  ;;  %v11425_v2 = vld [vmem:[%s24905_s1 + $0x590] sm:$0xf0]  ;;  %v540_v10 = vpop.f32.mrf.mxu2  ;;  %v504_v3 = vpop.f32.mrf.mxu0  ;;  %1510 = vmatmul.bf16.vlgmr.msrb.gmra.mxu1 %v17561_v20 }
  0xb9   :  { %1962 = vmatpush.bf16.msra.mxu1 %v11456_v37  ;;  %v11472_v37 = vor.u32 %v15599_v0, %v11471_v6  ;;  %v17788_v11 = vadd.f32 %v559_v30, %v540_v10  ;;  %v11428_v12 = vor.u32 %v15585_v7, %v11425_v2  ;;  %11285 = vmatmul.msk.bf16.vlgmr.msrb.gmra.mxu3 %vm481_vm1, %v17569_v8  ;;  %v15569_v6 = vld [vmem:[%s24905_s1 + $0x504] sm:$0xf]  ;;  %v11527_v10 = vld [vmem:[%s24905_s1 + $0x648] sm:$0xf] }
  0xba   :  { %v17796_v16 = vadd.f32 %v523_v33, %v504_v3  ;;  %v11393_v33 = vld [vmem:[%s24905_s1 + $0x550] sm:$0xf0]  ;;  %v11448_v7 = vor.u32 %v15592_v58, %v11447_v57  ;;  %v15612_v3 = vld [vmem:[%s24905_s1 + $0x654] sm:$0xf0]  ;;  %v15590_v57 = vld [vmem:[%s24905_s1 + $0x5ac] sm:$0xf] }
  0xbb   :  { %1988 = vmatpush.bf16.msra.mxu3 %v11472_v37  ;;  %v11396_v49 = vor.u32 %v15577_v32, %v11393_v33  ;;  %v15614_v37 = vld [vmem:[%s24905_s1 + $0x66c] sm:$0xf]  ;;  %v11415_v33 = vld [vmem:[%s24905_s1 + $0x568] sm:$0xf]  ;;  %v11449_v58 = vld [vmem:[%s24905_s1 + $0x5b8] sm:$0xf0] }
  0xbc   :  { %1546 = vmatpush.bf16.msrb.mxu0 %v11104_v21  ;;  %v15601_v21 = vld [vmem:[%s24905_s1 + $0x604] sm:$0xf]  ;;  %v592_v28 = vpop.f32.mrf.mxu3 }
  0xbd   :  { %1963 = vmatpush.bf16.msra.mxu1 %v11440_v19  ;;  %v11376_v19 = vor.u32 %v15575_v9, %v11375_v43  ;;  %v11492_v27 = vor.u32 %v15601_v21, %v11489_v22  ;;  %v17813_v30 = vadd.f32 %v592_v28, %v573_v5  ;;  %v575_v31 = vpop.f32.mrf.mxu1  ;;  %v11545_v5 = vld [vmem:[%s24905_s1 + $0x678] sm:$0xf0]  ;;  %v15588_v9 = vld [vmem:[%s24905_s1 + $0x594] sm:$0xf0]  ;;  %v1615_v21 = vrot.slane %v17475_v18, 3 }
  0xbe   :  { %v11548_v2 = vor.u32 %v15614_v37, %v11545_v5  ;;  %v11345_v18 = vld [vmem:[%s24905_s1 + $0x4f0] sm:$0xf0]  ;;  %v11528_v28 = vor.u32 %v15612_v3, %v11527_v10  ;;  %v15586_v10 = vld [vmem:[%s24905_s1 + $0x58c] sm:$0xf]  ;;  %v11433_v3 = vld [vmem:[%s24905_s1 + $0x598] sm:$0xf0] }
  0xbf   :  { %2025 = vmatpush.bf16.msra.mxu2 %v11492_v27  ;;  %v15565_v27 = vld [vmem:[%s24905_s1 + $0x4e4] sm:$0xf] }
  0xc0   :  { %1547 = vmatpush.bf16.msrb.mxu0 %v11088_v42  ;;  %v11473_v42 = vld [vmem:[%s24905_s1 + $0x5f0] sm:$0xf0]  ;;  %v542_v44 = vpop.f32.mrf.mxu2  ;;  %v611_v48 = vpop.f32.mrf.mxu0 }
  0xc1   :  { %1964 = vmatpush.bf16.msra.mxu1 %v11424_v35  ;;  %v11343_v35 = vld [vmem:[%s24905_s1 + $0x4e0] sm:$0xf]  ;;  %v11476_v25 = vor.u32 %v15597_v41, %v11473_v42  ;;  %v17839_v47 = vadd.f32 %v561_v24, %v542_v44  ;;  %v1619_v42 = vrot.slane %v1597_v17, 3  ;;  %v1611_v44 = vrot.slane %v1594_v23, 3  ;;  %v15600_v23 = vld [vmem:[%s24905_s1 + $0x5f4] sm:$0xf0] }
  0xc2   :  { %v11344_v53 = vor.u32 %v15567_v36, %v11343_v35  ;;  %v11511_v35 = vld [vmem:[%s24905_s1 + $0x628] sm:$0xf]  ;;  %v15608_v36 = vld [vmem:[%s24905_s1 + $0x634] sm:$0xf0] }
  0xc3   :  { %2026 = vmatpush.bf16.msra.mxu2 %v11476_v25  ;;  %1548 = vmatmul.bf16.vlgmr.msrb.gmra.mxu0 %v17561_v20  ;;  %v17865_v20 = vld [vmem:[%s24906_s0 + $0x8] sm:$0xf8]  ;;  %v11348_v25 = vor.u32 %v15565_v27, %v11345_v18  ;;  %v11512_v45 = vor.u32 %v15608_v36, %v11511_v35 }
  0xc4   :  { %2000 = vmatpush.bf16.msra.mxu0 %v11460_v51  ;;  %v15573_v51 = vld [vmem:[%s24905_s1 + $0x524] sm:$0xf]  ;;  %v594_v61 = vpop.f32.mrf.mxu3  ;;  %v11367_v36 = vld [vmem:[%s24905_s1 + $0x508] sm:$0xf] }
  0xc5   :  { %1965 = vmatpush.bf16.msra.mxu1 %v11408_v59  ;;  %v11543_v59 = vld [vmem:[%s24905_s1 + $0x668] sm:$0xf]  ;;  %11287 = vmatmul.msk.bf16.vlgmr.msrb.gmra.mxu2 %vm481_vm1, %v17569_v8  ;;  %v11380_v62 = vor.u32 %v15573_v51, %v11377_v52  ;;  %v17870_v24 = vadd.f32 %v594_v61, %v575_v31  ;;  %v11361_v8 = vld [vmem:[%s24905_s1 + $0x510] sm:$0xf0]  ;;  %v11465_v31 = vld [vmem:[%s24905_s1 + $0x5d8] sm:$0xf0] }
  0xc6   :  { %v11544_v0 = vor.u32 %v15616_v60, %v11543_v59  ;;  %v11364_v22 = vor.u32 %v15569_v6, %v11361_v8  ;;  %v1617_v51 = vrot.slane %v1596_v26, 3  ;;  %v11399_v60 = vld [vmem:[%s24905_s1 + $0x548] sm:$0xf]  ;;  %v15604_v6 = vld [vmem:[%s24905_s1 + $0x614] sm:$0xf0] }
  0xc7   :  { %2098 = vmatpush.bf16.msrb.mxu2 %v11548_v2  ;;  %v15606_v2 = vld [vmem:[%s24905_s1 + $0x62c] sm:$0xf] }
  0xc8   :  { %2001 = vmatpush.bf16.msra.mxu0 %v11444_v63  ;;  %v578_v63 = vpop.f32.mrf.mxu1  ;;  %2060 = vmatpush.bf16.msrb.mxu3 %v11544_v0  ;;  %v630_v43 = vpop.f32.mrf.mxu2 }
  0xc9   :  { %1966 = vmatpush.bf16.msra.mxu1 %v11392_v55  ;;  %v11431_v55 = vld [vmem:[%s24905_s1 + $0x588] sm:$0xf]  ;;  %v613_v14 = vpop.f32.mrf.mxu0  ;;  %11286 = vmatmul.msk.bf16.gmra.mxu3 %vm481_vm1, %v17670_v4 }
  0xca   :  { %1515 = vmatmul.bf16.gmra.mxu1 %v17668_v1  ;;  %v11432_v32 = vor.u32 %v15588_v9, %v11431_v55  ;;  %v11513_v55 = vld [vmem:[%s24905_s1 + $0x638] sm:$0xf0]  ;;  %v1620_v9 = vsel %vm1610_vm3, %v1615_v21, %v1619_v42 }
  0xcb   :  { %v11516_v17 = vor.u32 %v15606_v2, %v11513_v55  ;;  %v15574_v2 = vld [vmem:[%s24905_s1 + $0x52c] sm:$0xf]  ;;  %v11723_v55 = vld [vmem:[%s24905_s1 + $0x760] sm:$0xf] }
  0xcc   :  { %2002 = vmatpush.bf16.msra.mxu0 %v11428_v12  ;;  %v17893_v12 = vadd.f32 %v630_v43, %v611_v48  ;;  %2061 = vmatpush.bf16.msrb.mxu3 %v11528_v28  ;;  %v597_v41 = vpop.f32.mrf.mxu3 }
  0xcd   :  { %1967 = vmatpush.bf16.msra.mxu1 %v11376_v19  ;;  %v1614_v19 = vrot.slane %v17865_v20, 3  ;;  %v17933_v46 = vadd.f32 %v597_v41, %v578_v63  ;;  %v15580_v20 = vld [vmem:[%s24905_s1 + $0x554] sm:$0xf0] }
  0xcf   :  { %v1616_v43 = vsel %vm1610_vm3, %v1614_v19, %v1615_v21  ;;  %v15576_v19 = vld [vmem:[%s24905_s1 + $0x534] sm:$0xf0]  ;;  %v11479_v21 = vld [vmem:[%s24905_s1 + $0x5e8] sm:$0xf] }
  0xd0   :  { %2003 = vmatpush.bf16.msra.mxu0 %v11412_v29  ;;  %v15594_v29 = vld [vmem:[%s24905_s1 + $0x5cc] sm:$0xf]  ;;  %v580_v48 = vpop.f32.mrf.mxu1  ;;  %v632_v61 = vpop.f32.mrf.mxu2  ;;  %2062 = vmatpush.bf16.msrb.mxu3 %v11512_v45  ;;  %v1598_v45 = vld [vmem:[%s24906_s0 + $0x30] sm:$0xf8] }
  0xd1   :  { %1968 = vmatpush.bf16.msra.mxu1 %v11360_v34  ;;  %v15584_v34 = vld [vmem:[%s24905_s1 + $0x574] sm:$0xf0]  ;;  %v11468_v52 = vor.u32 %v15594_v29, %v11465_v31  ;;  %v17960_v0 = vadd.f32 %v632_v61, %v613_v14  ;;  %v616_v63 = vpop.f32.mrf.mxu0  ;;  %v11400_v14 = vor.u32 %v15580_v20, %v11399_v60  ;;  %v17997_v29 = vpack.c.bf16 %v1620_v9, %v1616_v43  ;;  %v11351_v60 = vld [vmem:[%s24905_s1 + $0x4e8] sm:$0xf]  ;;  %v15647_v43 = vld [vmem:[%s24905_s1 + $0x76c] sm:$0xf0] }
  0xd2   :  { %v11436_v31 = vor.u32 %v15586_v10, %v11433_v3  ;;  %v15568_v61 = vld [vmem:[%s24905_s1 + $0x4f4] sm:$0xf0]  ;;  %v11385_v10 = vld [vmem:[%s24905_s1 + $0x538] sm:$0xf0] }
  0xd3   :  { %1553 = vmatmul.bf16.gmra.mxu0 %v17668_v1  ;;  %v11480_v1 = vor.u32 %v15600_v23, %v11479_v21  ;;  %v11352_v3 = vor.u32 %v15568_v61, %v11351_v60  ;;  %v11724_v21 = vor.u32 %v15647_v43, %v11723_v55  ;;  %v15645_v61 = vld [vmem:[%s24905_s1 + $0x764] sm:$0xf] }
  0xd4   :  { %2004 = vmatpush.bf16.msra.mxu0 %v11396_v49  ;;  %v1612_v49 = vrot.slane %v17509_v39, 3  ;;  %v11416_v39 = vor.u32 %v15584_v34, %v11415_v33  ;;  %v599_v26 = vpop.f32.mrf.mxu3  ;;  %v15582_v33 = vld [vmem:[%s24905_s1 + $0x56c] sm:$0xf] }
  0xd5   :  { %1969 = vmatpush.bf16.msra.mxu1 %v11344_v53  ;;  %v15610_v53 = vld [vmem:[%s24905_s1 + $0x64c] sm:$0xf]  ;;  %11288 = vmatmul.msk.bf16.gmra.mxu2 %vm481_vm1, %v17670_v4  ;;  %v17995_v18 = vadd.f32 %v599_v26, %v580_v48  ;;  %v11417_v4 = vld [vmem:[%s24905_s1 + $0x578] sm:$0xf0]  ;;  %v1600_v48 = vld [vmem:[%s24906_s0 + $0x50] sm:$0x7] }
  0xd6   :  { %v1613_v37 = vsel %vm1610_vm3, %v1611_v44, %v1612_v49  ;;  %v1618_v5 = vsel %vm1610_vm3, %v1612_v49, %v1617_v51  ;;  %v1599_v44 = vld [vmem:[%s24906_s0 + $0x38] sm:$0xf8]  ;;  %v11420_v49 = vor.u32 %v15582_v33, %v11417_v4  ;;  %v15602_v51 = vld [vmem:[%s24905_s1 + $0x60c] sm:$0xf]  ;;  %v15643_v33 = vld [vmem:[%s24905_s1 + $0x74c] sm:$0xf0] }
  0xd7   :  { %v17993_v27 = vpack.c.bf16 %v1618_v5, %v1613_v37  ;;  %v1627_v37 = vrot.slane %v1600_v48, 3 }
  0xd8   :  { %2005 = vmatpush.bf16.msra.mxu0 %v11380_v62  ;;  %v11495_v62 = vld [vmem:[%s24905_s1 + $0x608] sm:$0xf]  ;;  %v915_v28 = vpop.f32.mrf.mxu1  ;;  %v635_v35 = vpop.f32.mrf.mxu2 }
  0xd9   :  { %2038 = vmatpush.bf16.msrb.mxu1 %v11464_v54  ;;  %v11529_v54 = vld [vmem:[%s24905_s1 + $0x658] sm:$0xf0]  ;;  %v11496_v8 = vor.u32 %v15604_v6, %v11495_v62  ;;  %v18012_v41 = vadd.f32 %v635_v35, %v616_v63  ;;  %v618_v42 = vpop.f32.mrf.mxu0  ;;  %11549 = vmatmul.msk.bf16.vlgmr.msra.gmra.mxu3 %vm481_vm1, %v17997_v29  ;;  %v1621_v6 = vrot.slane %v1598_v45, 3  ;;  %v18051_v63 = vld [vmem:[%s24906_s0 + $0x40] sm:$0xff]  ;;  %v15566_v45 = vld [vmem:[%s24905_s1 + $0x4ec] sm:$0xf] }
  0xda   :  { %v11532_v59 = vor.u32 %v15610_v53, %v11529_v54  ;;  %1970 = vmatmul.bf16.vlgmr.msra.gmra.mxu1 %v17993_v27  ;;  %v15578_v53 = vld [vmem:[%s24905_s1 + $0x54c] sm:$0xf]  ;;  %v11401_v54 = vld [vmem:[%s24905_s1 + $0x558] sm:$0xf0] }
  0xdb   :  { %2063 = vmatpush.bf16.msrb.mxu3 %v11496_v8  ;;  %v1622_v8 = vrot.slane %v18051_v63, 3  ;;  %v11369_v35 = vld [vmem:[%s24905_s1 + $0x518] sm:$0xf0] }
  0xdc   :  { %2006 = vmatpush.bf16.msra.mxu0 %v11364_v22  ;;  %2099 = vmatpush.bf16.msrb.mxu2 %v11532_v59  ;;  %v11383_v22 = vld [vmem:[%s24905_s1 + $0x528] sm:$0xf]  ;;  %v1625_v59 = vrot.slane %v17626_v38, 3  ;;  %v934_v20 = vpop.f32.mrf.mxu3 }
  0xdd   :  { %2039 = vmatpush.bf16.msrb.mxu1 %v11448_v7  ;;  %v11452_v7 = vor.u32 %v15590_v57, %v11449_v58  ;;  %v11384_v34 = vor.u32 %v15576_v19, %v11383_v22  ;;  %v1623_v26 = vsel %vm1610_vm3, %v1621_v6, %v1622_v8 }
  0xdf   :  { %2064 = vmatpush.bf16.msrb.mxu3 %v11480_v1 }
  0xe0   :  { %2007 = vmatpush.bf16.msra.mxu0 %v11348_v25  ;;  %2100 = vmatpush.bf16.msrb.mxu2 %v11516_v17  ;;  %v1601_v25 = vld [vmem:[%s24906_s0 + $0x58] sm:$0x7]  ;;  %v917_v5 = vpop.f32.mrf.mxu1  ;;  %v11481_v17 = vld [vmem:[%s24905_s1 + $0x5f8] sm:$0xf0]  ;;  %v637_v22 = vpop.f32.mrf.mxu2 }
  0xe1   :  { %2040 = vmatpush.bf16.msrb.mxu1 %v11432_v32  ;;  %v916_v32 = vadd.f32 %v915_v28, %v17641_v50  ;;  %v15572_v50 = vld [vmem:[%s24905_s1 + $0x514] sm:$0xf0]  ;;  %v1629_v62 = vrot.slane %v1601_v25, 3  ;;  %v918_v9 = vadd.f32 %v917_v5, %v17701_v13  ;;  %v18075_v23 = vadd.f32 %v637_v22, %v618_v42  ;;  %v953_v13 = vpop.f32.mrf.mxu0  ;;  %v15667_v42 = vld [vmem:[%s24905_s1 + $0x80c] sm:$0xf0] }
  0xe2   :  { %v11368_v57 = vor.u32 %v15572_v50, %v11367_v36  ;;  %v954_v1 = vadd.f32 %v953_v13, %v17696_v15  ;;  %v1628_v28 = vsel %vm1610_vm3, %v1622_v8, %v1627_v37  ;;  %v15570_v15 = vld [vmem:[%s24905_s1 + $0x50c] sm:$0xf]  ;;  %v11803_v50 = vld [vmem:[%s24905_s1 + $0x800] sm:$0xf]  ;;  %v15663_v37 = vld [vmem:[%s24905_s1 + $0x7ec] sm:$0xf0] }
  0xe3   :  { %v18054_v38 = vadd.f32 %v934_v20, %v916_v32  ;;  %v11707_v32 = vld [vmem:[%s24905_s1 + $0x740] sm:$0xf]  ;;  %2008 = vmatmul.bf16.vlgmr.msra.gmra.mxu0 %v17993_v27  ;;  %v18103_v25 = vpack.c.bf16 %v1628_v28, %v1623_v26  ;;  %v11804_v48 = vor.u32 %v15667_v42, %v11803_v50  ;;  %v15639_v20 = vld [vmem:[%s24905_s1 + $0x72c] sm:$0xf0]  ;;  %v15661_v28 = vld [vmem:[%s24905_s1 + $0x7e4] sm:$0xf] }
  0xe4   :  { %2076 = vmatpush.bf16.msrb.mxu0 %v11468_v52  ;;  %v11497_v52 = vld [vmem:[%s24905_s1 + $0x618] sm:$0xf0]  ;;  %v11708_v36 = vor.u32 %v15643_v33, %v11707_v32  ;;  %v11787_v8 = vld [vmem:[%s24905_s1 + $0x7e0] sm:$0xf]  ;;  %v11693_v50 = vld [vmem:[%s24905_s1 + $0x730] sm:$0xf0] }
  0xe5   :  { %2041 = vmatpush.bf16.msrb.mxu1 %v11416_v39  ;;  %v11500_v58 = vor.u32 %v15602_v51, %v11497_v52  ;;  %v1624_v39 = vrot.slane %v1599_v44, 3  ;;  %v936_v44 = vpop.f32.mrf.mxu3  ;;  %11551 = vmatmul.msk.bf16.vlgmr.msra.gmra.mxu2 %vm481_vm1, %v17997_v29  ;;  %v11771_v22 = vld [vmem:[%s24905_s1 + $0x7c0] sm:$0xf] }
  0xe6   :  { %2520 = vmatpush.bf16.msra.mxu3 %v11804_v48  ;;  %v11659_v32 = vld [vmem:[%s24905_s1 + $0x6e0] sm:$0xf] }
  0xe7   :  { %2101 = vmatpush.bf16.msrb.mxu2 %v11500_v58  ;;  %v1626_v4 = vsel %vm1610_vm3, %v1624_v39, %v1625_v59  ;;  %v11691_v58 = vld [vmem:[%s24905_s1 + $0x720] sm:$0xf] }
  0xe8   :  { %2077 = vmatpush.bf16.msrb.mxu0 %v11452_v7  ;;  %v11404_v7 = vor.u32 %v15578_v53, %v11401_v54  ;;  %v920_v51 = vpop.f32.mrf.mxu1  ;;  %v11372_v53 = vor.u32 %v15570_v15, %v11369_v35  ;;  %v15665_v54 = vld [vmem:[%s24905_s1 + $0x804] sm:$0xf]  ;;  %v11692_v6 = vor.u32 %v15639_v20, %v11691_v58  ;;  %v15631_v35 = vld [vmem:[%s24905_s1 + $0x6ec] sm:$0xf0]  ;;  %v11643_v58 = vld [vmem:[%s24905_s1 + $0x6c0] sm:$0xf] }
  0xe9   :  { %2042 = vmatpush.bf16.msrb.mxu1 %v11400_v14  ;;  %v15598_v14 = vld [vmem:[%s24905_s1 + $0x5ec] sm:$0xf]  ;;  %v921_v39 = vadd.f32 %v920_v51, %v17753_v56  ;;  %v11725_v56 = vld [vmem:[%s24905_s1 + $0x770] sm:$0xf0]  ;;  %v15637_v15 = vld [vmem:[%s24905_s1 + $0x724] sm:$0xf]  ;;  %v11660_v42 = vor.u32 %v15631_v35, %v11659_v32 }
  0xea   :  { %v11484_v19 = vor.u32 %v15598_v14, %v11481_v17  ;;  %1975 = vmatmul.bf16.gmra.mxu1 %v18103_v25  ;;  %v15641_v14 = vld [vmem:[%s24905_s1 + $0x744] sm:$0xf]  ;;  %v11645_v32 = vld [vmem:[%s24905_s1 + $0x6d0] sm:$0xf0]  ;;  %v11731_v35 = vld [vmem:[%s24905_s1 + $0x768] sm:$0xf] }
  0xec   :  { %2078 = vmatpush.bf16.msrb.mxu0 %v11436_v31  ;;  %v11388_v31 = vor.u32 %v15574_v2, %v11385_v10  ;;  %2102 = vmatpush.bf16.msrb.mxu2 %v11484_v19  ;;  %v11788_v2 = vor.u32 %v15663_v37, %v11787_v8  ;;  %v15635_v10 = vld [vmem:[%s24905_s1 + $0x70c] sm:$0xf0] }
  0xed   :  { %2043 = vmatpush.bf16.msrb.mxu1 %v11384_v34  ;;  %v1630_v34 = vsel %vm1610_vm3, %v1625_v59, %v1629_v62  ;;  %v11353_v59 = vld [vmem:[%s24905_s1 + $0x4f8] sm:$0xf0]  ;;  %v972_v62 = vpop.f32.mrf.mxu2  ;;  %v15659_v19 = vld [vmem:[%s24905_s1 + $0x7cc] sm:$0xf0] }
  0xee   :  { %v18110_v52 = vpack.c.bf16 %v1630_v34, %v1626_v4  ;;  %v18140_v5 = vadd.f32 %v972_v62, %v954_v1  ;;  %v11356_v43 = vor.u32 %v15566_v45, %v11353_v59  ;;  %2521 = vmatpush.bf16.msra.mxu3 %v11788_v2  ;;  %v11772_v13 = vor.u32 %v15659_v19, %v11771_v22  ;;  %v15633_v59 = vld [vmem:[%s24905_s1 + $0x704] sm:$0xf]  ;;  %v11739_v62 = vld [vmem:[%s24905_s1 + $0x780] sm:$0xf] }
  0xef   :  { %v11627_v2 = vld [vmem:[%s24905_s1 + $0x6a0] sm:$0xf]  ;;  %v15653_v19 = vld [vmem:[%s24905_s1 + $0x7a4] sm:$0xf] }
  0xf0   :  { %2079 = vmatpush.bf16.msrb.mxu0 %v11420_v49  ;;  %v18108_v49 = vadd.f32 %v936_v44, %v918_v9  ;;  %11550 = vmatmul.msk.bf16.gmra.mxu3 %vm481_vm1, %v18110_v52  ;;  %v11675_v9 = vld [vmem:[%s24905_s1 + $0x700] sm:$0xf]  ;;  %v922_v1 = vpop.f32.mrf.mxu1  ;;  %v15655_v44 = vld [vmem:[%s24905_s1 + $0x7ac] sm:$0xf0] }
  0xf1   :  { %2044 = vmatpush.bf16.msrb.mxu1 %v11368_v57  ;;  %v11805_v57 = vld [vmem:[%s24905_s1 + $0x810] sm:$0xf0]  ;;  %v11676_v17 = vor.u32 %v15635_v10, %v11675_v9  ;;  %v923_v33 = vadd.f32 %v922_v1, %v17796_v16  ;;  %v11755_v16 = vld [vmem:[%s24905_s1 + $0x7a0] sm:$0xf] }
  0xf2   :  { %v11808_v60 = vor.u32 %v15665_v54, %v11805_v57  ;;  %2522 = vmatpush.bf16.msra.mxu3 %v11772_v13  ;;  %v11756_v51 = vor.u32 %v15655_v44, %v11755_v16  ;;  %v15657_v54 = vld [vmem:[%s24905_s1 + $0x7c4] sm:$0xf]  ;;  %v11773_v57 = vld [vmem:[%s24905_s1 + $0x7d0] sm:$0xf0]  ;;  %v11611_v13 = vld [vmem:[%s24905_s1 + $0x680] sm:$0xf] }
  0xf3   :  { %2013 = vmatmul.bf16.gmra.mxu0 %v18103_v25  ;;  %v15621_v16 = vld [vmem:[%s24905_s1 + $0x6a4] sm:$0xf] }
  0xf4   :  { %2080 = vmatpush.bf16.msrb.mxu0 %v11404_v7  ;;  %v955_v7 = vpop.f32.mrf.mxu0  ;;  %2558 = vmatpush.bf16.msra.mxu2 %v11808_v60  ;;  %v15627_v60 = vld [vmem:[%s24905_s1 + $0x6cc] sm:$0xf0] }
  0xf5   :  { %2045 = vmatpush.bf16.msrb.mxu1 %v11352_v3  ;;  %v956_v55 = vadd.f32 %v955_v7, %v17745_v40  ;;  %v11728_v3 = vor.u32 %v15645_v61, %v11725_v56  ;;  %v11709_v40 = vld [vmem:[%s24905_s1 + $0x750] sm:$0xf0]  ;;  %v11644_v20 = vor.u32 %v15627_v60, %v11643_v58  ;;  %v15651_v56 = vld [vmem:[%s24905_s1 + $0x78c] sm:$0xf0]  ;;  %11552 = vmatmul.msk.bf16.gmra.mxu2 %vm481_vm1, %v18110_v52 }
  0xf6   :  { %v11712_v4 = vor.u32 %v15641_v14, %v11709_v40  ;;  %2523 = vmatpush.bf16.msra.mxu3 %v11756_v51  ;;  %v11677_v61 = vld [vmem:[%s24905_s1 + $0x710] sm:$0xf0]  ;;  %v11740_v8 = vor.u32 %v15651_v56, %v11739_v62  ;;  %v11811_v62 = vld [vmem:[%s24905_s1 + $0x808] sm:$0xf]  ;;  %v15668_v56 = vld [vmem:[%s24905_s1 + $0x814] sm:$0xf0] }
  0xf7   :  { %v11680_v9 = vor.u32 %v15633_v59, %v11677_v61  ;;  %v11661_v14 = vld [vmem:[%s24905_s1 + $0x6f0] sm:$0xf0]  ;;  %v11715_v59 = vld [vmem:[%s24905_s1 + $0x748] sm:$0xf]  ;;  %v15617_v61 = vld [vmem:[%s24905_s1 + $0x684] sm:$0xf] }
  0xf8   :  { %2081 = vmatpush.bf16.msrb.mxu0 %v11388_v31  ;;  %v11789_v31 = vld [vmem:[%s24905_s1 + $0x7f0] sm:$0xf0]  ;;  %v991_v7 = vpop.f32.mrf.mxu1 }
  0xf9   :  { %2498 = vmatpush.bf16.msra.mxu1 %v11724_v21  ;;  %v939_v21 = vpop.f32.mrf.mxu3  ;;  %v11792_v34 = vor.u32 %v15661_v28, %v11789_v31  ;;  %v15619_v31 = vld [vmem:[%s24905_s1 + $0x68c] sm:$0xf0]  ;;  %v11629_v51 = vld [vmem:[%s24905_s1 + $0x6b0] sm:$0xf0] }
  0xfa   :  { %v18164_v26 = vadd.f32 %v939_v21, %v921_v39  ;;  %v11696_v39 = vor.u32 %v15637_v15, %v11693_v50  ;;  %2524 = vmatpush.bf16.msra.mxu3 %v11740_v8  ;;  %2046 = vmatmul.bf16.vlgmr.msrb.gmra.mxu1 %v17993_v27  ;;  %v11757_v21 = vld [vmem:[%s24905_s1 + $0x7b0] sm:$0xf0]  ;;  %v11632_v60 = vor.u32 %v15621_v16, %v11629_v51 }
  0xfb   :  { %2559 = vmatpush.bf16.msra.mxu2 %v11792_v34  ;;  %v11760_v28 = vor.u32 %v15653_v19, %v11757_v21  ;;  %v11812_v8 = vor.u32 %v15668_v56, %v11811_v62  ;;  %v11795_v21 = vld [vmem:[%s24905_s1 + $0x7e8] sm:$0xf]  ;;  %v16451_v56 = vld [vmem:[%s24906_s0 + $0x18] sm:$0xff] }
  0xfc   :  { %2082 = vmatpush.bf16.msrb.mxu0 %v11372_v53  ;;  %v958_v48 = vpop.f32.mrf.mxu0 }
  0xfd   :  { %2499 = vmatpush.bf16.msra.mxu1 %v11708_v36  ;;  %v974_v36 = vpop.f32.mrf.mxu2  ;;  %v959_v53 = vadd.f32 %v958_v48, %v17788_v11  ;;  %v11776_v11 = vor.u32 %v15657_v54, %v11773_v57 }
  0xfe   :  { %v18191_v45 = vadd.f32 %v974_v36, %v956_v55  ;;  %v15623_v55 = vld [vmem:[%s24905_s1 + $0x6ac] sm:$0xf0]  ;;  %v15648_v36 = vld [vmem:[%s24905_s1 + $0x774] sm:$0xf0] }
  0xff   :  { %2560 = vmatpush.bf16.msra.mxu2 %v11776_v11  ;;  %v11628_v40 = vor.u32 %v15623_v55, %v11627_v2  ;;  %v11732_v44 = vor.u32 %v15648_v36, %v11731_v35  ;;  %v15644_v11 = vld [vmem:[%s24905_s1 + $0x754] sm:$0xf0]  ;;  %v11683_v35 = vld [vmem:[%s24905_s1 + $0x708] sm:$0xf] }
 0x100   :  { %2083 = vmatpush.bf16.msrb.mxu0 %v11356_v43  ;;  %v992_v43 = vadd.f32 %v991_v7, %v17813_v30  ;;  %11553 = vmatmul.msk.bf16.vlgmr.msrb.gmra.mxu3 %vm481_vm1, %v17997_v29  ;;  %v993_v15 = vpop.f32.mrf.mxu1  ;;  %v11733_v7 = vld [vmem:[%s24905_s1 + $0x778] sm:$0xf0]  ;;  %v15636_v36 = vld [vmem:[%s24905_s1 + $0x714] sm:$0xf0] }
 0x101   :  { %2500 = vmatpush.bf16.msra.mxu1 %v11692_v6  ;;  %v941_v6 = vpop.f32.mrf.mxu3  ;;  %v994_v50 = vadd.f32 %v993_v15, %v17870_v24  ;;  %v11741_v24 = vld [vmem:[%s24905_s1 + $0x790] sm:$0xf0]  ;;  %2596 = vmatpush.bf16.msrb.mxu3 %v11812_v8 }
 0x102   :  { %v18221_v37 = vadd.f32 %v941_v6, %v923_v33  ;;  %v11612_v33 = vor.u32 %v15619_v31, %v11611_v13  ;;  %v15664_v31 = vld [vmem:[%s24905_s1 + $0x7f4] sm:$0xf0] }
 0x103   :  { %2561 = vmatpush.bf16.msra.mxu2 %v11760_v28  ;;  %2084 = vmatmul.bf16.vlgmr.msrb.gmra.mxu0 %v17993_v27  ;;  %v15646_v27 = vld [vmem:[%s24905_s1 + $0x76c] sm:$0xf]  ;;  %v11796_v15 = vor.u32 %v15664_v31, %v11795_v21  ;;  %v11685_v21 = vld [vmem:[%s24905_s1 + $0x718] sm:$0xf0] }
 0x104   :  { %2536 = vmatpush.bf16.msra.mxu0 %v11728_v3  ;;  %v15629_v3 = vld [vmem:[%s24905_s1 + $0x6e4] sm:$0xf]  ;;  %v960_v22 = vpop.f32.mrf.mxu0  ;;  %v11736_v19 = vor.u32 %v15646_v27, %v11733_v7 }
 0x105   :  { %2501 = vmatpush.bf16.msra.mxu1 %v11676_v17  ;;  %v977_v10 = vpop.f32.mrf.mxu2  ;;  %v961_v30 = vadd.f32 %v960_v22, %v17839_v47  ;;  %v11664_v1 = vor.u32 %v15629_v3, %v11661_v14  ;;  %v15625_v47 = vld [vmem:[%s24905_s1 + $0x6c4] sm:$0xf]  ;;  %11555 = vmatmul.msk.bf16.vlgmr.msrb.gmra.mxu2 %vm481_vm1, %v17997_v29  ;;  %v15640_v29 = vld [vmem:[%s24905_s1 + $0x734] sm:$0xf0] }
 0x106   :  { %v18236_v17 = vadd.f32 %v977_v10, %v959_v53  ;;  %v15649_v53 = vld [vmem:[%s24905_s1 + $0x784] sm:$0xf]  ;;  %v18323_v10 = vld [vmem:[%s24906_s0 + $0x8] sm:$0xf0]  ;;  %2597 = vmatpush.bf16.msrb.mxu3 %v11796_v15  ;;  %v11747_v15 = vld [vmem:[%s24905_s1 + $0x788] sm:$0xf] }
 0x107   :  { %v11744_v58 = vor.u32 %v15649_v53, %v11741_v24  ;;  %v18328_v22 = vld [vmem:[%s24906_s0] sm:$0xf0]  ;;  %v16450_v24 = vld [vmem:[%s24906_s0 + $0x10] sm:$0xff] }
 0x108   :  { %2537 = vmatpush.bf16.msra.mxu0 %v11712_v4  ;;  %v996_v55 = vpop.f32.mrf.mxu1  ;;  %v2147_v53 = vrot.slane %v18328_v22, 4 }
 0x109   :  { %2502 = vmatpush.bf16.msra.mxu1 %v11660_v42  ;;  %v1010_v4 = vpop.f32.mrf.mxu3  ;;  %v11648_v42 = vor.u32 %v15625_v47, %v11645_v32  ;;  %2562 = vmatpush.bf16.msra.mxu2 %v11744_v58  ;;  %v15642_v47 = vld [vmem:[%s24905_s1 + $0x74c] sm:$0xf]  ;;  %v11717_v32 = vld [vmem:[%s24905_s1 + $0x758] sm:$0xf0] }
 0x10a   :  { %v18260_v34 = vadd.f32 %v1010_v4, %v992_v43  ;;  %v11699_v43 = vld [vmem:[%s24905_s1 + $0x728] sm:$0xf]  ;;  %2051 = vmatmul.bf16.gmra.mxu1 %v18103_v25  ;;  %v2132_v4 = vld [vmem:[%s24906_s0 + $0x20] sm:$0xf]  ;;  %v11720_v16 = vor.u32 %v15642_v47, %v11717_v32  ;;  %v15658_v47 = vld [vmem:[%s24905_s1 + $0x7cc] sm:$0xf] }
 0x10b   :  { %v11700_v14 = vor.u32 %v15640_v29, %v11699_v43  ;;  %v2153_v58 = vrot.slane %v2132_v4, 4  ;;  %v11797_v43 = vld [vmem:[%s24905_s1 + $0x7f8] sm:$0xf0] }
 0x10c   :  { %2538 = vmatpush.bf16.msra.mxu0 %v11696_v39  ;;  %v1029_v57 = vpop.f32.mrf.mxu0  ;;  %v11781_v32 = vld [vmem:[%s24905_s1 + $0x7d8] sm:$0xf0] }
 0x10d   :  { %2503 = vmatpush.bf16.msra.mxu1 %v11644_v20  ;;  %v979_v48 = vpop.f32.mrf.mxu2  ;;  %v1030_v39 = vadd.f32 %v1029_v57, %v17893_v12  ;;  %v11716_v20 = vor.u32 %v15644_v11, %v11715_v59  ;;  %v11613_v12 = vld [vmem:[%s24905_s1 + $0x690] sm:$0xf0]  ;;  %v2148_v57 = vrot.slane %v16450_v24, 4  ;;  %v15638_v59 = vld [vmem:[%s24905_s1 + $0x72c] sm:$0xf]  ;;  %v11784_v4 = vor.u32 %v15658_v47, %v11781_v32 }
 0x10e   :  { %v18281_v54 = vadd.f32 %v979_v48, %v961_v30  ;;  %v11616_v3 = vor.u32 %v15617_v61, %v11613_v12  ;;  %v15666_v30 = vld [vmem:[%s24905_s1 + $0x80c] sm:$0xf]  ;;  %v15660_v48 = vld [vmem:[%s24905_s1 + $0x7d4] sm:$0xf0]  ;;  %v11701_v61 = vld [vmem:[%s24905_s1 + $0x738] sm:$0xf0] }
 0x10f   :  { %v15632_v12 = vld [vmem:[%s24905_s1 + $0x6f4] sm:$0xf0]  ;;  %v11749_v47 = vld [vmem:[%s24905_s1 + $0x798] sm:$0xf0] }
 0x110   :  { %2539 = vmatpush.bf16.msra.mxu0 %v11680_v9  ;;  %v997_v9 = vadd.f32 %v996_v55, %v17933_v46  ;;  %v11813_v46 = vld [vmem:[%s24905_s1 + $0x818] sm:$0xf0]  ;;  %11554 = vmatmul.msk.bf16.gmra.mxu3 %vm481_vm1, %v18110_v52  ;;  %v15662_v55 = vld [vmem:[%s24905_s1 + $0x7ec] sm:$0xf] }
 0x111   :  { %2504 = vmatpush.bf16.msra.mxu1 %v11628_v40  ;;  %v1012_v6 = vpop.f32.mrf.mxu3  ;;  %v11816_v28 = vor.u32 %v15666_v30, %v11813_v46  ;;  %v2149_v30 = vsel %vm2146_vm4, %v2147_v53, %v2148_v57  ;;  %v2154_v46 = vsel %vm2146_vm4, %v2148_v57, %v2153_v58  ;;  %v15624_v53 = vld [vmem:[%s24905_s1 + $0x6b4] sm:$0xf0] }
 0x112   :  { %v18311_v2 = vadd.f32 %v1012_v6, %v994_v50  ;;  %v2133_v50 = vld [vmem:[%s24906_s0 + $0x28] sm:$0xf]  ;;  %v2151_v6 = vrot.slane %v16451_v56, 4  ;;  %v15620_v56 = vld [vmem:[%s24905_s1 + $0x694] sm:$0xf0] }
 0x113   :  { %2634 = vmatpush.bf16.msrb.mxu2 %v11816_v28  ;;  %v2155_v8 = vrot.slane %v2133_v50, 4  ;;  %v15628_v28 = vld [vmem:[%s24905_s1 + $0x6d4] sm:$0xf0]  ;;  %2089 = vmatmul.bf16.gmra.mxu0 %v18103_v25  ;;  %v18441_v50 = vpack.c.bf16 %v2154_v46, %v2149_v30  ;;  %v15630_v25 = vld [vmem:[%s24905_s1 + $0x6ec] sm:$0xf] }
 0x114   :  { %2540 = vmatpush.bf16.msra.mxu0 %v11664_v1  ;;  %v1031_v1 = vpop.f32.mrf.mxu0  ;;  %v15622_v30 = vld [vmem:[%s24905_s1 + $0x6ac] sm:$0xf]  ;;  %v11637_v46 = vld [vmem:[%s24905_s1 + $0x6b8] sm:$0xf0] }
 0x115   :  { %2505 = vmatpush.bf16.msra.mxu1 %v11612_v33  ;;  %v1048_v40 = vpop.f32.mrf.mxu2  ;;  %v1032_v33 = vadd.f32 %v1031_v1, %v17960_v0  ;;  %v11684_v0 = vor.u32 %v15636_v36, %v11683_v35  ;;  %v11651_v1 = vld [vmem:[%s24905_s1 + $0x6c8] sm:$0xf]  ;;  %v2156_v31 = vsel %vm2146_vm4, %v2151_v6, %v2155_v8  ;;  %v15652_v35 = vld [vmem:[%s24905_s1 + $0x794] sm:$0xf0]  ;;  %11556 = vmatmul.msk.bf16.gmra.mxu2 %vm481_vm1, %v18110_v52  ;;  %v11765_v8 = vld [vmem:[%s24905_s1 + $0x7b8] sm:$0xf0] }
 0x116   :  { %v18339_v13 = vadd.f32 %v1048_v40, %v1030_v39  ;;  %v15634_v40 = vld [vmem:[%s24905_s1 + $0x70c] sm:$0xf]  ;;  %v11635_v52 = vld [vmem:[%s24905_s1 + $0x6a8] sm:$0xf] }
 0x117   :  { %v11636_v24 = vor.u32 %v15624_v53, %v11635_v52 }
 0x118   :  { %2541 = vmatpush.bf16.msra.mxu0 %v11648_v42  ;;  %v2150_v42 = vrot.slane %v18323_v10, 4  ;;  %v11800_v10 = vor.u32 %v15662_v55, %v11797_v43  ;;  %v2137_v55 = vld [vmem:[%s24906_s0 + $0x58] sm:$0xf] }
 0x119   :  { %2574 = vmatpush.bf16.msrb.mxu1 %v11732_v44  ;;  %v11779_v44 = vld [vmem:[%s24905_s1 + $0x7c8] sm:$0xf]  ;;  %v1015_v51 = vpop.f32.mrf.mxu3 }
 0x11a   :  { %v11780_v39 = vor.u32 %v15660_v48, %v11779_v44  ;;  %v18380_v11 = vadd.f32 %v1015_v51, %v997_v9  ;;  %2635 = vmatpush.bf16.msrb.mxu2 %v11800_v10  ;;  %v11669_v51 = vld [vmem:[%s24905_s1 + $0x6f8] sm:$0xf0]  ;;  %2506 = vmatmul.bf16.vlgmr.msra.gmra.mxu1 %v18441_v50 }
 0x11c   :  { %2542 = vmatpush.bf16.msra.mxu0 %v11632_v60  ;;  %v998_v60 = vpop.f32.mrf.mxu1  ;;  %2598 = vmatpush.bf16.msrb.mxu3 %v11780_v39  ;;  %v1034_v9 = vpop.f32.mrf.mxu0 }
 0x11d   :  { %2575 = vmatpush.bf16.msrb.mxu1 %v11716_v20  ;;  %v11667_v20 = vld [vmem:[%s24905_s1 + $0x6e8] sm:$0xf]  ;;  %v999_v62 = vadd.f32 %v998_v60, %v17995_v18  ;;  %v1050_v7 = vpop.f32.mrf.mxu2  ;;  %v1035_v22 = vadd.f32 %v1034_v9, %v18012_v41  ;;  %v2152_v41 = vsel %vm2146_vm4, %v2150_v42, %v2151_v6  ;;  %v11748_v42 = vor.u32 %v15652_v35, %v11747_v15  ;;  %v2136_v6 = vld [vmem:[%s24906_s0 + $0x50] sm:$0xf] }
 0x11e   :  { %v11668_v27 = vor.u32 %v15632_v12, %v11667_v20  ;;  %v11763_v18 = vld [vmem:[%s24905_s1 + $0x7a8] sm:$0xf]  ;;  %v18404_v29 = vadd.f32 %v1050_v7, %v1032_v33  ;;  %v11652_v33 = vor.u32 %v15628_v28, %v11651_v1  ;;  %v18448_v44 = vpack.c.bf16 %v2156_v31, %v2152_v41  ;;  %2636 = vmatpush.bf16.msrb.mxu2 %v11784_v4  ;;  %v11653_v12 = vld [vmem:[%s24905_s1 + $0x6d8] sm:$0xf0]  ;;  %v15650_v31 = vld [vmem:[%s24905_s1 + $0x78c] sm:$0xf] }
 0x11f   :  { %v11672_v60 = vor.u32 %v15630_v25, %v11669_v51  ;;  %v2135_v7 = vld [vmem:[%s24906_s0 + $0x38] sm:$0xf0]  ;;  %v2165_v28 = vrot.slane %v2137_v55, 4  ;;  %v11640_v4 = vor.u32 %v15622_v30, %v11637_v46  ;;  %v11752_v15 = vor.u32 %v15650_v31, %v11749_v47 }
 0x120   :  { %2543 = vmatpush.bf16.msra.mxu0 %v11616_v3  ;;  %v11704_v3 = vor.u32 %v15638_v59, %v11701_v61  ;;  %v2134_v59 = vld [vmem:[%s24906_s0 + $0x30] sm:$0xf0]  ;;  %v15626_v61 = vld [vmem:[%s24905_s1 + $0x6cc] sm:$0xf]  ;;  %11817 = vmatmul.msk.bf16.vlgmr.msra.gmra.mxu3 %vm481_vm1, %v18448_v44 }
 0x121   :  { %2576 = vmatpush.bf16.msrb.mxu1 %v11700_v14  ;;  %v15656_v14 = vld [vmem:[%s24905_s1 + $0x7b4] sm:$0xf0]  ;;  %v1017_v36 = vpop.f32.mrf.mxu3  ;;  %v2157_v9 = vrot.slane %v2134_v59, 4  ;;  %v11656_v10 = vor.u32 %v15626_v61, %v11653_v12 }
 0x123   :  { %2544 = vmatmul.bf16.vlgmr.msra.gmra.mxu0 %v18441_v50 }
 0x124   :  { %2612 = vmatpush.bf16.msrb.mxu0 %v11736_v19  ;;  %v11764_v19 = vor.u32 %v15656_v14, %v11763_v18  ;;  %v1435_v48 = vpop.f32.mrf.mxu1  ;;  %v1036_v39 = vpop.f32.mrf.mxu0 }
 0x125   :  { %2577 = vmatpush.bf16.msrb.mxu1 %v11684_v0  ;;  %v11688_v0 = vor.u32 %v15634_v40, %v11685_v21  ;;  %v1053_v57 = vpop.f32.mrf.mxu2  ;;  %v1037_v20 = vadd.f32 %v1036_v39, %v18075_v23  ;;  %v15654_v23 = vld [vmem:[%s24905_s1 + $0x7ac] sm:$0xf]  ;;  %v2158_v40 = vrot.slane %v18051_v63, 4  ;;  %11819 = vmatmul.msk.bf16.vlgmr.msra.gmra.mxu2 %vm481_vm1, %v18448_v44 }
 0x126   :  { %2599 = vmatpush.bf16.msrb.mxu3 %v11764_v19  ;;  %v18459_v58 = vadd.f32 %v1053_v57, %v1035_v22  ;;  %v11768_v43 = vor.u32 %v15654_v23, %v11765_v8  ;;  %v2163_v22 = vrot.slane %v2136_v6, 4  ;;  %v2160_v19 = vrot.slane %v2135_v7, 4  ;;  %v16452_v21 = vld [vmem:[%s24906_s0 + $0x48] sm:$0xff] }
 0x127   :  { %v2161_v1 = vrot.slane %v16452_v21, 4  ;;  %v2159_v35 = vsel %vm2146_vm4, %v2157_v9, %v2158_v40 }
 0x128   :  { %2613 = vmatpush.bf16.msrb.mxu0 %v11720_v16  ;;  %v18446_v16 = vadd.f32 %v1017_v36, %v999_v62  ;;  %v11619_v62 = vld [vmem:[%s24905_s1 + $0x688] sm:$0xf]  ;;  %2637 = vmatpush.bf16.msrb.mxu2 %v11768_v43  ;;  %v15618_v36 = vld [vmem:[%s24905_s1 + $0x68c] sm:$0xf] }
 0x129   :  { %2578 = vmatpush.bf16.msrb.mxu1 %v11668_v27  ;;  %v11620_v27 = vor.u32 %v15620_v56, %v11619_v62  ;;  %v1454_v18 = vpop.f32.mrf.mxu3  ;;  %v2166_v25 = vsel %vm2146_vm4, %v2161_v1, %v2165_v28 }
 0x12a   :  { %2600 = vmatpush.bf16.msrb.mxu3 %v11748_v42  ;;  %v2162_v42 = vsel %vm2146_vm4, %v2160_v19, %v2161_v1 }
 0x12b   :  { %v2178_v53 = vpack.c.bf16 %v2166_v25, %v2162_v42 }
 0x12c   :  { %2614 = vmatpush.bf16.msrb.mxu0 %v11704_v3  ;;  %v1455_v3 = vadd.f32 %v1454_v18, %v1435_v48  ;;  %v18495_v14 = vpop.f32.mrf.mxu1  ;;  %2638 = vmatpush.bf16.msrb.mxu2 %v11752_v15 }
 0x12d   :  { %2579 = vmatpush.bf16.msrb.mxu1 %v11652_v33  ;;  %v1055_v41 = vpop.f32.mrf.mxu2  ;;  %v1473_v33 = vpop.f32.mrf.mxu0 }
 0x12e   :  { %v18508_v63 = vadd.f32 %v1455_v3, %v18054_v38  ;;  %v18516_v32 = vadd.f32 %v1055_v41, %v1037_v20  ;;  %v2164_v38 = vsel %vm2146_vm4, %v2158_v40, %v2163_v22 }
 0x12f   :  { %v2177_v51 = vpack.c.bf16 %v2164_v38, %v2159_v35 }
 0x130   :  { %2615 = vmatpush.bf16.msrb.mxu0 %v11688_v0  ;;  %24941 = vst [vmem:[#allocation3_spill] sm:$0xff] %v18516_v32  ;;  %v11621_v0 = vld [vmem:[%s24905_s1 + $0x698] sm:$0xf0]  ;;  %11818 = vmatmul.msk.bf16.gmra.mxu3 %vm481_vm1, %v2178_v53  ;;  %s16469_s1 = smov 64  }
 0x131   :  { %2580 = vmatpush.bf16.msrb.mxu1 %v11636_v24  ;;  %v18529_v48 = vpop.f32.mrf.mxu3  ;;  %v11624_v52 = vor.u32 %v15618_v36, %v11621_v0 }
 0x132   :  { %2511 = vmatmul.bf16.gmra.mxu1 %v2177_v51 }
 0x133   :  { %2549 = vmatmul.bf16.gmra.mxu0 %v2177_v51 }
 0x134   :  { %2616 = vmatpush.bf16.msrb.mxu0 %v11672_v60  ;;  %v1440_v24 = vpop.f32.mrf.mxu1 }
 0x135   :  { %2581 = vmatpush.bf16.msrb.mxu1 %v11620_v27  ;;  %v1492_v57 = vpop.f32.mrf.mxu2  ;;  %v18533_v59 = vpop.f32.mrf.mxu0  ;;  %11820 = vmatmul.msk.bf16.gmra.mxu2 %vm481_vm1, %v2178_v53 }
 0x136   :  { %v1493_v39 = vadd.f32 %v1492_v57, %v1473_v33 }
 0x138   :  { %2617 = vmatpush.bf16.msrb.mxu0 %v11656_v10  ;;  %v1579_v60 = vadd.f32 %v1493_v39, %v18140_v5 }
 0x139   :  { %v1459_v61 = vpop.f32.mrf.mxu3 }
 0x13a   :  { %v1460_v20 = vadd.f32 %v1459_v61, %v1440_v24 }
 0x13c   :  { %2618 = vmatpush.bf16.msrb.mxu0 %v11640_v4  ;;  %v18537_v12 = vpop.f32.mrf.mxu1  ;;  %v1586_v62 = vadd.f32 %v1460_v20, %v18164_v26 }
 0x13d   :  { %v18540_v56 = vpop.f32.mrf.mxu2  ;;  %v1478_v6 = vpop.f32.mrf.mxu0 }
 0x140   :  { %2619 = vmatpush.bf16.msrb.mxu0 %v11624_v52  ;;  %11821 = vmatmul.msk.bf16.vlgmr.msrb.gmra.mxu3 %vm481_vm1, %v18448_v44 }
 0x141   :  { %v18542_v23 = vpop.f32.mrf.mxu3 }
 0x142   :  { %2582 = vmatmul.bf16.vlgmr.msrb.gmra.mxu1 %v18441_v50 }
 0x143   :  { %2620 = vmatmul.bf16.vlgmr.msrb.gmra.mxu0 %v18441_v50 }
 0x144   :  { %v1511_v8 = vpop.f32.mrf.mxu1 }
 0x145   :  { %v1497_v27 = vpop.f32.mrf.mxu2  ;;  %v18545_v55 = vpop.f32.mrf.mxu0  ;;  %11823 = vmatmul.msk.bf16.vlgmr.msrb.gmra.mxu2 %vm481_vm1, %v18448_v44 }
 0x146   :  { %v1498_v7 = vadd.f32 %v1497_v27, %v1478_v6 }
 0x148   :  { %v1587_v5 = vadd.f32 %v1498_v7, %v18236_v17 }
 0x149   :  { %v1530_v26 = vpop.f32.mrf.mxu3 }
 0x14a   :  { %v1531_v43 = vadd.f32 %v1530_v26, %v1511_v8 }
 0x14c   :  { %v18551_v18 = vpop.f32.mrf.mxu1  ;;  %v1580_v9 = vadd.f32 %v1531_v43, %v18260_v34 }
 0x14d   :  { %v18554_v10 = vpop.f32.mrf.mxu2  ;;  %v1549_v3 = vpop.f32.mrf.mxu0 }
 0x150   :  { %11822 = vmatmul.msk.bf16.gmra.mxu3 %vm481_vm1, %v2178_v53 }
 0x151   :  { %v18557_v40 = vpop.f32.mrf.mxu3 }
 0x152   :  { %2587 = vmatmul.bf16.gmra.mxu1 %v2177_v51 }
 0x153   :  { %2625 = vmatmul.bf16.gmra.mxu0 %v2177_v51 }
 0x154   :  { %v1516_v22 = vpop.f32.mrf.mxu1 }
 0x155   :  { %v1568_v30 = vpop.f32.mrf.mxu2  ;;  %v18561_v17 = vpop.f32.mrf.mxu0  ;;  %11824 = vmatmul.msk.bf16.gmra.mxu2 %vm481_vm1, %v2178_v53 }
 0x156   :  { %v1569_v46 = vadd.f32 %v1568_v30, %v1549_v3 }
 0x158   :  { %v1581_v34 = vadd.f32 %v1569_v46, %v18339_v13 }
 0x159   :  { %v1535_v19 = vpop.f32.mrf.mxu3 }
 0x15a   :  { %v1536_v21 = vadd.f32 %v1535_v19, %v1516_v22 }
 0x15c   :  { %v18565_v1 = vpop.f32.mrf.mxu1  ;;  %v1588_v50 = vadd.f32 %v1536_v21, %v18380_v11 }
 0x15d   :  { %v18568_v28 = vpop.f32.mrf.mxu2  ;;  %v1554_v41 = vpop.f32.mrf.mxu0 }
 0x161   :  { %v18570_v44 = vpop.f32.mrf.mxu3 }
 0x164   :  { %v1971_v31 = vpop.f32.mrf.mxu1 }
 0x165   :  { %v1573_v47 = vpop.f32.mrf.mxu2  ;;  %v18573_v4 = vpop.f32.mrf.mxu0 }
 0x166   :  { %v1574_v33 = vadd.f32 %v1573_v47, %v1554_v41 }
 0x168   :  { %v1589_v13 = vadd.f32 %v1574_v33, %v18459_v58 }
 0x169   :  { %v1990_v15 = vpop.f32.mrf.mxu3 }
 0x16a   :  { %v1991_v35 = vadd.f32 %v1990_v15, %v1971_v31 }
 0x16c   :  { %v18576_v38 = vpop.f32.mrf.mxu1  ;;  %v18579_v11 = vadd.f32 %v1991_v35, %v18508_v63 }
 0x16d   :  { %v18581_v36 = vpop.f32.mrf.mxu2  ;;  %v2009_v0 = vpop.f32.mrf.mxu0 }
 0x16e   :  { %24942 = vst [vmem:[#allocation4_spill] sm:$0xff] %v18579_v11  ;;  %v1571_v11 = vadd.f32 %v18568_v28, %v18561_v17  ;;  %v18654_v28 = vadd.f32 %v18581_v36, %v18573_v4 }
 0x171   :  { %v18583_v42 = vpop.f32.mrf.mxu3 }
 0x174   :  { %v1976_v25 = vpop.f32.mrf.mxu1 }
 0x175   :  { %v2028_v51 = vpop.f32.mrf.mxu2  ;;  %v18585_v53 = vpop.f32.mrf.mxu0 }
 0x176   :  { %v2029_v52 = vadd.f32 %v2028_v51, %v2009_v0 }
 0x178   :  { %v18587_v24 = vadd.f32 %v2029_v52, %v1579_v60 }
 0x179   :  { %v1995_v58 = vpop.f32.mrf.mxu3 }
 0x17a   :  { %24943 = vst [vmem:[#allocation5_spill] sm:$0xff] %v18587_v24  ;;  %v1996_v57 = vadd.f32 %v1995_v58, %v1976_v25  ;;  %v1533_v24 = vadd.f32 %v18557_v40, %v18551_v18  ;;  %v1585_v40 = vadd.f32 %v1571_v11, %v18404_v29 }
 0x17c   :  { %v18589_v39 = vpop.f32.mrf.mxu1  ;;  %v18591_v61 = vadd.f32 %v1996_v57, %v1586_v62 }
 0x17d   :  { %v18593_v63 = vpop.f32.mrf.mxu2  ;;  %v2014_v20 = vpop.f32.mrf.mxu0 }
 0x17e   :  { %24944 = vst [vmem:[#allocation6_spill] sm:$0xff] %v18591_v61  ;;  %v1500_v61 = vadd.f32 %v18554_v10, %v18545_v55  ;;  %v1584_v10 = vadd.f32 %v1533_v24, %v18311_v2 }
 0x180   :  { %v1591_v18 = vadd.f32 %v1500_v61, %v18281_v54 }
 0x181   :  { %v18595_v6 = vpop.f32.mrf.mxu3 }
 0x184   :  { %v2047_v8 = vpop.f32.mrf.mxu1 }
 0x185   :  { %v2033_v27 = vpop.f32.mrf.mxu2  ;;  %v18597_v26 = vpop.f32.mrf.mxu0 }
 0x186   :  { %v2034_v7 = vadd.f32 %v2033_v27, %v2014_v20 }
 0x188   :  { %v18599_v43 = vadd.f32 %v2034_v7, %v1587_v5 }
 0x189   :  { %v2066_v60 = vpop.f32.mrf.mxu3 }
 0x18a   :  { %24945 = vst [vmem:[#allocation7_spill] sm:$0xff] %v18599_v43  ;;  %v2067_v3 = vadd.f32 %v2066_v60, %v2047_v8 }
 0x18c   :  { %v18601_v22 = vpop.f32.mrf.mxu1  ;;  %v18603_v30 = vadd.f32 %v2067_v3, %v1580_v9 }
 0x18d   :  { %v18605_v62 = vpop.f32.mrf.mxu2  ;;  %v2085_v46 = vpop.f32.mrf.mxu0 }
 0x18e   :  { %24946 = vst [vmem:[#allocation8_spill] sm:$0xff] %v18603_v30  ;;  %v1457_v30 = vadd.f32 %v18529_v48, %v18495_v14  ;;  %v1993_v14 = vadd.f32 %v18583_v42, %v18576_v38 }
 0x191   :  { %v2068_v19 = vpop.f32.mrf.mxu3 }
 0x194   :  { %v2052_v21 = vpop.f32.mrf.mxu1 }
 0x195   :  { %v2104_v41 = vpop.f32.mrf.mxu2  ;;  %v18607_v47 = vpop.f32.mrf.mxu0 }
 0x196   :  { %v2105_v31 = vadd.f32 %v2104_v41, %v2085_v46 }
 0x198   :  { %v18609_v33 = vadd.f32 %v2105_v31, %v1581_v34 }
 0x199   :  { %v2071_v15 = vpop.f32.mrf.mxu3 }
 0x19a   :  { %24947 = vst [vmem:[#allocation9_spill] sm:$0xff] %v18609_v33  ;;  %v2072_v5 = vadd.f32 %v2071_v15, %v2052_v21 }
 0x19c   :  { %v18611_v35 = vpop.f32.mrf.mxu1  ;;  %v18613_v0 = vadd.f32 %v2072_v5, %v1588_v50 }
 0x19d   :  { %v2106_v25 = vpop.f32.mrf.mxu2  ;;  %v2090_v9 = vpop.f32.mrf.mxu0 }
 0x19e   :  { %24948 = vst [vmem:[#allocation10_spill] sm:$0xff] %v18613_v0  ;;  %v2107_v11 = vadd.f32 %v2106_v25, %v18607_v47 }
 0x1a0   :  { %v2121_v25 = vadd.f32 %v2107_v11, %v1585_v40 }
 0x1a1   :  { %v2073_v51 = vpop.f32.mrf.mxu3 }
 0x1a2   :  { %v2074_v24 = vadd.f32 %v2073_v51, %v18611_v35 }
 0x1a4   :  { %v2507_v52 = vpop.f32.mrf.mxu1 }
 0x1a5   :  { %v2109_v58 = vpop.f32.mrf.mxu2  ;;  %v18615_v20 = vpop.f32.mrf.mxu0 }
 0x1a6   :  { %v2110_v57 = vadd.f32 %v2109_v58, %v2090_v9  ;;  %24949 = vst [vmem:[#allocation11_spill] sm:$0xff] %v18615_v20  ;;  %v1462_v20 = vadd.f32 %v18542_v23, %v18537_v12  ;;  %v2031_v12 = vadd.f32 %v18593_v63, %v18585_v53 }
 0x1a8   :  { %v18617_v8 = vadd.f32 %v2110_v57, %v1589_v13  ;;  %v1590_v55 = vadd.f32 %v1462_v20, %v18221_v37 }
 0x1a9   :  { %v2526_v27 = vpop.f32.mrf.mxu3 }
 0x1aa   :  { %24950 = vst [vmem:[#allocation12_spill] sm:$0xff] %v18617_v8  ;;  %v2527_v37 = vadd.f32 %v2526_v27, %v2507_v52 }
 0x1ac   :  { %v2509_v7 = vpop.f32.mrf.mxu1 }
 0x1ad   :  { %v18619_v34 = vpop.f32.mrf.mxu2  ;;  %v2545_v60 = vpop.f32.mrf.mxu0 }
 0x1ae   :  { %24951 = vst [vmem:[#allocation13_spill] sm:$0xff] %v18619_v34  ;;  %v1495_v34 = vadd.f32 %v18540_v56, %v18533_v59  ;;  %v1582_v59 = vadd.f32 %v1457_v30, %v18108_v49 }
 0x1b0   :  { %v1583_v23 = vadd.f32 %v1495_v34, %v18191_v45  ;;  %v2069_v45 = vadd.f32 %v2068_v19, %v18601_v22  ;;  %v24953_v22 = vld [vmem:[#allocation4_spill] sm:$0xff] }
 0x1b1   :  { %v2528_v3 = vpop.f32.mrf.mxu3  ;;  %v18664_v30 = vadd.f32 %v2527_v37, %v24953_v22 }
 0x1b2   :  { %v2529_v49 = vadd.f32 %v2528_v3, %v2509_v7  ;;  %v2119_v54 = vadd.f32 %v2031_v12, %v1583_v23  ;;  %v24956_v7 = vld [vmem:[#allocation11_spill] sm:$0xff] }
 0x1b3   :  { %v24958_v3 = vld [vmem:[#allocation7_spill] sm:$0xff] }
 0x1b4   :  { %v2512_v46 = vpop.f32.mrf.mxu1 }
 0x1b5   :  { %v2564_v21 = vpop.f32.mrf.mxu2  ;;  %v2547_v50 = vpop.f32.mrf.mxu0  ;;  %v24957_v34 = vld [vmem:[#allocation13_spill] sm:$0xff] }
 0x1b6   :  { %v2565_v42 = vadd.f32 %v2564_v21, %v2545_v60  ;;  %v2112_v60 = vadd.f32 %v24957_v34, %v24956_v7 }
 0x1b9   :  { %v2531_v41 = vpop.f32.mrf.mxu3 }
 0x1ba   :  { %v2532_v2 = vadd.f32 %v2531_v41, %v2512_v46 }
 0x1bc   :  { %v2514_v31 = vpop.f32.mrf.mxu1 }
 0x1bd   :  { %v2566_v15 = vpop.f32.mrf.mxu2  ;;  %v2550_v5 = vpop.f32.mrf.mxu0 }
 0x1be   :  { %v2567_v53 = vadd.f32 %v2566_v15, %v2547_v50  ;;  %v2704_v50 = vmul.f32 %v18664_v30, %v18664_v30 }
 0x1c0   :  { %v18672_v47 = vadd.f32 %v2567_v53, %v2119_v54 }
 0x1c1   :  { %v2533_v32 = vpop.f32.mrf.mxu3 }
 0x1c2   :  { %v2534_v61 = vadd.f32 %v2533_v32, %v2514_v31  ;;  %v24959_v31 = vld [vmem:[#allocation8_spill] sm:$0xff]  ;;  %v2709_v12 = vmul.f32 %v18672_v47, %v18672_v47 }
 0x1c4   :  { %v2583_v33 = vpop.f32.mrf.mxu1 }
 0x1c5   :  { %v2569_v9 = vpop.f32.mrf.mxu2  ;;  %v2552_v58 = vpop.f32.mrf.mxu0 }
 0x1c6   :  { %v2570_v63 = vadd.f32 %v2569_v9, %v2550_v5  ;;  %v24960_v5 = vld [vmem:[#allocation10_spill] sm:$0xff] }
 0x1c8   :  { %v18683_v46 = vadd.f32 %v2570_v63, %v24958_v3 }
 0x1c9   :  { %v2602_v0 = vpop.f32.mrf.mxu3 }
 0x1ca   :  { %v2603_v19 = vadd.f32 %v2602_v0, %v2583_v33 }
 0x1cc   :  { %v2585_v13 = vpop.f32.mrf.mxu1  ;;  %v18690_v15 = vadd.f32 %v2603_v19, %v24959_v31  ;;  %v24962_v19 = vld [vmem:[#allocation9_spill] sm:$0xff] }
 0x1cd   :  { %v2571_v57 = vpop.f32.mrf.mxu2  ;;  %v18621_v8 = vpop.f32.mrf.mxu0 }
 0x1ce   :  { %24952 = vst [vmem:[#allocation14_spill] sm:$0xff] %v18621_v8  ;;  %v1538_v8 = vadd.f32 %v18570_v44, %v18565_v1  ;;  %v1998_v1 = vadd.f32 %v18595_v6, %v18589_v39  ;;  %v2118_v44 = vadd.f32 %v1993_v14, %v1582_v59  ;;  %v2120_v6 = vadd.f32 %v2069_v45, %v1584_v10 }
 0x1d0   :  { %v1592_v17 = vadd.f32 %v1538_v8, %v18446_v16  ;;  %v2036_v16 = vadd.f32 %v18605_v62, %v18597_v26  ;;  %v2126_v4 = vadd.f32 %v1998_v1, %v1590_v55  ;;  %v18661_v36 = vadd.f32 %v2529_v49, %v2118_v44  ;;  %v24954_v8 = vld [vmem:[#allocation5_spill] sm:$0xff]  ;;  %v24955_v26 = vld [vmem:[#allocation6_spill] sm:$0xff] }
 0x1d1   :  { %v2604_v43 = vpop.f32.mrf.mxu3  ;;  %v18667_v27 = vadd.f32 %v2565_v42, %v24954_v8  ;;  %v18670_v62 = vadd.f32 %v2532_v2, %v24955_v26  ;;  %v2713_v49 = vmul.f32 %v18683_v46, %v18683_v46  ;;  %v2706_v42 = vmul.f32 %v18690_v15, %v18690_v15 }
 0x1d2   :  { %v2605_v39 = vadd.f32 %v2604_v43, %v2585_v13  ;;  %v2572_v43 = vadd.f32 %v2571_v57, %v2552_v58  ;;  %v2127_v35 = vadd.f32 %v2036_v16, %v1591_v18  ;;  %v2128_v32 = vadd.f32 %v2074_v24, %v1592_v17 }
 0x1d3   :  { %v2668_v33 = vadd.f32 %v18661_v36, %v18664_v30  ;;  %v18680_v0 = vadd.f32 %v2534_v61, %v2126_v4  ;;  %v2708_v41 = vmul.f32 %v18661_v36, %v18661_v36  ;;  %v2705_v58 = vmul.f32 %v18667_v27, %v18667_v27 }
 0x1d4   :  { %v2588_v56 = vpop.f32.mrf.mxu1  ;;  %v18674_v51 = vadd.f32 %v2605_v39, %v2120_v6  ;;  %v2677_v57 = vadd.f32 %v18672_v47, %v18667_v27  ;;  %v18700_v14 = vadd.f32 %v2572_v43, %v2127_v35  ;;  %v2712_v10 = vmul.f32 %v18670_v62, %v18670_v62  ;;  %v24963_v43 = vld [vmem:[#allocation12_spill] sm:$0xff] }
 0x1d5   :  { %v18639_v48 = vpop.f32.mrf.mxu2  ;;  %v2623_v38 = vpop.f32.mrf.mxu0  ;;  %v2669_v13 = vadd.f32 %v2668_v33, %v18670_v62  ;;  %v24961_v44 = vld [vmem:[#allocation14_spill] sm:$0xff]  ;;  %v2729_v16 = vadd.f32 %v2709_v12, %v2705_v58  ;;  %v2720_v39 = vadd.f32 %v2708_v41, %v2704_v50  ;;  %v2716_v4 = vmul.f32 %v18680_v0, %v18680_v0 }
 0x1d6   :  { %v2678_v17 = vadd.f32 %v2677_v57, %v18683_v46  ;;  %v2710_v1 = vmul.f32 %v18674_v51, %v18674_v51  ;;  %v2641_v45 = vadd.f32 %v18639_v48, %v24961_v44  ;;  %v2717_v11 = vmul.f32 %v18700_v14, %v18700_v14 }
 0x1d7   :  { %v2670_v40 = vadd.f32 %v2669_v13, %v18680_v0  ;;  %v2730_v22 = vadd.f32 %v2729_v16, %v2713_v49  ;;  %v2721_v7 = vadd.f32 %v2720_v39, %v2712_v10 }
 0x1d8   :  { %v2679_v2 = vadd.f32 %v2678_v17, %v18700_v14  ;;  %v2738_v61 = vadd.f32 %v2710_v1, %v2706_v42 }
 0x1d9   :  { %v2607_v29 = vpop.f32.mrf.mxu3  ;;  %v2671_v6 = vrot.slane %v2670_v40, 4  ;;  %v2731_v34 = vadd.f32 %v2730_v22, %v2717_v11  ;;  %v2722_v41 = vadd.f32 %v2721_v7, %v2716_v4 }
 0x1da   :  { %v2608_v52 = vadd.f32 %v2607_v29, %v2588_v56  ;;  %v2686_v56 = vadd.f32 %v18674_v51, %v18690_v15  ;;  %v2680_v8 = vrot.slane %v2679_v2, 4 }
 0x1db   :  { %v2672_v13 = vadd.f32 %v2671_v6, %v2670_v40  ;;  %v2723_v17 = vrot.slane %v2722_v41, 4 }
 0x1dc   :  { %v2590_v21 = vpop.f32.mrf.mxu1  ;;  %v18693_v9 = vadd.f32 %v2608_v52, %v24960_v5  ;;  %v18734_v52 = vadd.f32 %v2641_v45, %v24962_v19  ;;  %v2681_v12 = vadd.f32 %v2680_v8, %v2679_v2 }
 0x1dd   :  { %v2642_v20 = vpop.f32.mrf.mxu2  ;;  %v2626_v55 = vpop.f32.mrf.mxu0  ;;  %v2673_v1 = vrot.slane %v2672_v13, 2 }
 0x1de   :  { %v2643_v23 = vadd.f32 %v2642_v20, %v2623_v38  ;;  %v2687_v37 = vadd.f32 %v2686_v56, %v18693_v9  ;;  %v2714_v53 = vmul.f32 %v18693_v9, %v18693_v9  ;;  %v2707_v31 = vmul.f32 %v18734_v52, %v18734_v52 }
 0x1df   :  { %v2732_v56 = vrot.slane %v2731_v34, 4  ;;  %v2682_v45 = vrot.slane %v2681_v12, 2  ;;  %v2674_v11 = vadd.f32 %v2673_v1, %v2672_v13 }
 0x1e0   :  { %v18726_v24 = vadd.f32 %v2643_v23, %v2121_v25  ;;  %v2739_v26 = vadd.f32 %v2738_v61, %v2714_v53  ;;  %v24964_v25 = vld [vmem:[#allocation3_spill] sm:$0xff] }
 0x1e1   :  { %v2609_v59 = vpop.f32.mrf.mxu3 }
 0x1e2   :  { %v2610_v18 = vadd.f32 %v2609_v59, %v2590_v21  ;;  %v2711_v33 = vmul.f32 %v18726_v24, %v18726_v24  ;;  %v2695_v57 = vadd.f32 %v18726_v24, %v18734_v52 }
 0x1e4   :  { %v18717_v38 = vadd.f32 %v2610_v18, %v2128_v32  ;;  %v1593_v32 = vadd.f32 %v18654_v28, %v24964_v25  ;;  %v2747_v23 = vadd.f32 %v2711_v33, %v2707_v31 }
 0x1e5   :  { %v2645_v54 = vpop.f32.mrf.mxu2  ;;  %v2628_v5 = vpop.f32.mrf.mxu0 }
 0x1e6   :  { %v2646_v29 = vadd.f32 %v2645_v54, %v2626_v55  ;;  %v2688_v48 = vadd.f32 %v2687_v37, %v18717_v38  ;;  %v2718_v63 = vmul.f32 %v18717_v38, %v18717_v38  ;;  %v2129_v50 = vadd.f32 %v2112_v60, %v1593_v32 }
 0x1e7   :  { %v2733_v37 = vadd.f32 %v2732_v56, %v2731_v34 }
 0x1e8   :  { %v2689_v20 = vrot.slane %v2688_v48, 4  ;;  %v18737_v35 = vadd.f32 %v2646_v29, %v24963_v43  ;;  %v2740_v3 = vadd.f32 %v2739_v26, %v2718_v63  ;;  %v2724_v29 = vadd.f32 %v2723_v17, %v2722_v41 }
 0x1e9   :  { %v2734_v4 = vrot.slane %v2733_v37, 2 }
 0x1ea   :  { %v2690_v21 = vadd.f32 %v2689_v20, %v2688_v48  ;;  %v2715_v28 = vmul.f32 %v18737_v35, %v18737_v35  ;;  %v2741_v55 = vrot.slane %v2740_v3, 4  ;;  %v2696_v60 = vadd.f32 %v2695_v57, %v18737_v35 }
 0x1eb   :  { %v2683_v48 = vadd.f32 %v2682_v45, %v2681_v12  ;;  %v2725_v19 = vrot.slane %v2724_v29, 2  ;;  %v2675_v20 = vrot.slane %v2674_v11, 1  ;;  %v2735_v25 = vadd.f32 %v2734_v4, %v2733_v37 }
 0x1ec   :  { %v2691_v10 = vrot.slane %v2690_v21, 2  ;;  %v2748_v49 = vadd.f32 %v2747_v23, %v2715_v28  ;;  %v2742_v53 = vadd.f32 %v2741_v55, %v2740_v3 }
 0x1ed   :  { %v2647_v58 = vpop.f32.mrf.mxu2  ;;  %v2684_v8 = vrot.slane %v2683_v48, 1  ;;  %v2726_v3 = vadd.f32 %v2725_v19, %v2724_v29  ;;  %v2736_v13 = vrot.slane %v2735_v25, 1  ;;  %v15859_v19 = vld [vmem:[%s24907_s4 + $0x5ec] sm:$0xf0] }
 0x1ee   :  { %v2648_v59 = vadd.f32 %v2647_v58, %v2628_v5  ;;  %v2692_v2 = vadd.f32 %v2691_v10, %v2690_v21  ;;  %v2743_v6 = vrot.slane %v2742_v53, 2  ;;  %v2676_v21 = vadd.f32 %v2675_v20, %v2674_v11  ;;  %v12067_v20 = vld [vmem:[%s24907_s4 + $0x4e0] sm:$0xf] }
 0x1ef   :  { %v2737_v56 = vadd.f32 %v2736_v13, %v2735_v25  ;;  %v12323_v25 = vld [vmem:[%s24907_s4 + $0x6e0] sm:$0xf] }
 0x1f0   :  { %v18750_v18 = vadd.f32 %v2648_v59, %v2129_v50  ;;  %v2693_v61 = vrot.slane %v2692_v2, 1  ;;  %v2744_v34 = vadd.f32 %v2743_v6, %v2742_v53  ;;  %v2685_v50 = vadd.f32 %v2684_v8, %v2683_v48 }
 0x1f1   :  { %v2727_v59 = vrot.slane %v2726_v3, 1 }
 0x1f2   :  { %v2697_v40 = vadd.f32 %v2696_v60, %v18750_v18  ;;  %v2719_v44 = vmul.f32 %v18750_v18, %v18750_v18  ;;  %v2694_v32 = vadd.f32 %v2693_v61, %v2692_v2  ;;  %v2745_v57 = vrot.slane %v2744_v34, 1 }
 0x1f3   :  { %v2728_v55 = vadd.f32 %v2727_v59, %v2726_v3  ;;  %v12051_v59 = vld [vmem:[%s24907_s4 + $0x4c0] sm:$0xf] }
 0x1f4   :  { %v2698_v54 = vrot.slane %v2697_v40, 4  ;;  %v2749_v42 = vadd.f32 %v2748_v49, %v2719_v44  ;;  %v2756_v5 = vadd.f32 %v2694_v32, %v2676_v21  ;;  %v2746_v23 = vadd.f32 %v2745_v57, %v2744_v34  ;;  %v15891_v32 = vld [vmem:[%s24907_s4 + $0x6ec] sm:$0xf0]  ;;  %v12451_v21 = vld [vmem:[%s24907_s4 + $0x7e0] sm:$0xf] }
 0x1f5   :  { %v12179_v57 = vld [vmem:[%s24907_s4 + $0x5c0] sm:$0xf] }
 0x1f6   :  { %v2750_v16 = vrot.slane %v2749_v42, 4  ;;  %v2699_v39 = vadd.f32 %v2698_v54, %v2697_v40  ;;  %v2758_v10 = vadd.f32 %v2746_v23, %v2728_v55  ;;  %v15823_v23 = vld [vmem:[%s24907_s4 + $0x4cc] sm:$0xf0]  ;;  %v12307_v55 = vld [vmem:[%s24907_s4 + $0x6c0] sm:$0xf] }
 0x1f8   :  { %v2700_v63 = vrot.slane %v2699_v39, 2  ;;  %v2751_v22 = vadd.f32 %v2750_v16, %v2749_v42 }
 0x1fa   :  { %v2701_v26 = vadd.f32 %v2700_v63, %v2699_v39  ;;  %v2752_v43 = vrot.slane %v2751_v22, 2 }
 0x1fc   :  { %v2702_v7 = vrot.slane %v2701_v26, 1  ;;  %v2753_v33 = vadd.f32 %v2752_v43, %v2751_v22  ;;  %v12195_v22 = vld [vmem:[%s24907_s4 + $0x5e0] sm:$0xf]  ;;  %v15827_v43 = vld [vmem:[%s24907_s4 + $0x4ec] sm:$0xf0] }
 0x1fd   :  { %v12068_v3 = vor.u32 %v15827_v43, %v12067_v20 }
 0x1fe   :  { %v2703_v41 = vadd.f32 %v2702_v7, %v2701_v26  ;;  %v2754_v31 = vrot.slane %v2753_v33, 1  ;;  %v12196_v26 = vor.u32 %v15859_v19, %v12195_v22  ;;  %v12035_v19 = vld [vmem:[%s24907_s4 + $0x4a0] sm:$0xf] }
 0x1ff   :  { %4030 = vmatpush.bf16.msra.mxu1 %v12068_v3 }
 0x200   :  { %v2757_v58 = vadd.f32 %v2703_v41, %v2685_v50  ;;  %v2755_v12 = vadd.f32 %v2754_v31, %v2753_v33  ;;  %v2666_v50 = vld [vmem:[%s24908_s2] sm:$0xf]  ;;  %4049 = vmatpush.bf16.msra.mxu3 %v12196_v26  ;;  %v12324_v41 = vor.u32 %v15891_v32, %v12323_v25  ;;  %v15923_v31 = vld [vmem:[%s24907_s4 + $0x7ec] sm:$0xf0] }
 0x201   :  { %v12452_v13 = vor.u32 %v15923_v31, %v12451_v21  ;;  %v15883_v25 = vld [vmem:[%s24907_s4 + $0x6ac] sm:$0xf0]  ;;  %v12419_v32 = vld [vmem:[%s24907_s4 + $0x7a0] sm:$0xf] }
 0x202   :  { %v2760_v28 = vadd.f32 %v2757_v58, %v2756_v5  ;;  %v2759_v60 = vadd.f32 %v2755_v12, %v2737_v56  ;;  %4068 = vmatpush.bf16.msra.mxu0 %v12324_v41 }
 0x203   :  { %4087 = vmatpush.bf16.msra.mxu2 %v12452_v13  ;;  %v15815_v13 = vld [vmem:[%s24907_s4 + $0x48c] sm:$0xf0] }
 0x204   :  { %2762 = vrot.lane.b32.xlu0 %v2760_v28, %s16469_s1  ;;  %v2761_v17 = vadd.f32 %v2759_v60, %v2758_v10  ;;  %v15887_v60 = vld [vmem:[%s24907_s4 + $0x6cc] sm:$0xf0] }
 0x20c   :  { %2767 = vrot.lane.b32.xlu0 %v2761_v17, %s16469_s1 }
 0x276   :  { %v2763_v1 = vpop.permute.xlu0 %2762 }
 0x277   :  { %v2766_v49 = vadd.f32 %v2763_v1, %v2760_v28  ;;  %v15855_v28 = vld [vmem:[%s24907_s4 + $0x5cc] sm:$0xf0]  ;;  %v12308_v1 = vor.u32 %v15887_v60, %v12307_v55 }
 0x278   :  { %v12180_v56 = vor.u32 %v15855_v28, %v12179_v57 }
 0x279   :  { %2770 = vrot.lane.b32.xlu1 %v2766_v49, %s16470_s26  ;;  %4069 = vmatpush.bf16.msra.mxu0 %v12308_v1 }
 0x27a   :  { %4050 = vmatpush.bf16.msra.mxu3 %v12180_v56 }
 0x27e   :  { %v2768_v40 = vpop.permute.xlu0 %2767 }
 0x27f   :  { %v2769_v44 = vadd.f32 %v2768_v40, %v2761_v17  ;;  %v12052_v17 = vor.u32 %v15823_v23, %v12051_v59  ;;  %v15919_v40 = vld [vmem:[%s24907_s4 + $0x7cc] sm:$0xf0] }
 0x280   :  { %v15911_v59 = vld [vmem:[%s24907_s4 + $0x78c] sm:$0xf0] }
 0x281   :  { %2773 = vrot.lane.b32.xlu1 %v2769_v44, %s16470_s26  ;;  %4031 = vmatpush.bf16.msra.mxu1 %v12052_v17 }
 0x2eb   :  { %v2771_v45 = vpop.permute.xlu1 %2770 }
 0x2ec   :  { %v2772_v37 = vadd.f32 %v2771_v45, %v2766_v49  ;;  %v12435_v49 = vld [vmem:[%s24907_s4 + $0x7c0] sm:$0xf] }
 0x2ee   :  { %v18759_v54 = vmul.f32 0.001953125, %v2772_v37 }
 0x2f0   :  { %v2778_v53 = vmul.f32 %v18759_v54, %v18759_v54 }
 0x2f3   :  { %v2774_v42 = vpop.permute.xlu1 %2773 }
 0x2f4   :  { %v2775_v2 = vadd.f32 %v2774_v42, %v2769_v44  ;;  %v12436_v44 = vor.u32 %v15919_v40, %v12435_v49 }
 0x2f6   :  { %v2777_v29 = vmul.f32 0.001953125, %v2775_v2  ;;  %4088 = vmatpush.bf16.msra.mxu2 %v12436_v44 }
 0x2f8   :  { %v2779_v16 = vsub.f32 %v2777_v29, %v2778_v53 }
 0x2fa   :  { %v2780_v11 = vadd.f32 1e-05, %v2779_v16 }
 0x2fc   :  { %16440 = vrsqrt.f32 %v2780_v11  ;;  %vm2787_vm6 = vweird.f32 %v2780_v11 }
 0x302   :  { %v16441_v48 = vpop.eup %16440 }
 0x303   :  { %v2782_v39 = vmul.f32 %v16441_v48, %v2780_v11  ;;  %vm2788_vm5 = vweird.f32 %v16441_v48  ;;  %v2667_v11 = vld [vmem:[%s24909_s3] sm:$0xf] }
 0x304   :  { %vm2789_vm10 = vmor %vm2787_vm6, %vm2788_vm5 }
 0x305   :  { %v2783_v4 = vmul.f32 %v16441_v48, %v2782_v39  ;;  %v12163_v39 = vld [vmem:[%s24907_s4 + $0x5a0] sm:$0xf] }
 0x307   :  { %v2784_v61 = vmul.f32 0.5, %v2783_v4  ;;  %v15851_v4 = vld [vmem:[%s24907_s4 + $0x5ac] sm:$0xf0] }
 0x309   :  { %v2785_v63 = vsub.f32 1.5, %v2784_v61 }
 0x30b   :  { %v2786_v6 = vmul.f32 %v16441_v48, %v2785_v63 }
 0x30d   :  { %v2790_v8 = vsel %vm2789_vm10, %v16441_v48, %v2786_v6 }
 0x30e   :  { %v2792_v7 = vrot.slane %v2790_v8, 7  ;;  %v2793_v34 = vrot.slane %v2790_v8, 6  ;;  %v2794_v33 = vrot.slane %v2790_v8, 5 }
 0x310   :  { %v2796_v5 = vsel %vm24920_vm7, %v2790_v8, %v2792_v7  ;;  %v2798_v58 = vsel %vm24917_vm8, %v2793_v34, %v2794_v33  ;;  %v15915_v7 = vld [vmem:[%s24907_s4 + $0x7ac] sm:$0xf0]  ;;  %v12147_v34 = vld [vmem:[%s24907_s4 + $0x580] sm:$0xf] }
 0x311   :  { %v2800_v12 = vsel %vm24916_vm9, %v2796_v5, %v2798_v58  ;;  %v15847_v33 = vld [vmem:[%s24907_s4 + $0x58c] sm:$0xf0]  ;;  %v12164_v5 = vor.u32 %v15851_v4, %v12163_v39  ;;  %v12019_v58 = vld [vmem:[%s24907_s4 + $0x480] sm:$0xf]  ;;  %v12420_v57 = vor.u32 %v15915_v7, %v12419_v32 }
 0x312   :  { %v2802_v10 = vmul.f32 %v2800_v12, %v2666_v50  ;;  %v12148_v28 = vor.u32 %v15847_v33, %v12147_v34  ;;  %v12020_v17 = vor.u32 %v15815_v13, %v12019_v58 }
 0x313   :  { %4051 = vmatpush.bf16.msra.mxu3 %v12164_v5  ;;  %4089 = vmatpush.bf16.msra.mxu2 %v12420_v57 }
 0x314   :  { %v2804_v45 = vperm.slane %v2802_v10, 0  ;;  %v2805_v37 = vperm.slane %v2802_v10, 1  ;;  %v2806_v42 = vperm.slane %v2802_v10, 2  ;;  %v2807_v2 = vperm.slane %v2802_v10, 3 }
 0x316   :  { %v2813_v53 = vmul.f32 %v2805_v37, %v18759_v54  ;;  %v2814_v29 = vmul.f32 %v2806_v42, %v18759_v54  ;;  %v2815_v16 = vmul.f32 %v2807_v2, %v18759_v54  ;;  %v2812_v48 = vmul.f32 %v2804_v45, %v18759_v54  ;;  %v15819_v54 = vld [vmem:[%s24907_s4 + $0x4ac] sm:$0xf0] }
 0x317   :  { %v2828_v22 = vmul.f32 %v2804_v45, %v18664_v30  ;;  %v2829_v20 = vmul.f32 %v2805_v37, %v18667_v27  ;;  %v2830_v8 = vmul.f32 %v2806_v42, %v18690_v15  ;;  %v2831_v26 = vmul.f32 %v2807_v2, %v18734_v52  ;;  %v12291_v30 = vld [vmem:[%s24907_s4 + $0x6a0] sm:$0xf]  ;;  %4052 = vmatpush.bf16.msra.mxu3 %v12148_v28 }
 0x318   :  { %v2820_v61 = vrot.slane %v2813_v53, 7  ;;  %v2821_v63 = vrot.slane %v2814_v29, 6  ;;  %v2822_v6 = vrot.slane %v2815_v16, 5  ;;  %v2832_v43 = vmul.f32 %v2804_v45, %v18661_v36 }
 0x319   :  { %v2833_v52 = vmul.f32 %v2805_v37, %v18672_v47  ;;  %v2834_v36 = vmul.f32 %v2806_v42, %v18674_v51  ;;  %v2835_v21 = vmul.f32 %v2807_v2, %v18726_v24  ;;  %v2836_v47 = vmul.f32 %v2804_v45, %v18670_v62  ;;  %v12275_v62 = vld [vmem:[%s24907_s4 + $0x680] sm:$0xf] }
 0x31a   :  { %v2823_v27 = vsel %vm24920_vm7, %v2812_v48, %v2820_v61  ;;  %v2824_v15 = vsel %vm24917_vm8, %v2821_v63, %v2822_v6  ;;  %v2837_v51 = vmul.f32 %v2805_v37, %v18683_v46  ;;  %v2838_v41 = vmul.f32 %v2806_v42, %v18693_v9  ;;  %v15879_v9 = vld [vmem:[%s24907_s4 + $0x68c] sm:$0xf0] }
 0x31b   :  { %v2825_v3 = vsel %vm24916_vm9, %v2823_v27, %v2824_v15  ;;  %v2839_v31 = vmul.f32 %v2807_v2, %v18737_v35  ;;  %v12036_v24 = vor.u32 %v15819_v54, %v12035_v19  ;;  %v12292_v46 = vor.u32 %v15883_v25, %v12291_v30  ;;  %v12403_v35 = vld [vmem:[%s24907_s4 + $0x780] sm:$0xf]  ;;  %v15843_v63 = vld [vmem:[%s24907_s4 + $0x56c] sm:$0xf0] }
 0x31c   :  { %v2827_v50 = vsub.f32 %v2667_v11, %v2825_v3  ;;  %v2840_v60 = vmul.f32 %v2804_v45, %v18680_v0  ;;  %v2841_v10 = vmul.f32 %v2805_v37, %v18700_v14  ;;  %v2842_v1 = vmul.f32 %v2806_v42, %v18717_v38  ;;  %v15811_v19 = vld [vmem:[%s24907_s4 + $0x46c] sm:$0xf0] }
 0x31d   :  { %4032 = vmatpush.bf16.msra.mxu1 %v12036_v24  ;;  %4070 = vmatpush.bf16.msra.mxu0 %v12292_v46  ;;  %v2843_v49 = vmul.f32 %v2807_v2, %v18750_v18  ;;  %v12276_v40 = vor.u32 %v15879_v9, %v12275_v62  ;;  %v12404_v44 = vor.u32 %v15911_v59, %v12403_v35  ;;  %v12131_v2 = vld [vmem:[%s24907_s4 + $0x560] sm:$0xf]  ;;  %v15875_v35 = vld [vmem:[%s24907_s4 + $0x66c] sm:$0xf0] }
 0x31e   :  { %v2845_v12 = vperm.slane %v2827_v50, 0  ;;  %v2846_v56 = vperm.slane %v2827_v50, 1  ;;  %v2847_v23 = vperm.slane %v2827_v50, 2  ;;  %v2848_v55 = vperm.slane %v2827_v50, 3  ;;  %v12259_v9 = vld [vmem:[%s24907_s4 + $0x660] sm:$0xf] }
 0x31f   :  { %4090 = vmatpush.bf16.msra.mxu2 %v12404_v44  ;;  %v12387_v59 = vld [vmem:[%s24907_s4 + $0x760] sm:$0xf] }
 0x320   :  { %v2853_v53 = vadd.f32 %v2845_v12, %v2828_v22  ;;  %v2854_v29 = vadd.f32 %v2846_v56, %v2829_v20  ;;  %v2855_v16 = vadd.f32 %v2847_v23, %v2830_v8  ;;  %v2856_v11 = vadd.f32 %v2848_v55, %v2831_v26  ;;  %v12003_v22 = vld [vmem:[%s24907_s4 + $0x460] sm:$0xf] }
 0x321   :  { %v2857_v48 = vadd.f32 %v2845_v12, %v2832_v43  ;;  %v2858_v39 = vadd.f32 %v2846_v56, %v2833_v52  ;;  %v2859_v4 = vadd.f32 %v2847_v23, %v2834_v36  ;;  %v2860_v0 = vadd.f32 %v2848_v55, %v2835_v21  ;;  %4033 = vmatpush.bf16.msra.mxu1 %v12020_v17  ;;  %v15839_v17 = vld [vmem:[%s24907_s4 + $0x54c] sm:$0xf0] }
 0x322   :  { %v2861_v14 = vadd.f32 %v2845_v12, %v2836_v47  ;;  %v2862_v45 = vadd.f32 %v2846_v56, %v2837_v51  ;;  %v18891_v37 = vadd.f32 %v2847_v23, %v2838_v41  ;;  %v18893_v61 = vadd.f32 %v2848_v55, %v2839_v31  ;;  %4071 = vmatpush.bf16.msra.mxu0 %v12276_v40 }
 0x323   :  { %v18895_v38 = vadd.f32 %v2845_v12, %v2840_v60  ;;  %v18897_v18 = vadd.f32 %v2846_v56, %v2841_v10  ;;  %v18899_v42 = vadd.f32 %v2847_v23, %v2842_v1  ;;  %v18907_v6 = vadd.f32 %v2848_v55, %v2843_v49  ;;  %v15907_v12 = vld [vmem:[%s24907_s4 + $0x76c] sm:$0xf0]  ;;  %v12115_v10 = vld [vmem:[%s24907_s4 + $0x540] sm:$0xf] }
 0x324   :  { %vm2869_vm11 = vcmp.gt.f32.partialorder %v2853_v53, 0.0  ;;  %vm2870_vm12 = vcmp.gt.f32.partialorder %v2854_v29, 0.0  ;;  %vm2871_vm13 = vcmp.gt.f32.partialorder %v2855_v16, 0.0  ;;  %vm2872_vm14 = vcmp.gt.f32.partialorder %v2856_v11, 0.0  ;;  %v11987_v1 = vld [vmem:[%s24907_s4 + $0x440] sm:$0xf] }
 0x325   :  { %vm2873_vm15 = vcmp.gt.f32.partialorder %v2857_v48, 0.0  ;;  %vm2874_vm1 = vcmp.gt.f32.partialorder %v2858_v39, 0.0  ;;  %vm2875_vm3 = vcmp.gt.f32.partialorder %v2859_v4, 0.0  ;;  %vm2876_vm4 = vcmp.gt.f32.partialorder %v2860_v0, 0.0  ;;  %v15807_v49 = vld [vmem:[%s24907_s4 + $0x44c] sm:$0xf0] }
 0x326   :  { %vm2877_vm5 = vcmp.gt.f32.partialorder %v2861_v14, 0.0  ;;  %vm2878_vm6 = vcmp.gt.f32.partialorder %v2862_v45, 0.0  ;;  %vm2879_vm10 = vcmp.gt.f32.partialorder %v18891_v37, 0.0  ;;  %vm2880_vm9 = vcmp.gt.f32.partialorder %v18893_v61, 0.0 }
 0x327   :  { %vm2881_vm8 = vcmp.gt.f32.partialorder %v18895_v38, 0.0  ;;  %v2885_v54 = vmul.f32 0.2, %v2853_v53  ;;  %v12132_v20 = vor.u32 %v15843_v63, %v12131_v2  ;;  %vm2882_vm2 = vcmp.gt.f32.partialorder %v18897_v18, 0.0  ;;  %v19066_v63 = vld [vmem:[%s24907_s4 + $0x620] sm:$0xf] }
 0x328   :  { %v2886_v8 = vmul.f32 0.2, %v2854_v29  ;;  %v2887_v26 = vmul.f32 0.2, %v2855_v16  ;;  %v12004_v43 = vor.u32 %v15811_v19, %v12003_v22  ;;  %v2888_v30 = vmul.f32 0.2, %v2856_v11 }
 0x329   :  { %v2889_v25 = vmul.f32 0.2, %v2857_v48  ;;  %v2890_v32 = vmul.f32 0.2, %v2858_v39  ;;  %4053 = vmatpush.bf16.msra.mxu3 %v12132_v20  ;;  %vm2883_vm0 = vcmp.gt.f32.partialorder %v18899_v42, 0.0  ;;  %vm2884_vm7 = vcmp.gt.f32.partialorder %v18907_v6, 0.0 }
 0x32a   :  { %v2891_v27 = vmul.f32 0.2, %v2859_v4  ;;  %v2892_v15 = vmul.f32 0.2, %v2860_v0  ;;  %4034 = vmatpush.bf16.msra.mxu1 %v12004_v43  ;;  %v2893_v52 = vmul.f32 0.2, %v2861_v14  ;;  %v18923_v34 = vsel %vm2869_vm11, %v2853_v53, %v2885_v54 }
 0x32b   :  { %v2894_v36 = vmul.f32 0.2, %v2862_v45  ;;  %v2895_v7 = vmul.f32 0.2, %v18891_v37  ;;  %24965 = vst [vmem:[#allocation4_spill] sm:$0xff] %v18923_v34  ;;  %v18929_v47 = vsel %vm2870_vm12, %v2854_v29, %v2886_v8  ;;  %v18932_v51 = vsel %vm2871_vm13, %v2855_v16, %v2887_v26 }
 0x32c   :  { %v2896_v33 = vmul.f32 0.2, %v18893_v61  ;;  %v2897_v3 = vmul.f32 0.2, %v18895_v38  ;;  %v2898_v21 = vmul.f32 0.2, %v18897_v18  ;;  %v18935_v50 = vsel %vm2872_vm14, %v2856_v11, %v2888_v30 }
 0x32d   :  { %24966 = vst [vmem:[#allocation5_spill] sm:$0xff] %v18929_v47  ;;  %v18938_v41 = vsel %vm2873_vm15, %v2857_v48, %v2889_v25  ;;  %v18941_v31 = vsel %vm2874_vm1, %v2858_v39, %v2890_v32  ;;  %v2899_v5 = vmul.f32 0.2, %v18899_v42  ;;  %v2900_v58 = vmul.f32 0.2, %v18907_v6 }
 0x32e   :  { %24967 = vst [vmem:[#allocation6_spill] sm:$0xff] %v18932_v51  ;;  %v18946_v13 = vsel %vm2875_vm3, %v2859_v4, %v2891_v27  ;;  %v18949_v62 = vsel %vm2876_vm4, %v2860_v0, %v2892_v15  ;;  %v18952_v24 = vsel %vm2877_vm5, %v2861_v14, %v2893_v52  ;;  %v18955_v46 = vsel %vm2878_vm6, %v2862_v45, %v2894_v36  ;;  %v19000_v53 = vld [vmem:[%s24907_s4 + $0x640] sm:$0xf]  ;;  %v19005_v29 = vld [vmem:[%s24907_s4 + $0x64c] sm:$0xf0] }
 0x32f   :  { %24968 = vst [vmem:[#allocation11_spill] sm:$0xff] %v18935_v50  ;;  %v2933_v57 = vrot.slane %v18923_v34, 7  ;;  %v2934_v28 = vrot.slane %v18929_v47, 7  ;;  %v2935_v56 = vrot.slane %v18932_v51, 7  ;;  %v2936_v23 = vrot.slane %v18935_v50, 7 }
 0x330   :  { %24969 = vst [vmem:[#allocation13_spill] sm:$0xff] %v18938_v41  ;;  %v2937_v55 = vrot.slane %v18938_v41, 7  ;;  %v2939_v60 = vrot.slane %v18941_v31, 7  ;;  %v18990_v40 = vsel %vm2879_vm10, %v18891_v37, %v2895_v7  ;;  %v18995_v44 = vsel %vm2880_vm9, %v18893_v61, %v2896_v33  ;;  %v19010_v16 = vld [vmem:[%s24907_s4 + $0x740] sm:$0xf] }
 0x331   :  { %24970 = vst [vmem:[#allocation7_spill] sm:$0xff] %v18941_v31  ;;  %v19015_v11 = vld [vmem:[%s24907_s4 + $0x74c] sm:$0xf0]  ;;  %v19020_v48 = vsel %vm2881_vm8, %v18895_v38, %v2897_v3  ;;  %v19025_v39 = vsel %vm2882_vm2, %v18897_v18, %v2898_v21  ;;  %v19030_v4 = vsel %vm2883_vm0, %v18899_v42, %v2899_v5  ;;  %v19035_v0 = vsel %vm2884_vm7, %v18907_v6, %v2900_v58  ;;  %v19040_v14 = vld [vmem:[%s24907_s4 + $0x520] sm:$0xf] }
 0x332   :  { %24971 = vst [vmem:[#allocation8_spill] sm:$0xff] %v18946_v13  ;;  %v19045_v45 = vld [vmem:[%s24907_s4 + $0x52c] sm:$0xf0]  ;;  %v19050_v37 = vld [vmem:[%s24907_s4 + $0x420] sm:$0xf]  ;;  %v2941_v38 = vrot.slane %v18946_v13, 7  ;;  %v12260_v54 = vor.u32 %v15875_v35, %v12259_v9  ;;  %v12388_v20 = vor.u32 %v15907_v12, %v12387_v59  ;;  %v12116_v27 = vor.u32 %v15839_v17, %v12115_v10 }
 0x333   :  { %24972 = vst [vmem:[#allocation10_spill] sm:$0xff] %v18949_v62  ;;  %v19055_v61 = vld [vmem:[%s24907_s4 + $0x42c] sm:$0xf0]  ;;  %v2943_v18 = vrot.slane %v18949_v62, 7  ;;  %v2945_v42 = vrot.slane %v18952_v24, 7  ;;  %v2946_v2 = vrot.slane %v18955_v46, 7  ;;  %v11988_v15 = vor.u32 %v15807_v49, %v11987_v1 }
 0x334   :  { %24973 = vst [vmem:[#allocation14_spill] sm:$0xff] %v18952_v24  ;;  %v19071_v6 = vld [vmem:[%s24907_s4 + $0x62c] sm:$0xf0]  ;;  %vm24981_vm0 = vcmask 1040384   ;;  %v19084_v8 = vld [vmem:[%s24907_s4 + $0x720] sm:$0xf]  ;;  %4072 = vmatpush.bf16.msra.mxu0 %v12260_v54  ;;  %4091 = vmatpush.bf16.msra.mxu2 %v12388_v20  ;;  %v12244_v5 = vor.u32 %v19005_v29, %v19000_v53  ;;  %v12372_v58 = vor.u32 %v19015_v11, %v19010_v16 }
 0x335   :  { %24974 = vst [vmem:[#allocation9_spill] sm:$0xff] %v18955_v46  ;;  %v19074_v22 = vsel %vm24981_vm0, %v2933_v57, %v2937_v55  ;;  %vm24982_vm2 = vmmov %vm24981_vm0  ;;  %v19089_v26 = vld [vmem:[%s24907_s4 + $0x72c] sm:$0xf0]  ;;  %v19094_v43 = vld [vmem:[%s24907_s4 + $0x500] sm:$0xf]  ;;  %v2947_v25 = vrot.slane %v18990_v40, 7  ;;  %4054 = vmatpush.bf16.msra.mxu3 %v12116_v27  ;;  %4035 = vmatpush.bf16.msra.mxu1 %v11988_v15  ;;  %v12228_v16 = vor.u32 %v19071_v6, %v19066_v63 }
 0x336   :  { %24975 = vst [vmem:[#allocation12_spill] sm:$0xff] %v18990_v40  ;;  %v19077_v19 = vsel %vm24982_vm2, %v2934_v28, %v2939_v60  ;;  %v19099_v30 = vld [vmem:[%s24907_s4 + $0x50c] sm:$0xf0]  ;;  %v2948_v32 = vrot.slane %v18995_v44, 7  ;;  %v19106_v52 = vld [vmem:[%s24907_s4 + $0x400] sm:$0xf]  ;;  %vm24983_vm7 = vmmov %vm24981_vm0 }
 0x337   :  { %24976 = vst [vmem:[#allocation3_spill] sm:$0xff] %v18995_v44  ;;  %v19111_v36 = vld [vmem:[%s24907_s4 + $0x40c] sm:$0xf0]  ;;  %v19116_v7 = vld [vmem:[%s24907_s4 + $0x600] sm:$0xf]  ;;  %v2949_v3 = vrot.slane %v19020_v48, 7  ;;  %v19178_v53 = vsel %vm24983_vm7, %v2935_v56, %v2941_v38  ;;  %vm24984_vm8 = vmmov %vm24981_vm0 }
 0x338   :  { %2981 = vst [vmem:[#allocation2] sm:$0xfe] %v2933_v57  ;;  %v19121_v33 = vld [vmem:[%s24907_s4 + $0x60c] sm:$0xf0]  ;;  %v2951_v21 = vrot.slane %v19025_v39, 7  ;;  %v2953_v59 = vrot.slane %v19030_v4, 7  ;;  %v19183_v29 = vsel %vm24984_vm8, %v2936_v23, %v2943_v18  ;;  %4073 = vmatpush.bf16.msra.mxu0 %v12244_v5  ;;  %4092 = vmatpush.bf16.msra.mxu2 %v12372_v58  ;;  %v11956_v6 = vor.u32 %v19111_v36, %v19106_v52  ;;  %vm24992_vm3 = vmmov %vm24981_vm0 }
 0x339   :  { %24977 = vst [vmem:[#allocation15_spill] sm:$0xff] %v19020_v48  ;;  %v19132_v57 = vld [vmem:[%s24907_s4 + $0x700] sm:$0xf]  ;;  %v19142_v9 = vld [vmem:[%s24907_s4 + $0x5e4] sm:$0xf]  ;;  %v2955_v12 = vrot.slane %v19035_v0, 7  ;;  %v12212_v54 = vor.u32 %v19121_v33, %v19116_v7  ;;  %vm24993_vm4 = vmmov %vm24981_vm0 }
 0x33a   :  { %24978 = vst [vmem:[#allocation16_spill] sm:$0xff] %v19025_v39  ;;  %v19147_v35 = vld [vmem:[%s24907_s4 + $0x5f0] sm:$0xf0]  ;;  %v19158_v10 = vld [vmem:[%s24907_s4 + $0x4e4] sm:$0xf]  ;;  %v3204_v27 = vrot.slane %v19178_v53, 1  ;;  %vm24995_vm6 = vmmov %vm24981_vm0 }
 0x33b   :  { %24979 = vst [vmem:[#allocation17_spill] sm:$0xff] %v19030_v4  ;;  %v19163_v17 = vld [vmem:[%s24907_s4 + $0x4f0] sm:$0xf0]  ;;  %v19168_v1 = vld [vmem:[%s24907_s4 + $0x6e4] sm:$0xf]  ;;  %v12200_v52 = vor.u32 %v19142_v9, %v19147_v35  ;;  %v3207_v33 = vrot.slane %v19183_v29, 1  ;;  %vm24996_vm10 = vmmov %vm24981_vm0 }
 0x33c   :  { %24980 = vst [vmem:[#allocation18_spill] sm:$0xff] %v19035_v0  ;;  %v19173_v49 = vld [vmem:[%s24907_s4 + $0x6f0] sm:$0xf0]  ;;  %v12072_v5 = vor.u32 %v19158_v10, %v19163_v17  ;;  %vm24985_vm9 = vcmask 1046528   ;;  %4074 = vmatpush.bf16.msra.mxu0 %v12228_v16  ;;  %v13331_v39 = vld [vmem:[%s24907_s4 + $0x9c0] sm:$0xf] }
 0x33d   :  { %2982 = vst [vmem:[#allocation2 + $0x8] sm:$0xfe] %v2934_v28  ;;  %v19137_v28 = vld [vmem:[%s24907_s4 + $0x70c] sm:$0xf0]  ;;  %v12328_v58 = vor.u32 %v19168_v1, %v19173_v49  ;;  %v12053_v10 = vld [vmem:[%s24907_s4 + $0x4d0] sm:$0xf0]  ;;  %vm24986_vm11 = vmmov %vm24985_vm9 }
 0x33e   :  { %2983 = vst [vmem:[#allocation2 + $0x10] sm:$0xfe] %v2935_v56  ;;  %v19195_v56 = vld [vmem:[%s24907_s4 + $0x7f0] sm:$0xf0]  ;;  %vm24987_vm12 = vmmov %vm24985_vm9  ;;  %v15983_v48 = vld [vmem:[%s24907_s4 + $0x9cc] sm:$0xf0] }
 0x33f   :  { %2984 = vst [vmem:[#allocation2 + $0x18] sm:$0xfe] %v2936_v23  ;;  %v3157_v11 = vld [vmem:[#allocation2] sm:$0xfe]  ;;  %vm24988_vm13 = vmmov %vm24985_vm9 }
 0x340   :  { %2989 = vst [vmem:[#allocation2 + $0x40] sm:$0x1] %v2937_v55  ;;  %v12100_v55 = vor.u32 %v19045_v45, %v19040_v14  ;;  %v19190_v14 = vld [vmem:[%s24907_s4 + $0x7e4] sm:$0xf]  ;;  %v19205_v45 = vld [vmem:[%s24907_s4 + $0x5d0] sm:$0xf0]  ;;  %vm24989_vm14 = vmmov %vm24985_vm9  ;;  %4075 = vmatpush.bf16.msra.mxu0 %v12212_v54 }
 0x341   :  { %2990 = vst [vmem:[#allocation2 + $0x48] sm:$0x1] %v2939_v60  ;;  %v11972_v60 = vor.u32 %v19055_v61, %v19050_v37  ;;  %v19200_v23 = vld [vmem:[%s24907_s4 + $0x5c4] sm:$0xf]  ;;  %v12356_v37 = vor.u32 %v19089_v26, %v19084_v8  ;;  %v12084_v61 = vor.u32 %v19099_v30, %v19094_v43  ;;  %v3201_v8 = vrot.slane %v19077_v19, 1  ;;  %vm24990_vm15 = vmmov %vm24985_vm9 }
 0x342   :  { %2991 = vst [vmem:[#allocation2 + $0x50] sm:$0x1] %v2941_v38  ;;  %v3197_v38 = vrot.slane %v3157_v11, 1  ;;  %4055 = vmatpush.bf16.msra.mxu3 %v12100_v55  ;;  %v12340_v43 = vor.u32 %v19137_v28, %v19132_v57  ;;  %v12456_v35 = vor.u32 %v19190_v14, %v19195_v56  ;;  %v12184_v55 = vor.u32 %v19200_v23, %v19205_v45  ;;  %vm24991_vm1 = vmmov %vm24985_vm9 }
 0x343   :  { %2992 = vst [vmem:[#allocation2 + $0x58] sm:$0x1] %v2943_v18  ;;  %v3198_v18 = vrot.slane %v19074_v22, 1  ;;  %4036 = vmatpush.bf16.msra.mxu1 %v11972_v60  ;;  %v15821_v60 = vld [vmem:[%s24907_s4 + $0x4c4] sm:$0xf]  ;;  %4093 = vmatpush.bf16.msra.mxu2 %v12356_v37  ;;  %vm24994_vm5 = vmmov %vm24991_vm1 }
 0x344   :  { %2993 = vst [vmem:[#allocation2 + $0x60] sm:$0xfe] %v2945_v42  ;;  %v3158_v63 = vld [vmem:[#allocation2 + $0x8] sm:$0xfe]  ;;  %4144 = vmatpush.bf16.msrb.mxu0 %v12328_v58  ;;  %v15913_v58 = vld [vmem:[%s24907_s4 + $0x7a4] sm:$0xf]  ;;  %vm24997_vm0 = vmmov %vm24991_vm1 }
 0x345   :  { %2994 = vst [vmem:[#allocation2 + $0x68] sm:$0xfe] %v2946_v2  ;;  %v3200_v20 = vrot.slane %v3158_v63, 1  ;;  %v3159_v26 = vld [vmem:[#allocation2 + $0x10] sm:$0xfe]  ;;  %v3199_v57 = vsel %vm24985_vm9, %v3197_v38, %v3198_v18  ;;  %vm24998_vm2 = vmmov %vm24997_vm0 }
 0x346   :  { %2995 = vst [vmem:[#allocation2 + $0x70] sm:$0xfe] %v2947_v25  ;;  %v3203_v30 = vrot.slane %v3159_v26, 1  ;;  %v3160_v15 = vld [vmem:[#allocation2 + $0x18] sm:$0xfe]  ;;  %4056 = vmatpush.bf16.msra.mxu3 %v12084_v61  ;;  %v19281_v26 = vsel %vm24992_vm3, %v2945_v42, %v2949_v3  ;;  %vm24999_vm7 = vmmov %vm24997_vm0 }
 0x347   :  { %2996 = vst [vmem:[#allocation2 + $0x78] sm:$0xfe] %v2948_v32  ;;  %v3161_v36 = vld [vmem:[#allocation2 + $0x40] sm:$0x1]  ;;  %v3206_v7 = vrot.slane %v3160_v15, 1  ;;  %v3202_v17 = vsel %vm24986_vm11, %v3200_v20, %v3201_v8  ;;  %4037 = vmatpush.bf16.msra.mxu1 %v11956_v6  ;;  %4094 = vmatpush.bf16.msra.mxu2 %v12340_v43  ;;  %vm25000_vm8 = vmmov %vm24997_vm0 }
 0x348   :  { %3001 = vst [vmem:[#allocation2 + $0xa0] sm:$0x1] %v2949_v3  ;;  %v3209_v28 = vrot.slane %v3161_v36, 1  ;;  %v3162_v9 = vld [vmem:[#allocation2 + $0x48] sm:$0x1]  ;;  %v3205_v11 = vsel %vm24987_vm12, %v3203_v30, %v3204_v27  ;;  %v19288_v30 = vsel %vm24993_vm4, %v2946_v2, %v2951_v21  ;;  %vm25001_vm9 = vmmov %vm24997_vm0 }
 0x349   :  { %3002 = vst [vmem:[#allocation2 + $0xa8] sm:$0x1] %v2951_v21  ;;  %v3211_v1 = vrot.slane %v3162_v9, 1  ;;  %v3163_v49 = vld [vmem:[#allocation2 + $0x50] sm:$0x1]  ;;  %v3208_v45 = vsel %vm24989_vm14, %v3206_v7, %v3207_v33  ;;  %vm25002_vm11 = vmmov %vm24997_vm0 }
 0x34a   :  { %3003 = vst [vmem:[#allocation2 + $0xb0] sm:$0x1] %v2953_v59  ;;  %v3210_v14 = vsel %vm24988_vm13, %v3198_v18, %v3209_v28  ;;  %v3213_v56 = vrot.slane %v3163_v49, 1  ;;  %v3164_v23 = vld [vmem:[#allocation2 + $0x58] sm:$0x1]  ;;  %4125 = vmatpush.bf16.msrb.mxu3 %v12200_v52  ;;  %v12056_v52 = vor.u32 %v15821_v60, %v12053_v10  ;;  %vm25003_vm12 = vmmov %vm24997_vm0 }
 0x34b   :  { %3004 = vst [vmem:[#allocation2 + $0xb8] sm:$0x1] %v2955_v12  ;;  %v19258_v16 = vpack.c.bf16 %v3210_v14, %v3199_v57  ;;  %v3212_v37 = vsel %vm24990_vm15, %v3201_v8, %v3211_v1  ;;  %v3215_v38 = vrot.slane %v3164_v23, 1  ;;  %4106 = vmatpush.bf16.msrb.mxu1 %v12072_v5  ;;  %v15885_v61 = vld [vmem:[%s24907_s4 + $0x6c4] sm:$0xf]  ;;  %4163 = vmatpush.bf16.msrb.mxu2 %v12456_v35  ;;  %v3218_v5 = vrot.slane %v19281_v26, 1  ;;  %vm25004_vm13 = vmmov %vm24997_vm0 }
 0x34c   :  { %v19264_v63 = vpack.c.bf16 %v3212_v37, %v3202_v17  ;;  %v3214_v18 = vsel %vm24991_vm1, %v3204_v27, %v3213_v56  ;;  %v12309_v6 = vld [vmem:[%s24907_s4 + $0x6d0] sm:$0xf0]  ;;  %v15917_v20 = vld [vmem:[%s24907_s4 + $0x7c4] sm:$0xf]  ;;  %v3221_v57 = vrot.slane %v19288_v30, 1  ;;  %v19333_v35 = vsel %vm24995_vm6, %v2947_v25, %v2953_v59 }
 0x34d   :  { %v12437_v8 = vld [vmem:[%s24907_s4 + $0x7d0] sm:$0xf0]  ;;  %v19290_v27 = vpack.c.bf16 %v3214_v18, %v3205_v11  ;;  %v3216_v15 = vsel %vm24994_vm5, %v3207_v33, %v3215_v38  ;;  %v15849_v36 = vld [vmem:[%s24907_s4 + $0x5a4] sm:$0xf]  ;;  %4038 = vmatmul.bf16.vlgmr.msra.gmra.mxu1 %v19258_v16  ;;  %v12312_v54 = vor.u32 %v15885_v61, %v12309_v6  ;;  %v3166_v38 = vld [vmem:[#allocation2 + $0x68] sm:$0xfe] }
 0x34e   :  { %4057 = vmatmul.bf16.vlgmr.msra.gmra.mxu3 %v19264_v63  ;;  %v19298_v42 = vpack.c.bf16 %v3216_v15, %v3208_v45  ;;  %v12165_v2 = vld [vmem:[%s24907_s4 + $0x5b0] sm:$0xf0]  ;;  %v15817_v3 = vld [vmem:[%s24907_s4 + $0x4a4] sm:$0xf]  ;;  %v12440_v43 = vor.u32 %v15917_v20, %v12437_v8  ;;  %v3224_v18 = vrot.slane %v19333_v35, 1  ;;  %v3220_v20 = vrot.slane %v3166_v38, 1 }
 0x34f   :  { %v12037_v21 = vld [vmem:[%s24907_s4 + $0x4b0] sm:$0xf0]  ;;  %v15881_v7 = vld [vmem:[%s24907_s4 + $0x6a4] sm:$0xf]  ;;  %4076 = vmatmul.bf16.vlgmr.msra.gmra.mxu0 %v19290_v27  ;;  %4126 = vmatpush.bf16.msrb.mxu3 %v12184_v55  ;;  %v12168_v60 = vor.u32 %v15849_v36, %v12165_v2  ;;  %v3169_v56 = vld [vmem:[#allocation2 + $0xa0] sm:$0x1] }
 0x350   :  { %v12293_v33 = vld [vmem:[%s24907_s4 + $0x6b0] sm:$0xf0]  ;;  %4095 = vmatmul.bf16.vlgmr.msra.gmra.mxu2 %v19298_v42  ;;  %v15845_v9 = vld [vmem:[%s24907_s4 + $0x584] sm:$0xf]  ;;  %4107 = vmatpush.bf16.msrb.mxu1 %v12056_v52  ;;  %v12040_v10 = vor.u32 %v15817_v3, %v12037_v21  ;;  %v3170_v61 = vld [vmem:[#allocation2 + $0xa8] sm:$0x1]  ;;  %v19362_v52 = vsel %vm24996_vm10, %v2948_v32, %v2955_v12 }
 0x351   :  { %v12421_v28 = vld [vmem:[%s24907_s4 + $0x7b0] sm:$0xf0]  ;;  %v15813_v1 = vld [vmem:[%s24907_s4 + $0x484] sm:$0xf]  ;;  %4145 = vmatpush.bf16.msrb.mxu0 %v12312_v54  ;;  %4164 = vmatpush.bf16.msrb.mxu2 %v12440_v43  ;;  %v12296_v23 = vor.u32 %v15881_v7, %v12293_v33  ;;  %v3229_v6 = vrot.slane %v3169_v56, 1  ;;  %v3231_v3 = vrot.slane %v3170_v61, 1 }
 0x352   :  { %v12149_v17 = vld [vmem:[%s24907_s4 + $0x590] sm:$0xf0]  ;;  %v15877_v25 = vld [vmem:[%s24907_s4 + $0x684] sm:$0xf]  ;;  %v12424_v45 = vor.u32 %v15913_v58, %v12421_v28  ;;  %v3171_v15 = vld [vmem:[#allocation2 + $0xb0] sm:$0x1] }
 0x353   :  { %v12021_v49 = vld [vmem:[%s24907_s4 + $0x490] sm:$0xf0]  ;;  %v15909_v55 = vld [vmem:[%s24907_s4 + $0x784] sm:$0xf]  ;;  %4127 = vmatpush.bf16.msrb.mxu3 %v12168_v60  ;;  %v12152_v36 = vor.u32 %v15845_v9, %v12149_v17  ;;  %v3168_v54 = vld [vmem:[#allocation2 + $0x78] sm:$0xfe] }
 0x354   :  { %v12277_v59 = vld [vmem:[%s24907_s4 + $0x690] sm:$0xf0]  ;;  %v3165_v14 = vld [vmem:[#allocation2 + $0x60] sm:$0xfe]  ;;  %4108 = vmatpush.bf16.msrb.mxu1 %v12040_v10  ;;  %v12024_v2 = vor.u32 %v15813_v1, %v12021_v49  ;;  %v3172_v43 = vld [vmem:[#allocation2 + $0xb8] sm:$0x1]  ;;  %v3230_v49 = vsel %vm24998_vm2, %v3218_v5, %v3229_v6 }
 0x355   :  { %v12405_v11 = vld [vmem:[%s24907_s4 + $0x790] sm:$0xf0]  ;;  %v3217_v37 = vrot.slane %v3165_v14, 1  ;;  %v3233_v7 = vrot.slane %v3171_v15, 1  ;;  %v3226_v33 = vrot.slane %v3168_v54, 1  ;;  %4146 = vmatpush.bf16.msrb.mxu0 %v12296_v23  ;;  %4165 = vmatpush.bf16.msrb.mxu2 %v12424_v45  ;;  %v12280_v32 = vor.u32 %v15877_v25, %v12277_v59 }
 0x356   :  { %v3167_v8 = vld [vmem:[#allocation2 + $0x70] sm:$0xfe]  ;;  %v15841_v58 = vld [vmem:[%s24907_s4 + $0x564] sm:$0xf]  ;;  %v12408_v12 = vor.u32 %v15909_v55, %v12405_v11  ;;  %v3227_v9 = vrot.slane %v19362_v52, 1  ;;  %v3235_v60 = vrot.slane %v3172_v43, 1  ;;  %v3222_v14 = vsel %vm24999_vm7, %v3220_v20, %v3221_v57 }
 0x357   :  { %v3223_v21 = vrot.slane %v3167_v8, 1  ;;  %v12133_v28 = vld [vmem:[%s24907_s4 + $0x570] sm:$0xf0]  ;;  %v15809_v10 = vld [vmem:[%s24907_s4 + $0x464] sm:$0xf]  ;;  %v3219_v1 = vsel %vm24997_vm0, %v3217_v37, %v3218_v5  ;;  %4128 = vmatpush.bf16.msrb.mxu3 %v12152_v36  ;;  %v3232_v11 = vsel %vm25000_vm8, %v3221_v57, %v3231_v3  ;;  %v3234_v38 = vsel %vm25002_vm11, %v3224_v18, %v3233_v7 }
 0x358   :  { %v12005_v17 = vld [vmem:[%s24907_s4 + $0x470] sm:$0xf0]  ;;  %v15873_v25 = vld [vmem:[%s24907_s4 + $0x664] sm:$0xf]  ;;  %4109 = vmatpush.bf16.msrb.mxu1 %v12024_v2  ;;  %v12136_v56 = vor.u32 %v15841_v58, %v12133_v28  ;;  %v3228_v61 = vsel %vm25003_vm12, %v3226_v33, %v3227_v9  ;;  %v3236_v8 = vsel %vm25004_vm13, %v3227_v9, %v3235_v60  ;;  %v19412_v2 = vpack.c.bf16 %v3230_v49, %v3219_v1 }
 0x359   :  { %v12261_v59 = vld [vmem:[%s24907_s4 + $0x670] sm:$0xf0]  ;;  %v15905_v55 = vld [vmem:[%s24907_s4 + $0x764] sm:$0xf]  ;;  %v12008_v5 = vor.u32 %v15809_v10, %v12005_v17  ;;  %v3225_v37 = vsel %vm25001_vm9, %v3223_v21, %v3224_v18  ;;  %4147 = vmatpush.bf16.msrb.mxu0 %v12280_v32  ;;  %4166 = vmatpush.bf16.msrb.mxu2 %v12408_v12  ;;  %v19414_v3 = vpack.c.bf16 %v3232_v11, %v3222_v14  ;;  %vm25009_vm15 = vcmask 1045504  }
 0x35a   :  { %v12389_v23 = vld [vmem:[%s24907_s4 + $0x770] sm:$0xf0]  ;;  %v15837_v45 = vld [vmem:[%s24907_s4 + $0x544] sm:$0xf]  ;;  %v12264_v15 = vor.u32 %v15873_v25, %v12261_v59  ;;  %v19430_v28 = vpack.c.bf16 %v3234_v38, %v3225_v37  ;;  %v19432_v32 = vpack.c.bf16 %v3236_v8, %v3228_v61  ;;  %v12203_v38 = vld [vmem:[%s24907_s4 + $0x5e8] sm:$0xf] }
 0x35b   :  { %v12117_v57 = vld [vmem:[%s24907_s4 + $0x550] sm:$0xf0]  ;;  %v15805_v6 = vld [vmem:[%s24907_s4 + $0x444] sm:$0xf]  ;;  %v12392_v18 = vor.u32 %v15905_v55, %v12389_v23  ;;  %4129 = vmatpush.bf16.msrb.mxu3 %v12136_v56  ;;  %v15828_v8 = vld [vmem:[%s24907_s4 + $0x4f4] sm:$0xf0] }
 0x35c   :  { %v11989_v20 = vld [vmem:[%s24907_s4 + $0x450] sm:$0xf0]  ;;  %v15869_v36 = vld [vmem:[%s24907_s4 + $0x644] sm:$0xf]  ;;  %4110 = vmatpush.bf16.msrb.mxu1 %v12008_v5  ;;  %v12120_v7 = vor.u32 %v15837_v45, %v12117_v57  ;;  %vm25012_vm1 = vmmov %vm25009_vm15 }
 0x35d   :  { %v12245_v21 = vld [vmem:[%s24907_s4 + $0x650] sm:$0xf0]  ;;  %v15901_v54 = vld [vmem:[%s24907_s4 + $0x744] sm:$0xf]  ;;  %v11992_v33 = vor.u32 %v15805_v6, %v11989_v20  ;;  %4043 = vmatmul.bf16.gmra.mxu1 %v19412_v2  ;;  %4148 = vmatpush.bf16.msrb.mxu0 %v12264_v15  ;;  %v15860_v6 = vld [vmem:[%s24907_s4 + $0x5f4] sm:$0xf0] }
 0x35e   :  { %v12373_v43 = vld [vmem:[%s24907_s4 + $0x750] sm:$0xf0]  ;;  %v15833_v58 = vld [vmem:[%s24907_s4 + $0x524] sm:$0xf]  ;;  %4062 = vmatmul.bf16.gmra.mxu3 %v19414_v3  ;;  %4167 = vmatpush.bf16.msrb.mxu2 %v12392_v18  ;;  %v12248_v10 = vor.u32 %v15869_v36, %v12245_v21  ;;  %v12075_v20 = vld [vmem:[%s24907_s4 + $0x4e8] sm:$0xf] }
 0x35f   :  { %v12101_v12 = vld [vmem:[%s24907_s4 + $0x530] sm:$0xf0]  ;;  %v15801_v9 = vld [vmem:[%s24907_s4 + $0x424] sm:$0xf]  ;;  %v12376_v17 = vor.u32 %v15901_v54, %v12373_v43  ;;  %4081 = vmatmul.bf16.gmra.mxu0 %v19430_v28  ;;  %4130 = vmatpush.bf16.msrb.mxu3 %v12120_v7  ;;  %v12331_v36 = vld [vmem:[%s24907_s4 + $0x6e8] sm:$0xf] }
 0x360   :  { %v11973_v60 = vld [vmem:[%s24907_s4 + $0x430] sm:$0xf0]  ;;  %v15865_v1 = vld [vmem:[%s24907_s4 + $0x624] sm:$0xf]  ;;  %4100 = vmatmul.bf16.gmra.mxu2 %v19432_v32  ;;  %4111 = vmatpush.bf16.msrb.mxu1 %v11992_v33  ;;  %v12104_v55 = vor.u32 %v15833_v58, %v12101_v12  ;;  %v15892_v43 = vld [vmem:[%s24907_s4 + $0x6f4] sm:$0xf0]  ;;  %v12204_v58 = vor.u32 %v15860_v6, %v12203_v38  ;;  %v12076_v12 = vor.u32 %v15828_v8, %v12075_v20 }
 0x361   :  { %v12229_v49 = vld [vmem:[%s24907_s4 + $0x630] sm:$0xf0]  ;;  %v15897_v14 = vld [vmem:[%s24907_s4 + $0x724] sm:$0xf]  ;;  %v11976_v11 = vor.u32 %v15801_v9, %v11973_v60  ;;  %4149 = vmatpush.bf16.msrb.mxu0 %v12248_v10  ;;  %v12459_v7 = vld [vmem:[%s24907_s4 + $0x7e8] sm:$0xf] }
 0x362   :  { %v12357_v25 = vld [vmem:[%s24907_s4 + $0x730] sm:$0xf0]  ;;  %v15829_v59 = vld [vmem:[%s24907_s4 + $0x504] sm:$0xf]  ;;  %4168 = vmatpush.bf16.msrb.mxu2 %v12376_v17  ;;  %v12232_v61 = vor.u32 %v15865_v1, %v12229_v49  ;;  %v15924_v33 = vld [vmem:[%s24907_s4 + $0x7f4] sm:$0xf0]  ;;  %v12332_v17 = vor.u32 %v15892_v43, %v12331_v36 }
 0x363   :  { %v12085_v56 = vld [vmem:[%s24907_s4 + $0x510] sm:$0xf0]  ;;  %v15797_v5 = vld [vmem:[%s24907_s4 + $0x404] sm:$0xf]  ;;  %v12360_v57 = vor.u32 %v15897_v14, %v12357_v25  ;;  %4131 = vmatpush.bf16.msrb.mxu3 %v12104_v55  ;;  %v12187_v10 = vld [vmem:[%s24907_s4 + $0x5c8] sm:$0xf]  ;;  %v12460_v1 = vor.u32 %v15924_v33, %v12459_v7 }
 0x364   :  { %v11957_v23 = vld [vmem:[%s24907_s4 + $0x410] sm:$0xf0]  ;;  %v15861_v45 = vld [vmem:[%s24907_s4 + $0x604] sm:$0xf]  ;;  %4112 = vmatpush.bf16.msrb.mxu1 %v11976_v11  ;;  %v12088_v21 = vor.u32 %v15829_v59, %v12085_v56  ;;  %v15856_v49 = vld [vmem:[%s24907_s4 + $0x5d4] sm:$0xf0] }
 0x365   :  { %v12213_v37 = vld [vmem:[%s24907_s4 + $0x610] sm:$0xf0]  ;;  %v15893_v15 = vld [vmem:[%s24907_s4 + $0x704] sm:$0xf]  ;;  %v11960_v54 = vor.u32 %v15797_v5, %v11957_v23  ;;  %4150 = vmatpush.bf16.msrb.mxu0 %v12232_v61  ;;  %v12059_v14 = vld [vmem:[%s24907_s4 + $0x4c8] sm:$0xf]  ;;  %v12188_v5 = vor.u32 %v15856_v49, %v12187_v10 }
 0x366   :  { %v12341_v18 = vld [vmem:[%s24907_s4 + $0x710] sm:$0xf0]  ;;  %4169 = vmatpush.bf16.msrb.mxu2 %v12360_v57  ;;  %v12216_v9 = vor.u32 %v15861_v45, %v12213_v37  ;;  %v15824_v25 = vld [vmem:[%s24907_s4 + $0x4d4] sm:$0xf0]  ;;  %v12315_v59 = vld [vmem:[%s24907_s4 + $0x6c8] sm:$0xf] }
 0x367   :  { %v12344_v60 = vor.u32 %v15893_v15, %v12341_v18  ;;  %4132 = vmatpush.bf16.msrb.mxu3 %v12088_v21  ;;  %v15888_v55 = vld [vmem:[%s24907_s4 + $0x6d4] sm:$0xf0]  ;;  %v12443_v11 = vld [vmem:[%s24907_s4 + $0x7c8] sm:$0xf]  ;;  %v12060_v23 = vor.u32 %v15824_v25, %v12059_v14  ;;  %vm25015_vm3 = vmmov %vm25012_vm1 }
 0x368   :  { %4113 = vmatpush.bf16.msrb.mxu1 %v11960_v54  ;;  %v15920_v56 = vld [vmem:[%s24907_s4 + $0x7d4] sm:$0xf0]  ;;  %v12171_v45 = vld [vmem:[%s24907_s4 + $0x5a8] sm:$0xf]  ;;  %v12316_v57 = vor.u32 %v15888_v55, %v12315_v59  ;;  %vm25017_vm4 = vmmov %vm25012_vm1 }
 0x369   :  { %4151 = vmatpush.bf16.msrb.mxu0 %v12216_v9  ;;  %v15852_v37 = vld [vmem:[%s24907_s4 + $0x5b4] sm:$0xf0]  ;;  %v12043_v38 = vld [vmem:[%s24907_s4 + $0x4a8] sm:$0xf]  ;;  %v12444_v6 = vor.u32 %v15920_v56, %v12443_v11  ;;  %vm25019_vm5 = vmmov %vm25012_vm1 }
 0x36a   :  { %4170 = vmatpush.bf16.msrb.mxu2 %v12344_v60  ;;  %v15820_v61 = vld [vmem:[%s24907_s4 + $0x4b4] sm:$0xf0]  ;;  %v12299_v20 = vld [vmem:[%s24907_s4 + $0x6a8] sm:$0xf]  ;;  %v12172_v36 = vor.u32 %v15852_v37, %v12171_v45  ;;  %vm25021_vm6 = vmmov %vm25012_vm1 }
 0x36b   :  { %4201 = vmatpush.bf16.msra.mxu3 %v12204_v58  ;;  %v15884_v8 = vld [vmem:[%s24907_s4 + $0x6b4] sm:$0xf0]  ;;  %v12427_v15 = vld [vmem:[%s24907_s4 + $0x7a8] sm:$0xf]  ;;  %v12044_v21 = vor.u32 %v15820_v61, %v12043_v38  ;;  %vm25022_vm10 = vmmov %vm25012_vm1 }
 0x36c   :  { %4182 = vmatpush.bf16.msra.mxu1 %v12076_v12  ;;  %v15916_v18 = vld [vmem:[%s24907_s4 + $0x7b4] sm:$0xf0]  ;;  %v12155_v54 = vld [vmem:[%s24907_s4 + $0x588] sm:$0xf]  ;;  %v12300_v58 = vor.u32 %v15884_v8, %v12299_v20  ;;  %vm25023_vm0 = vmmov %vm25012_vm1 }
 0x36d   :  { %4220 = vmatpush.bf16.msra.mxu0 %v12332_v17  ;;  %4114 = vmatmul.bf16.vlgmr.msrb.gmra.mxu1 %v19258_v16  ;;  %v15848_v43 = vld [vmem:[%s24907_s4 + $0x594] sm:$0xf0]  ;;  %v12027_v7 = vld [vmem:[%s24907_s4 + $0x488] sm:$0xf]  ;;  %v12428_v12 = vor.u32 %v15916_v18, %v12427_v15  ;;  %vm25024_vm2 = vmmov %vm25023_vm0 }
 0x36e   :  { %4239 = vmatpush.bf16.msra.mxu2 %v12460_v1  ;;  %4133 = vmatmul.bf16.vlgmr.msrb.gmra.mxu3 %v19264_v63  ;;  %v15816_v33 = vld [vmem:[%s24907_s4 + $0x494] sm:$0xf0]  ;;  %v12283_v9 = vld [vmem:[%s24907_s4 + $0x688] sm:$0xf]  ;;  %v12156_v1 = vor.u32 %v15848_v43, %v12155_v54  ;;  %vm25026_vm7 = vmmov %vm25023_vm0 }
 0x36f   :  { %4202 = vmatpush.bf16.msra.mxu3 %v12188_v5  ;;  %4152 = vmatmul.bf16.vlgmr.msrb.gmra.mxu0 %v19290_v27  ;;  %v15880_v60 = vld [vmem:[%s24907_s4 + $0x694] sm:$0xf0]  ;;  %v12411_v10 = vld [vmem:[%s24907_s4 + $0x788] sm:$0xf]  ;;  %v12028_v49 = vor.u32 %v15816_v33, %v12027_v7  ;;  %vm25029_vm8 = vmmov %vm25023_vm0 }
 0x370   :  { %4183 = vmatpush.bf16.msra.mxu1 %v12060_v23  ;;  %4171 = vmatmul.bf16.vlgmr.msrb.gmra.mxu2 %v19298_v42  ;;  %v15912_v17 = vld [vmem:[%s24907_s4 + $0x794] sm:$0xf0]  ;;  %v12139_v14 = vld [vmem:[%s24907_s4 + $0x568] sm:$0xf]  ;;  %v12284_v11 = vor.u32 %v15880_v60, %v12283_v9  ;;  %vm25031_vm9 = vmmov %vm25023_vm0 }
 0x371   :  { %4221 = vmatpush.bf16.msra.mxu0 %v12316_v57  ;;  %v15844_v25 = vld [vmem:[%s24907_s4 + $0x574] sm:$0xf0]  ;;  %v12011_v59 = vld [vmem:[%s24907_s4 + $0x468] sm:$0xf]  ;;  %v12412_v56 = vor.u32 %v15912_v17, %v12411_v10  ;;  %vm25032_vm11 = vmmov %vm25023_vm0 }
 0x372   :  { %4240 = vmatpush.bf16.msra.mxu2 %v12444_v6  ;;  %v15812_v55 = vld [vmem:[%s24907_s4 + $0x474] sm:$0xf0]  ;;  %v12267_v5 = vld [vmem:[%s24907_s4 + $0x668] sm:$0xf]  ;;  %v12140_v38 = vor.u32 %v15844_v25, %v12139_v14  ;;  %vm25033_vm12 = vmmov %vm25023_vm0 }
 0x373   :  { %4203 = vmatpush.bf16.msra.mxu3 %v12172_v36  ;;  %v15876_v23 = vld [vmem:[%s24907_s4 + $0x674] sm:$0xf0]  ;;  %v12395_v45 = vld [vmem:[%s24907_s4 + $0x768] sm:$0xf]  ;;  %v12012_v61 = vor.u32 %v15812_v55, %v12011_v59  ;;  %vm25034_vm13 = vmmov %vm25023_vm0 }
 0x374   :  { %4184 = vmatpush.bf16.msra.mxu1 %v12044_v21  ;;  %v15908_v37 = vld [vmem:[%s24907_s4 + $0x774] sm:$0xf0]  ;;  %v12123_v57 = vld [vmem:[%s24907_s4 + $0x548] sm:$0xf]  ;;  %v12268_v15 = vor.u32 %v15876_v23, %v12267_v5 }
 0x375   :  { %4222 = vmatpush.bf16.msra.mxu0 %v12300_v58  ;;  %v15840_v6 = vld [vmem:[%s24907_s4 + $0x554] sm:$0xf0]  ;;  %v11995_v20 = vld [vmem:[%s24907_s4 + $0x448] sm:$0xf]  ;;  %v12396_v18 = vor.u32 %v15908_v37, %v12395_v45 }
 0x376   :  { %4241 = vmatpush.bf16.msra.mxu2 %v12428_v12  ;;  %v15808_v8 = vld [vmem:[%s24907_s4 + $0x454] sm:$0xf0]  ;;  %v12251_v36 = vld [vmem:[%s24907_s4 + $0x648] sm:$0xf]  ;;  %v12124_v7 = vor.u32 %v15840_v6, %v12123_v57  ;;  %v12205_v6 = vld [vmem:[%s24907_s4 + $0x5f8] sm:$0xf0] }
 0x377   :  { %4204 = vmatpush.bf16.msra.mxu3 %v12156_v1  ;;  %v15872_v21 = vld [vmem:[%s24907_s4 + $0x654] sm:$0xf0]  ;;  %v12379_v54 = vld [vmem:[%s24907_s4 + $0x748] sm:$0xf]  ;;  %v11996_v33 = vor.u32 %v15808_v8, %v11995_v20  ;;  %v15826_v20 = vld [vmem:[%s24907_s4 + $0x4ec] sm:$0xf] }
 0x378   :  { %4185 = vmatpush.bf16.msra.mxu1 %v12028_v49  ;;  %v15904_v43 = vld [vmem:[%s24907_s4 + $0x754] sm:$0xf0]  ;;  %v12107_v58 = vld [vmem:[%s24907_s4 + $0x528] sm:$0xf]  ;;  %v12252_v10 = vor.u32 %v15872_v21, %v12251_v36  ;;  %v12077_v8 = vld [vmem:[%s24907_s4 + $0x4f8] sm:$0xf0] }
 0x379   :  { %4223 = vmatpush.bf16.msra.mxu0 %v12284_v11  ;;  %v15836_v12 = vld [vmem:[%s24907_s4 + $0x534] sm:$0xf0]  ;;  %v11979_v9 = vld [vmem:[%s24907_s4 + $0x428] sm:$0xf]  ;;  %v12380_v17 = vor.u32 %v15904_v43, %v12379_v54  ;;  %v15890_v36 = vld [vmem:[%s24907_s4 + $0x6ec] sm:$0xf] }
 0x37a   :  { %4242 = vmatpush.bf16.msra.mxu2 %v12412_v56  ;;  %v15804_v60 = vld [vmem:[%s24907_s4 + $0x434] sm:$0xf0]  ;;  %v12235_v1 = vld [vmem:[%s24907_s4 + $0x628] sm:$0xf]  ;;  %v12108_v55 = vor.u32 %v15836_v12, %v12107_v58  ;;  %v12333_v43 = vld [vmem:[%s24907_s4 + $0x6f8] sm:$0xf0]  ;;  %v12080_v12 = vor.u32 %v15826_v20, %v12077_v8 }
 0x37b   :  { %4205 = vmatpush.bf16.msra.mxu3 %v12140_v38  ;;  %v15868_v49 = vld [vmem:[%s24907_s4 + $0x634] sm:$0xf0]  ;;  %v12363_v14 = vld [vmem:[%s24907_s4 + $0x728] sm:$0xf]  ;;  %v11980_v11 = vor.u32 %v15804_v60, %v11979_v9  ;;  %v15858_v38 = vld [vmem:[%s24907_s4 + $0x5ec] sm:$0xf] }
 0x37c   :  { %4186 = vmatpush.bf16.msra.mxu1 %v12012_v61  ;;  %v15900_v25 = vld [vmem:[%s24907_s4 + $0x734] sm:$0xf0]  ;;  %v12091_v59 = vld [vmem:[%s24907_s4 + $0x508] sm:$0xf]  ;;  %v12236_v61 = vor.u32 %v15868_v49, %v12235_v1  ;;  %v12208_v58 = vor.u32 %v15858_v38, %v12205_v6  ;;  %v15854_v9 = vld [vmem:[%s24907_s4 + $0x5cc] sm:$0xf] }
 0x37d   :  { %4224 = vmatpush.bf16.msra.mxu0 %v12268_v15  ;;  %4119 = vmatmul.bf16.gmra.mxu1 %v19412_v2  ;;  %v15832_v56 = vld [vmem:[%s24907_s4 + $0x514] sm:$0xf0]  ;;  %v11963_v5 = vld [vmem:[%s24907_s4 + $0x408] sm:$0xf]  ;;  %v12364_v57 = vor.u32 %v15900_v25, %v12363_v14  ;;  %v15822_v1 = vld [vmem:[%s24907_s4 + $0x4cc] sm:$0xf]  ;;  %v36_v14 = vlaneseq  ;;  %v12336_v25 = vor.u32 %v15890_v36, %v12333_v43 }
 0x37e   :  { %4243 = vmatpush.bf16.msra.mxu2 %v12396_v18  ;;  %4138 = vmatmul.bf16.gmra.mxu3 %v19414_v3  ;;  %v15800_v23 = vld [vmem:[%s24907_s4 + $0x414] sm:$0xf0]  ;;  %v12219_v45 = vld [vmem:[%s24907_s4 + $0x608] sm:$0xf]  ;;  %v12092_v21 = vor.u32 %v15832_v56, %v12091_v59  ;;  %v12061_v49 = vld [vmem:[%s24907_s4 + $0x4d8] sm:$0xf0] }
 0x37f   :  { %4206 = vmatpush.bf16.msra.mxu3 %v12124_v7  ;;  %4157 = vmatmul.bf16.gmra.mxu0 %v19430_v28  ;;  %v15864_v37 = vld [vmem:[%s24907_s4 + $0x614] sm:$0xf0]  ;;  %v12347_v15 = vld [vmem:[%s24907_s4 + $0x708] sm:$0xf]  ;;  %v11964_v54 = vor.u32 %v15800_v23, %v11963_v5  ;;  %v15922_v7 = vld [vmem:[%s24907_s4 + $0x7ec] sm:$0xf]  ;;  %v12064_v56 = vor.u32 %v15822_v1, %v12061_v49 }
 0x380   :  { %4187 = vmatpush.bf16.msra.mxu1 %v11996_v33  ;;  %4176 = vmatmul.bf16.gmra.mxu2 %v19432_v32  ;;  %v15896_v18 = vld [vmem:[%s24907_s4 + $0x714] sm:$0xf0]  ;;  %v12461_v33 = vld [vmem:[%s24907_s4 + $0x7f8] sm:$0xf0]  ;;  %v12220_v60 = vor.u32 %v15864_v37, %v12219_v45  ;;  %v15918_v23 = vld [vmem:[%s24907_s4 + $0x7cc] sm:$0xf] }
 0x381   :  { %4225 = vmatpush.bf16.msra.mxu0 %v12252_v10  ;;  %v12348_v10 = vor.u32 %v15896_v18, %v12347_v15  ;;  %v12464_v59 = vor.u32 %v15922_v7, %v12461_v33  ;;  %v12317_v5 = vld [vmem:[%s24907_s4 + $0x6d8] sm:$0xf0]  ;;  %v15850_v37 = vld [vmem:[%s24907_s4 + $0x5ac] sm:$0xf]  ;;  %vm19735_vm14 = vcmp.lt.s32.totalorder %v36_v14, 512 }
 0x382   :  { %4244 = vmatpush.bf16.msra.mxu2 %v12380_v17  ;;  %v12189_v17 = vld [vmem:[%s24907_s4 + $0x5d8] sm:$0xf0]  ;;  %v15882_v20 = vld [vmem:[%s24907_s4 + $0x6ac] sm:$0xf] }
 0x383   :  { %4207 = vmatpush.bf16.msra.mxu3 %v12108_v55  ;;  %v15886_v55 = vld [vmem:[%s24907_s4 + $0x6cc] sm:$0xf]  ;;  %v12445_v45 = vld [vmem:[%s24907_s4 + $0x7d8] sm:$0xf0] }
 0x384   :  { %4188 = vmatpush.bf16.msra.mxu1 %v11980_v11  ;;  %v12192_v11 = vor.u32 %v15854_v9, %v12189_v17  ;;  %v12173_v38 = vld [vmem:[%s24907_s4 + $0x5b8] sm:$0xf0]  ;;  %v12320_v8 = vor.u32 %v15886_v55, %v12317_v5  ;;  %v12448_v15 = vor.u32 %v15918_v23, %v12445_v45  ;;  %v15914_v36 = vld [vmem:[%s24907_s4 + $0x7ac] sm:$0xf] }
 0x385   :  { %4226 = vmatpush.bf16.msra.mxu0 %v12236_v61  ;;  %v12045_v6 = vld [vmem:[%s24907_s4 + $0x4b8] sm:$0xf0]  ;;  %v12176_v7 = vor.u32 %v15850_v37, %v12173_v38  ;;  %v15878_v17 = vld [vmem:[%s24907_s4 + $0x68c] sm:$0xf] }
 0x386   :  { %4245 = vmatpush.bf16.msra.mxu2 %v12364_v57  ;;  %v15818_v57 = vld [vmem:[%s24907_s4 + $0x4ac] sm:$0xf]  ;;  %v12301_v18 = vld [vmem:[%s24907_s4 + $0x6b8] sm:$0xf0] }
 0x387   :  { %4208 = vmatpush.bf16.msra.mxu3 %v12092_v21  ;;  %v12429_v21 = vld [vmem:[%s24907_s4 + $0x7b8] sm:$0xf0]  ;;  %v12048_v33 = vor.u32 %v15818_v57, %v12045_v6  ;;  %v15910_v49 = vld [vmem:[%s24907_s4 + $0x78c] sm:$0xf] }
 0x388   :  { %4189 = vmatpush.bf16.msra.mxu1 %v11964_v54  ;;  %v15846_v54 = vld [vmem:[%s24907_s4 + $0x58c] sm:$0xf]  ;;  %v12157_v43 = vld [vmem:[%s24907_s4 + $0x598] sm:$0xf0] }
 0x389   :  { %4227 = vmatpush.bf16.msra.mxu0 %v12220_v60  ;;  %v12029_v9 = vld [vmem:[%s24907_s4 + $0x498] sm:$0xf0]  ;;  %v12304_v60 = vor.u32 %v15882_v20, %v12301_v18  ;;  %v15842_v55 = vld [vmem:[%s24907_s4 + $0x56c] sm:$0xf] }
 0x38a   :  { %4246 = vmatpush.bf16.msra.mxu2 %v12348_v10  ;;  %v12432_v10 = vor.u32 %v15914_v36, %v12429_v21  ;;  %v12285_v1 = vld [vmem:[%s24907_s4 + $0x698] sm:$0xf0]  ;;  %v15874_v37 = vld [vmem:[%s24907_s4 + $0x66c] sm:$0xf] }
 0x38b   :  { %4277 = vmatpush.bf16.msrb.mxu3 %v12208_v58  ;;  %v15814_v58 = vld [vmem:[%s24907_s4 + $0x48c] sm:$0xf]  ;;  %v12413_v14 = vld [vmem:[%s24907_s4 + $0x798] sm:$0xf0]  ;;  %v12288_v23 = vor.u32 %v15878_v17, %v12285_v1 }
 0x38c   :  { %4258 = vmatpush.bf16.msrb.mxu1 %v12080_v12  ;;  %v16471_v12 = vmov 0.0   ;;  %v12013_v5 = vld [vmem:[%s24907_s4 + $0x478] sm:$0xf0]  ;;  %v12416_v45 = vor.u32 %v15910_v49, %v12413_v14  ;;  %v15906_v57 = vld [vmem:[%s24907_s4 + $0x76c] sm:$0xf] }
 0x38d   :  { %4296 = vmatpush.bf16.msrb.mxu0 %v12336_v25  ;;  %40 = vst.msk [vmem:[#allocation2] ss:$8 sm:$0xf] %vm19735_vm14, %v16471_v12  ;;  %4190 = vmatmul.bf16.vlgmr.msra.gmra.mxu1 %v19258_v16  ;;  %v12160_v25 = vor.u32 %v15846_v54, %v12157_v43  ;;  %v12269_v38 = vld [vmem:[%s24907_s4 + $0x678] sm:$0xf0] }
 0x38e   :  { %4315 = vmatpush.bf16.msrb.mxu2 %v12464_v59  ;;  %4209 = vmatmul.bf16.vlgmr.msra.gmra.mxu3 %v19264_v63  ;;  %43 = vst.msk [vmem:[#allocation2 + $0x60] ss:$8 sm:$0xf] %vm19735_vm14, %v16471_v12  ;;  %v12032_v59 = vor.u32 %v15814_v58, %v12029_v9  ;;  %v12397_v6 = vld [vmem:[%s24907_s4 + $0x778] sm:$0xf0]  ;;  %v12272_v54 = vor.u32 %v15874_v37, %v12269_v38 }
 0x38f   :  { %4278 = vmatpush.bf16.msrb.mxu3 %v12192_v11  ;;  %46 = vst.msk [vmem:[#allocation2 + $0x41] ss:$8 sm:$0xf] %vm19735_vm14, %v16471_v12  ;;  %4228 = vmatmul.bf16.vlgmr.msra.gmra.mxu0 %v19290_v27  ;;  %v12141_v11 = vld [vmem:[%s24907_s4 + $0x578] sm:$0xf0]  ;;  %v12400_v43 = vor.u32 %v15906_v57, %v12397_v6 }
 0x390   :  { %4259 = vmatpush.bf16.msrb.mxu1 %v12064_v56  ;;  %4247 = vmatmul.bf16.vlgmr.msra.gmra.mxu2 %v19298_v42  ;;  %v15810_v56 = vld [vmem:[%s24907_s4 + $0x46c] sm:$0xf]  ;;  %v12144_v20 = vor.u32 %v15842_v55, %v12141_v11  ;;  %v12125_v18 = vld [vmem:[%s24907_s4 + $0x558] sm:$0xf0] }
 0x391   :  { %4297 = vmatpush.bf16.msrb.mxu0 %v12320_v8  ;;  %v12016_v8 = vor.u32 %v15810_v56, %v12013_v5  ;;  %v15806_v36 = vld [vmem:[%s24907_s4 + $0x44c] sm:$0xf]  ;;  %v11997_v21 = vld [vmem:[%s24907_s4 + $0x458] sm:$0xf0] }
 0x392   :  { %4316 = vmatpush.bf16.msrb.mxu2 %v12448_v15  ;;  %v15838_v15 = vld [vmem:[%s24907_s4 + $0x54c] sm:$0xf]  ;;  %v12381_v9 = vld [vmem:[%s24907_s4 + $0x758] sm:$0xf0] }
 0x393   :  { %4279 = vmatpush.bf16.msrb.mxu3 %v12176_v7  ;;  %v15870_v7 = vld [vmem:[%s24907_s4 + $0x64c] sm:$0xf]  ;;  %v12109_v1 = vld [vmem:[%s24907_s4 + $0x538] sm:$0xf0] }
 0x394   :  { %4260 = vmatpush.bf16.msrb.mxu1 %v12048_v33  ;;  %v12253_v33 = vld [vmem:[%s24907_s4 + $0x658] sm:$0xf0]  ;;  %v15902_v58 = vld [vmem:[%s24907_s4 + $0x74c] sm:$0xf] }
 0x395   :  { %4298 = vmatpush.bf16.msrb.mxu0 %v12304_v60  ;;  %v12128_v60 = vor.u32 %v15838_v15, %v12125_v18  ;;  %v15834_v17 = vld [vmem:[%s24907_s4 + $0x52c] sm:$0xf]  ;;  %v11981_v14 = vld [vmem:[%s24907_s4 + $0x438] sm:$0xf0]  ;;  %v12384_v55 = vor.u32 %v15902_v58, %v12381_v9  ;;  %v15731_v18 = vld [vmem:[%s24907_s4 + $0x1ec] sm:$0xf0] }
 0x396   :  { %4317 = vmatpush.bf16.msrb.mxu2 %v12432_v10  ;;  %v12000_v10 = vor.u32 %v15806_v36, %v11997_v21  ;;  %v15802_v49 = vld [vmem:[%s24907_s4 + $0x42c] sm:$0xf]  ;;  %v12237_v11 = vld [vmem:[%s24907_s4 + $0x638] sm:$0xf0]  ;;  %v12579_v36 = vld [vmem:[%s24907_s4 + $0xe0] sm:$0xf] }
 0x397   :  { %4280 = vmatpush.bf16.msrb.mxu3 %v12160_v25  ;;  %v15866_v25 = vld [vmem:[%s24907_s4 + $0x62c] sm:$0xf]  ;;  %49 = vst.msk [vmem:[#allocation2 + $0xa1] ss:$8 sm:$0xf] %vm19735_vm14, %v16471_v12  ;;  %v11984_v37 = vor.u32 %v15802_v49, %v11981_v14  ;;  %vm25035_vm14 = vmmov %vm25023_vm0 }
 0x398   :  { %4261 = vmatpush.bf16.msrb.mxu1 %v12032_v59  ;;  %v12256_v59 = vor.u32 %v15870_v7, %v12253_v33  ;;  %v15898_v56 = vld [vmem:[%s24907_s4 + $0x72c] sm:$0xf]  ;;  %v12365_v5 = vld [vmem:[%s24907_s4 + $0x738] sm:$0xf0]  ;;  %v15699_v21 = vld [vmem:[%s24907_s4 + $0xec] sm:$0xf0] }
 0x399   :  { %4299 = vmatpush.bf16.msrb.mxu0 %v12288_v23  ;;  %v15830_v23 = vld [vmem:[%s24907_s4 + $0x50c] sm:$0xf]  ;;  %v12093_v61 = vld [vmem:[%s24907_s4 + $0x518] sm:$0xf0]  ;;  %v12368_v15 = vor.u32 %v15898_v56, %v12365_v5  ;;  %v12835_v7 = vld [vmem:[%s24907_s4 + $0x2e0] sm:$0xf] }
 0x39a   :  { %4318 = vmatpush.bf16.msrb.mxu2 %v12416_v45  ;;  %v12112_v45 = vor.u32 %v15834_v17, %v12109_v1  ;;  %v15798_v12 = vld [vmem:[%s24907_s4 + $0x40c] sm:$0xf]  ;;  %v11965_v38 = vld [vmem:[%s24907_s4 + $0x418] sm:$0xf0]  ;;  %v12096_v33 = vor.u32 %v15830_v23, %v12093_v61  ;;  %v15763_v9 = vld [vmem:[%s24907_s4 + $0x2ec] sm:$0xf0]  ;;  %v12580_v1 = vor.u32 %v15699_v21, %v12579_v36 }
 0x39b   :  { %4281 = vmatpush.bf16.msrb.mxu3 %v12144_v20  ;;  %v15862_v57 = vld [vmem:[%s24907_s4 + $0x60c] sm:$0xf]  ;;  %v12221_v6 = vld [vmem:[%s24907_s4 + $0x618] sm:$0xf0]  ;;  %v12707_v20 = vld [vmem:[%s24907_s4 + $0x1e0] sm:$0xf]  ;;  %v11968_v58 = vor.u32 %v15798_v12, %v11965_v38  ;;  %v12836_v56 = vor.u32 %v15763_v9, %v12835_v7 }
 0x39c   :  { %4262 = vmatpush.bf16.msrb.mxu1 %v12016_v8  ;;  %v12240_v8 = vor.u32 %v15866_v25, %v12237_v11  ;;  %v12708_v17 = vor.u32 %v15731_v18, %v12707_v20  ;;  %v12691_v49 = vld [vmem:[%s24907_s4 + $0x1c0] sm:$0xf]  ;;  %v12224_v14 = vor.u32 %v15862_v57, %v12221_v6  ;;  %v15695_v11 = vld [vmem:[%s24907_s4 + $0xcc] sm:$0xf0] }
 0x39d   :  { %4300 = vmatpush.bf16.msrb.mxu0 %v12272_v54  ;;  %4195 = vmatmul.bf16.gmra.mxu1 %v19412_v2  ;;  %v15894_v54 = vld [vmem:[%s24907_s4 + $0x70c] sm:$0xf]  ;;  %v12819_v23 = vld [vmem:[%s24907_s4 + $0x2c0] sm:$0xf]  ;;  %v15791_v61 = vld [vmem:[%s24907_s4 + $0x3cc] sm:$0xf0] }
 0x39e   :  { %4319 = vmatpush.bf16.msrb.mxu2 %v12400_v43  ;;  %4214 = vmatmul.bf16.gmra.mxu3 %v19414_v3  ;;  %v12349_v43 = vld [vmem:[%s24907_s4 + $0x718] sm:$0xf0]  ;;  %v12675_v57 = vld [vmem:[%s24907_s4 + $0x1a0] sm:$0xf]  ;;  %v15691_v18 = vld [vmem:[%s24907_s4 + $0xac] sm:$0xf0] }
 0x39f   :  { %4282 = vmatpush.bf16.msrb.mxu3 %v12128_v60  ;;  %4233 = vmatmul.bf16.gmra.mxu0 %v19430_v28  ;;  %v12963_v60 = vld [vmem:[%s24907_s4 + $0x3e0] sm:$0xf]  ;;  %v12352_v25 = vor.u32 %v15894_v54, %v12349_v43  ;;  %v15755_v21 = vld [vmem:[%s24907_s4 + $0x2ac] sm:$0xf0] }
 0x3a0   :  { %4263 = vmatpush.bf16.msrb.mxu1 %v12000_v10  ;;  %4252 = vmatmul.bf16.gmra.mxu2 %v19432_v32  ;;  %v15795_v10 = vld [vmem:[%s24907_s4 + $0x3ec] sm:$0xf0]  ;;  %v12803_v36 = vld [vmem:[%s24907_s4 + $0x2a0] sm:$0xf] }
 0x3a1   :  { %4301 = vmatpush.bf16.msrb.mxu0 %v12256_v59  ;;  %v15727_v59 = vld [vmem:[%s24907_s4 + $0x1cc] sm:$0xf0]  ;;  %v12964_v5 = vor.u32 %v15795_v10, %v12963_v60  ;;  %v12931_v54 = vld [vmem:[%s24907_s4 + $0x3a0] sm:$0xf] }
 0x3a2   :  { %4320 = vmatpush.bf16.msrb.mxu2 %v12384_v55  ;;  %v12563_v55 = vld [vmem:[%s24907_s4 + $0xc0] sm:$0xf]  ;;  %v12692_v12 = vor.u32 %v15727_v59, %v12691_v49  ;;  %v15787_v43 = vld [vmem:[%s24907_s4 + $0x3ac] sm:$0xf0] }
 0x3a3   :  { %4283 = vmatpush.bf16.msrb.mxu3 %v12112_v45  ;;  %v15759_v45 = vld [vmem:[%s24907_s4 + $0x2cc] sm:$0xf0]  ;;  %v12564_v38 = vor.u32 %v15695_v11, %v12563_v55  ;;  %v12531_v60 = vld [vmem:[%s24907_s4 + $0x80] sm:$0xf] }
 0x3a4   :  { %4264 = vmatpush.bf16.msrb.mxu1 %v11984_v37  ;;  %v12947_v37 = vld [vmem:[%s24907_s4 + $0x3c0] sm:$0xf]  ;;  %v12820_v6 = vor.u32 %v15759_v45, %v12819_v23  ;;  %v15719_v9 = vld [vmem:[%s24907_s4 + $0x18c] sm:$0xf0] }
 0x3a5   :  { %4302 = vmatpush.bf16.msrb.mxu0 %v12240_v8  ;;  %v12948_v20 = vor.u32 %v15791_v61, %v12947_v37  ;;  %v15723_v8 = vld [vmem:[%s24907_s4 + $0x1ac] sm:$0xf0]  ;;  %v12787_v49 = vld [vmem:[%s24907_s4 + $0x280] sm:$0xf] }
 0x3a6   :  { %4321 = vmatpush.bf16.msrb.mxu2 %v12368_v15  ;;  %v12547_v15 = vld [vmem:[%s24907_s4 + $0xa0] sm:$0xf]  ;;  %v12676_v7 = vor.u32 %v15723_v8, %v12675_v57  ;;  %v15687_v10 = vld [vmem:[%s24907_s4 + $0x8c] sm:$0xf0] }
 0x3a7   :  { %4284 = vmatpush.bf16.msrb.mxu3 %v12096_v33  ;;  %v12548_v33 = vor.u32 %v15691_v18, %v12547_v15  ;;  %v15783_v59 = vld [vmem:[%s24907_s4 + $0x38c] sm:$0xf0]  ;;  %v12532_v11 = vor.u32 %v15687_v10, %v12531_v60  ;;  %v12899_v37 = vld [vmem:[%s24907_s4 + $0x360] sm:$0xf] }
 0x3a8   :  { %4265 = vmatpush.bf16.msrb.mxu1 %v11968_v58  ;;  %v12659_v58 = vld [vmem:[%s24907_s4 + $0x180] sm:$0xf]  ;;  %v15779_v61 = vld [vmem:[%s24907_s4 + $0x36c] sm:$0xf0] }
 0x3a9   :  { %4303 = vmatpush.bf16.msrb.mxu0 %v12224_v14  ;;  %v15751_v14 = vld [vmem:[%s24907_s4 + $0x28c] sm:$0xf0]  ;;  %v12660_v55 = vor.u32 %v15719_v9, %v12659_v58  ;;  %v12627_v57 = vld [vmem:[%s24907_s4 + $0x140] sm:$0xf]  ;;  %v12900_v18 = vor.u32 %v15779_v61, %v12899_v37  ;;  %v12709_v61 = vld [vmem:[%s24907_s4 + $0x1f0] sm:$0xf0] }
 0x3aa   :  { %4322 = vmatpush.bf16.msrb.mxu2 %v12352_v25  ;;  %v12915_v25 = vld [vmem:[%s24907_s4 + $0x380] sm:$0xf]  ;;  %v12788_v23 = vor.u32 %v15751_v14, %v12787_v49  ;;  %v15679_v8 = vld [vmem:[%s24907_s4 + $0x4c] sm:$0xf0] }
 0x3ab   :  { %4993 = vmatpush.bf16.msra.mxu3 %v12708_v17  ;;  %v12804_v17 = vor.u32 %v15755_v21, %v12803_v36  ;;  %v12916_v45 = vor.u32 %v15783_v59, %v12915_v25  ;;  %v12755_v36 = vld [vmem:[%s24907_s4 + $0x240] sm:$0xf]  ;;  %v15743_v21 = vld [vmem:[%s24907_s4 + $0x24c] sm:$0xf0] }
 0x3ac   :  { %4974 = vmatpush.bf16.msra.mxu1 %v12580_v1  ;;  %v12932_v1 = vor.u32 %v15787_v43, %v12931_v54  ;;  %v12883_v54 = vld [vmem:[%s24907_s4 + $0x340] sm:$0xf]  ;;  %v15775_v43 = vld [vmem:[%s24907_s4 + $0x34c] sm:$0xf0] }
 0x3ad   :  { %5012 = vmatpush.bf16.msra.mxu0 %v12836_v56  ;;  %4266 = vmatmul.bf16.vlgmr.msrb.gmra.mxu1 %v19258_v16  ;;  %v12643_v16 = vld [vmem:[%s24907_s4 + $0x160] sm:$0xf]  ;;  %v15707_v9 = vld [vmem:[%s24907_s4 + $0x12c] sm:$0xf0] }
 0x3ae   :  { %5031 = vmatpush.bf16.msra.mxu2 %v12964_v5  ;;  %4285 = vmatmul.bf16.vlgmr.msrb.gmra.mxu3 %v19264_v63  ;;  %v15715_v63 = vld [vmem:[%s24907_s4 + $0x16c] sm:$0xf0]  ;;  %v12515_v56 = vld [vmem:[%s24907_s4 + $0x60] sm:$0xf] }
 0x3af   :  { %4994 = vmatpush.bf16.msra.mxu3 %v12692_v12  ;;  %4304 = vmatmul.bf16.vlgmr.msrb.gmra.mxu0 %v19290_v27  ;;  %v15683_v5 = vld [vmem:[%s24907_s4 + $0x6c] sm:$0xf0]  ;;  %v12771_v27 = vld [vmem:[%s24907_s4 + $0x260] sm:$0xf]  ;;  %v12644_v12 = vor.u32 %v15715_v63, %v12643_v16 }
 0x3b0   :  { %4975 = vmatpush.bf16.msra.mxu1 %v12564_v38  ;;  %4323 = vmatmul.bf16.vlgmr.msrb.gmra.mxu2 %v19298_v42  ;;  %v15747_v42 = vld [vmem:[%s24907_s4 + $0x26c] sm:$0xf0]  ;;  %v12516_v38 = vor.u32 %v15683_v5, %v12515_v56  ;;  %v12611_v58 = vld [vmem:[%s24907_s4 + $0x120] sm:$0xf] }
 0x3b1   :  { %5013 = vmatpush.bf16.msra.mxu0 %v12820_v6  ;;  %v15711_v6 = vld [vmem:[%s24907_s4 + $0x14c] sm:$0xf0]  ;;  %v12772_v15 = vor.u32 %v15747_v42, %v12771_v27  ;;  %v12483_v60 = vld [vmem:[%s24907_s4 + $0x20] sm:$0xf]  ;;  %v15729_v27 = vld [vmem:[%s24907_s4 + $0x1e4] sm:$0xf] }
 0x3b2   :  { %5032 = vmatpush.bf16.msra.mxu2 %v12948_v20  ;;  %v12499_v20 = vld [vmem:[%s24907_s4 + $0x40] sm:$0xf]  ;;  %v15675_v10 = vld [vmem:[%s24907_s4 + $0x2c] sm:$0xf0] }
 0x3b3   :  { %4995 = vmatpush.bf16.msra.mxu3 %v12676_v7  ;;  %v12628_v7 = vor.u32 %v15711_v6, %v12627_v57  ;;  %v12739_v49 = vld [vmem:[%s24907_s4 + $0x220] sm:$0xf]  ;;  %v15739_v14 = vld [vmem:[%s24907_s4 + $0x22c] sm:$0xf0]  ;;  %v12484_v16 = vor.u32 %v15675_v10, %v12483_v60  ;;  %v15757_v60 = vld [vmem:[%s24907_s4 + $0x2c4] sm:$0xf] }
 0x3b4   :  { %4976 = vmatpush.bf16.msra.mxu1 %v12548_v33  ;;  %v12500_v33 = vor.u32 %v15679_v8, %v12499_v20  ;;  %v12867_v25 = vld [vmem:[%s24907_s4 + $0x320] sm:$0xf]  ;;  %v15771_v59 = vld [vmem:[%s24907_s4 + $0x32c] sm:$0xf0]  ;;  %v12740_v42 = vor.u32 %v15739_v14, %v12739_v49  ;;  %v15761_v20 = vld [vmem:[%s24907_s4 + $0x2e4] sm:$0xf] }
 0x3b5   :  { %5014 = vmatpush.bf16.msra.mxu0 %v12804_v17  ;;  %v12756_v17 = vor.u32 %v15743_v21, %v12755_v36  ;;  %v15703_v63 = vld [vmem:[%s24907_s4 + $0x10c] sm:$0xf0]  ;;  %v12467_v56 = vld [vmem:[%s24907_s4] sm:$0xf]  ;;  %v12868_v37 = vor.u32 %v15771_v59, %v12867_v25  ;;  %v12712_v36 = vor.u32 %v15729_v27, %v12709_v61  ;;  %v12821_v10 = vld [vmem:[%s24907_s4 + $0x2d0] sm:$0xf0] }
 0x3b6   :  { %5033 = vmatpush.bf16.msra.mxu2 %v12932_v1  ;;  %v12884_v1 = vor.u32 %v15775_v43, %v12883_v54  ;;  %v15671_v5 = vld [vmem:[%s24907_s4 + $0xc] sm:$0xf0]  ;;  %v12851_v57 = vld [vmem:[%s24907_s4 + $0x300] sm:$0xf]  ;;  %v15725_v54 = vld [vmem:[%s24907_s4 + $0x1c4] sm:$0xf] }
 0x3b7   :  { %4996 = vmatpush.bf16.msra.mxu3 %v12660_v55  ;;  %v12595_v55 = vld [vmem:[%s24907_s4 + $0x100] sm:$0xf]  ;;  %v15767_v6 = vld [vmem:[%s24907_s4 + $0x30c] sm:$0xf0]  ;;  %v15721_v25 = vld [vmem:[%s24907_s4 + $0x1a4] sm:$0xf] }
 0x3b8   :  { %4977 = vmatpush.bf16.msra.mxu1 %v12532_v11  ;;  %v12612_v11 = vor.u32 %v15707_v9, %v12611_v58  ;;  %v12596_v8 = vor.u32 %v15703_v63, %v12595_v55  ;;  %v12677_v59 = vld [vmem:[%s24907_s4 + $0x1b0] sm:$0xf0]  ;;  %v15689_v55 = vld [vmem:[%s24907_s4 + $0xa4] sm:$0xf]  ;;  %v3006_v61 = vld [vmem:[#allocation2 + $0x8] sm:$0xff] }
 0x3b9   :  { %5015 = vmatpush.bf16.msra.mxu0 %v12788_v23  ;;  %v12723_v23 = vld [vmem:[%s24907_s4 + $0x200] sm:$0xf]  ;;  %v15785_v27 = vld [vmem:[%s24907_s4 + $0x3a4] sm:$0xf] }
 0x3ba   :  { %5034 = vmatpush.bf16.msra.mxu2 %v12916_v45  ;;  %v15735_v45 = vld [vmem:[%s24907_s4 + $0x20c] sm:$0xf0]  ;;  %v21043_v44 = vld [vmem:[#allocation2 + $0xa0] sm:$0x3] }
 0x3bb   :  { %4997 = vmatpush.bf16.msra.mxu3 %v12644_v12  ;;  %v15697_v12 = vld [vmem:[%s24907_s4 + $0xe4] sm:$0xf]  ;;  %v12724_v43 = vor.u32 %v15735_v45, %v12723_v23  ;;  %v12805_v45 = vld [vmem:[%s24907_s4 + $0x2b0] sm:$0xf0] }
 0x3bc   :  { %4978 = vmatpush.bf16.msra.mxu1 %v12516_v38  ;;  %v12581_v38 = vld [vmem:[%s24907_s4 + $0xf0] sm:$0xf0] }
 0x3bd   :  { %5016 = vmatpush.bf16.msra.mxu0 %v12772_v15  ;;  %4271 = vmatmul.bf16.gmra.mxu1 %v19412_v2  ;;  %v12468_v15 = vor.u32 %v15671_v5, %v12467_v56  ;;  %v12837_v2 = vld [vmem:[%s24907_s4 + $0x2f0] sm:$0xf0]  ;;  %v12584_v21 = vor.u32 %v15697_v12, %v12581_v38  ;;  %v15753_v56 = vld [vmem:[%s24907_s4 + $0x2a4] sm:$0xf]  ;;  %v12680_v5 = vor.u32 %v15721_v25, %v12677_v59 }
 0x3be   :  { %5035 = vmatpush.bf16.msra.mxu2 %v12900_v18  ;;  %4290 = vmatmul.bf16.gmra.mxu3 %v19414_v3  ;;  %v15793_v3 = vld [vmem:[%s24907_s4 + $0x3e4] sm:$0xf]  ;;  %v12965_v18 = vld [vmem:[%s24907_s4 + $0x3f0] sm:$0xf0]  ;;  %v12840_v58 = vor.u32 %v15761_v20, %v12837_v2  ;;  %v12808_v2 = vor.u32 %v15753_v56, %v12805_v45 }
 0x3bf   :  { %4998 = vmatpush.bf16.msra.mxu3 %v12628_v7  ;;  %4309 = vmatmul.bf16.gmra.mxu0 %v19430_v28  ;;  %v12852_v7 = vor.u32 %v15767_v6, %v12851_v57  ;;  %v15693_v28 = vld [vmem:[%s24907_s4 + $0xc4] sm:$0xf]  ;;  %v12968_v9 = vor.u32 %v15793_v3, %v12965_v18  ;;  %v12661_v38 = vld [vmem:[%s24907_s4 + $0x190] sm:$0xf0] }
 0x3c0   :  { %4979 = vmatpush.bf16.msra.mxu1 %v12500_v33  ;;  %4328 = vmatmul.bf16.gmra.mxu2 %v19432_v32  ;;  %v12693_v33 = vld [vmem:[%s24907_s4 + $0x1d0] sm:$0xf0]  ;;  %v15717_v12 = vld [vmem:[%s24907_s4 + $0x184] sm:$0xf] }
 0x3c1   :  { %5017 = vmatpush.bf16.msra.mxu0 %v12756_v17  ;;  %v12565_v32 = vld [vmem:[%s24907_s4 + $0xd0] sm:$0xf0]  ;;  %v15789_v17 = vld [vmem:[%s24907_s4 + $0x3c4] sm:$0xf]  ;;  %v12696_v49 = vor.u32 %v15725_v54, %v12693_v33 }
 0x3c2   :  { %5036 = vmatpush.bf16.msra.mxu2 %v12884_v1  ;;  %v12949_v1 = vld [vmem:[%s24907_s4 + $0x3d0] sm:$0xf0]  ;;  %v12568_v14 = vor.u32 %v15693_v28, %v12565_v32  ;;  %v15685_v57 = vld [vmem:[%s24907_s4 + $0x84] sm:$0xf]  ;;  %v12664_v28 = vor.u32 %v15717_v12, %v12661_v38 }
 0x3c3   :  { %4999 = vmatpush.bf16.msra.mxu3 %v12612_v11  ;;  %v12549_v11 = vld [vmem:[%s24907_s4 + $0xb0] sm:$0xf0]  ;;  %v12952_v63 = vor.u32 %v15789_v17, %v12949_v1  ;;  %v15749_v18 = vld [vmem:[%s24907_s4 + $0x284] sm:$0xf] }
 0x3c4   :  { %4980 = vmatpush.bf16.msra.mxu1 %v12484_v16  ;;  %v12824_v16 = vor.u32 %v15757_v60, %v12821_v10  ;;  %v12552_v23 = vor.u32 %v15689_v55, %v12549_v11  ;;  %v12533_v6 = vld [vmem:[%s24907_s4 + $0x90] sm:$0xf0]  ;;  %v15681_v17 = vld [vmem:[%s24907_s4 + $0x64] sm:$0xf] }
 0x3c5   :  { %5018 = vmatpush.bf16.msra.mxu0 %v12740_v42  ;;  %v12933_v42 = vld [vmem:[%s24907_s4 + $0x3b0] sm:$0xf0]  ;;  %v12536_v32 = vor.u32 %v15685_v57, %v12533_v6  ;;  %v15745_v25 = vld [vmem:[%s24907_s4 + $0x264] sm:$0xf] }
 0x3c6   :  { %5037 = vmatpush.bf16.msra.mxu2 %v12868_v37  ;;  %v3005_v37 = vld [vmem:[#allocation2] sm:$0xff]  ;;  %v12936_v3 = vor.u32 %v15785_v27, %v12933_v42  ;;  %v12789_v54 = vld [vmem:[%s24907_s4 + $0x290] sm:$0xf0] }
 0x3c7   :  { %5000 = vmatpush.bf16.msra.mxu3 %v12596_v8  ;;  %v3007_v8 = vld [vmem:[#allocation2 + $0x10] sm:$0xff]  ;;  %v15777_v55 = vld [vmem:[%s24907_s4 + $0x364] sm:$0xf] }
 0x3c8   :  { %4981 = vmatpush.bf16.msra.mxu1 %v12468_v15  ;;  %v3008_v15 = vld [vmem:[#allocation2 + $0x18] sm:$0xff]  ;;  %v12645_v10 = vld [vmem:[%s24907_s4 + $0x170] sm:$0xf0]  ;;  %v15677_v27 = vld [vmem:[%s24907_s4 + $0x44] sm:$0xf] }
 0x3c9   :  { %5019 = vmatpush.bf16.msra.mxu0 %v12724_v43  ;;  %v15781_v43 = vld [vmem:[%s24907_s4 + $0x384] sm:$0xf]  ;;  %v20208_v60 = vpack.c.bf16 %v19183_v29, %v3008_v15  ;;  %v12517_v1 = vld [vmem:[%s24907_s4 + $0x70] sm:$0xf0] }
 0x3ca   :  { %5038 = vmatpush.bf16.msra.mxu2 %v12852_v7  ;;  %v4039_v20 = vpop.f32.mrf.mxu1  ;;  %v12917_v7 = vld [vmem:[%s24907_s4 + $0x390] sm:$0xf0]  ;;  %v12520_v56 = vor.u32 %v15681_v17, %v12517_v1  ;;  %v15741_v57 = vld [vmem:[%s24907_s4 + $0x244] sm:$0xf] }
 0x3cb   :  { %5069 = vmatpush.bf16.msrb.mxu3 %v12712_v36  ;;  %v20185_v36 = vpack.c.bf16 %v19074_v22, %v3005_v37  ;;  %v12773_v59 = vld [vmem:[%s24907_s4 + $0x270] sm:$0xf0] }
 0x3cc   :  { %5050 = vmatpush.bf16.msrb.mxu1 %v12584_v21  ;;  %v20188_v21 = vpack.c.bf16 %v19077_v19, %v3006_v61  ;;  %v4077_v33 = vpop.f32.mrf.mxu0  ;;  %v12901_v11 = vld [vmem:[%s24907_s4 + $0x370] sm:$0xf0]  ;;  %v12776_v12 = vor.u32 %v15745_v25, %v12773_v59  ;;  %v3016_v25 = vld [vmem:[#allocation2 + $0x78] sm:$0xff]  ;;  %v15769_v59 = vld [vmem:[%s24907_s4 + $0x324] sm:$0xf] }
 0x3cd   :  { %5088 = vmatpush.bf16.msrb.mxu0 %v12840_v58  ;;  %v15713_v58 = vld [vmem:[%s24907_s4 + $0x164] sm:$0xf]  ;;  %4982 = vmatmul.bf16.vlgmr.msra.gmra.mxu1 %v20185_v36  ;;  %v12629_v45 = vld [vmem:[%s24907_s4 + $0x150] sm:$0xf0]  ;;  %v12904_v38 = vor.u32 %v15777_v55, %v12901_v11 }
 0x3ce   :  { %5107 = vmatpush.bf16.msrb.mxu2 %v12968_v9  ;;  %5001 = vmatmul.bf16.vlgmr.msra.gmra.mxu3 %v20188_v21  ;;  %v20205_v9 = vpack.c.bf16 %v19178_v53, %v3007_v8  ;;  %v12501_v42 = vld [vmem:[%s24907_s4 + $0x50] sm:$0xf0]  ;;  %v15773_v8 = vld [vmem:[%s24907_s4 + $0x344] sm:$0xf] }
 0x3cf   :  { %5070 = vmatpush.bf16.msrb.mxu3 %v12696_v49  ;;  %v12792_v49 = vor.u32 %v15749_v18, %v12789_v54  ;;  %v12885_v15 = vld [vmem:[%s24907_s4 + $0x350] sm:$0xf0]  ;;  %v12504_v18 = vor.u32 %v15677_v27, %v12501_v42  ;;  %v15705_v54 = vld [vmem:[%s24907_s4 + $0x124] sm:$0xf] }
 0x3d0   :  { %5051 = vmatpush.bf16.msrb.mxu1 %v12568_v14  ;;  %v12920_v14 = vor.u32 %v15781_v43, %v12917_v7  ;;  %5020 = vmatmul.bf16.vlgmr.msra.gmra.mxu0 %v20205_v9  ;;  %v12613_v7 = vld [vmem:[%s24907_s4 + $0x130] sm:$0xf0]  ;;  %v12888_v1 = vor.u32 %v15773_v8, %v12885_v15  ;;  %v15701_v11 = vld [vmem:[%s24907_s4 + $0x104] sm:$0xf]  ;;  %v12587_v8 = vld [vmem:[%s24907_s4 + $0xe8] sm:$0xf] }
 0x3d1   :  { %5089 = vmatpush.bf16.msrb.mxu0 %v12824_v16  ;;  %5039 = vmatmul.bf16.vlgmr.msra.gmra.mxu2 %v20208_v60  ;;  %v4058_v16 = vpop.f32.mrf.mxu3  ;;  %v12869_v55 = vld [vmem:[%s24907_s4 + $0x330] sm:$0xf0]  ;;  %v15733_v42 = vld [vmem:[%s24907_s4 + $0x204] sm:$0xf]  ;;  %v15700_v15 = vld [vmem:[%s24907_s4 + $0xf4] sm:$0xf0] }
 0x3d2   :  { %5108 = vmatpush.bf16.msrb.mxu2 %v12952_v63  ;;  %v12648_v63 = vor.u32 %v15713_v58, %v12645_v10  ;;  %v4041_v61 = vpop.f32.mrf.mxu1  ;;  %v3014_v58 = vld [vmem:[#allocation2 + $0x68] sm:$0xff]  ;;  %v3015_v10 = vld [vmem:[#allocation2 + $0x70] sm:$0xff] }
 0x3d3   :  { %5071 = vmatpush.bf16.msrb.mxu3 %v12680_v5  ;;  %v15709_v5 = vld [vmem:[%s24907_s4 + $0x144] sm:$0xf]  ;;  %v4096_v37 = vpop.f32.mrf.mxu2 }
 0x3d4   :  { %5052 = vmatpush.bf16.msrb.mxu1 %v12552_v23  ;;  %v4059_v23 = vadd.f32 %v4058_v16, %v4039_v20  ;;  %v12757_v20 = vld [vmem:[%s24907_s4 + $0x250] sm:$0xf0] }
 0x3d5   :  { %5090 = vmatpush.bf16.msrb.mxu0 %v12808_v2  ;;  %v4079_v2 = vpop.f32.mrf.mxu0  ;;  %v12760_v17 = vor.u32 %v15741_v57, %v12757_v20  ;;  %v12872_v20 = vor.u32 %v15769_v59, %v12869_v55  ;;  %v12588_v55 = vor.u32 %v15700_v15, %v12587_v8  ;;  %v12683_v15 = vld [vmem:[%s24907_s4 + $0x1a8] sm:$0xf] }
 0x3d6   :  { %5109 = vmatpush.bf16.msrb.mxu2 %v12936_v3  ;;  %v4078_v6 = vadd.f32 %v4077_v33, %v4059_v23  ;;  %v12632_v3 = vor.u32 %v15709_v5, %v12629_v45  ;;  %v15673_v33 = vld [vmem:[%s24907_s4 + $0x24] sm:$0xf]  ;;  %v12597_v5 = vld [vmem:[%s24907_s4 + $0x110] sm:$0xf0] }
 0x3d7   :  { %5072 = vmatpush.bf16.msrb.mxu3 %v12664_v28  ;;  %v12485_v28 = vld [vmem:[%s24907_s4 + $0x30] sm:$0xf0]  ;;  %v15669_v23 = vld [vmem:[%s24907_s4 + $0x4] sm:$0xf] }
 0x3d8   :  { %5053 = vmatpush.bf16.msrb.mxu1 %v12536_v32  ;;  %v20260_v43 = vadd.f32 %v4096_v37, %v4078_v6  ;;  %v3013_v32 = vld [vmem:[#allocation2 + $0x60] sm:$0xff]  ;;  %v12469_v45 = vld [vmem:[%s24907_s4 + $0x10] sm:$0xf0] }
 0x3d9   :  { %5091 = vmatpush.bf16.msrb.mxu0 %v12792_v49  ;;  %v15737_v49 = vld [vmem:[%s24907_s4 + $0x224] sm:$0xf]  ;;  %v4060_v16 = vpop.f32.mrf.mxu3  ;;  %v12725_v37 = vld [vmem:[%s24907_s4 + $0x210] sm:$0xf0] }
 0x3da   :  { %5110 = vmatpush.bf16.msrb.mxu2 %v12920_v14  ;;  %v12741_v14 = vld [vmem:[%s24907_s4 + $0x230] sm:$0xf0]  ;;  %v4061_v27 = vadd.f32 %v4060_v16, %v4041_v61  ;;  %v4044_v57 = vpop.f32.mrf.mxu1  ;;  %v15732_v61 = vld [vmem:[%s24907_s4 + $0x1f4] sm:$0xf0]  ;;  %v12728_v16 = vor.u32 %v15733_v42, %v12725_v37  ;;  %v12827_v42 = vld [vmem:[%s24907_s4 + $0x2c8] sm:$0xf] }
 0x3db   :  { %5073 = vmatpush.bf16.msrb.mxu3 %v12648_v63  ;;  %v12616_v63 = vor.u32 %v15705_v54, %v12613_v7  ;;  %v12744_v6 = vor.u32 %v15737_v49, %v12741_v14  ;;  %v20317_v54 = vpack.c.bf16 %v19288_v30, %v3014_v58  ;;  %v20320_v7 = vpack.c.bf16 %v19333_v35, %v3015_v10  ;;  %v12971_v49 = vld [vmem:[%s24907_s4 + $0x3e8] sm:$0xf]  ;;  %v15796_v14 = vld [vmem:[%s24907_s4 + $0x3f4] sm:$0xf0] }
 0x3dc   :  { %5054 = vmatpush.bf16.msrb.mxu1 %v12520_v56  ;;  %v12488_v56 = vor.u32 %v15673_v33, %v12485_v28  ;;  %v15765_v33 = vld [vmem:[%s24907_s4 + $0x304] sm:$0xf]  ;;  %v12853_v28 = vld [vmem:[%s24907_s4 + $0x310] sm:$0xf0]  ;;  %v12600_v58 = vor.u32 %v15701_v11, %v12597_v5  ;;  %v12472_v10 = vor.u32 %v15669_v23, %v12469_v45  ;;  %v12699_v11 = vld [vmem:[%s24907_s4 + $0x1c8] sm:$0xf] }
 0x3dd   :  { %5092 = vmatpush.bf16.msrb.mxu0 %v12776_v12  ;;  %v12715_v12 = vld [vmem:[%s24907_s4 + $0x1e8] sm:$0xf]  ;;  %v15696_v23 = vld [vmem:[%s24907_s4 + $0xd4] sm:$0xf0] }
 0x3de   :  { %5111 = vmatpush.bf16.msrb.mxu2 %v12904_v38  ;;  %v4098_v38 = vpop.f32.mrf.mxu2  ;;  %5006 = vmatmul.bf16.gmra.mxu3 %v20317_v54  ;;  %v12571_v5 = vld [vmem:[%s24907_s4 + $0xc8] sm:$0xf] }
 0x3df   :  { %5074 = vmatpush.bf16.msrb.mxu3 %v12632_v3  ;;  %v4080_v3 = vadd.f32 %v4079_v2, %v4061_v27  ;;  %v12843_v2 = vld [vmem:[%s24907_s4 + $0x2e8] sm:$0xf]  ;;  %v12972_v27 = vor.u32 %v15796_v14, %v12971_v49  ;;  %v12572_v8 = vor.u32 %v15696_v23, %v12571_v5 }
 0x3e0   :  { %5055 = vmatpush.bf16.msrb.mxu1 %v12504_v18  ;;  %v20314_v18 = vpack.c.bf16 %v19281_v26, %v3013_v32  ;;  %v4082_v32 = vpop.f32.mrf.mxu0  ;;  %5025 = vmatmul.bf16.gmra.mxu0 %v20320_v7  ;;  %v12811_v49 = vld [vmem:[%s24907_s4 + $0x2a8] sm:$0xf] }
 0x3e1   :  { %5093 = vmatpush.bf16.msrb.mxu0 %v12760_v17  ;;  %v20332_v17 = vpack.c.bf16 %v19362_v52, %v3016_v25  ;;  %v20343_v59 = vadd.f32 %v4098_v38, %v4080_v3  ;;  %v12716_v25 = vor.u32 %v15732_v61, %v12715_v12  ;;  %v4063_v37 = vpop.f32.mrf.mxu3  ;;  %v15760_v12 = vld [vmem:[%s24907_s4 + $0x2d4] sm:$0xf0]  ;;  %v12955_v38 = vld [vmem:[%s24907_s4 + $0x3c8] sm:$0xf] }
 0x3e2   :  { %5112 = vmatpush.bf16.msrb.mxu2 %v12888_v1  ;;  %v15764_v1 = vld [vmem:[%s24907_s4 + $0x2f4] sm:$0xf0]  ;;  %4987 = vmatmul.bf16.gmra.mxu1 %v20314_v18 }
 0x3e3   :  { %5075 = vmatpush.bf16.msrb.mxu3 %v12616_v63  ;;  %v12856_v63 = vor.u32 %v15765_v33, %v12853_v28  ;;  %5044 = vmatmul.bf16.gmra.mxu2 %v20332_v17  ;;  %v12844_v45 = vor.u32 %v15764_v1, %v12843_v2  ;;  %v4046_v33 = vpop.f32.mrf.mxu1  ;;  %v15724_v28 = vld [vmem:[%s24907_s4 + $0x1b4] sm:$0xf0] }
 0x3e4   :  { %5056 = vmatpush.bf16.msrb.mxu1 %v12488_v56  ;;  %v15728_v56 = vld [vmem:[%s24907_s4 + $0x1d4] sm:$0xf0] }
 0x3e5   :  { %5094 = vmatpush.bf16.msrb.mxu0 %v12744_v6  ;;  %v15792_v6 = vld [vmem:[%s24907_s4 + $0x3d4] sm:$0xf0]  ;;  %v12700_v61 = vor.u32 %v15728_v56, %v12699_v11  ;;  %v12667_v56 = vld [vmem:[%s24907_s4 + $0x188] sm:$0xf] }
 0x3e6   :  { %5113 = vmatpush.bf16.msrb.mxu2 %v12872_v20  ;;  %v4064_v20 = vadd.f32 %v4063_v37, %v4044_v57  ;;  %v4101_v3 = vpop.f32.mrf.mxu2  ;;  %v12555_v57 = vld [vmem:[%s24907_s4 + $0xa8] sm:$0xf]  ;;  %v15692_v2 = vld [vmem:[%s24907_s4 + $0xb4] sm:$0xf0]  ;;  %v12956_v1 = vor.u32 %v15792_v6, %v12955_v38 }
 0x3e7   :  { %5076 = vmatpush.bf16.msrb.mxu3 %v12600_v58  ;;  %v15752_v6 = vld [vmem:[%s24907_s4 + $0x294] sm:$0xf0] }
 0x3e8   :  { %5057 = vmatpush.bf16.msrb.mxu1 %v12472_v10  ;;  %v4083_v58 = vadd.f32 %v4082_v32, %v4064_v20  ;;  %v12828_v10 = vor.u32 %v15760_v12, %v12827_v42  ;;  %v4084_v14 = vpop.f32.mrf.mxu0  ;;  %v15788_v32 = vld [vmem:[%s24907_s4 + $0x3b4] sm:$0xf0]  ;;  %v12795_v12 = vld [vmem:[%s24907_s4 + $0x288] sm:$0xf] }
 0x3e9   :  { %5095 = vmatpush.bf16.msrb.mxu0 %v12728_v16  ;;  %v12684_v16 = vor.u32 %v15724_v28, %v12683_v15  ;;  %v15688_v42 = vld [vmem:[%s24907_s4 + $0x94] sm:$0xf0]  ;;  %v4065_v37 = vpop.f32.mrf.mxu3  ;;  %v12923_v20 = vld [vmem:[%s24907_s4 + $0x388] sm:$0xf] }
 0x3ea   :  { %5114 = vmatpush.bf16.msrb.mxu2 %v12856_v63  ;;  %v20397_v11 = vadd.f32 %v4101_v3, %v4083_v58  ;;  %v12556_v63 = vor.u32 %v15692_v2, %v12555_v57  ;;  %v4066_v38 = vadd.f32 %v4065_v37, %v4046_v33  ;;  %v12651_v33 = vld [vmem:[%s24907_s4 + $0x168] sm:$0xf]  ;;  %v15716_v2 = vld [vmem:[%s24907_s4 + $0x174] sm:$0xf0] }
 0x3eb   :  { %5145 = vmatpush.bf16.msra.mxu3 %v12716_v25  ;;  %v15756_v25 = vld [vmem:[%s24907_s4 + $0x2b4] sm:$0xf0]  ;;  %v4115_v15 = vpop.f32.mrf.mxu1  ;;  %v12523_v58 = vld [vmem:[%s24907_s4 + $0x68] sm:$0xf] }
 0x3ec   :  { %5126 = vmatpush.bf16.msra.mxu1 %v12588_v55  ;;  %v12939_v55 = vld [vmem:[%s24907_s4 + $0x3a8] sm:$0xf]  ;;  %v12812_v5 = vor.u32 %v15756_v25, %v12811_v49  ;;  %v4085_v57 = vadd.f32 %v4084_v14, %v4066_v38  ;;  %v12796_v49 = vor.u32 %v15752_v6, %v12795_v12 }
 0x3ed   :  { %5164 = vmatpush.bf16.msra.mxu0 %v12844_v45  ;;  %v12940_v23 = vor.u32 %v15788_v32, %v12939_v55  ;;  %v15720_v45 = vld [vmem:[%s24907_s4 + $0x194] sm:$0xf0]  ;;  %v12779_v14 = vld [vmem:[%s24907_s4 + $0x268] sm:$0xf] }
 0x3ee   :  { %5183 = vmatpush.bf16.msra.mxu2 %v12972_v27  ;;  %v12539_v27 = vld [vmem:[%s24907_s4 + $0x88] sm:$0xf]  ;;  %v12668_v3 = vor.u32 %v15720_v45, %v12667_v56  ;;  %5077 = vmatmul.bf16.vlgmr.msrb.gmra.mxu3 %v20188_v21  ;;  %v15748_v32 = vld [vmem:[%s24907_s4 + $0x274] sm:$0xf0]  ;;  %v12652_v56 = vor.u32 %v15716_v2, %v12651_v33 }
 0x3ef   :  { %5146 = vmatpush.bf16.msra.mxu3 %v12700_v61  ;;  %v15784_v61 = vld [vmem:[%s24907_s4 + $0x394] sm:$0xf0]  ;;  %v12540_v28 = vor.u32 %v15688_v42, %v12539_v27  ;;  %v12507_v27 = vld [vmem:[%s24907_s4 + $0x48] sm:$0xf]  ;;  %v12780_v12 = vor.u32 %v15748_v32, %v12779_v14 }
 0x3f0   :  { %5127 = vmatpush.bf16.msra.mxu1 %v12572_v8  ;;  %v4103_v8 = vpop.f32.mrf.mxu2  ;;  %v12924_v25 = vor.u32 %v15784_v61, %v12923_v20  ;;  %5096 = vmatmul.bf16.vlgmr.msrb.gmra.mxu0 %v20205_v9  ;;  %v15712_v45 = vld [vmem:[%s24907_s4 + $0x154] sm:$0xf0]  ;;  %v12763_v6 = vld [vmem:[%s24907_s4 + $0x248] sm:$0xf] }
 0x3f1   :  { %5165 = vmatpush.bf16.msra.mxu0 %v12828_v10  ;;  %v15684_v10 = vld [vmem:[%s24907_s4 + $0x74] sm:$0xf0]  ;;  %v20438_v55 = vadd.f32 %v4103_v8, %v4085_v57  ;;  %v4134_v37 = vpop.f32.mrf.mxu3  ;;  %v12891_v8 = vld [vmem:[%s24907_s4 + $0x348] sm:$0xf] }
 0x3f2   :  { %5184 = vmatpush.bf16.msra.mxu2 %v12956_v1  ;;  %v4153_v1 = vpop.f32.mrf.mxu0  ;;  %5058 = vmatmul.bf16.vlgmr.msrb.gmra.mxu1 %v20185_v36  ;;  %v15680_v42 = vld [vmem:[%s24907_s4 + $0x54] sm:$0xf0]  ;;  %v4135_v20 = vadd.f32 %v4134_v37, %v4115_v15  ;;  %v12619_v15 = vld [vmem:[%s24907_s4 + $0x128] sm:$0xf] }
 0x3f3   :  { %5147 = vmatpush.bf16.msra.mxu3 %v12684_v16  ;;  %v12907_v16 = vld [vmem:[%s24907_s4 + $0x368] sm:$0xf]  ;;  %5115 = vmatmul.bf16.vlgmr.msrb.gmra.mxu2 %v20208_v60  ;;  %v15744_v61 = vld [vmem:[%s24907_s4 + $0x254] sm:$0xf0]  ;;  %v4117_v33 = vpop.f32.mrf.mxu1  ;;  %v12508_v2 = vor.u32 %v15680_v42, %v12507_v27 }
 0x3f4   :  { %5128 = vmatpush.bf16.msra.mxu1 %v12556_v63  ;;  %v15780_v63 = vld [vmem:[%s24907_s4 + $0x374] sm:$0xf0]  ;;  %v12764_v32 = vor.u32 %v15744_v61, %v12763_v6  ;;  %v12603_v42 = vld [vmem:[%s24907_s4 + $0x108] sm:$0xf] }
 0x3f5   :  { %5166 = vmatpush.bf16.msra.mxu0 %v12812_v5  ;;  %v12524_v5 = vor.u32 %v15684_v10, %v12523_v58  ;;  %v12908_v38 = vor.u32 %v15780_v63, %v12907_v16  ;;  %v4154_v58 = vadd.f32 %v4153_v1, %v4135_v20  ;;  %v15708_v10 = vld [vmem:[%s24907_s4 + $0x134] sm:$0xf0]  ;;  %v12747_v1 = vld [vmem:[%s24907_s4 + $0x228] sm:$0xf] }
 0x3f6   :  { %5185 = vmatpush.bf16.msra.mxu2 %v12940_v23  ;;  %v12635_v23 = vld [vmem:[%s24907_s4 + $0x148] sm:$0xf]  ;;  %v15704_v37 = vld [vmem:[%s24907_s4 + $0x114] sm:$0xf0] }
 0x3f7   :  { %5148 = vmatpush.bf16.msra.mxu3 %v12668_v3  ;;  %v15776_v3 = vld [vmem:[%s24907_s4 + $0x354] sm:$0xf0]  ;;  %v12636_v57 = vor.u32 %v15712_v45, %v12635_v23  ;;  %v12620_v45 = vor.u32 %v15708_v10, %v12619_v15  ;;  %v15730_v15 = vld [vmem:[%s24907_s4 + $0x1ec] sm:$0xf] }
 0x3f8   :  { %5129 = vmatpush.bf16.msra.mxu1 %v12540_v28  ;;  %v4172_v28 = vpop.f32.mrf.mxu2  ;;  %v12892_v16 = vor.u32 %v15776_v3, %v12891_v8  ;;  %v15772_v23 = vld [vmem:[%s24907_s4 + $0x334] sm:$0xf0]  ;;  %v12731_v8 = vld [vmem:[%s24907_s4 + $0x208] sm:$0xf] }
 0x3f9   :  { %5167 = vmatpush.bf16.msra.mxu0 %v12796_v49  ;;  %v12491_v49 = vld [vmem:[%s24907_s4 + $0x28] sm:$0xf]  ;;  %v20492_v63 = vadd.f32 %v4172_v28, %v4154_v58  ;;  %v4136_v6 = vpop.f32.mrf.mxu3  ;;  %v15736_v3 = vld [vmem:[%s24907_s4 + $0x214] sm:$0xf0]  ;;  %v12717_v58 = vld [vmem:[%s24907_s4 + $0x1f8] sm:$0xf0] }
 0x3fa   :  { %5186 = vmatpush.bf16.msra.mxu2 %v12924_v25  ;;  %v15676_v25 = vld [vmem:[%s24907_s4 + $0x34] sm:$0xf0]  ;;  %v4155_v14 = vpop.f32.mrf.mxu0  ;;  %v12859_v28 = vld [vmem:[%s24907_s4 + $0x308] sm:$0xf] }
 0x3fb   :  { %5149 = vmatpush.bf16.msra.mxu3 %v12652_v56  ;;  %v15740_v56 = vld [vmem:[%s24907_s4 + $0x234] sm:$0xf0]  ;;  %v12492_v27 = vor.u32 %v15676_v25, %v12491_v49  ;;  %v4120_v49 = vpop.f32.mrf.mxu1  ;;  %v12604_v25 = vor.u32 %v15704_v37, %v12603_v42  ;;  %v12732_v42 = vor.u32 %v15736_v3, %v12731_v8  ;;  %v15694_v8 = vld [vmem:[%s24907_s4 + $0xcc] sm:$0xf]  ;;  %v12573_v3 = vld [vmem:[%s24907_s4 + $0xd8] sm:$0xf0] }
 0x3fc   :  { %5130 = vmatpush.bf16.msra.mxu1 %v12524_v5  ;;  %v12875_v5 = vld [vmem:[%s24907_s4 + $0x328] sm:$0xf]  ;;  %v12748_v20 = vor.u32 %v15740_v56, %v12747_v1  ;;  %v15762_v1 = vld [vmem:[%s24907_s4 + $0x2ec] sm:$0xf] }
 0x3fd   :  { %5168 = vmatpush.bf16.msra.mxu0 %v12780_v12  ;;  %v12475_v12 = vld [vmem:[%s24907_s4 + $0x8] sm:$0xf]  ;;  %v12876_v61 = vor.u32 %v15772_v23, %v12875_v5  ;;  %v12845_v5 = vld [vmem:[%s24907_s4 + $0x2f8] sm:$0xf0]  ;;  %v15794_v23 = vld [vmem:[%s24907_s4 + $0x3ec] sm:$0xf] }
 0x3fe   :  { %5187 = vmatpush.bf16.msra.mxu2 %v12908_v38  ;;  %v15672_v38 = vld [vmem:[%s24907_s4 + $0x14] sm:$0xf0]  ;;  %5082 = vmatmul.bf16.gmra.mxu3 %v20317_v54 }
 0x3ff   :  { %5150 = vmatpush.bf16.msra.mxu3 %v12636_v57  ;;  %v4137_v57 = vadd.f32 %v4136_v6, %v4117_v33  ;;  %v15698_v33 = vld [vmem:[%s24907_s4 + $0xec] sm:$0xf] }
 0x400   :  { %5131 = vmatpush.bf16.msra.mxu1 %v12508_v2  ;;  %v15768_v2 = vld [vmem:[%s24907_s4 + $0x314] sm:$0xf0]  ;;  %v4174_v10 = vpop.f32.mrf.mxu2  ;;  %v15726_v6 = vld [vmem:[%s24907_s4 + $0x1cc] sm:$0xf]  ;;  %5101 = vmatmul.bf16.gmra.mxu0 %v20320_v7 }
 0x401   :  { %5169 = vmatpush.bf16.msra.mxu0 %v12764_v32  ;;  %v12476_v32 = vor.u32 %v15672_v38, %v12475_v12  ;;  %v4156_v56 = vadd.f32 %v4155_v14, %v4137_v57  ;;  %v12860_v37 = vor.u32 %v15768_v2, %v12859_v28  ;;  %v12720_v14 = vor.u32 %v15730_v15, %v12717_v58  ;;  %v12701_v57 = vld [vmem:[%s24907_s4 + $0x1d8] sm:$0xf0]  ;;  %v15758_v28 = vld [vmem:[%s24907_s4 + $0x2cc] sm:$0xf] }
 0x402   :  { %5188 = vmatpush.bf16.msra.mxu2 %v12892_v16  ;;  %v12589_v16 = vld [vmem:[%s24907_s4 + $0xf8] sm:$0xf0]  ;;  %5063 = vmatmul.bf16.gmra.mxu1 %v20314_v18  ;;  %v15790_v15 = vld [vmem:[%s24907_s4 + $0x3cc] sm:$0xf] }
 0x403   :  { %5151 = vmatpush.bf16.msra.mxu3 %v12620_v45  ;;  %v12973_v45 = vld [vmem:[%s24907_s4 + $0x3f8] sm:$0xf0]  ;;  %v20551_v12 = vadd.f32 %v4174_v10, %v4156_v56  ;;  %v12592_v38 = vor.u32 %v15698_v33, %v12589_v16  ;;  %5120 = vmatmul.bf16.gmra.mxu2 %v20332_v17  ;;  %v4139_v10 = vpop.f32.mrf.mxu3  ;;  %v12576_v33 = vor.u32 %v15694_v8, %v12573_v3  ;;  %v15722_v16 = vld [vmem:[%s24907_s4 + $0x1ac] sm:$0xf] }
 0x404   :  { %5132 = vmatpush.bf16.msra.mxu1 %v12492_v27  ;;  %v4158_v27 = vpop.f32.mrf.mxu0  ;;  %v12829_v2 = vld [vmem:[%s24907_s4 + $0x2d8] sm:$0xf0] }
 0x405   :  { %5170 = vmatpush.bf16.msra.mxu0 %v12748_v20  ;;  %v12848_v20 = vor.u32 %v15762_v1, %v12845_v5  ;;  %v12957_v58 = vld [vmem:[%s24907_s4 + $0x3d8] sm:$0xf0]  ;;  %v4122_v5 = vpop.f32.mrf.mxu1 }
 0x406   :  { %5189 = vmatpush.bf16.msra.mxu2 %v12876_v61  ;;  %v12976_v61 = vor.u32 %v15794_v23, %v12973_v45  ;;  %v12685_v1 = vld [vmem:[%s24907_s4 + $0x1b8] sm:$0xf0]  ;;  %v12832_v23 = vor.u32 %v15758_v28, %v12829_v2  ;;  %v12960_v45 = vor.u32 %v15790_v15, %v12957_v58  ;;  %v15718_v2 = vld [vmem:[%s24907_s4 + $0x18c] sm:$0xf] }
 0x407   :  { %5152 = vmatpush.bf16.msra.mxu3 %v12604_v25  ;;  %v4140_v25 = vadd.f32 %v4139_v10, %v4120_v49  ;;  %v15690_v49 = vld [vmem:[%s24907_s4 + $0xac] sm:$0xf]  ;;  %v12688_v8 = vor.u32 %v15722_v16, %v12685_v1  ;;  %v12669_v15 = vld [vmem:[%s24907_s4 + $0x198] sm:$0xf0] }
 0x408   :  { %5133 = vmatpush.bf16.msra.mxu1 %v12476_v32  ;;  %v12704_v32 = vor.u32 %v15726_v6, %v12701_v57  ;;  %v4177_v56 = vpop.f32.mrf.mxu2  ;;  %v15786_v6 = vld [vmem:[%s24907_s4 + $0x3ac] sm:$0xf]  ;;  %v12941_v57 = vld [vmem:[%s24907_s4 + $0x3b8] sm:$0xf0] }
 0x409   :  { %5171 = vmatpush.bf16.msra.mxu0 %v12732_v42  ;;  %v12557_v42 = vld [vmem:[%s24907_s4 + $0xb8] sm:$0xf0]  ;;  %v12944_v28 = vor.u32 %v15786_v6, %v12941_v57  ;;  %v15686_v58 = vld [vmem:[%s24907_s4 + $0x8c] sm:$0xf] }
 0x40a   :  { %5190 = vmatpush.bf16.msra.mxu2 %v12860_v37  ;;  %v15754_v37 = vld [vmem:[%s24907_s4 + $0x2ac] sm:$0xf]  ;;  %v12560_v3 = vor.u32 %v15690_v49, %v12557_v42  ;;  %v12541_v10 = vld [vmem:[%s24907_s4 + $0x98] sm:$0xf0]  ;;  %v12672_v49 = vor.u32 %v15718_v2, %v12669_v15 }
 0x40b   :  { %5221 = vmatpush.bf16.msrb.mxu3 %v12720_v14  ;;  %v4159_v14 = vadd.f32 %v4158_v27, %v4140_v25  ;;  %v4141_v25 = vpop.f32.mrf.mxu3  ;;  %v12797_v16 = vld [vmem:[%s24907_s4 + $0x298] sm:$0xf0]  ;;  %v15782_v1 = vld [vmem:[%s24907_s4 + $0x38c] sm:$0xf] }
 0x40c   :  { %5202 = vmatpush.bf16.msrb.mxu1 %v12592_v38  ;;  %v12813_v38 = vld [vmem:[%s24907_s4 + $0x2b8] sm:$0xf0]  ;;  %v15714_v42 = vld [vmem:[%s24907_s4 + $0x16c] sm:$0xf] }
 0x40d   :  { %5240 = vmatpush.bf16.msrb.mxu0 %v12848_v20  ;;  %v4160_v20 = vpop.f32.mrf.mxu0  ;;  %v12816_v27 = vor.u32 %v15754_v37, %v12813_v38  ;;  %v15682_v38 = vld [vmem:[%s24907_s4 + $0x6c] sm:$0xf]  ;;  %v12525_v6 = vld [vmem:[%s24907_s4 + $0x78] sm:$0xf0] }
 0x40e   :  { %5259 = vmatpush.bf16.msrb.mxu2 %v12976_v61  ;;  %v20605_v61 = vadd.f32 %v4177_v56, %v4159_v14  ;;  %v12925_v56 = vld [vmem:[%s24907_s4 + $0x398] sm:$0xf0]  ;;  %5153 = vmatmul.bf16.vlgmr.msra.gmra.mxu3 %v20188_v21  ;;  %v15778_v2 = vld [vmem:[%s24907_s4 + $0x36c] sm:$0xf] }
 0x40f   :  { %5222 = vmatpush.bf16.msrb.mxu3 %v12704_v32  ;;  %v15750_v32 = vld [vmem:[%s24907_s4 + $0x28c] sm:$0xf]  ;;  %v12653_v14 = vld [vmem:[%s24907_s4 + $0x178] sm:$0xf0] }
 0x410   :  { %5203 = vmatpush.bf16.msrb.mxu1 %v12576_v33  ;;  %v4142_v33 = vadd.f32 %v4141_v25, %v4122_v5  ;;  %v12544_v5 = vor.u32 %v15686_v58, %v12541_v10  ;;  %v12909_v15 = vld [vmem:[%s24907_s4 + $0x378] sm:$0xf0]  ;;  %v12656_v58 = vor.u32 %v15714_v42, %v12653_v14  ;;  %v12528_v10 = vor.u32 %v15682_v38, %v12525_v6  ;;  %v15710_v25 = vld [vmem:[%s24907_s4 + $0x14c] sm:$0xf] }
 0x411   :  { %5241 = vmatpush.bf16.msrb.mxu0 %v12832_v23  ;;  %v4179_v23 = vpop.f32.mrf.mxu2  ;;  %v12765_v42 = vld [vmem:[%s24907_s4 + $0x258] sm:$0xf0] }
 0x412   :  { %5260 = vmatpush.bf16.msrb.mxu2 %v12960_v45  ;;  %v4191_v45 = vpop.f32.mrf.mxu1  ;;  %v4161_v37 = vadd.f32 %v4160_v20, %v4142_v33  ;;  %5134 = vmatmul.bf16.vlgmr.msra.gmra.mxu1 %v20185_v36  ;;  %v15678_v33 = vld [vmem:[%s24907_s4 + $0x4c] sm:$0xf]  ;;  %v12893_v14 = vld [vmem:[%s24907_s4 + $0x358] sm:$0xf0] }
 0x413   :  { %5223 = vmatpush.bf16.msrb.mxu3 %v12688_v8  ;;  %v12800_v8 = vor.u32 %v15750_v32, %v12797_v16  ;;  %5172 = vmatmul.bf16.vlgmr.msra.gmra.mxu0 %v20205_v9  ;;  %v12637_v32 = vld [vmem:[%s24907_s4 + $0x158] sm:$0xf0] }
 0x414   :  { %5204 = vmatpush.bf16.msrb.mxu1 %v12560_v3  ;;  %v12928_v3 = vor.u32 %v15782_v1, %v12925_v56  ;;  %v20646_v20 = vadd.f32 %v4179_v23, %v4161_v37  ;;  %5191 = vmatmul.bf16.vlgmr.msra.gmra.mxu2 %v20208_v60  ;;  %v12509_v16 = vld [vmem:[%s24907_s4 + $0x58] sm:$0xf0]  ;;  %v4210_v1 = vpop.f32.mrf.mxu3  ;;  %v12912_v23 = vor.u32 %v15778_v2, %v12909_v15  ;;  %v15774_v37 = vld [vmem:[%s24907_s4 + $0x34c] sm:$0xf] }
 0x415   :  { %5242 = vmatpush.bf16.msrb.mxu0 %v12816_v27  ;;  %v4229_v57 = vpop.f32.mrf.mxu0  ;;  %v15746_v27 = vld [vmem:[%s24907_s4 + $0x26c] sm:$0xf]  ;;  %v12493_v15 = vld [vmem:[%s24907_s4 + $0x38] sm:$0xf0] }
 0x416   :  { %5261 = vmatpush.bf16.msrb.mxu2 %v12944_v28  ;;  %v12781_v28 = vld [vmem:[%s24907_s4 + $0x278] sm:$0xf0]  ;;  %v15674_v2 = vld [vmem:[%s24907_s4 + $0x2c] sm:$0xf] }
 0x417   :  { %5224 = vmatpush.bf16.msrb.mxu3 %v12672_v49  ;;  %v12784_v56 = vor.u32 %v15746_v27, %v12781_v28  ;;  %v15742_v49 = vld [vmem:[%s24907_s4 + $0x24c] sm:$0xf]  ;;  %v12621_v28 = vld [vmem:[%s24907_s4 + $0x138] sm:$0xf0] }
 0x418   :  { %5205 = vmatpush.bf16.msrb.mxu1 %v12544_v5  ;;  %v4211_v5 = vadd.f32 %v4210_v1, %v4191_v45  ;;  %v15706_v45 = vld [vmem:[%s24907_s4 + $0x12c] sm:$0xf]  ;;  %v12877_v1 = vld [vmem:[%s24907_s4 + $0x338] sm:$0xf0] }
 0x419   :  { %5243 = vmatpush.bf16.msrb.mxu0 %v12800_v8  ;;  %v4248_v38 = vpop.f32.mrf.mxu2  ;;  %v12640_v8 = vor.u32 %v15710_v25, %v12637_v32  ;;  %v12896_v25 = vor.u32 %v15774_v37, %v12893_v14  ;;  %v12477_v37 = vld [vmem:[%s24907_s4 + $0x18] sm:$0xf0] }
 0x41a   :  { %5262 = vmatpush.bf16.msrb.mxu2 %v12928_v3  ;;  %v4193_v6 = vpop.f32.mrf.mxu1  ;;  %v12512_v3 = vor.u32 %v15678_v33, %v12509_v16  ;;  %v4230_v27 = vadd.f32 %v4229_v57, %v4211_v5  ;;  %v15738_v57 = vld [vmem:[%s24907_s4 + $0x22c] sm:$0xf]  ;;  %v12749_v33 = vld [vmem:[%s24907_s4 + $0x238] sm:$0xf0] }
 0x41b   :  { %5225 = vmatpush.bf16.msrb.mxu3 %v12656_v58  ;;  %v15770_v16 = vld [vmem:[%s24907_s4 + $0x32c] sm:$0xf]  ;;  %v12605_v5 = vld [vmem:[%s24907_s4 + $0x118] sm:$0xf0] }
 0x41c   :  { %5206 = vmatpush.bf16.msrb.mxu1 %v12528_v10  ;;  %v12768_v10 = vor.u32 %v15742_v49, %v12765_v42  ;;  %v20700_v32 = vadd.f32 %v4248_v38, %v4230_v27  ;;  %v15702_v49 = vld [vmem:[%s24907_s4 + $0x10c] sm:$0xf]  ;;  %v4212_v14 = vpop.f32.mrf.mxu3  ;;  %v12752_v38 = vor.u32 %v15738_v57, %v12749_v33 }
 0x41d   :  { %v4231_v58 = vpop.f32.mrf.mxu0  ;;  %5244 = vmatpush.bf16.msrb.mxu0 %v12784_v56  ;;  %v12624_v56 = vor.u32 %v15706_v45, %v12621_v28  ;;  %v15670_v42 = vld [vmem:[%s24907_s4 + $0xc] sm:$0xf]  ;;  %v12733_v45 = vld [vmem:[%s24907_s4 + $0x218] sm:$0xf0]  ;;  %v4213_v28 = vadd.f32 %v4212_v14, %v4193_v6  ;;  %v12608_v33 = vor.u32 %v15702_v49, %v12605_v5  ;;  %v13219_v6 = vld [vmem:[%s24907_s4 + $0x8e0] sm:$0xf] }
 0x41e   :  { %5263 = vmatpush.bf16.msrb.mxu2 %v12912_v23  ;;  %v12496_v23 = vor.u32 %v15674_v2, %v12493_v15  ;;  %v15766_v27 = vld [vmem:[%s24907_s4 + $0x30c] sm:$0xf]  ;;  %v12861_v2 = vld [vmem:[%s24907_s4 + $0x318] sm:$0xf0]  ;;  %v13347_v15 = vld [vmem:[%s24907_s4 + $0x9e0] sm:$0xf]  ;;  %5158 = vmatmul.bf16.gmra.mxu3 %v20317_v54 }
 0x41f   :  { %5226 = vmatpush.bf16.msrb.mxu3 %v12640_v8  ;;  %v12880_v8 = vor.u32 %v15770_v16, %v12877_v1  ;;  %v12480_v16 = vor.u32 %v15670_v42, %v12477_v37  ;;  %v15955_v1 = vld [vmem:[%s24907_s4 + $0x8ec] sm:$0xf0]  ;;  %v13475_v14 = vld [vmem:[%s24907_s4 + $0xae0] sm:$0xf]  ;;  %v4232_v0 = vadd.f32 %v4231_v58, %v4213_v28  ;;  %v12864_v37 = vor.u32 %v15766_v27, %v12861_v2 }
 0x420   :  { %5207 = vmatpush.bf16.msrb.mxu1 %v12512_v3  ;;  %v15734_v3 = vld [vmem:[%s24907_s4 + $0x20c] sm:$0xf]  ;;  %v16051_v49 = vld [vmem:[%s24907_s4 + $0xbec] sm:$0xf0]  ;;  %v13220_v28 = vor.u32 %v15955_v1, %v13219_v6  ;;  %v13587_v2 = vld [vmem:[%s24907_s4 + $0xbc0] sm:$0xf] }
 0x421   :  { %5245 = vmatpush.bf16.msrb.mxu0 %v12768_v10  ;;  %v15987_v10 = vld [vmem:[%s24907_s4 + $0x9ec] sm:$0xf0]  ;;  %v12736_v42 = vor.u32 %v15734_v3, %v12733_v45  ;;  %v13459_v45 = vld [vmem:[%s24907_s4 + $0xac0] sm:$0xf] }
 0x422   :  { %5264 = vmatpush.bf16.msrb.mxu2 %v12896_v25  ;;  %v4250_v25 = vpop.f32.mrf.mxu2  ;;  %v4196_v57 = vpop.f32.mrf.mxu1  ;;  %5139 = vmatmul.bf16.gmra.mxu1 %v20314_v18  ;;  %v13348_v58 = vor.u32 %v15987_v10, %v13347_v15  ;;  %v15951_v3 = vld [vmem:[%s24907_s4 + $0x8cc] sm:$0xf0]  ;;  %v13315_v6 = vld [vmem:[%s24907_s4 + $0x9a0] sm:$0xf] }
 0x423   :  { %5227 = vmatpush.bf16.msrb.mxu3 %v12624_v56  ;;  %v16019_v56 = vld [vmem:[%s24907_s4 + $0xaec] sm:$0xf0]  ;;  %v20759_v4 = vadd.f32 %v4250_v25, %v4232_v0  ;;  %v13203_v0 = vld [vmem:[%s24907_s4 + $0x8c0] sm:$0xf]  ;;  %5177 = vmatmul.bf16.gmra.mxu0 %v20320_v7 }
 0x424   :  { %5208 = vmatpush.bf16.msrb.mxu1 %v12496_v23  ;;  %v13603_v23 = vld [vmem:[%s24907_s4 + $0xbe0] sm:$0xf]  ;;  %5196 = vmatmul.bf16.gmra.mxu2 %v20332_v17  ;;  %v16015_v27 = vld [vmem:[%s24907_s4 + $0xacc] sm:$0xf0]  ;;  %v4215_v10 = vpop.f32.mrf.mxu3 }
 0x425   :  { %v4234_v5 = vpop.f32.mrf.mxu0  ;;  %5246 = vmatpush.bf16.msrb.mxu0 %v12752_v38  ;;  %v13476_v38 = vor.u32 %v16019_v56, %v13475_v14  ;;  %v16047_v15 = vld [vmem:[%s24907_s4 + $0xbcc] sm:$0xf0]  ;;  %v4216_v25 = vadd.f32 %v4215_v10, %v4196_v57  ;;  %v13187_v57 = vld [vmem:[%s24907_s4 + $0x8a0] sm:$0xf] }
 0x426   :  { %5265 = vmatpush.bf16.msrb.mxu2 %v12880_v8  ;;  %v13604_v8 = vor.u32 %v16051_v49, %v13603_v23  ;;  %v15979_v1 = vld [vmem:[%s24907_s4 + $0x9ac] sm:$0xf0]  ;;  %v13460_v23 = vor.u32 %v16015_v27, %v13459_v45  ;;  %v13588_v49 = vor.u32 %v16047_v15, %v13587_v2  ;;  %v13299_v27 = vld [vmem:[%s24907_s4 + $0x980] sm:$0xf] }
 0x427   :  { %5228 = vmatpush.bf16.msrb.mxu3 %v12608_v33  ;;  %v13332_v33 = vor.u32 %v15983_v48, %v13331_v39  ;;  %v15947_v48 = vld [vmem:[%s24907_s4 + $0x8ac] sm:$0xf0]  ;;  %v13443_v39 = vld [vmem:[%s24907_s4 + $0xaa0] sm:$0xf] }
 0x428   :  { %5209 = vmatpush.bf16.msrb.mxu1 %v12480_v16  ;;  %v13204_v16 = vor.u32 %v15951_v3, %v13203_v0  ;;  %v13316_v0 = vor.u32 %v15979_v1, %v13315_v6  ;;  %v13188_v3 = vor.u32 %v15947_v48, %v13187_v57  ;;  %v15975_v2 = vld [vmem:[%s24907_s4 + $0x98c] sm:$0xf0]  ;;  %v13171_v15 = vld [vmem:[%s24907_s4 + $0x880] sm:$0xf] }
 0x429   :  { %5247 = vmatpush.bf16.msrb.mxu0 %v12736_v42  ;;  %v4235_v42 = vadd.f32 %v4234_v5, %v4216_v25  ;;  %v15943_v10 = vld [vmem:[%s24907_s4 + $0x88c] sm:$0xf0]  ;;  %v13555_v1 = vld [vmem:[%s24907_s4 + $0xb80] sm:$0xf]  ;;  %v13300_v57 = vor.u32 %v15975_v2, %v13299_v27 }
 0x42a   :  { %5266 = vmatpush.bf16.msrb.mxu2 %v12864_v37  ;;  %v4253_v14 = vpop.f32.mrf.mxu2  ;;  %v4198_v56 = vpop.f32.mrf.mxu1  ;;  %v16011_v37 = vld [vmem:[%s24907_s4 + $0xaac] sm:$0xf0]  ;;  %v13283_v48 = vld [vmem:[%s24907_s4 + $0x960] sm:$0xf] }
 0x42b   :  { %6162 = vmatpush.bf16.msra.mxu3 %v13348_v58  ;;  %v13571_v58 = vld [vmem:[%s24907_s4 + $0xba0] sm:$0xf]  ;;  %v13444_v5 = vor.u32 %v16011_v37, %v13443_v39  ;;  %v16007_v6 = vld [vmem:[%s24907_s4 + $0xa8c] sm:$0xf0] }
 0x42c   :  { %6143 = vmatpush.bf16.msra.mxu1 %v13220_v28  ;;  %v16043_v28 = vld [vmem:[%s24907_s4 + $0xbac] sm:$0xf0]  ;;  %v4217_v25 = vpop.f32.mrf.mxu3  ;;  %v13155_v37 = vld [vmem:[%s24907_s4 + $0x860] sm:$0xf] }
 0x42d   :  { %6181 = vmatpush.bf16.msra.mxu0 %v13476_v38  ;;  %v4236_v38 = vpop.f32.mrf.mxu0  ;;  %v13572_v45 = vor.u32 %v16043_v28, %v13571_v58  ;;  %v15939_v58 = vld [vmem:[%s24907_s4 + $0x86c] sm:$0xf0]  ;;  %v13539_v27 = vld [vmem:[%s24907_s4 + $0xb60] sm:$0xf] }
 0x42e   :  { %6200 = vmatpush.bf16.msra.mxu2 %v13604_v8  ;;  %v20813_v8 = vadd.f32 %v4253_v14, %v4235_v42  ;;  %v16039_v14 = vld [vmem:[%s24907_s4 + $0xb8c] sm:$0xf0]  ;;  %5229 = vmatmul.bf16.vlgmr.msrb.gmra.mxu3 %v20188_v21 }
 0x42f   :  { %6163 = vmatpush.bf16.msra.mxu3 %v13332_v33  ;;  %v13427_v33 = vld [vmem:[%s24907_s4 + $0xa80] sm:$0xf]  ;;  %v15971_v42 = vld [vmem:[%s24907_s4 + $0x96c] sm:$0xf0] }
 0x430   :  { %6144 = vmatpush.bf16.msra.mxu1 %v13204_v16  ;;  %v4218_v16 = vadd.f32 %v4217_v25, %v4198_v56  ;;  %v13172_v56 = vor.u32 %v15943_v10, %v13171_v15  ;;  %v16035_v2 = vld [vmem:[%s24907_s4 + $0xb6c] sm:$0xf0]  ;;  %v13284_v15 = vor.u32 %v15971_v42, %v13283_v48  ;;  %v13156_v10 = vor.u32 %v15939_v58, %v13155_v37  ;;  %v13139_v25 = vld [vmem:[%s24907_s4 + $0x840] sm:$0xf]  ;;  %v20898_v58 = vld [vmem:[#allocation2 + $0x8] sm:$0xfc] }
 0x431   :  { %6182 = vmatpush.bf16.msra.mxu0 %v13460_v23  ;;  %v15967_v21 = vld [vmem:[%s24907_s4 + $0x94c] sm:$0xf0]  ;;  %v20896_v37 = vld [vmem:[#allocation2] sm:$0xfc] }
 0x432   :  { %6201 = vmatpush.bf16.msra.mxu2 %v13588_v49  ;;  %v4255_v23 = vpop.f32.mrf.mxu2  ;;  %v4267_v49 = vpop.f32.mrf.mxu1  ;;  %v4237_v39 = vadd.f32 %v4236_v38, %v4218_v16  ;;  %5210 = vmatmul.bf16.vlgmr.msrb.gmra.mxu1 %v20185_v36  ;;  %v13267_v36 = vld [vmem:[%s24907_s4 + $0x940] sm:$0xf] }
 0x433   :  { %6164 = vmatpush.bf16.msra.mxu3 %v13316_v0  ;;  %v13428_v0 = vor.u32 %v16007_v6, %v13427_v33  ;;  %5248 = vmatmul.bf16.vlgmr.msrb.gmra.mxu0 %v20205_v9  ;;  %v15935_v33 = vld [vmem:[%s24907_s4 + $0x84c] sm:$0xf0]  ;;  %v13395_v9 = vld [vmem:[%s24907_s4 + $0xa40] sm:$0xf] }
 0x434   :  { %6145 = vmatpush.bf16.msra.mxu1 %v13188_v3  ;;  %v13556_v3 = vor.u32 %v16039_v14, %v13555_v1  ;;  %v20854_v38 = vadd.f32 %v4255_v23, %v4237_v39  ;;  %5267 = vmatmul.bf16.vlgmr.msrb.gmra.mxu2 %v20208_v60  ;;  %v4286_v16 = vpop.f32.mrf.mxu3  ;;  %v13540_v1 = vor.u32 %v16035_v2, %v13539_v27  ;;  %v15999_v14 = vld [vmem:[%s24907_s4 + $0xa4c] sm:$0xf0]  ;;  %v13523_v23 = vld [vmem:[%s24907_s4 + $0xb40] sm:$0xf] }
 0x435   :  { %6183 = vmatpush.bf16.msra.mxu0 %v13444_v5  ;;  %v4305_v28 = vpop.f32.mrf.mxu0  ;;  %v13411_v5 = vld [vmem:[%s24907_s4 + $0xa60] sm:$0xf]  ;;  %v4287_v60 = vadd.f32 %v4286_v16, %v4267_v49  ;;  %v13268_v39 = vor.u32 %v15967_v21, %v13267_v36  ;;  %v13140_v42 = vor.u32 %v15935_v33, %v13139_v25  ;;  %v13396_v2 = vor.u32 %v15999_v14, %v13395_v9  ;;  %v15995_v21 = vld [vmem:[%s24907_s4 + $0xa2c] sm:$0xf0]  ;;  %v16017_v9 = vld [vmem:[%s24907_s4 + $0xae4] sm:$0xf] }
 0x436   :  { %6202 = vmatpush.bf16.msra.mxu2 %v13572_v45  ;;  %v16003_v45 = vld [vmem:[%s24907_s4 + $0xa6c] sm:$0xf0]  ;;  %v13251_v49 = vld [vmem:[%s24907_s4 + $0x920] sm:$0xf] }
 0x437   :  { %6165 = vmatpush.bf16.msra.mxu3 %v13300_v57  ;;  %v13412_v6 = vor.u32 %v16003_v45, %v13411_v5  ;;  %v16031_v57 = vld [vmem:[%s24907_s4 + $0xb4c] sm:$0xf0]  ;;  %v13123_v5 = vld [vmem:[%s24907_s4 + $0x820] sm:$0xf] }
 0x438   :  { %6146 = vmatpush.bf16.msra.mxu1 %v13172_v56  ;;  %v15931_v45 = vld [vmem:[%s24907_s4 + $0x82c] sm:$0xf0]  ;;  %v13507_v25 = vld [vmem:[%s24907_s4 + $0xb20] sm:$0xf] }
 0x439   :  { %6184 = vmatpush.bf16.msra.mxu0 %v13428_v0  ;;  %v4306_v0 = vadd.f32 %v4305_v28, %v4287_v60  ;;  %v13379_v28 = vld [vmem:[%s24907_s4 + $0xa20] sm:$0xf]  ;;  %v16027_v33 = vld [vmem:[%s24907_s4 + $0xb2c] sm:$0xf0] }
 0x43a   :  { %6203 = vmatpush.bf16.msra.mxu2 %v13556_v3  ;;  %v4324_v56 = vpop.f32.mrf.mxu2  ;;  %v4269_v48 = vpop.f32.mrf.mxu1  ;;  %v15963_v3 = vld [vmem:[%s24907_s4 + $0x92c] sm:$0xf0] }
 0x43b   :  { %6166 = vmatpush.bf16.msra.mxu3 %v13284_v15  ;;  %v13524_v15 = vor.u32 %v16031_v57, %v13523_v23  ;;  %v20913_v36 = vadd.f32 %v4324_v56, %v4306_v0  ;;  %v13252_v16 = vor.u32 %v15963_v3, %v13251_v49  ;;  %v15959_v14 = vld [vmem:[%s24907_s4 + $0x90c] sm:$0xf0]  ;;  %v13107_v23 = vld [vmem:[%s24907_s4 + $0x800] sm:$0xf] }
 0x43c   :  { %6147 = vmatpush.bf16.msra.mxu1 %v13156_v10  ;;  %v15927_v57 = vld [vmem:[%s24907_s4 + $0x80c] sm:$0xf0]  ;;  %v4288_v56 = vpop.f32.mrf.mxu3  ;;  %v13363_v49 = vld [vmem:[%s24907_s4 + $0xa00] sm:$0xf] }
 0x43d   :  { %v4307_v27 = vpop.f32.mrf.mxu0  ;;  %6185 = vmatpush.bf16.msra.mxu0 %v13412_v6  ;;  %v13124_v6 = vor.u32 %v15931_v45, %v13123_v5  ;;  %v15991_v0 = vld [vmem:[%s24907_s4 + $0xa0c] sm:$0xf0]  ;;  %v13491_v3 = vld [vmem:[%s24907_s4 + $0xb00] sm:$0xf]  ;;  %v4289_v45 = vadd.f32 %v4288_v56, %v4269_v48  ;;  %v13108_v60 = vor.u32 %v15927_v57, %v13107_v23  ;;  %v15953_v48 = vld [vmem:[%s24907_s4 + $0x8e4] sm:$0xf] }
 0x43e   :  { %6204 = vmatpush.bf16.msra.mxu2 %v13540_v1  ;;  %v13235_v1 = vld [vmem:[%s24907_s4 + $0x900] sm:$0xf]  ;;  %v20947_v5 = vld [vmem:[#allocation2 + $0x10] sm:$0xfc]  ;;  %v13364_v23 = vor.u32 %v15991_v0, %v13363_v49  ;;  %5234 = vmatmul.bf16.gmra.mxu3 %v20317_v54  ;;  %v16013_v0 = vld [vmem:[%s24907_s4 + $0xac4] sm:$0xf] }
 0x43f   :  { %6167 = vmatpush.bf16.msra.mxu3 %v13268_v39  ;;  %v13380_v39 = vor.u32 %v15995_v21, %v13379_v28  ;;  %v13349_v28 = vld [vmem:[%s24907_s4 + $0x9f0] sm:$0xf0]  ;;  %v4308_v10 = vadd.f32 %v4307_v27, %v4289_v45  ;;  %v21041_v27 = vld [vmem:[#allocation2 + $0x60] sm:$0xfc] }
 0x440   :  { %6148 = vmatpush.bf16.msra.mxu1 %v13140_v42  ;;  %v13508_v42 = vor.u32 %v16027_v33, %v13507_v25  ;;  %v13236_v33 = vor.u32 %v15959_v14, %v13235_v1  ;;  %v13221_v56 = vld [vmem:[%s24907_s4 + $0x8f0] sm:$0xf0] }
 0x441   :  { %6186 = vmatpush.bf16.msra.mxu0 %v13396_v2  ;;  %v16023_v2 = vld [vmem:[%s24907_s4 + $0xb0c] sm:$0xf0]  ;;  %v13605_v1 = vld [vmem:[%s24907_s4 + $0xbf0] sm:$0xf0]  ;;  %v13224_v24 = vor.u32 %v15953_v48, %v13221_v56 }
 0x442   :  { %6205 = vmatpush.bf16.msra.mxu2 %v13524_v15  ;;  %v15985_v15 = vld [vmem:[%s24907_s4 + $0x9e4] sm:$0xf]  ;;  %v4326_v21 = vpop.f32.mrf.mxu2  ;;  %v4272_v25 = vpop.f32.mrf.mxu1  ;;  %v13492_v57 = vor.u32 %v16023_v2, %v13491_v3  ;;  %5215 = vmatmul.bf16.gmra.mxu1 %v20314_v18  ;;  %v13205_v54 = vld [vmem:[%s24907_s4 + $0x8d0] sm:$0xf0]  ;;  %v21000_v3 = vld [vmem:[#allocation2 + $0x18] sm:$0xfc] }
 0x443   :  { %6168 = vmatpush.bf16.msra.mxu3 %v13252_v16  ;;  %v13477_v16 = vld [vmem:[%s24907_s4 + $0xaf0] sm:$0xf0]  ;;  %v20978_v45 = vadd.f32 %v4326_v21, %v4308_v10  ;;  %v13352_v46 = vor.u32 %v15985_v15, %v13349_v28  ;;  %v15949_v18 = vld [vmem:[%s24907_s4 + $0x8c4] sm:$0xf]  ;;  %5253 = vmatmul.bf16.gmra.mxu0 %v20320_v7  ;;  %v5282_v7 = vld [vmem:[#allocation2 + $0x40] sm:$0x3] }
 0x444   :  { %6149 = vmatpush.bf16.msra.mxu1 %v13124_v6  ;;  %v16049_v6 = vld [vmem:[%s24907_s4 + $0xbe4] sm:$0xf]  ;;  %v13480_v10 = vor.u32 %v16017_v9, %v13477_v16  ;;  %5272 = vmatmul.bf16.gmra.mxu2 %v20332_v17  ;;  %v13461_v9 = vld [vmem:[%s24907_s4 + $0xad0] sm:$0xf0]  ;;  %v4291_v15 = vpop.f32.mrf.mxu3  ;;  %v5283_v28 = vld [vmem:[#allocation2 + $0x48] sm:$0x3]  ;;  %v13208_v56 = vor.u32 %v15949_v18, %v13205_v54 }
 0x445   :  { %v4310_v14 = vpop.f32.mrf.mxu0  ;;  %6187 = vmatpush.bf16.msra.mxu0 %v13380_v39  ;;  %v15981_v39 = vld [vmem:[%s24907_s4 + $0x9c4] sm:$0xf]  ;;  %v13608_v49 = vor.u32 %v16049_v6, %v13605_v1  ;;  %v13589_v2 = vld [vmem:[%s24907_s4 + $0xbd0] sm:$0xf0]  ;;  %v5284_v17 = vld [vmem:[#allocation2 + $0x50] sm:$0x3]  ;;  %v4292_v21 = vadd.f32 %v4291_v15, %v4272_v25 }
 0x446   :  { %6206 = vmatpush.bf16.msra.mxu2 %v13508_v42  ;;  %v13333_v42 = vld [vmem:[%s24907_s4 + $0x9d0] sm:$0xf0]  ;;  %v15977_v16 = vld [vmem:[%s24907_s4 + $0x9a4] sm:$0xf]  ;;  %v5326_v15 = vrot.slane %v5284_v17, 2  ;;  %v25007_v17 = vrot.slane %v19074_v22, 2 }
 0x447   :  { %6169 = vmatpush.bf16.msra.mxu3 %v13236_v33  ;;  %v21011_v33 = vld [vmem:[#allocation2 + $0x58] sm:$0x3]  ;;  %v13336_v48 = vor.u32 %v15981_v39, %v13333_v42  ;;  %v13317_v6 = vld [vmem:[%s24907_s4 + $0x9b0] sm:$0xf0]  ;;  %v16009_v39 = vld [vmem:[%s24907_s4 + $0xaa4] sm:$0xf]  ;;  %v4311_v42 = vadd.f32 %v4310_v14, %v4292_v21 }
 0x448   :  { %6150 = vmatpush.bf16.msra.mxu1 %v13108_v60  ;;  %v16045_v60 = vld [vmem:[%s24907_s4 + $0xbc4] sm:$0xf]  ;;  %v13573_v18 = vld [vmem:[%s24907_s4 + $0xbb0] sm:$0xf0]  ;;  %v13320_v21 = vor.u32 %v15977_v16, %v13317_v6  ;;  %v5328_v62 = vrot.slane %v21011_v33, 2  ;;  %v25010_v16 = vrot.slane %v19077_v19, 2 }
 0x449   :  { %6188 = vmatpush.bf16.msra.mxu0 %v13364_v23  ;;  %v13592_v25 = vor.u32 %v16045_v60, %v13589_v2  ;;  %v5319_v60 = vrot.slane %v21000_v3, 2  ;;  %v5320_v2 = vrot.slane %v19183_v29, 2  ;;  %v15973_v29 = vld [vmem:[%s24907_s4 + $0x984] sm:$0xf]  ;;  %v5331_v3 = vrot.slane %v19281_v26, 2 }
 0x44a   :  { %6207 = vmatpush.bf16.msra.mxu2 %v13492_v57  ;;  %v4329_v1 = vpop.f32.mrf.mxu2  ;;  %v4274_v23 = vpop.f32.mrf.mxu1  ;;  %v13464_v57 = vor.u32 %v16013_v0, %v13461_v9  ;;  %v5322_v0 = vrot.slane %v5282_v7, 2  ;;  %v5324_v9 = vrot.slane %v5283_v28, 2  ;;  %v25011_v33 = vrot.slane %v20898_v58, 2  ;;  %v13173_v58 = vld [vmem:[%s24907_s4 + $0x890] sm:$0xf0] }
 0x44b   :  { %6238 = vmatpush.bf16.msrb.mxu3 %v13352_v46  ;;  %v13189_v46 = vld [vmem:[%s24907_s4 + $0x8b0] sm:$0xf0]  ;;  %v21039_v14 = vadd.f32 %v4329_v1, %v4311_v42  ;;  %v25013_v1 = vrot.slane %v19178_v53, 2  ;;  %v15925_v26 = vld [vmem:[%s24907_s4 + $0x804] sm:$0xf] }
 0x44c   :  { %6219 = vmatpush.bf16.msrb.mxu1 %v13224_v24  ;;  %v15945_v24 = vld [vmem:[%s24907_s4 + $0x8a4] sm:$0xf]  ;;  %v5315_v6 = vsel %vm25012_vm1, %v25011_v33, %v25010_v16  ;;  %v13429_v19 = vld [vmem:[%s24907_s4 + $0xa90] sm:$0xf0] }
 0x44d   :  { %6257 = vmatpush.bf16.msrb.mxu0 %v13480_v10  ;;  %v13445_v10 = vld [vmem:[%s24907_s4 + $0xab0] sm:$0xf0]  ;;  %v4312_v54 = vpop.f32.mrf.mxu0  ;;  %v13192_v40 = vor.u32 %v15945_v24, %v13189_v46  ;;  %v4293_v46 = vpop.f32.mrf.mxu3  ;;  %v25020_v33 = vmov %v25013_v1 }
 0x44e   :  { %6276 = vmatpush.bf16.msrb.mxu2 %v13608_v49  ;;  %v16041_v49 = vld [vmem:[%s24907_s4 + $0xba4] sm:$0xf]  ;;  %v13448_v7 = vor.u32 %v16009_v39, %v13445_v10  ;;  %v13301_v24 = vld [vmem:[%s24907_s4 + $0x990] sm:$0xf0]  ;;  %v25016_v39 = vmov %v25007_v17  ;;  %v5327_v22 = vsel %vm25021_vm6, %v25020_v33, %v5326_v15  ;;  %v5329_v15 = vsel %vm25023_vm0, %v5320_v2, %v5328_v62 }
 0x44f   :  { %6239 = vmatpush.bf16.msrb.mxu3 %v13336_v48  ;;  %v13576_v28 = vor.u32 %v16041_v49, %v13573_v18  ;;  %v25008_v48 = vrot.slane %v20896_v37, 2  ;;  %v15941_v37 = vld [vmem:[%s24907_s4 + $0x884] sm:$0xf]  ;;  %v5323_v42 = vsel %vm25017_vm4, %v25016_v39, %v5322_v0  ;;  %v5330_v18 = vrot.slane %v21041_v27, 2  ;;  %v13285_v62 = vld [vmem:[%s24907_s4 + $0x970] sm:$0xf0] }
 0x450   :  { %6220 = vmatpush.bf16.msrb.mxu1 %v13208_v56  ;;  %v16005_v49 = vld [vmem:[%s24907_s4 + $0xa84] sm:$0xf]  ;;  %v5321_v0 = vsel %vm25022_vm10, %v5319_v60, %v5320_v2  ;;  %v13304_v60 = vor.u32 %v15973_v29, %v13301_v24  ;;  %v25027_v27 = vrot.slane %v19288_v30, 2  ;;  %vm25066_vm4 = vcmask 1040384  }
 0x451   :  { %6258 = vmatpush.bf16.msrb.mxu0 %v13464_v57  ;;  %v5312_v56 = vsel %vm25009_vm15, %v25008_v48, %v25007_v17  ;;  %v25014_v57 = vrot.slane %v20947_v5, 2  ;;  %v25018_v5 = vmov %v25010_v16  ;;  %v21085_v48 = vld [vmem:[#allocation2 + $0x68] sm:$0xfc]  ;;  %v4294_v16 = vadd.f32 %v4293_v46, %v4274_v23  ;;  %v13557_v23 = vld [vmem:[%s24907_s4 + $0xb90] sm:$0xf0]  ;;  %vm25069_vm10 = vmmov %vm25066_vm4 }
 0x452   :  { %6277 = vmatpush.bf16.msrb.mxu2 %v13592_v25  ;;  %v5325_v10 = vsel %vm25019_vm5, %v25018_v5, %v5324_v9  ;;  %v16037_v9 = vld [vmem:[%s24907_s4 + $0xb84] sm:$0xf]  ;;  %v4983_v53 = vpop.f32.mrf.mxu1  ;;  %v21109_v33 = vpack.c.bf16 %v5323_v42, %v5312_v56  ;;  %v13413_v42 = vld [vmem:[%s24907_s4 + $0xa70] sm:$0xf0]  ;;  %vm25067_vm5 = vcmask 1042434   ;;  %vm25068_vm6 = vcmask 1041408  }
 0x453   :  { %v5318_v25 = vsel %vm25015_vm3, %v25014_v57, %v25013_v1  ;;  %6240 = vmatpush.bf16.msrb.mxu3 %v13320_v21  ;;  %v4331_v1 = vpop.f32.mrf.mxu2  ;;  %v21101_v21 = vld [vmem:[#allocation2 + $0xa8] sm:$0x3]  ;;  %v21103_v57 = vld [vmem:[#allocation2 + $0x70] sm:$0xfc]  ;;  %v15969_v46 = vld [vmem:[%s24907_s4 + $0x964] sm:$0xf]  ;;  %v4313_v39 = vadd.f32 %v4312_v54, %v4294_v16  ;;  %v4984_v5 = vadd.f32 %v4983_v53, %v20260_v43  ;;  %v21111_v17 = vpack.c.bf16 %v5325_v10, %v5315_v6 }
 0x454   :  { %6221 = vmatpush.bf16.msrb.mxu1 %v13192_v40  ;;  %v13176_v40 = vor.u32 %v15941_v37, %v13173_v58  ;;  %v15937_v2 = vld [vmem:[%s24907_s4 + $0x864] sm:$0xf]  ;;  %v13432_v54 = vor.u32 %v16005_v49, %v13429_v19  ;;  %v13560_v29 = vor.u32 %v16037_v9, %v13557_v23  ;;  %v21131_v37 = vpack.c.bf16 %v5327_v22, %v5318_v25  ;;  %v13541_v49 = vld [vmem:[%s24907_s4 + $0xb70] sm:$0xf0]  ;;  %v21145_v25 = vld [vmem:[#allocation2 + $0xb0] sm:$0x3] }
 0x455   :  { %6259 = vmatpush.bf16.msrb.mxu0 %v13448_v7  ;;  %v13157_v7 = vld [vmem:[%s24907_s4 + $0x870] sm:$0xf0]  ;;  %v16001_v6 = vld [vmem:[%s24907_s4 + $0xa64] sm:$0xf]  ;;  %v21127_v24 = vadd.f32 %v4331_v1, %v4313_v39  ;;  %6151 = vmatmul.bf16.vlgmr.msra.gmra.mxu1 %v21109_v33  ;;  %v21133_v58 = vpack.c.bf16 %v5329_v15, %v5321_v0  ;;  %v5344_v16 = vrot.slane %v21101_v21, 2  ;;  %v5336_v22 = vrot.slane %v21103_v57, 2  ;;  %v5002_v15 = vpop.f32.mrf.mxu3  ;;  %vm25070_vm0 = vmmov %vm25067_vm5 }
 0x456   :  { %6278 = vmatpush.bf16.msrb.mxu2 %v13576_v28  ;;  %v5021_v28 = vpop.f32.mrf.mxu0  ;;  %6170 = vmatmul.bf16.vlgmr.msra.gmra.mxu3 %v21111_v17  ;;  %v16033_v10 = vld [vmem:[%s24907_s4 + $0xb64] sm:$0xf]  ;;  %v13288_v0 = vor.u32 %v15969_v46, %v13285_v62  ;;  %v13160_v19 = vor.u32 %v15937_v2, %v13157_v7  ;;  %v13269_v23 = vld [vmem:[%s24907_s4 + $0x950] sm:$0xf0]  ;;  %v13416_v21 = vor.u32 %v16001_v6, %v13413_v42  ;;  %v5337_v6 = vrot.slane %v19333_v35, 2 }
 0x457   :  { %6241 = vmatpush.bf16.msrb.mxu3 %v13304_v60  ;;  %v15965_v9 = vld [vmem:[%s24907_s4 + $0x944] sm:$0xf]  ;;  %6189 = vmatmul.bf16.vlgmr.msra.gmra.mxu0 %v21131_v37  ;;  %v13141_v53 = vld [vmem:[%s24907_s4 + $0x850] sm:$0xf0]  ;;  %v5289_v60 = vld [vmem:[#allocation2 + $0x78] sm:$0xfc]  ;;  %v13544_v57 = vor.u32 %v16033_v10, %v13541_v49  ;;  %v5003_v39 = vadd.f32 %v5002_v15, %v4984_v5 }
 0x458   :  { %6222 = vmatpush.bf16.msrb.mxu1 %v13176_v40  ;;  %6208 = vmatmul.bf16.vlgmr.msra.gmra.mxu2 %v21133_v58  ;;  %v15933_v1 = vld [vmem:[%s24907_s4 + $0x844] sm:$0xf]  ;;  %v5293_v40 = vld [vmem:[#allocation2 + $0xb8] sm:$0x3]  ;;  %v13397_v62 = vld [vmem:[%s24907_s4 + $0xa50] sm:$0xf0]  ;;  %v13272_v5 = vor.u32 %v15965_v9, %v13269_v23 }
 0x459   :  { %6260 = vmatpush.bf16.msrb.mxu0 %v13432_v54  ;;  %v15997_v46 = vld [vmem:[%s24907_s4 + $0xa44] sm:$0xf]  ;;  %v13525_v7 = vld [vmem:[%s24907_s4 + $0xb50] sm:$0xf0]  ;;  %v5346_v42 = vrot.slane %v21145_v25, 2  ;;  %v13144_v10 = vor.u32 %v15933_v1, %v13141_v53  ;;  %v5022_v15 = vadd.f32 %v5021_v28, %v5003_v39  ;;  %v5348_v9 = vrot.slane %v5293_v40, 2 }
 0x45a   :  { %6279 = vmatpush.bf16.msrb.mxu2 %v13560_v29  ;;  %v16029_v2 = vld [vmem:[%s24907_s4 + $0xb44] sm:$0xf]  ;;  %v4985_v29 = vpop.f32.mrf.mxu1  ;;  %v13253_v56 = vld [vmem:[%s24907_s4 + $0x930] sm:$0xf0]  ;;  %v13400_v28 = vor.u32 %v15997_v46, %v13397_v62  ;;  %v5332_v40 = vsel %vm25024_vm2, %v5330_v18, %v5331_v3  ;;  %v25028_v18 = vrot.slane %v21085_v48, 2  ;;  %vm25071_vm2 = vmmov %vm25068_vm6 }
 0x45b   :  { %v5040_v54 = vpop.f32.mrf.mxu2  ;;  %6242 = vmatpush.bf16.msrb.mxu3 %v13288_v0  ;;  %v15961_v49 = vld [vmem:[%s24907_s4 + $0x924] sm:$0xf]  ;;  %v4986_v43 = vadd.f32 %v4985_v29, %v20343_v59  ;;  %v13125_v25 = vld [vmem:[%s24907_s4 + $0x830] sm:$0xf0]  ;;  %v13528_v23 = vor.u32 %v16029_v2, %v13525_v7  ;;  %v25025_v2 = vrot.slane %v21043_v44, 2  ;;  %v5338_v29 = vsel %vm25032_vm11, %v5336_v22, %v5337_v6 }
 0x45c   :  { %6223 = vmatpush.bf16.msrb.mxu1 %v13160_v19  ;;  %v15929_v35 = vld [vmem:[%s24907_s4 + $0x824] sm:$0xf]  ;;  %v5339_v19 = vrot.slane %v5289_v60, 2  ;;  %v21192_v1 = vadd.f32 %v5040_v54, %v5022_v15  ;;  %v13381_v53 = vld [vmem:[%s24907_s4 + $0xa30] sm:$0xf0]  ;;  %v25030_v54 = vmov %v25027_v27 }
 0x45d   :  { %6261 = vmatpush.bf16.msrb.mxu0 %v13416_v21  ;;  %v15993_v59 = vld [vmem:[%s24907_s4 + $0xa24] sm:$0xf]  ;;  %v13509_v60 = vld [vmem:[%s24907_s4 + $0xb30] sm:$0xf0]  ;;  %v5340_v21 = vrot.slane %v19362_v52, 2  ;;  %v13128_v46 = vor.u32 %v15929_v35, %v13125_v25  ;;  %v5343_v7 = vsel %vm25026_vm7, %v5331_v3, %v25025_v2  ;;  %v5335_v52 = vsel %vm25029_vm8, %v25028_v18, %v25027_v27  ;;  %v5004_v48 = vpop.f32.mrf.mxu3 }
 0x45e   :  { %v5023_v0 = vpop.f32.mrf.mxu0  ;;  %6280 = vmatpush.bf16.msrb.mxu2 %v13544_v57  ;;  %v16025_v39 = vld [vmem:[%s24907_s4 + $0xb24] sm:$0xf]  ;;  %v13256_v57 = vor.u32 %v15961_v49, %v13253_v56  ;;  %v5345_v56 = vsel %vm25031_vm9, %v25030_v54, %v5344_v16  ;;  %v13237_v44 = vld [vmem:[%s24907_s4 + $0x910] sm:$0xf0]  ;;  %v13384_v30 = vor.u32 %v15993_v59, %v13381_v53  ;;  %v5005_v15 = vadd.f32 %v5004_v48, %v4986_v43  ;;  %v13355_v25 = vld [vmem:[%s24907_s4 + $0x9e8] sm:$0xf] }
 0x45f   :  { %6243 = vmatpush.bf16.msrb.mxu3 %v13272_v5  ;;  %v15957_v62 = vld [vmem:[%s24907_s4 + $0x904] sm:$0xf]  ;;  %v13109_v3 = vld [vmem:[%s24907_s4 + $0x810] sm:$0xf0]  ;;  %v5347_v5 = vsel %vm25033_vm12, %v5337_v6, %v5346_v42  ;;  %v13512_v16 = vor.u32 %v16025_v39, %v13509_v60  ;;  %v5341_v35 = vsel %vm25034_vm13, %v5339_v19, %v5340_v21  ;;  %v5349_v6 = vsel %vm25035_vm14, %v5340_v21, %v5348_v9  ;;  %v13227_v9 = vld [vmem:[%s24907_s4 + $0x8e8] sm:$0xf] }
 0x460   :  { %6224 = vmatpush.bf16.msrb.mxu1 %v13144_v10  ;;  %v15989_v22 = vld [vmem:[%s24907_s4 + $0xa04] sm:$0xf]  ;;  %v13365_v10 = vld [vmem:[%s24907_s4 + $0xa10] sm:$0xf0]  ;;  %v21256_v53 = vpack.c.bf16 %v5343_v7, %v5332_v40  ;;  %v13240_v43 = vor.u32 %v15957_v62, %v13237_v44  ;;  %v13112_v19 = vor.u32 %v15925_v26, %v13109_v3  ;;  %v15956_v39 = vld [vmem:[%s24907_s4 + $0x8f4] sm:$0xf0]  ;;  %v5024_v21 = vadd.f32 %v5023_v0, %v5005_v15 }
 0x461   :  { %6262 = vmatpush.bf16.msrb.mxu0 %v13400_v28  ;;  %v16021_v49 = vld [vmem:[%s24907_s4 + $0xb04] sm:$0xf]  ;;  %v13493_v42 = vld [vmem:[%s24907_s4 + $0xb10] sm:$0xf0]  ;;  %v15988_v28 = vld [vmem:[%s24907_s4 + $0x9f4] sm:$0xf0]  ;;  %v21268_v2 = vpack.c.bf16 %v5345_v56, %v5335_v52  ;;  %v21281_v0 = vpack.c.bf16 %v5349_v6, %v5341_v35  ;;  %v13228_v56 = vor.u32 %v15956_v39, %v13227_v9 }
 0x462   :  { %6281 = vmatpush.bf16.msrb.mxu2 %v13528_v23  ;;  %v4988_v59 = vpop.f32.mrf.mxu1  ;;  %v13483_v60 = vld [vmem:[%s24907_s4 + $0xae8] sm:$0xf]  ;;  %v16052_v7 = vld [vmem:[%s24907_s4 + $0xbf4] sm:$0xf0]  ;;  %v13496_v18 = vor.u32 %v16021_v49, %v13493_v42  ;;  %v13356_v54 = vor.u32 %v15988_v28, %v13355_v25 }
 0x463   :  { %v5042_v23 = vpop.f32.mrf.mxu2  ;;  %6244 = vmatpush.bf16.msrb.mxu3 %v13256_v57  ;;  %v4989_v40 = vadd.f32 %v4988_v59, %v20397_v11  ;;  %v21270_v57 = vpack.c.bf16 %v5347_v5, %v5338_v29  ;;  %v13611_v62 = vld [vmem:[%s24907_s4 + $0xbe8] sm:$0xf]  ;;  %v13368_v11 = vor.u32 %v15989_v22, %v13365_v10  ;;  %v15984_v44 = vld [vmem:[%s24907_s4 + $0x9d4] sm:$0xf0] }
 0x464   :  { %6225 = vmatpush.bf16.msrb.mxu1 %v13128_v46  ;;  %v16020_v46 = vld [vmem:[%s24907_s4 + $0xaf4] sm:$0xf0]  ;;  %v21283_v52 = vadd.f32 %v5042_v23, %v5024_v21  ;;  %v13339_v29 = vld [vmem:[%s24907_s4 + $0x9c8] sm:$0xf]  ;;  %v13612_v3 = vor.u32 %v16052_v7, %v13611_v62 }
 0x465   :  { %6263 = vmatpush.bf16.msrb.mxu0 %v13384_v30  ;;  %6156 = vmatmul.bf16.gmra.mxu1 %v21256_v53  ;;  %v13484_v26 = vor.u32 %v16020_v46, %v13483_v60  ;;  %v13211_v48 = vld [vmem:[%s24907_s4 + $0x8c8] sm:$0xf]  ;;  %v15952_v5 = vld [vmem:[%s24907_s4 + $0x8d4] sm:$0xf0]  ;;  %v5007_v49 = vpop.f32.mrf.mxu3  ;;  %v13340_v35 = vor.u32 %v15984_v44, %v13339_v29 }
 0x466   :  { %v5026_v27 = vpop.f32.mrf.mxu0  ;;  %6282 = vmatpush.bf16.msrb.mxu2 %v13512_v16  ;;  %6175 = vmatmul.bf16.gmra.mxu3 %v21268_v2  ;;  %v13467_v30 = vld [vmem:[%s24907_s4 + $0xac8] sm:$0xf]  ;;  %v16016_v16 = vld [vmem:[%s24907_s4 + $0xad4] sm:$0xf0]  ;;  %v5008_v15 = vadd.f32 %v5007_v49, %v4989_v40  ;;  %v13212_v6 = vor.u32 %v15952_v5, %v13211_v48 }
 0x467   :  { %6245 = vmatpush.bf16.msrb.mxu3 %v13240_v43  ;;  %6194 = vmatmul.bf16.gmra.mxu0 %v21270_v57  ;;  %v13595_v22 = vld [vmem:[%s24907_s4 + $0xbc8] sm:$0xf]  ;;  %v16048_v10 = vld [vmem:[%s24907_s4 + $0xbd4] sm:$0xf0]  ;;  %v13468_v59 = vor.u32 %v16016_v16, %v13467_v30 }
 0x468   :  { %6226 = vmatpush.bf16.msrb.mxu1 %v13112_v19  ;;  %6213 = vmatmul.bf16.gmra.mxu2 %v21281_v0  ;;  %v13323_v42 = vld [vmem:[%s24907_s4 + $0x9a8] sm:$0xf]  ;;  %v15980_v25 = vld [vmem:[%s24907_s4 + $0x9b4] sm:$0xf0]  ;;  %v13596_v43 = vor.u32 %v16048_v10, %v13595_v22  ;;  %v5027_v60 = vadd.f32 %v5026_v27, %v5008_v15 }
 0x469   :  { %6264 = vmatpush.bf16.msrb.mxu0 %v13368_v11  ;;  %v13195_v19 = vld [vmem:[%s24907_s4 + $0x8a8] sm:$0xf]  ;;  %v15948_v9 = vld [vmem:[%s24907_s4 + $0x8b4] sm:$0xf0]  ;;  %v13324_v27 = vor.u32 %v15980_v25, %v13323_v42 }
 0x46a   :  { %6283 = vmatpush.bf16.msrb.mxu2 %v13496_v18  ;;  %v4990_v23 = vpop.f32.mrf.mxu1  ;;  %v13451_v39 = vld [vmem:[%s24907_s4 + $0xaa8] sm:$0xf]  ;;  %v16012_v40 = vld [vmem:[%s24907_s4 + $0xab4] sm:$0xf0]  ;;  %v13196_v18 = vor.u32 %v15948_v9, %v13195_v19 }
 0x46b   :  { %6314 = vmatpush.bf16.msra.mxu3 %v13356_v54  ;;  %v5045_v28 = vpop.f32.mrf.mxu2  ;;  %v4991_v21 = vadd.f32 %v4990_v23, %v20438_v55  ;;  %v13579_v46 = vld [vmem:[%s24907_s4 + $0xba8] sm:$0xf]  ;;  %v16044_v62 = vld [vmem:[%s24907_s4 + $0xbb4] sm:$0xf0]  ;;  %v13452_v55 = vor.u32 %v16012_v40, %v13451_v39 }
 0x46c   :  { %6295 = vmatpush.bf16.msra.mxu1 %v13228_v56  ;;  %v21338_v11 = vadd.f32 %v5045_v28, %v5027_v60  ;;  %v13580_v54 = vor.u32 %v16044_v62, %v13579_v46  ;;  %v13307_v56 = vld [vmem:[%s24907_s4 + $0x988] sm:$0xf]  ;;  %v15976_v29 = vld [vmem:[%s24907_s4 + $0x994] sm:$0xf0] }
 0x46d   :  { %6333 = vmatpush.bf16.msra.mxu0 %v13484_v26  ;;  %v13179_v44 = vld [vmem:[%s24907_s4 + $0x888] sm:$0xf]  ;;  %v15944_v26 = vld [vmem:[%s24907_s4 + $0x894] sm:$0xf0]  ;;  %v13308_v15 = vor.u32 %v15976_v29, %v13307_v56 }
 0x46e   :  { %6352 = vmatpush.bf16.msra.mxu2 %v13612_v3  ;;  %v5028_v7 = vpop.f32.mrf.mxu0  ;;  %v5009_v3 = vpop.f32.mrf.mxu3  ;;  %v13435_v48 = vld [vmem:[%s24907_s4 + $0xa88] sm:$0xf]  ;;  %v16008_v30 = vld [vmem:[%s24907_s4 + $0xa94] sm:$0xf0] }
 0x46f   :  { %6315 = vmatpush.bf16.msra.mxu3 %v13340_v35  ;;  %v5010_v5 = vadd.f32 %v5009_v3, %v4991_v21  ;;  %v13563_v16 = vld [vmem:[%s24907_s4 + $0xb88] sm:$0xf]  ;;  %v16040_v22 = vld [vmem:[%s24907_s4 + $0xb94] sm:$0xf0]  ;;  %v13180_v35 = vor.u32 %v15944_v26, %v13179_v44  ;;  %v13436_v19 = vor.u32 %v16008_v30, %v13435_v48 }
 0x470   :  { %6296 = vmatpush.bf16.msra.mxu1 %v13212_v6  ;;  %v13291_v6 = vld [vmem:[%s24907_s4 + $0x968] sm:$0xf]  ;;  %v15972_v28 = vld [vmem:[%s24907_s4 + $0x974] sm:$0xf0]  ;;  %v13564_v9 = vor.u32 %v16040_v22, %v13563_v16 }
 0x471   :  { %6334 = vmatpush.bf16.msra.mxu0 %v13468_v59  ;;  %v5029_v42 = vadd.f32 %v5028_v7, %v5010_v5  ;;  %v13163_v23 = vld [vmem:[%s24907_s4 + $0x868] sm:$0xf]  ;;  %v15940_v59 = vld [vmem:[%s24907_s4 + $0x874] sm:$0xf0]  ;;  %v13292_v46 = vor.u32 %v15972_v28, %v13291_v6 }
 0x472   :  { %6353 = vmatpush.bf16.msra.mxu2 %v13596_v43  ;;  %v5059_v49 = vpop.f32.mrf.mxu1  ;;  %v13419_v39 = vld [vmem:[%s24907_s4 + $0xa68] sm:$0xf]  ;;  %v16004_v60 = vld [vmem:[%s24907_s4 + $0xa74] sm:$0xf0]  ;;  %v13164_v62 = vor.u32 %v15940_v59, %v13163_v23 }
 0x473   :  { %6316 = vmatpush.bf16.msra.mxu3 %v13324_v27  ;;  %v5047_v10 = vpop.f32.mrf.mxu2  ;;  %v5060_v25 = vadd.f32 %v5059_v49, %v20492_v63  ;;  %v13547_v21 = vld [vmem:[%s24907_s4 + $0xb68] sm:$0xf]  ;;  %v16036_v40 = vld [vmem:[%s24907_s4 + $0xb74] sm:$0xf0]  ;;  %v13420_v56 = vor.u32 %v16004_v60, %v13419_v39 }
 0x474   :  { %6297 = vmatpush.bf16.msra.mxu1 %v13196_v18  ;;  %v21380_v63 = vadd.f32 %v5047_v10, %v5029_v42  ;;  %v13275_v7 = vld [vmem:[%s24907_s4 + $0x948] sm:$0xf]  ;;  %v15968_v27 = vld [vmem:[%s24907_s4 + $0x954] sm:$0xf0]  ;;  %v13548_v29 = vor.u32 %v16036_v40, %v13547_v21 }
 0x475   :  { %6335 = vmatpush.bf16.msra.mxu0 %v13452_v55  ;;  %6227 = vmatmul.bf16.vlgmr.msrb.gmra.mxu1 %v21109_v33  ;;  %v13147_v18 = vld [vmem:[%s24907_s4 + $0x848] sm:$0xf]  ;;  %v15936_v55 = vld [vmem:[%s24907_s4 + $0x854] sm:$0xf0]  ;;  %v13276_v22 = vor.u32 %v15968_v27, %v13275_v7 }
 0x476   :  { %6354 = vmatpush.bf16.msra.mxu2 %v13580_v54  ;;  %v5097_v43 = vpop.f32.mrf.mxu0  ;;  %25036 = vst [vmem:[#allocation19_spill] sm:$0xff] %v21380_v63  ;;  %6246 = vmatmul.bf16.vlgmr.msrb.gmra.mxu3 %v21111_v17  ;;  %v5078_v54 = vpop.f32.mrf.mxu3  ;;  %v13403_v44 = vld [vmem:[%s24907_s4 + $0xa48] sm:$0xf]  ;;  %v16000_v3 = vld [vmem:[%s24907_s4 + $0xa54] sm:$0xf0]  ;;  %v13148_v10 = vor.u32 %v15936_v55, %v13147_v18 }
 0x477   :  { %6317 = vmatpush.bf16.msra.mxu3 %v13308_v15  ;;  %6265 = vmatmul.bf16.vlgmr.msrb.gmra.mxu0 %v21131_v37  ;;  %v5079_v26 = vadd.f32 %v5078_v54, %v5060_v25  ;;  %v13531_v48 = vld [vmem:[%s24907_s4 + $0xb48] sm:$0xf]  ;;  %v16032_v5 = vld [vmem:[%s24907_s4 + $0xb54] sm:$0xf0]  ;;  %v13404_v23 = vor.u32 %v16000_v3, %v13403_v44  ;;  %v15986_v3 = vld [vmem:[%s24907_s4 + $0x9ec] sm:$0xf] }
 0x478   :  { %6298 = vmatpush.bf16.msra.mxu1 %v13180_v35  ;;  %6284 = vmatmul.bf16.vlgmr.msrb.gmra.mxu2 %v21133_v58  ;;  %v13259_v49 = vld [vmem:[%s24907_s4 + $0x928] sm:$0xf]  ;;  %v15964_v6 = vld [vmem:[%s24907_s4 + $0x934] sm:$0xf0]  ;;  %v13532_v59 = vor.u32 %v16032_v5, %v13531_v48  ;;  %v13357_v48 = vld [vmem:[%s24907_s4 + $0x9f8] sm:$0xf0] }
 0x479   :  { %6336 = vmatpush.bf16.msra.mxu0 %v13436_v19  ;;  %v5098_v15 = vadd.f32 %v5097_v43, %v5079_v26  ;;  %v13131_v42 = vld [vmem:[%s24907_s4 + $0x828] sm:$0xf]  ;;  %v15932_v25 = vld [vmem:[%s24907_s4 + $0x834] sm:$0xf0]  ;;  %v13260_v60 = vor.u32 %v15964_v6, %v13259_v49  ;;  %v13229_v49 = vld [vmem:[%s24907_s4 + $0x8f8] sm:$0xf0] }
 0x47a   :  { %6355 = vmatpush.bf16.msra.mxu2 %v13564_v9  ;;  %v5061_v16 = vpop.f32.mrf.mxu1  ;;  %v15996_v19 = vld [vmem:[%s24907_s4 + $0xa34] sm:$0xf0]  ;;  %v13515_v9 = vld [vmem:[%s24907_s4 + $0xb28] sm:$0xf]  ;;  %v13132_v21 = vor.u32 %v15932_v25, %v13131_v42  ;;  %v13485_v42 = vld [vmem:[%s24907_s4 + $0xaf8] sm:$0xf0] }
 0x47b   :  { %v5116_v30 = vpop.f32.mrf.mxu2  ;;  %6318 = vmatpush.bf16.msra.mxu3 %v13292_v46  ;;  %v5062_v35 = vadd.f32 %v5061_v16, %v20551_v12  ;;  %v13387_v12 = vld [vmem:[%s24907_s4 + $0xa28] sm:$0xf]  ;;  %v16028_v39 = vld [vmem:[%s24907_s4 + $0xb34] sm:$0xf0]  ;;  %v16050_v25 = vld [vmem:[%s24907_s4 + $0xbec] sm:$0xf] }
 0x47c   :  { %6299 = vmatpush.bf16.msra.mxu1 %v13164_v62  ;;  %v21435_v43 = vadd.f32 %v5116_v30, %v5098_v15  ;;  %v13243_v40 = vld [vmem:[%s24907_s4 + $0x908] sm:$0xf]  ;;  %v15960_v46 = vld [vmem:[%s24907_s4 + $0x914] sm:$0xf0]  ;;  %v13388_v18 = vor.u32 %v15996_v19, %v13387_v12  ;;  %v13516_v55 = vor.u32 %v16028_v39, %v13515_v9  ;;  %v16018_v15 = vld [vmem:[%s24907_s4 + $0xaec] sm:$0xf] }
 0x47d   :  { %6337 = vmatpush.bf16.msra.mxu0 %v13420_v56  ;;  %v13115_v62 = vld [vmem:[%s24907_s4 + $0x808] sm:$0xf]  ;;  %v15928_v7 = vld [vmem:[%s24907_s4 + $0x814] sm:$0xf0]  ;;  %v13244_v16 = vor.u32 %v15960_v46, %v13243_v40  ;;  %v15982_v39 = vld [vmem:[%s24907_s4 + $0x9cc] sm:$0xf] }
 0x47e   :  { %v5099_v28 = vpop.f32.mrf.mxu0  ;;  %6356 = vmatpush.bf16.msra.mxu2 %v13548_v29  ;;  %v5080_v27 = vpop.f32.mrf.mxu3  ;;  %v13371_v54 = vld [vmem:[%s24907_s4 + $0xa08] sm:$0xf]  ;;  %v15992_v56 = vld [vmem:[%s24907_s4 + $0xa14] sm:$0xf0]  ;;  %v15950_v46 = vld [vmem:[%s24907_s4 + $0x8cc] sm:$0xf] }
 0x47f   :  { %6319 = vmatpush.bf16.msra.mxu3 %v13276_v22  ;;  %v13499_v29 = vld [vmem:[%s24907_s4 + $0xb08] sm:$0xf]  ;;  %v5081_v44 = vadd.f32 %v5080_v27, %v5062_v35  ;;  %v16024_v26 = vld [vmem:[%s24907_s4 + $0xb14] sm:$0xf0]  ;;  %v13116_v22 = vor.u32 %v15928_v7, %v13115_v62  ;;  %v13372_v12 = vor.u32 %v15992_v56, %v13371_v54  ;;  %v13213_v62 = vld [vmem:[%s24907_s4 + $0x8d8] sm:$0xf0] }
 0x480   :  { %6300 = vmatpush.bf16.msra.mxu1 %v13148_v10  ;;  %v15954_v10 = vld [vmem:[%s24907_s4 + $0x8ec] sm:$0xf]  ;;  %v13500_v19 = vor.u32 %v16024_v26, %v13499_v29  ;;  %v13469_v27 = vld [vmem:[%s24907_s4 + $0xad8] sm:$0xf0] }
 0x481   :  { %6338 = vmatpush.bf16.msra.mxu0 %v13404_v23  ;;  %v5100_v35 = vadd.f32 %v5099_v28, %v5081_v44  ;;  %v13613_v23 = vld [vmem:[%s24907_s4 + $0xbf8] sm:$0xf0]  ;;  %v13232_v9 = vor.u32 %v15954_v10, %v13229_v49  ;;  %v16014_v7 = vld [vmem:[%s24907_s4 + $0xacc] sm:$0xf]  ;;  %v13216_v44 = vor.u32 %v15950_v46, %v13213_v62 }
 0x482   :  { %6357 = vmatpush.bf16.msra.mxu2 %v13532_v59  ;;  %v5064_v30 = vpop.f32.mrf.mxu1  ;;  %v13616_v40 = vor.u32 %v16050_v25, %v13613_v23  ;;  %v15978_v26 = vld [vmem:[%s24907_s4 + $0x9ac] sm:$0xf]  ;;  %v13197_v10 = vld [vmem:[%s24907_s4 + $0x8b8] sm:$0xf0] }
 0x483   :  { %v5118_v5 = vpop.f32.mrf.mxu2  ;;  %6320 = vmatpush.bf16.msra.mxu3 %v13260_v60  ;;  %v5065_v6 = vadd.f32 %v5064_v30, %v20605_v61  ;;  %v13360_v61 = vor.u32 %v15986_v3, %v13357_v48  ;;  %v13341_v60 = vld [vmem:[%s24907_s4 + $0x9d8] sm:$0xf0]  ;;  %v13472_v30 = vor.u32 %v16014_v7, %v13469_v27  ;;  %v16010_v49 = vld [vmem:[%s24907_s4 + $0xaac] sm:$0xf] }
 0x484   :  { %6301 = vmatpush.bf16.msra.mxu1 %v13132_v21  ;;  %v21495_v28 = vadd.f32 %v5118_v5, %v5100_v35  ;;  %v13488_v21 = vor.u32 %v16018_v15, %v13485_v42  ;;  %v13344_v29 = vor.u32 %v15982_v39, %v13341_v60  ;;  %v13325_v3 = vld [vmem:[%s24907_s4 + $0x9b8] sm:$0xf0]  ;;  %v16042_v42 = vld [vmem:[%s24907_s4 + $0xbac] sm:$0xf] }
 0x485   :  { %6339 = vmatpush.bf16.msra.mxu0 %v13388_v18  ;;  %6232 = vmatmul.bf16.gmra.mxu1 %v21256_v53  ;;  %v16046_v18 = vld [vmem:[%s24907_s4 + $0xbcc] sm:$0xf]  ;;  %v13581_v25 = vld [vmem:[%s24907_s4 + $0xbb8] sm:$0xf0] }
 0x486   :  { %v5102_v59 = vpop.f32.mrf.mxu0  ;;  %6358 = vmatpush.bf16.msra.mxu2 %v13516_v55  ;;  %6251 = vmatmul.bf16.gmra.mxu3 %v21268_v2  ;;  %v13597_v55 = vld [vmem:[%s24907_s4 + $0xbd8] sm:$0xf0]  ;;  %v5083_v54 = vpop.f32.mrf.mxu3  ;;  %v15942_v60 = vld [vmem:[%s24907_s4 + $0x88c] sm:$0xf] }
 0x487   :  { %6321 = vmatpush.bf16.msra.mxu3 %v13244_v16  ;;  %6270 = vmatmul.bf16.gmra.mxu0 %v21270_v57  ;;  %v5084_v56 = vadd.f32 %v5083_v54, %v5065_v6  ;;  %v13600_v16 = vor.u32 %v16046_v18, %v13597_v55  ;;  %v13453_v6 = vld [vmem:[%s24907_s4 + $0xab8] sm:$0xf0]  ;;  %v16006_v46 = vld [vmem:[%s24907_s4 + $0xa8c] sm:$0xf] }
 0x488   :  { %6302 = vmatpush.bf16.msra.mxu1 %v13116_v22  ;;  %6289 = vmatmul.bf16.gmra.mxu2 %v21281_v0  ;;  %v15946_v22 = vld [vmem:[%s24907_s4 + $0x8ac] sm:$0xf]  ;;  %v13309_v39 = vld [vmem:[%s24907_s4 + $0x998] sm:$0xf0] }
 0x489   :  { %6340 = vmatpush.bf16.msra.mxu0 %v13372_v12  ;;  %v5103_v15 = vadd.f32 %v5102_v59, %v5084_v56  ;;  %v13328_v59 = vor.u32 %v15978_v26, %v13325_v3  ;;  %v13437_v7 = vld [vmem:[%s24907_s4 + $0xa98] sm:$0xf0]  ;;  %v16038_v27 = vld [vmem:[%s24907_s4 + $0xb8c] sm:$0xf] }
 0x48a   :  { %6359 = vmatpush.bf16.msra.mxu2 %v13500_v19  ;;  %v5066_v5 = vpop.f32.mrf.mxu1  ;;  %v13200_v19 = vor.u32 %v15946_v22, %v13197_v10  ;;  %v13565_v18 = vld [vmem:[%s24907_s4 + $0xb98] sm:$0xf0]  ;;  %v13440_v22 = vor.u32 %v16006_v46, %v13437_v7  ;;  %v16030_v46 = vld [vmem:[%s24907_s4 + $0xb4c] sm:$0xf] }
 0x48b   :  { %6390 = vmatpush.bf16.msrb.mxu3 %v13360_v61  ;;  %v5121_v48 = vpop.f32.mrf.mxu2  ;;  %v5067_v35 = vadd.f32 %v5066_v5, %v20646_v20  ;;  %v13456_v20 = vor.u32 %v16010_v49, %v13453_v6  ;;  %v13584_v61 = vor.u32 %v16042_v42, %v13581_v25  ;;  %v15938_v5 = vld [vmem:[%s24907_s4 + $0x86c] sm:$0xf]  ;;  %v13568_v10 = vor.u32 %v16038_v27, %v13565_v18  ;;  %v13549_v6 = vld [vmem:[%s24907_s4 + $0xb78] sm:$0xf0] }
 0x48c   :  { %6371 = vmatpush.bf16.msrb.mxu1 %v13232_v9  ;;  %v21550_v12 = vadd.f32 %v5121_v48, %v5103_v15  ;;  %v15974_v9 = vld [vmem:[%s24907_s4 + $0x98c] sm:$0xf]  ;;  %v13293_v48 = vld [vmem:[%s24907_s4 + $0x978] sm:$0xf0] }
 0x48d   :  { %6409 = vmatpush.bf16.msrb.mxu0 %v13488_v21  ;;  %v13181_v21 = vld [vmem:[%s24907_s4 + $0x898] sm:$0xf0]  ;;  %v13312_v56 = vor.u32 %v15974_v9, %v13309_v39  ;;  %v16002_v49 = vld [vmem:[%s24907_s4 + $0xa6c] sm:$0xf] }
 0x48e   :  { %6428 = vmatpush.bf16.msrb.mxu2 %v13616_v40  ;;  %v5104_v23 = vpop.f32.mrf.mxu0  ;;  %v5085_v40 = vpop.f32.mrf.mxu3  ;;  %v13421_v15 = vld [vmem:[%s24907_s4 + $0xa78] sm:$0xf0] }
 0x48f   :  { %6391 = vmatpush.bf16.msrb.mxu3 %v13344_v29  ;;  %v5086_v62 = vadd.f32 %v5085_v40, %v5067_v35  ;;  %v13184_v29 = vor.u32 %v15942_v60, %v13181_v21  ;;  %v16034_v35 = vld [vmem:[%s24907_s4 + $0xb6c] sm:$0xf]  ;;  %v13424_v9 = vor.u32 %v16002_v49, %v13421_v15  ;;  %v13405_v40 = vld [vmem:[%s24907_s4 + $0xa58] sm:$0xf0] }
 0x490   :  { %6372 = vmatpush.bf16.msrb.mxu1 %v13216_v44  ;;  %v15970_v44 = vld [vmem:[%s24907_s4 + $0x96c] sm:$0xf]  ;;  %v13552_v39 = vor.u32 %v16034_v35, %v13549_v6  ;;  %v13517_v49 = vld [vmem:[%s24907_s4 + $0xb38] sm:$0xf0] }
 0x491   :  { %6410 = vmatpush.bf16.msrb.mxu0 %v13472_v30  ;;  %v5105_v26 = vadd.f32 %v5104_v23, %v5086_v62  ;;  %v13165_v30 = vld [vmem:[%s24907_s4 + $0x878] sm:$0xf0]  ;;  %v13296_v42 = vor.u32 %v15970_v44, %v13293_v48  ;;  %v15966_v23 = vld [vmem:[%s24907_s4 + $0x94c] sm:$0xf] }
 0x492   :  { %6429 = vmatpush.bf16.msrb.mxu2 %v13600_v16  ;;  %v5135_v54 = vpop.f32.mrf.mxu1  ;;  %v13168_v25 = vor.u32 %v15938_v5, %v13165_v30  ;;  %v15998_v60 = vld [vmem:[%s24907_s4 + $0xa4c] sm:$0xf]  ;;  %v13533_v62 = vld [vmem:[%s24907_s4 + $0xb58] sm:$0xf0] }
 0x493   :  { %6392 = vmatpush.bf16.msrb.mxu3 %v13328_v59  ;;  %v5123_v55 = vpop.f32.mrf.mxu2  ;;  %v5136_v3 = vadd.f32 %v5135_v54, %v20700_v32  ;;  %v13277_v59 = vld [vmem:[%s24907_s4 + $0x958] sm:$0xf0]  ;;  %v15962_v54 = vld [vmem:[%s24907_s4 + $0x92c] sm:$0xf]  ;;  %v13408_v48 = vor.u32 %v15998_v60, %v13405_v40  ;;  %v13536_v5 = vor.u32 %v16030_v46, %v13533_v62 }
 0x494   :  { %6373 = vmatpush.bf16.msrb.mxu1 %v13200_v19  ;;  %v21592_v32 = vadd.f32 %v5123_v55, %v5105_v26  ;;  %v15934_v19 = vld [vmem:[%s24907_s4 + $0x84c] sm:$0xf]  ;;  %v13280_v18 = vor.u32 %v15966_v23, %v13277_v59  ;;  %v13133_v26 = vld [vmem:[%s24907_s4 + $0x838] sm:$0xf0] }
 0x495   :  { %6411 = vmatpush.bf16.msrb.mxu0 %v13456_v20  ;;  %6303 = vmatmul.bf16.vlgmr.msra.gmra.mxu1 %v21109_v33  ;;  %v13149_v20 = vld [vmem:[%s24907_s4 + $0x858] sm:$0xf0]  ;;  %v15930_v44 = vld [vmem:[%s24907_s4 + $0x82c] sm:$0xf] }
 0x496   :  { %6430 = vmatpush.bf16.msrb.mxu2 %v13584_v61  ;;  %v5173_v16 = vpop.f32.mrf.mxu0  ;;  %25037 = vst [vmem:[#allocation20_spill] sm:$0xff] %v21592_v32  ;;  %6322 = vmatmul.bf16.vlgmr.msra.gmra.mxu3 %v21111_v17  ;;  %v5154_v61 = vpop.f32.mrf.mxu3  ;;  %v13152_v55 = vor.u32 %v15934_v19, %v13149_v20  ;;  %v15994_v30 = vld [vmem:[%s24907_s4 + $0xa2c] sm:$0xf]  ;;  %v13136_v35 = vor.u32 %v15930_v44, %v13133_v26  ;;  %v13117_v23 = vld [vmem:[%s24907_s4 + $0x818] sm:$0xf0] }
 0x497   :  { %6393 = vmatpush.bf16.msrb.mxu3 %v13312_v56  ;;  %6341 = vmatmul.bf16.vlgmr.msra.gmra.mxu0 %v21131_v37  ;;  %v5155_v21 = vadd.f32 %v5154_v61, %v5136_v3  ;;  %v15958_v6 = vld [vmem:[%s24907_s4 + $0x90c] sm:$0xf]  ;;  %v13501_v60 = vld [vmem:[%s24907_s4 + $0xb18] sm:$0xf0] }
 0x498   :  { %6374 = vmatpush.bf16.msrb.mxu1 %v13184_v29  ;;  %6360 = vmatmul.bf16.vlgmr.msra.gmra.mxu2 %v21133_v58  ;;  %v13261_v29 = vld [vmem:[%s24907_s4 + $0x938] sm:$0xf0]  ;;  %v15990_v61 = vld [vmem:[%s24907_s4 + $0xa0c] sm:$0xf] }
 0x499   :  { %6412 = vmatpush.bf16.msrb.mxu0 %v13440_v22  ;;  %v5174_v56 = vadd.f32 %v5173_v16, %v5155_v21  ;;  %v13389_v22 = vld [vmem:[%s24907_s4 + $0xa38] sm:$0xf0]  ;;  %v13264_v15 = vor.u32 %v15962_v54, %v13261_v29 }
 0x49a   :  { %6431 = vmatpush.bf16.msrb.mxu2 %v13568_v10  ;;  %v21631_v27 = vpop.f32.mrf.mxu1  ;;  %v16026_v10 = vld [vmem:[%s24907_s4 + $0xb2c] sm:$0xf]  ;;  %v13392_v19 = vor.u32 %v15994_v30, %v13389_v22 }
 0x49b   :  { %v5192_v7 = vpop.f32.mrf.mxu2  ;;  %6394 = vmatpush.bf16.msrb.mxu3 %v13296_v42  ;;  %v13245_v42 = vld [vmem:[%s24907_s4 + $0x918] sm:$0xf0]  ;;  %v13520_v20 = vor.u32 %v16026_v10, %v13517_v49 }
 0x49c   :  { %6375 = vmatpush.bf16.msrb.mxu1 %v13168_v25  ;;  %v21650_v16 = vadd.f32 %v5192_v7, %v5174_v56  ;;  %v15926_v25 = vld [vmem:[%s24907_s4 + $0x80c] sm:$0xf]  ;;  %v13248_v46 = vor.u32 %v15958_v6, %v13245_v42 }
 0x49d   :  { %6413 = vmatpush.bf16.msrb.mxu0 %v13424_v9  ;;  %v13373_v9 = vld [vmem:[%s24907_s4 + $0xa18] sm:$0xf0]  ;;  %v13120_v62 = vor.u32 %v15926_v25, %v13117_v23 }
 0x49e   :  { %v21645_v3 = vpop.f32.mrf.mxu0  ;;  %6432 = vmatpush.bf16.msrb.mxu2 %v13552_v39  ;;  %25038 = vst [vmem:[#allocation21_spill] sm:$0xff] %v21650_v16  ;;  %v21673_v59 = vpop.f32.mrf.mxu3  ;;  %v16022_v39 = vld [vmem:[%s24907_s4 + $0xb0c] sm:$0xf] }
 0x49f   :  { %6395 = vmatpush.bf16.msrb.mxu3 %v13280_v18  ;;  %v13504_v54 = vor.u32 %v16022_v39, %v13501_v60 }
 0x4a0   :  { %6376 = vmatpush.bf16.msrb.mxu1 %v13152_v55  ;;  %v13376_v55 = vor.u32 %v15990_v61, %v13373_v9 }
 0x4a1   :  { %6414 = vmatpush.bf16.msrb.mxu0 %v13408_v48 }
 0x4a2   :  { %6433 = vmatpush.bf16.msrb.mxu2 %v13536_v5  ;;  %v5140_v40 = vpop.f32.mrf.mxu1 }
 0x4a3   :  { %v21687_v21 = vpop.f32.mrf.mxu2  ;;  %6396 = vmatpush.bf16.msrb.mxu3 %v13264_v15  ;;  %v5141_v7 = vadd.f32 %v5140_v40, %v20813_v8 }
 0x4a4   :  { %6377 = vmatpush.bf16.msrb.mxu1 %v13136_v35 }
 0x4a5   :  { %6415 = vmatpush.bf16.msrb.mxu0 %v13392_v19  ;;  %6308 = vmatmul.bf16.gmra.mxu1 %v21256_v53 }
 0x4a6   :  { %v5178_v18 = vpop.f32.mrf.mxu0  ;;  %6434 = vmatpush.bf16.msrb.mxu2 %v13520_v20  ;;  %6327 = vmatmul.bf16.gmra.mxu3 %v21268_v2  ;;  %v5159_v56 = vpop.f32.mrf.mxu3 }
 0x4a7   :  { %6397 = vmatpush.bf16.msrb.mxu3 %v13248_v46  ;;  %6346 = vmatmul.bf16.gmra.mxu0 %v21270_v57  ;;  %v5160_v29 = vadd.f32 %v5159_v56, %v5141_v7 }
 0x4a8   :  { %6378 = vmatpush.bf16.msrb.mxu1 %v13120_v62  ;;  %6365 = vmatmul.bf16.gmra.mxu2 %v21281_v0 }
 0x4a9   :  { %6416 = vmatpush.bf16.msrb.mxu0 %v13376_v55  ;;  %v5179_v26 = vadd.f32 %v5178_v18, %v5160_v29 }
 0x4aa   :  { %6435 = vmatpush.bf16.msrb.mxu2 %v13504_v54  ;;  %v21694_v44 = vpop.f32.mrf.mxu1 }
 0x4ab   :  { %v5197_v8 = vpop.f32.mrf.mxu2  ;;  %v5143_v32 = vadd.f32 %v21694_v44, %v20854_v38 }
 0x4ac   :  { %v21698_v5 = vadd.f32 %v5197_v8, %v5179_v26 }
 0x4ae   :  { %v21696_v48 = vpop.f32.mrf.mxu0  ;;  %25039 = vst [vmem:[#allocation22_spill] sm:$0xff] %v21698_v5  ;;  %v21700_v30 = vpop.f32.mrf.mxu3 }
 0x4b2   :  { %v5211_v10 = vpop.f32.mrf.mxu1 }
 0x4b3   :  { %v21702_v22 = vpop.f32.mrf.mxu2  ;;  %v5212_v49 = vadd.f32 %v5211_v10, %v20913_v36 }
 0x4b5   :  { %6379 = vmatmul.bf16.vlgmr.msrb.gmra.mxu1 %v21109_v33 }
 0x4b6   :  { %v5249_v15 = vpop.f32.mrf.mxu0  ;;  %6398 = vmatmul.bf16.vlgmr.msrb.gmra.mxu3 %v21111_v17  ;;  %v5230_v35 = vpop.f32.mrf.mxu3 }
 0x4b7   :  { %6417 = vmatmul.bf16.vlgmr.msrb.gmra.mxu0 %v21131_v37  ;;  %v5231_v6 = vadd.f32 %v5230_v35, %v5212_v49 }
 0x4b8   :  { %6436 = vmatmul.bf16.vlgmr.msrb.gmra.mxu2 %v21133_v58 }
 0x4b9   :  { %v5250_v23 = vadd.f32 %v5249_v15, %v5231_v6 }
 0x4ba   :  { %v21709_v25 = vpop.f32.mrf.mxu1 }
 0x4bb   :  { %v5268_v42 = vpop.f32.mrf.mxu2 }
 0x4bc   :  { %v21713_v20 = vadd.f32 %v5268_v42, %v5250_v23 }
 0x4be   :  { %v21711_v19 = vpop.f32.mrf.mxu0  ;;  %25040 = vst [vmem:[#allocation23_spill] sm:$0xff] %v21713_v20  ;;  %v21715_v36 = vpop.f32.mrf.mxu3  ;;  %v5138_v20 = vadd.f32 %v21631_v27, %v20759_v4 }
 0x4c2   :  { %v5216_v33 = vpop.f32.mrf.mxu1 }
 0x4c3   :  { %v21717_v61 = vpop.f32.mrf.mxu2  ;;  %v5217_v17 = vadd.f32 %v5216_v33, %v21039_v14 }
 0x4c4   :  { %25041 = vst [vmem:[#allocation24_spill] sm:$0xff] %v21717_v61 }
 0x4c5   :  { %6384 = vmatmul.bf16.gmra.mxu1 %v21256_v53 }
 0x4c6   :  { %v5254_v37 = vpop.f32.mrf.mxu0  ;;  %6403 = vmatmul.bf16.gmra.mxu3 %v21268_v2  ;;  %v5235_v58 = vpop.f32.mrf.mxu3 }
 0x4c7   :  { %6422 = vmatmul.bf16.gmra.mxu0 %v21270_v57  ;;  %v5236_v9 = vadd.f32 %v5235_v58, %v5217_v17 }
 0x4c8   :  { %6441 = vmatmul.bf16.gmra.mxu2 %v21281_v0 }
 0x4c9   :  { %v5255_v40 = vadd.f32 %v5254_v37, %v5236_v9 }
 0x4ca   :  { %v21724_v60 = vpop.f32.mrf.mxu1 }
 0x4cb   :  { %v5273_v39 = vpop.f32.mrf.mxu2 }
 0x4cc   :  { %v21728_v62 = vadd.f32 %v5273_v39, %v5255_v40 }
 0x4ce   :  { %v21726_v46 = vpop.f32.mrf.mxu0  ;;  %25043 = vst [vmem:[#allocation26_spill] sm:$0xff] %v21728_v62  ;;  %v21730_v14 = vpop.f32.mrf.mxu3 }
 0x4cf   :  { %25042 = vst [vmem:[#allocation25_spill] sm:$0xff] %v21726_v46 }
 0x4d0   :  { %25044 = vst [vmem:[#allocation27_spill] sm:$0xff] %v21730_v14  ;;  %v5162_v14 = vadd.f32 %v21700_v30, %v5143_v32 }
 0x4d2   :  { %v6152_v53 = vpop.f32.mrf.mxu1  ;;  %v5181_v32 = vadd.f32 %v21696_v48, %v5162_v14 }
 0x4d3   :  { %v21732_v7 = vpop.f32.mrf.mxu2 }
 0x4d4   :  { %25045 = vst [vmem:[#allocation28_spill] sm:$0xff] %v21732_v7 }
 0x4d6   :  { %v6190_v2 = vpop.f32.mrf.mxu0 }
 0x4d9   :  { %v6171_v18 = vpop.f32.mrf.mxu3 }
 0x4da   :  { %v6172_v57 = vadd.f32 %v6171_v18, %v6152_v53  ;;  %v21734_v0 = vpop.f32.mrf.mxu1 }
 0x4db   :  { %v6209_v55 = vpop.f32.mrf.mxu2 }
 0x4dc   :  { %v6191_v54 = vadd.f32 %v6190_v2, %v6172_v57 }
 0x4de   :  { %v21736_v56 = vpop.f32.mrf.mxu0  ;;  %v6210_v29 = vadd.f32 %v6209_v55, %v6191_v54 }
 0x4e0   :  { %v21739_v8 = vadd.f32 %v6210_v29, %v21192_v1 }
 0x4e1   :  { %v6173_v26 = vpop.f32.mrf.mxu3 }
 0x4e2   :  { %25046 = vst [vmem:[#allocation29_spill] sm:$0xff] %v21739_v8  ;;  %v6157_v49 = vpop.f32.mrf.mxu1  ;;  %v6174_v46 = vadd.f32 %v6173_v26, %v21734_v0 }
 0x4e3   :  { %v21741_v10 = vpop.f32.mrf.mxu2 }
 0x4e4   :  { %v6193_v27 = vadd.f32 %v21736_v56, %v6174_v46 }
 0x4e6   :  { %v6195_v15 = vpop.f32.mrf.mxu0 }
 0x4e9   :  { %v6176_v35 = vpop.f32.mrf.mxu3 }
 0x4ea   :  { %v6177_v6 = vadd.f32 %v6176_v35, %v6157_v49  ;;  %v21743_v23 = vpop.f32.mrf.mxu1 }
 0x4eb   :  { %v6214_v42 = vpop.f32.mrf.mxu2 }
 0x4ec   :  { %v6196_v33 = vadd.f32 %v6195_v15, %v6177_v6 }
 0x4ee   :  { %v21745_v17 = vpop.f32.mrf.mxu0  ;;  %v6215_v37 = vadd.f32 %v6214_v42, %v6196_v33 }
 0x4f0   :  { %v21748_v58 = vadd.f32 %v6215_v37, %v21338_v11 }
 0x4f1   :  { %v6178_v9 = vpop.f32.mrf.mxu3 }
 0x4f2   :  { %25047 = vst [vmem:[#allocation30_spill] sm:$0xff] %v21748_v58  ;;  %v6228_v39 = vpop.f32.mrf.mxu1  ;;  %v5157_v58 = vadd.f32 %v21673_v59, %v5138_v20  ;;  %v6179_v59 = vadd.f32 %v6178_v9, %v21743_v23 }
 0x4f3   :  { %v21750_v1 = vpop.f32.mrf.mxu2 }
 0x4f4   :  { %v5176_v4 = vadd.f32 %v21645_v3, %v5157_v58  ;;  %v25052_v58 = vld [vmem:[#allocation22_spill] sm:$0xff] }
 0x4f6   :  { %v6266_v40 = vpop.f32.mrf.mxu0  ;;  %v5195_v3 = vadd.f32 %v21687_v21, %v5176_v4  ;;  %v5219_v21 = vadd.f32 %v21724_v60, %v21127_v24 }
 0x4f9   :  { %v6247_v53 = vpop.f32.mrf.mxu3  ;;  %v25061_v4 = vld [vmem:[#allocation30_spill] sm:$0xff] }
 0x4fa   :  { %v6248_v2 = vadd.f32 %v6247_v53, %v6228_v39  ;;  %v6230_v57 = vpop.f32.mrf.mxu1 }
 0x4fb   :  { %v6285_v18 = vpop.f32.mrf.mxu2 }
 0x4fc   :  { %v6267_v55 = vadd.f32 %v6266_v40, %v6248_v2 }
 0x4fe   :  { %v6268_v54 = vpop.f32.mrf.mxu0  ;;  %v6286_v29 = vadd.f32 %v6285_v18, %v6267_v55 }
 0x500   :  { %v21753_v49 = vadd.f32 %v6286_v29, %v21435_v43 }
 0x501   :  { %v6249_v15 = vpop.f32.mrf.mxu3 }
 0x502   :  { %25048 = vst [vmem:[#allocation31_spill] sm:$0xff] %v21753_v49  ;;  %v6233_v6 = vpop.f32.mrf.mxu1  ;;  %v6250_v49 = vadd.f32 %v6249_v15, %v6230_v57  ;;  %v25054_v15 = vld [vmem:[#allocation24_spill] sm:$0xff] }
 0x503   :  { %v6287_v35 = vpop.f32.mrf.mxu2 }
 0x504   :  { %v6269_v38 = vadd.f32 %v6268_v54, %v6250_v49  ;;  %v25053_v54 = vld [vmem:[#allocation27_spill] sm:$0xff] }
 0x505   :  { %v5238_v49 = vadd.f32 %v25053_v54, %v5219_v21 }
 0x506   :  { %v6271_v11 = vpop.f32.mrf.mxu0  ;;  %v6288_v46 = vadd.f32 %v6287_v35, %v6269_v38  ;;  %v25055_v35 = vld [vmem:[#allocation29_spill] sm:$0xff] }
 0x509   :  { %v6252_v42 = vpop.f32.mrf.mxu3 }
 0x50a   :  { %v6253_v33 = vadd.f32 %v6252_v42, %v6233_v6  ;;  %v6235_v13 = vpop.f32.mrf.mxu1 }
 0x50b   :  { %v6290_v37 = vpop.f32.mrf.mxu2 }
 0x50c   :  { %v6272_v31 = vadd.f32 %v6271_v11, %v6253_v33 }
 0x50e   :  { %v6273_v41 = vpop.f32.mrf.mxu0  ;;  %v6291_v50 = vadd.f32 %v6290_v37, %v6272_v31 }
 0x510   :  { %v21756_v39 = vadd.f32 %v6291_v50, %v21550_v12 }
 0x511   :  { %v6254_v40 = vpop.f32.mrf.mxu3 }
 0x512   :  { %25049 = vst [vmem:[#allocation32_spill] sm:$0xff] %v21756_v39  ;;  %v6304_v2 = vpop.f32.mrf.mxu1  ;;  %v6255_v44 = vadd.f32 %v6254_v40, %v6235_v13 }
 0x513   :  { %v21758_v53 = vpop.f32.mrf.mxu2 }
 0x514   :  { %v6274_v56 = vadd.f32 %v6273_v41, %v6255_v44 }
 0x516   :  { %v6342_v43 = vpop.f32.mrf.mxu0 }
 0x519   :  { %v6323_v18 = vpop.f32.mrf.mxu3 }
 0x51a   :  { %v6306_v29 = vpop.f32.mrf.mxu1  ;;  %v6324_v63 = vadd.f32 %v6323_v18, %v6304_v2 }
 0x51b   :  { %v6361_v55 = vpop.f32.mrf.mxu2 }
 0x51c   :  { %v6343_v20 = vadd.f32 %v6342_v43, %v6324_v63  ;;  %v25057_v43 = vld [vmem:[#allocation31_spill] sm:$0xff] }
 0x51e   :  { %v6344_v51 = vpop.f32.mrf.mxu0  ;;  %v6362_v23 = vadd.f32 %v6361_v55, %v6343_v20  ;;  %v25058_v55 = vld [vmem:[#allocation20_spill] sm:$0xff] }
 0x521   :  { %v6325_v47 = vpop.f32.mrf.mxu3 }
 0x522   :  { %v6309_v6 = vpop.f32.mrf.mxu1  ;;  %v6326_v39 = vadd.f32 %v6325_v47, %v6306_v29  ;;  %v5214_v47 = vadd.f32 %v21709_v25, %v20978_v45  ;;  %v6212_v45 = vadd.f32 %v21741_v10, %v6193_v27  ;;  %v6198_v25 = vadd.f32 %v21745_v17, %v6179_v59  ;;  %v25051_v17 = vld [vmem:[#allocation21_spill] sm:$0xff]  ;;  %v25062_v59 = vld [vmem:[#allocation32_spill] sm:$0xff] }
 0x523   :  { %v6363_v34 = vpop.f32.mrf.mxu2  ;;  %v21792_v10 = vadd.f32 %v6288_v46, %v21495_v28 }
 0x524   :  { %v6345_v5 = vadd.f32 %v6344_v51, %v6326_v39  ;;  %v5233_v51 = vadd.f32 %v21715_v36, %v5214_v47  ;;  %v6217_v36 = vadd.f32 %v21750_v1, %v6198_v25 }
 0x525   :  { %v6474_v18 = vadd.f32 %v21792_v10, %v25057_v43  ;;  %v6506_v27 = vmul.f32 %v21792_v10, %v21792_v10 }
 0x526   :  { %v6347_v42 = vpop.f32.mrf.mxu0  ;;  %v6364_v30 = vadd.f32 %v6363_v34, %v6345_v5  ;;  %v5252_v48 = vadd.f32 %v21711_v19, %v5233_v51  ;;  %v21788_v5 = vadd.f32 %v6212_v45, %v21283_v52  ;;  %v21796_v19 = vadd.f32 %v6362_v23, %v25051_v17 }
 0x527   :  { %v6475_v38 = vadd.f32 %v6474_v18, %v25062_v59  ;;  %v6509_v23 = vmul.f32 %v25061_v4, %v25061_v4 }
 0x528   :  { %v21783_v14 = vadd.f32 %v6364_v30, %v5195_v3  ;;  %v5271_v28 = vadd.f32 %v25054_v15, %v5252_v48  ;;  %v6465_v39 = vadd.f32 %v21788_v5, %v25055_v35  ;;  %v6503_v45 = vmul.f32 %v21796_v19, %v21796_v19 }
 0x529   :  { %v6328_v7 = vpop.f32.mrf.mxu3 }
 0x52a   :  { %v6311_v33 = vpop.f32.mrf.mxu1  ;;  %v6329_v8 = vadd.f32 %v6328_v7, %v6309_v6  ;;  %v6483_v52 = vadd.f32 %v21783_v14, %v21796_v19  ;;  %v6466_v47 = vadd.f32 %v6465_v39, %v25061_v4 }
 0x52b   :  { %v6366_v11 = vpop.f32.mrf.mxu2 }
 0x52c   :  { %v6348_v7 = vadd.f32 %v6347_v42, %v6329_v8  ;;  %v5200_v8 = vadd.f32 %v21702_v22, %v5181_v32  ;;  %v6293_v22 = vadd.f32 %v21758_v53, %v6274_v56  ;;  %v25056_v53 = vld [vmem:[#allocation19_spill] sm:$0xff] }
 0x52d   :  { %v21810_v2 = vadd.f32 %v6217_v36, %v25056_v53 }
 0x52e   :  { %v6349_v31 = vpop.f32.mrf.mxu0  ;;  %v6367_v13 = vadd.f32 %v6366_v11, %v6348_v7  ;;  %v25059_v11 = vld [vmem:[#allocation25_spill] sm:$0xff]  ;;  %v6505_v7 = vmul.f32 %v21788_v5, %v21788_v5 }
 0x52f   :  { %v6467_v30 = vadd.f32 %v6466_v47, %v21810_v2 }
 0x530   :  { %v21799_v9 = vadd.f32 %v6367_v13, %v25052_v58 }
 0x531   :  { %v6330_v37 = vpop.f32.mrf.mxu3  ;;  %v6468_v36 = vrot.slane %v6467_v30, 4 }
 0x532   :  { %v6380_v12 = vpop.f32.mrf.mxu1  ;;  %v6331_v16 = vadd.f32 %v6330_v37, %v6311_v33  ;;  %v6484_v29 = vadd.f32 %v6483_v52, %v21799_v9  ;;  %v5257_v33 = vadd.f32 %v25059_v11, %v5238_v49  ;;  %v6511_v25 = vmul.f32 %v21799_v9, %v21799_v9  ;;  %v25063_v49 = vld [vmem:[#allocation23_spill] sm:$0xff]  ;;  %v25064_v52 = vld [vmem:[#allocation26_spill] sm:$0xff] }
 0x533   :  { %v6368_v50 = vpop.f32.mrf.mxu2 }
 0x534   :  { %v6350_v26 = vadd.f32 %v6349_v31, %v6331_v16  ;;  %v6501_v31 = vmul.f32 %v25055_v35, %v25055_v35 }
 0x536   :  { %v21760_v62 = vpop.f32.mrf.mxu0  ;;  %v6369_v34 = vadd.f32 %v6368_v50, %v6350_v26  ;;  %v6502_v26 = vmul.f32 %v25057_v43, %v25057_v43  ;;  %v6517_v48 = vadd.f32 %v6505_v7, %v6501_v31 }
 0x537   :  { %25050 = vst [vmem:[#allocation33_spill] sm:$0xff] %v21760_v62 }
 0x538   :  { %v21804_v60 = vadd.f32 %v6369_v34, %v5200_v8  ;;  %v6526_v13 = vadd.f32 %v6506_v27, %v6502_v26  ;;  %v6518_v39 = vadd.f32 %v6517_v48, %v6509_v23 }
 0x539   :  { %v6399_v61 = vpop.f32.mrf.mxu3 }
 0x53a   :  { %v6382_v0 = vpop.f32.mrf.mxu1  ;;  %v6400_v24 = vadd.f32 %v6399_v61, %v6380_v12  ;;  %v21815_v61 = vadd.f32 %v6293_v22, %v25058_v55  ;;  %v6485_v44 = vadd.f32 %v6484_v29, %v21804_v60 }
 0x53b   :  { %v21769_v62 = vpop.f32.mrf.mxu2 }
 0x53c   :  { %v6476_v3 = vadd.f32 %v6475_v38, %v21815_v61  ;;  %v6486_v8 = vrot.slane %v6485_v44, 4 }
 0x53e   :  { %v6420_v57 = vpop.f32.mrf.mxu0  ;;  %v25060_v37 = vld [vmem:[#allocation33_spill] sm:$0xff]  ;;  %v6477_v22 = vrot.slane %v6476_v3, 4  ;;  %v6487_v53 = vadd.f32 %v6486_v8, %v6485_v44 }
 0x53f   :  { %v6419_v50 = vadd.f32 %v25060_v37, %v6400_v24  ;;  %v6469_v37 = vadd.f32 %v6468_v36, %v6467_v30 }
 0x541   :  { %v6401_v63 = vpop.f32.mrf.mxu3  ;;  %v6438_v46 = vadd.f32 %v21769_v62, %v6419_v50  ;;  %v6513_v62 = vmul.f32 %v21810_v2, %v21810_v2  ;;  %v6478_v50 = vadd.f32 %v6477_v22, %v6476_v3  ;;  %v6470_v30 = vrot.slane %v6469_v37, 2 }
 0x542   :  { %v6402_v41 = vadd.f32 %v6401_v63, %v6382_v0  ;;  %v6385_v1 = vpop.f32.mrf.mxu1  ;;  %v6507_v0 = vmul.f32 %v21783_v14, %v21783_v14  ;;  %v6514_v63 = vmul.f32 %v21815_v61, %v21815_v61 }
 0x543   :  { %v6439_v16 = vpop.f32.mrf.mxu2  ;;  %v21853_v24 = vadd.f32 %v6438_v46, %v25063_v49  ;;  %v6519_v11 = vadd.f32 %v6518_v39, %v6513_v62 }
 0x544   :  { %v6421_v40 = vadd.f32 %v6420_v57, %v6402_v41  ;;  %v6510_v57 = vmul.f32 %v25062_v59, %v25062_v59  ;;  %v6535_v34 = vadd.f32 %v6507_v0, %v6503_v45  ;;  %v6479_v45 = vrot.slane %v6478_v50, 2 }
 0x546   :  { %v6423_v6 = vpop.f32.mrf.mxu0  ;;  %v6440_v32 = vadd.f32 %v6439_v16, %v6421_v40  ;;  %v6515_v16 = vmul.f32 %v21804_v60, %v21804_v60  ;;  %v6527_v41 = vadd.f32 %v6526_v13, %v6510_v57  ;;  %v6536_v54 = vadd.f32 %v6535_v34, %v6511_v25 }
 0x547   :  { %v6480_v48 = vadd.f32 %v6479_v45, %v6478_v50 }
 0x548   :  { %v21848_v21 = vadd.f32 %v6440_v32, %v5271_v28  ;;  %v6528_v40 = vadd.f32 %v6527_v41, %v6514_v63  ;;  %v6537_v18 = vadd.f32 %v6536_v54, %v6515_v16  ;;  %v6471_v63 = vadd.f32 %v6470_v30, %v6469_v37 }
 0x549   :  { %v6404_v42 = vpop.f32.mrf.mxu3  ;;  %v6481_v54 = vrot.slane %v6480_v48, 1 }
 0x54a   :  { %v6405_v12 = vadd.f32 %v6404_v42, %v6385_v1  ;;  %v6387_v17 = vpop.f32.mrf.mxu1  ;;  %v6508_v55 = vmul.f32 %v21848_v21, %v21848_v21  ;;  %v6492_v47 = vadd.f32 %v21848_v21, %v21853_v24  ;;  %v6529_v44 = vrot.slane %v6528_v40, 4 }
 0x54b   :  { %v6442_v20 = vpop.f32.mrf.mxu2  ;;  %v6538_v7 = vrot.slane %v6537_v18, 4 }
 0x54c   :  { %v6424_v51 = vadd.f32 %v6423_v6, %v6405_v12  ;;  %v25065_v6 = vld [vmem:[#allocation28_spill] sm:$0xff]  ;;  %v6504_v12 = vmul.f32 %v21853_v24, %v21853_v24  ;;  %v6530_v23 = vadd.f32 %v6529_v44, %v6528_v40 }
 0x54d   :  { %v5276_v42 = vadd.f32 %v25065_v6, %v5257_v33  ;;  %v6539_v13 = vadd.f32 %v6538_v7, %v6537_v18 }
 0x54e   :  { %v6443_v56 = vadd.f32 %v6442_v20, %v6424_v51  ;;  %v6425_v28 = vpop.f32.mrf.mxu0  ;;  %v6488_v20 = vrot.slane %v6487_v53, 2  ;;  %v6544_v0 = vadd.f32 %v6508_v55, %v6504_v12  ;;  %v6520_v51 = vrot.slane %v6519_v11, 4 }
 0x54f   :  { %v6531_v41 = vrot.slane %v6530_v23, 2  ;;  %v6540_v22 = vrot.slane %v6539_v13, 2 }
 0x550   :  { %v21856_v1 = vadd.f32 %v6443_v56, %v25064_v52  ;;  %v6489_v25 = vadd.f32 %v6488_v20, %v6487_v53  ;;  %v6521_v16 = vadd.f32 %v6520_v51, %v6519_v11 }
 0x551   :  { %v6406_v58 = vpop.f32.mrf.mxu3  ;;  %v6532_v53 = vadd.f32 %v6531_v41, %v6530_v23  ;;  %v6541_v40 = vadd.f32 %v6540_v22, %v6539_v13 }
 0x552   :  { %v6407_v15 = vadd.f32 %v6406_v58, %v6387_v17  ;;  %v6512_v27 = vmul.f32 %v21856_v1, %v21856_v1  ;;  %v6493_v33 = vadd.f32 %v6492_v47, %v21856_v1  ;;  %v6490_v36 = vrot.slane %v6489_v25, 1 }
 0x553   :  { %v6444_v31 = vpop.f32.mrf.mxu2  ;;  %v6472_v58 = vrot.slane %v6471_v63, 1  ;;  %v6522_v52 = vrot.slane %v6521_v16, 2  ;;  %v6533_v50 = vrot.slane %v6532_v53, 1  ;;  %v6542_v12 = vrot.slane %v6541_v40, 1 }
 0x554   :  { %v6426_v29 = vadd.f32 %v6425_v28, %v6407_v15  ;;  %v6545_v26 = vadd.f32 %v6544_v0, %v6512_v27  ;;  %v6491_v39 = vadd.f32 %v6490_v36, %v6489_v25 }
 0x555   :  { %v6473_v55 = vadd.f32 %v6472_v58, %v6471_v63  ;;  %v6534_v44 = vadd.f32 %v6533_v50, %v6532_v53  ;;  %v6543_v20 = vadd.f32 %v6542_v12, %v6541_v40 }
 0x556   :  { %v6445_v38 = vadd.f32 %v6444_v31, %v6426_v29  ;;  %v6482_v29 = vadd.f32 %v6481_v54, %v6480_v48 }
 0x557   :  { %v6553_v31 = vadd.f32 %v6491_v39, %v6473_v55 }
 0x558   :  { %v21868_v32 = vadd.f32 %v6445_v38, %v5276_v42  ;;  %v6523_v42 = vadd.f32 %v6522_v52, %v6521_v16  ;;  %v6463_v52 = vld [vmem:[%s24910_s5] sm:$0xf] }
 0x55a   :  { %v6494_v57 = vadd.f32 %v6493_v33, %v21868_v32  ;;  %v6516_v3 = vmul.f32 %v21868_v32, %v21868_v32  ;;  %v6524_v27 = vrot.slane %v6523_v42, 1 }
 0x55c   :  { %v6495_v46 = vrot.slane %v6494_v57, 4  ;;  %v6546_v56 = vadd.f32 %v6545_v26, %v6516_v3  ;;  %v6525_v7 = vadd.f32 %v6524_v27, %v6523_v42 }
 0x55e   :  { %v6547_v8 = vrot.slane %v6546_v56, 4  ;;  %v6496_v34 = vadd.f32 %v6495_v46, %v6494_v57  ;;  %v6555_v33 = vadd.f32 %v6543_v20, %v6525_v7 }
 0x560   :  { %v6497_v62 = vrot.slane %v6496_v34, 2  ;;  %v6548_v17 = vadd.f32 %v6547_v8, %v6546_v56 }
 0x562   :  { %v6498_v49 = vadd.f32 %v6497_v62, %v6496_v34  ;;  %v6549_v15 = vrot.slane %v6548_v17, 2 }
 0x564   :  { %v6499_v28 = vrot.slane %v6498_v49, 1  ;;  %v6550_v18 = vadd.f32 %v6549_v15, %v6548_v17 }
 0x566   :  { %v6500_v6 = vadd.f32 %v6499_v28, %v6498_v49  ;;  %v6551_v11 = vrot.slane %v6550_v18, 1 }
 0x568   :  { %v6554_v37 = vadd.f32 %v6500_v6, %v6482_v29  ;;  %v6552_v38 = vadd.f32 %v6551_v11, %v6550_v18 }
 0x56a   :  { %v6557_v47 = vadd.f32 %v6554_v37, %v6553_v31  ;;  %v6556_v0 = vadd.f32 %v6552_v38, %v6534_v44 }
 0x56c   :  { %6559 = vrot.lane.b32.xlu2 %v6557_v47, %s16469_s1  ;;  %v6558_v51 = vadd.f32 %v6556_v0, %v6555_v33 }
 0x574   :  { %6562 = vrot.lane.b32.xlu2 %v6558_v51, %s16469_s1 }
 0x5c6   :  { %v6560_v30 = vpop.permute.xlu2 %6559 }
 0x5c7   :  { %v6561_v26 = vadd.f32 %v6560_v30, %v6557_v47  ;;  %v6464_v47 = vld [vmem:[%s24911_s6] sm:$0xf] }
 0x5c9   :  { %6565 = vrot.lane.b32.xlu0 %v6561_v26, %s16470_s26 }
 0x5ce   :  { %v6563_v57 = vpop.permute.xlu2 %6562 }
 0x5cf   :  { %v6564_v3 = vadd.f32 %v6563_v57, %v6558_v51 }
 0x5d1   :  { %6568 = vrot.lane.b32.xlu1 %v6564_v3, %s16470_s26 }
 0x63b   :  { %v6566_v45 = vpop.permute.xlu0 %6565 }
 0x63c   :  { %v6567_v25 = vadd.f32 %v6566_v45, %v6561_v26 }
 0x63e   :  { %v6571_v46 = vmul.f32 0.001953125, %v6567_v25 }
 0x640   :  { %v6573_v13 = vmul.f32 %v6571_v46, %v6571_v46 }
 0x643   :  { %v6569_v56 = vpop.permute.xlu1 %6568 }
 0x644   :  { %v6570_v23 = vadd.f32 %v6569_v56, %v6564_v3 }
 0x646   :  { %v6572_v63 = vmul.f32 0.001953125, %v6570_v23 }
 0x648   :  { %v6574_v8 = vsub.f32 %v6572_v63, %v6573_v13 }
 0x64a   :  { %v6575_v48 = vadd.f32 1e-05, %v6574_v8 }
 0x64c   :  { %16442 = vrsqrt.f32 %v6575_v48  ;;  %vm6582_vm1 = vweird.f32 %v6575_v48 }
 0x652   :  { %v16443_v34 = vpop.eup %16442 }
 0x653   :  { %v6577_v16 = vmul.f32 %v16443_v34, %v6575_v48  ;;  %vm6583_vm15 = vweird.f32 %v16443_v34 }
 0x654   :  { %vm6584_vm3 = vmor %vm6582_vm1, %vm6583_vm15 }
 0x655   :  { %v6578_v36 = vmul.f32 %v16443_v34, %v6577_v16 }
 0x657   :  { %v6579_v62 = vmul.f32 0.5, %v6578_v36 }
 0x659   :  { %v6580_v41 = vsub.f32 1.5, %v6579_v62 }
 0x65b   :  { %v6581_v22 = vmul.f32 %v16443_v34, %v6580_v41 }
 0x65d   :  { %v6585_v17 = vsel %vm6584_vm3, %v16443_v34, %v6581_v22 }
 0x65e   :  { %v6587_v58 = vrot.slane %v6585_v17, 7  ;;  %v6588_v54 = vrot.slane %v6585_v17, 6  ;;  %v6589_v49 = vrot.slane %v6585_v17, 5 }
 0x660   :  { %v6590_v15 = vsel %vm25066_vm4, %v6585_v17, %v6587_v58  ;;  %v6591_v39 = vsel %vm25067_vm5, %v6588_v54, %v6589_v49 }
 0x661   :  { %v6592_v28 = vsel %vm25068_vm6, %v6590_v15, %v6591_v39 }
 0x662   :  { %v6594_v53 = vmul.f32 %v6592_v28, %v6463_v52 }
 0x664   :  { %v6596_v40 = vperm.slane %v6594_v53, 0  ;;  %v6597_v18 = vperm.slane %v6594_v53, 1  ;;  %v6598_v55 = vperm.slane %v6594_v53, 2  ;;  %v6599_v29 = vperm.slane %v6594_v53, 3 }
 0x666   :  { %v6605_v6 = vmul.f32 %v6597_v18, %v6571_v46  ;;  %v6606_v42 = vmul.f32 %v6598_v55, %v6571_v46  ;;  %v6607_v11 = vmul.f32 %v6599_v29, %v6571_v46  ;;  %v6604_v31 = vmul.f32 %v6596_v40, %v6571_v46 }
 0x667   :  { %v6620_v44 = vmul.f32 %v6596_v40, %v25055_v35  ;;  %v6621_v7 = vmul.f32 %v6597_v18, %v25057_v43  ;;  %v6622_v0 = vmul.f32 %v6598_v55, %v21796_v19  ;;  %v6623_v33 = vmul.f32 %v6599_v29, %v21853_v24 }
 0x668   :  { %v6612_v37 = vrot.slane %v6605_v6, 7  ;;  %v6613_v50 = vrot.slane %v6606_v42, 6  ;;  %v6614_v12 = vrot.slane %v6607_v11, 5  ;;  %v6624_v30 = vmul.f32 %v6596_v40, %v21788_v5 }
 0x669   :  { %v6625_v26 = vmul.f32 %v6597_v18, %v21792_v10  ;;  %v6626_v57 = vmul.f32 %v6598_v55, %v21783_v14  ;;  %v6627_v3 = vmul.f32 %v6599_v29, %v21848_v21  ;;  %v6628_v45 = vmul.f32 %v6596_v40, %v25061_v4 }
 0x66a   :  { %v6615_v27 = vsel %vm25069_vm10, %v6604_v31, %v6612_v37  ;;  %v6616_v38 = vsel %vm25070_vm0, %v6613_v50, %v6614_v12  ;;  %v6629_v35 = vmul.f32 %v6597_v18, %v25062_v59  ;;  %v6630_v25 = vmul.f32 %v6598_v55, %v21799_v9 }
 0x66b   :  { %v6617_v20 = vsel %vm25071_vm2, %v6615_v27, %v6616_v38  ;;  %v6631_v24 = vmul.f32 %v6599_v29, %v21856_v1  ;;  %v6632_v5 = vmul.f32 %v6596_v40, %v21810_v2  ;;  %v6633_v10 = vmul.f32 %v6597_v18, %v21815_v61 }
 0x66c   :  { %v6619_v51 = vsub.f32 %v6464_v47, %v6617_v20  ;;  %v6634_v14 = vmul.f32 %v6598_v55, %v21804_v60  ;;  %v6635_v21 = vmul.f32 %v6599_v29, %v21868_v32  ;;  %v13987_v60 = vld [vmem:[%s24912_s7 + $0x5e0] sm:$0xf]  ;;  %v16243_v32 = vld [vmem:[%s24912_s7 + $0x5ec] sm:$0xf0] }
 0x66d   :  { %v13988_v54 = vor.u32 %v16243_v32, %v13987_v60  ;;  %v16303_v60 = vld [vmem:[%s24912_s7 + $0x7cc] sm:$0xf0] }
 0x66e   :  { %v6637_v43 = vperm.slane %v6619_v51, 0  ;;  %v6638_v46 = vperm.slane %v6619_v51, 1  ;;  %v6639_v19 = vperm.slane %v6619_v51, 2  ;;  %v6640_v56 = vperm.slane %v6619_v51, 3 }
 0x66f   :  { %7841 = vmatpush.bf16.msra.mxu3 %v13988_v54  ;;  %v13955_v54 = vld [vmem:[%s24912_s7 + $0x5a0] sm:$0xf] }
 0x670   :  { %v6645_v23 = vadd.f32 %v6637_v43, %v6620_v44  ;;  %v6646_v4 = vadd.f32 %v6638_v46, %v6621_v7  ;;  %v6647_v13 = vadd.f32 %v6639_v19, %v6622_v0  ;;  %v6648_v59 = vadd.f32 %v6640_v56, %v6623_v33 }
 0x671   :  { %v6649_v63 = vadd.f32 %v6637_v43, %v6624_v30  ;;  %v6650_v9 = vadd.f32 %v6638_v46, %v6625_v26  ;;  %v6651_v8 = vadd.f32 %v6639_v19, %v6626_v57  ;;  %v6652_v48 = vadd.f32 %v6640_v56, %v6627_v3  ;;  %v13859_v3 = vld [vmem:[%s24912_s7 + $0x4e0] sm:$0xf] }
 0x672   :  { %v6653_v34 = vadd.f32 %v6637_v43, %v6628_v45  ;;  %v6654_v16 = vadd.f32 %v6638_v46, %v6629_v35  ;;  %v6655_v36 = vadd.f32 %v6639_v19, %v6630_v25  ;;  %v6656_v1 = vadd.f32 %v6640_v56, %v6631_v24  ;;  %v16211_v45 = vld [vmem:[%s24912_s7 + $0x4ec] sm:$0xf0]  ;;  %v14115_v35 = vld [vmem:[%s24912_s7 + $0x6e0] sm:$0xf] }
 0x673   :  { %v6657_v62 = vadd.f32 %v6637_v43, %v6632_v5  ;;  %v6658_v2 = vadd.f32 %v6638_v46, %v6633_v10  ;;  %v21905_v41 = vadd.f32 %v6639_v19, %v6634_v14  ;;  %v21907_v61 = vadd.f32 %v6640_v56, %v6635_v21  ;;  %v16275_v25 = vld [vmem:[%s24912_s7 + $0x6ec] sm:$0xf0]  ;;  %v14243_v24 = vld [vmem:[%s24912_s7 + $0x7e0] sm:$0xf] }
 0x674   :  { %vm6661_vm7 = vcmp.gt.f32.partialorder %v6645_v23, 0.0  ;;  %vm6662_vm8 = vcmp.gt.f32.partialorder %v6646_v4, 0.0  ;;  %vm6663_vm9 = vcmp.gt.f32.partialorder %v6647_v13, 0.0  ;;  %vm6664_vm11 = vcmp.gt.f32.partialorder %v6648_v59, 0.0  ;;  %v16307_v5 = vld [vmem:[%s24912_s7 + $0x7ec] sm:$0xf0] }
 0x675   :  { %vm6665_vm12 = vcmp.gt.f32.partialorder %v6649_v63, 0.0  ;;  %vm6666_vm13 = vcmp.gt.f32.partialorder %v6650_v9, 0.0  ;;  %vm6667_vm14 = vcmp.gt.f32.partialorder %v6651_v8, 0.0  ;;  %vm6668_vm15 = vcmp.gt.f32.partialorder %v6652_v48, 0.0  ;;  %v13971_v10 = vld [vmem:[%s24912_s7 + $0x5c0] sm:$0xf] }
 0x676   :  { %vm6669_vm1 = vcmp.gt.f32.partialorder %v6653_v34, 0.0  ;;  %vm6670_vm3 = vcmp.gt.f32.partialorder %v6654_v16, 0.0  ;;  %vm6671_vm4 = vcmp.gt.f32.partialorder %v6655_v36, 0.0  ;;  %vm6672_vm5 = vcmp.gt.f32.partialorder %v6656_v1, 0.0  ;;  %v16239_v14 = vld [vmem:[%s24912_s7 + $0x5cc] sm:$0xf0] }
 0x677   :  { %vm6673_vm6 = vcmp.gt.f32.partialorder %v6657_v62, 0.0  ;;  %vm6674_vm10 = vcmp.gt.f32.partialorder %v6658_v2, 0.0  ;;  %vm6675_vm0 = vcmp.gt.f32.partialorder %v21905_v41, 0.0  ;;  %vm6676_vm2 = vcmp.gt.f32.partialorder %v21907_v61, 0.0 }
 0x678   :  { %v6677_v22 = vmul.f32 0.2, %v6645_v23  ;;  %v6678_v17 = vmul.f32 0.2, %v6646_v4  ;;  %v6679_v58 = vmul.f32 0.2, %v6647_v13 }
 0x679   :  { %v6680_v49 = vmul.f32 0.2, %v6648_v59  ;;  %v6681_v52 = vmul.f32 0.2, %v6649_v63  ;;  %v6682_v15 = vmul.f32 0.2, %v6650_v9 }
 0x67a   :  { %v6683_v39 = vmul.f32 0.2, %v6651_v8  ;;  %v6684_v28 = vmul.f32 0.2, %v6652_v48  ;;  %v6685_v53 = vmul.f32 0.2, %v6653_v34  ;;  %v6693_v42 = vsel %vm6661_vm7, %v6645_v23, %v6677_v22 }
 0x67b   :  { %v6686_v40 = vmul.f32 0.2, %v6654_v16  ;;  %v6687_v18 = vmul.f32 0.2, %v6655_v36  ;;  %v6688_v55 = vmul.f32 0.2, %v6656_v1  ;;  %v6694_v11 = vsel %vm6662_vm8, %v6646_v4, %v6678_v17 }
 0x67c   :  { %v6689_v29 = vmul.f32 0.2, %v6657_v62  ;;  %v6690_v6 = vmul.f32 0.2, %v6658_v2  ;;  %v6691_v31 = vmul.f32 0.2, %v21905_v41  ;;  %v6695_v50 = vsel %vm6663_vm9, %v6647_v13, %v6679_v58 }
 0x67d   :  { %v6692_v37 = vmul.f32 0.2, %v21907_v61  ;;  %v6696_v12 = vsel %vm6664_vm11, %v6648_v59, %v6680_v49  ;;  %v21924_v47 = vsel %vm6665_vm12, %v6649_v63, %v6681_v52  ;;  %v21927_v27 = vsel %vm6666_vm13, %v6650_v9, %v6682_v15  ;;  %v13843_v59 = vld [vmem:[%s24912_s7 + $0x4c0] sm:$0xf]  ;;  %v16207_v63 = vld [vmem:[%s24912_s7 + $0x4cc] sm:$0xf0] }
 0x67e   :  { %v21930_v38 = vsel %vm6667_vm14, %v6651_v8, %v6683_v39  ;;  %v21933_v44 = vsel %vm6668_vm15, %v6652_v48, %v6684_v28  ;;  %v21936_v20 = vsel %vm6669_vm1, %v6653_v34, %v6685_v53  ;;  %v21939_v7 = vsel %vm6670_vm3, %v6654_v16, %v6686_v40  ;;  %v14099_v9 = vld [vmem:[%s24912_s7 + $0x6c0] sm:$0xf]  ;;  %v16271_v8 = vld [vmem:[%s24912_s7 + $0x6cc] sm:$0xf0] }
 0x67f   :  { %v21942_v0 = vsel %vm6671_vm4, %v6655_v36, %v6687_v18  ;;  %v21945_v33 = vsel %vm6672_vm5, %v6656_v1, %v6688_v55  ;;  %v21948_v51 = vsel %vm6673_vm6, %v6657_v62, %v6689_v29  ;;  %v21951_v30 = vsel %vm6674_vm10, %v6658_v2, %v6690_v6  ;;  %v14227_v1 = vld [vmem:[%s24912_s7 + $0x7c0] sm:$0xf]  ;;  %v16235_v28 = vld [vmem:[%s24912_s7 + $0x5ac] sm:$0xf0] }
 0x680   :  { %v6725_v26 = vrot.slane %v6693_v42, 7  ;;  %v6726_v57 = vrot.slane %v6694_v11, 7  ;;  %v6727_v43 = vrot.slane %v6695_v50, 7  ;;  %v6728_v46 = vrot.slane %v6696_v12, 7  ;;  %v13827_v53 = vld [vmem:[%s24912_s7 + $0x4a0] sm:$0xf] }
 0x681   :  { %v6729_v19 = vrot.slane %v21924_v47, 7  ;;  %v6731_v56 = vrot.slane %v21927_v27, 7  ;;  %v21982_v21 = vsel %vm6675_vm0, %v21905_v41, %v6691_v31  ;;  %v6733_v23 = vrot.slane %v21930_v38, 7  ;;  %v16203_v55 = vld [vmem:[%s24912_s7 + $0x4ac] sm:$0xf0] }
 0x682   :  { %v6735_v4 = vrot.slane %v21933_v44, 7  ;;  %v6737_v13 = vrot.slane %v21936_v20, 7  ;;  %6773 = vst [vmem:[#allocation2] sm:$0xfe] %v6725_v26  ;;  %v22002_v48 = vsel %vm6676_vm2, %v21907_v61, %v6692_v37  ;;  %vm25072_vm7 = vcmask 1040384  }
 0x683   :  { %v22005_v34 = vsel %vm25072_vm7, %v6725_v26, %v6729_v19  ;;  %v6738_v16 = vrot.slane %v21939_v7, 7  ;;  %v6739_v36 = vrot.slane %v21942_v0, 7  ;;  %6774 = vst [vmem:[#allocation2 + $0x8] sm:$0xfe] %v6726_v57  ;;  %vm25073_vm8 = vmmov %vm25072_vm7  ;;  %v6740_v41 = vrot.slane %v21945_v33, 7 }
 0x684   :  { %v22013_v62 = vsel %vm25073_vm8, %v6726_v57, %v6731_v56  ;;  %vm25074_vm9 = vmmov %vm25072_vm7  ;;  %v6741_v61 = vrot.slane %v21948_v51, 7  ;;  %6775 = vst [vmem:[#allocation2 + $0x10] sm:$0xfe] %v6727_v43  ;;  %v6743_v32 = vrot.slane %v21951_v30, 7  ;;  %v6745_v22 = vrot.slane %v21982_v21, 7 }
 0x685   :  { %v22016_v2 = vsel %vm25074_vm9, %v6727_v43, %v6733_v23  ;;  %6776 = vst [vmem:[#allocation2 + $0x18] sm:$0xfe] %v6728_v46  ;;  %v13860_v17 = vor.u32 %v16211_v45, %v13859_v3  ;;  %v14116_v58 = vor.u32 %v16275_v25, %v14115_v35  ;;  %vm25075_vm11 = vmmov %vm25072_vm7  ;;  %v6747_v52 = vrot.slane %v22002_v48, 7  ;;  %v14083_v29 = vld [vmem:[%s24912_s7 + $0x6a0] sm:$0xf] }
 0x686   :  { %v22031_v49 = vsel %vm25075_vm11, %v6728_v46, %v6735_v4  ;;  %6777 = vst [vmem:[#allocation2 + $0x20] sm:$0xff] %v22005_v34  ;;  %v14244_v15 = vor.u32 %v16307_v5, %v14243_v24  ;;  %v13972_v39 = vor.u32 %v16239_v14, %v13971_v10  ;;  %v13844_v40 = vor.u32 %v16207_v63, %v13843_v59  ;;  %v16267_v31 = vld [vmem:[%s24912_s7 + $0x6ac] sm:$0xf0]  ;;  %v14211_v37 = vld [vmem:[%s24912_s7 + $0x7a0] sm:$0xf]  ;;  %vm25076_vm12 = vmmov %vm25072_vm7 }
 0x687   :  { %6778 = vst [vmem:[#allocation2 + $0x28] sm:$0xff] %v22013_v62  ;;  %7822 = vmatpush.bf16.msra.mxu1 %v13860_v17  ;;  %7860 = vmatpush.bf16.msra.mxu0 %v14116_v58  ;;  %v14100_v18 = vor.u32 %v16271_v8, %v14099_v9  ;;  %v6990_v6 = vrot.slane %v22005_v34, 1  ;;  %v14228_v42 = vor.u32 %v16303_v60, %v14227_v1  ;;  %v6993_v50 = vrot.slane %v22013_v62, 1  ;;  %v16299_v12 = vld [vmem:[%s24912_s7 + $0x7ac] sm:$0xf0]  ;;  %vm25077_vm13 = vmmov %vm25072_vm7 }
 0x688   :  { %6779 = vst [vmem:[#allocation2 + $0x30] sm:$0xff] %v22016_v2  ;;  %7879 = vmatpush.bf16.msra.mxu2 %v14244_v15  ;;  %7842 = vmatpush.bf16.msra.mxu3 %v13972_v39  ;;  %v13956_v11 = vor.u32 %v16235_v28, %v13955_v54  ;;  %v13939_v47 = vld [vmem:[%s24912_s7 + $0x580] sm:$0xf]  ;;  %v6996_v27 = vrot.slane %v22016_v2, 1  ;;  %v16231_v38 = vld [vmem:[%s24912_s7 + $0x58c] sm:$0xf0]  ;;  %v13828_v57 = vor.u32 %v16203_v55, %v13827_v53  ;;  %vm25086_vm0 = vmmov %vm25072_vm7 }
 0x689   :  { %6780 = vst [vmem:[#allocation2 + $0x38] sm:$0xff] %v22031_v49  ;;  %v13811_v26 = vld [vmem:[%s24912_s7 + $0x480] sm:$0xf]  ;;  %v14084_v3 = vor.u32 %v16267_v31, %v14083_v29  ;;  %v16199_v45 = vld [vmem:[%s24912_s7 + $0x48c] sm:$0xf0]  ;;  %v14212_v25 = vor.u32 %v16299_v12, %v14211_v37  ;;  %v13940_v43 = vor.u32 %v16231_v38, %v13939_v47  ;;  %v6999_v30 = vrot.slane %v22031_v49, 1  ;;  %vm25087_vm2 = vmmov %vm25086_vm0 }
 0x68a   :  { %6781 = vst [vmem:[#allocation2 + $0x40] sm:$0x1] %v6729_v19  ;;  %v14067_v35 = vld [vmem:[%s24912_s7 + $0x680] sm:$0xf]  ;;  %v16263_v46 = vld [vmem:[%s24912_s7 + $0x68c] sm:$0xf0]  ;;  %v13812_v10 = vor.u32 %v16199_v45, %v13811_v26 }
 0x68b   :  { %6782 = vst [vmem:[#allocation2 + $0x48] sm:$0x1] %v6731_v56  ;;  %7823 = vmatpush.bf16.msra.mxu1 %v13844_v40  ;;  %7861 = vmatpush.bf16.msra.mxu0 %v14100_v18  ;;  %v14195_v19 = vld [vmem:[%s24912_s7 + $0x780] sm:$0xf]  ;;  %v16295_v56 = vld [vmem:[%s24912_s7 + $0x78c] sm:$0xf0]  ;;  %v14068_v14 = vor.u32 %v16263_v46, %v14067_v35 }
 0x68c   :  { %6783 = vst [vmem:[#allocation2 + $0x50] sm:$0x1] %v6733_v23  ;;  %7880 = vmatpush.bf16.msra.mxu2 %v14228_v42  ;;  %7843 = vmatpush.bf16.msra.mxu3 %v13956_v11  ;;  %v13923_v24 = vld [vmem:[%s24912_s7 + $0x560] sm:$0xf]  ;;  %v16227_v5 = vld [vmem:[%s24912_s7 + $0x56c] sm:$0xf0]  ;;  %v14196_v59 = vor.u32 %v16295_v56, %v14195_v19 }
 0x68d   :  { %6784 = vst [vmem:[#allocation2 + $0x58] sm:$0x1] %v6735_v4  ;;  %v13795_v44 = vld [vmem:[%s24912_s7 + $0x460] sm:$0xf]  ;;  %v16195_v23 = vld [vmem:[%s24912_s7 + $0x46c] sm:$0xf0]  ;;  %v13924_v63 = vor.u32 %v16227_v5, %v13923_v24 }
 0x68e   :  { %6785 = vst [vmem:[#allocation2 + $0x60] sm:$0xfe] %v6737_v13  ;;  %v14051_v4 = vld [vmem:[%s24912_s7 + $0x660] sm:$0xf]  ;;  %v16259_v9 = vld [vmem:[%s24912_s7 + $0x66c] sm:$0xf0]  ;;  %v13796_v54 = vor.u32 %v16195_v23, %v13795_v44  ;;  %v22224_v23 = vsel %vm25077_vm13, %v6738_v16, %v6743_v32 }
 0x68f   :  { %6786 = vst [vmem:[#allocation2 + $0x68] sm:$0xfe] %v6738_v16  ;;  %7824 = vmatpush.bf16.msra.mxu1 %v13828_v57  ;;  %7862 = vmatpush.bf16.msra.mxu0 %v14084_v3  ;;  %v14179_v8 = vld [vmem:[%s24912_s7 + $0x760] sm:$0xf]  ;;  %v16291_v1 = vld [vmem:[%s24912_s7 + $0x76c] sm:$0xf0]  ;;  %v14052_v15 = vor.u32 %v16259_v9, %v14051_v4 }
 0x690   :  { %6787 = vst [vmem:[#allocation2 + $0x70] sm:$0xfe] %v6739_v36  ;;  %7881 = vmatpush.bf16.msra.mxu2 %v14212_v25  ;;  %7844 = vmatpush.bf16.msra.mxu3 %v13940_v43  ;;  %v13907_v60 = vld [vmem:[%s24912_s7 + $0x540] sm:$0xf]  ;;  %v16223_v17 = vld [vmem:[%s24912_s7 + $0x54c] sm:$0xf0]  ;;  %v14180_v53 = vor.u32 %v16291_v1, %v14179_v8 }
 0x691   :  { %6788 = vst [vmem:[#allocation2 + $0x78] sm:$0xfe] %v6740_v41  ;;  %v13779_v58 = vld [vmem:[%s24912_s7 + $0x440] sm:$0xf]  ;;  %v16191_v39 = vld [vmem:[%s24912_s7 + $0x44c] sm:$0xf0]  ;;  %v13908_v40 = vor.u32 %v16223_v17, %v13907_v60 }
 0x692   :  { %6793 = vst [vmem:[#allocation2 + $0xa0] sm:$0x1] %v6741_v61  ;;  %v14035_v28 = vld [vmem:[%s24912_s7 + $0x640] sm:$0xf]  ;;  %v16255_v18 = vld [vmem:[%s24912_s7 + $0x64c] sm:$0xf0]  ;;  %v13780_v12 = vor.u32 %v16191_v39, %v13779_v58 }
 0x693   :  { %6794 = vst [vmem:[#allocation2 + $0xa8] sm:$0x1] %v6743_v32  ;;  %7825 = vmatpush.bf16.msra.mxu1 %v13812_v10  ;;  %7863 = vmatpush.bf16.msra.mxu0 %v14068_v14  ;;  %v14163_v55 = vld [vmem:[%s24912_s7 + $0x740] sm:$0xf]  ;;  %v16287_v29 = vld [vmem:[%s24912_s7 + $0x74c] sm:$0xf0]  ;;  %v14036_v47 = vor.u32 %v16255_v18, %v14035_v28  ;;  %v22217_v14 = vsel %vm25076_vm12, %v6737_v13, %v6741_v61 }
 0x694   :  { %6795 = vst [vmem:[#allocation2 + $0xb0] sm:$0x1] %v6745_v22  ;;  %7882 = vmatpush.bf16.msra.mxu2 %v14196_v59  ;;  %7845 = vmatpush.bf16.msra.mxu3 %v13924_v63  ;;  %v13891_v42 = vld [vmem:[%s24912_s7 + $0x520] sm:$0xf]  ;;  %v16219_v11 = vld [vmem:[%s24912_s7 + $0x52c] sm:$0xf0]  ;;  %v14164_v3 = vor.u32 %v16287_v29, %v14163_v55 }
 0x695   :  { %6796 = vst [vmem:[#allocation2 + $0xb8] sm:$0x1] %v6747_v52  ;;  %v13763_v31 = vld [vmem:[%s24912_s7 + $0x420] sm:$0xf]  ;;  %v16187_v37 = vld [vmem:[%s24912_s7 + $0x42c] sm:$0xf0]  ;;  %v13892_v45 = vor.u32 %v16219_v11, %v13891_v42 }
 0x696   :  { %v14019_v38 = vld [vmem:[%s24912_s7 + $0x620] sm:$0xf]  ;;  %v16251_v26 = vld [vmem:[%s24912_s7 + $0x62c] sm:$0xf0]  ;;  %v13764_v24 = vor.u32 %v16187_v37, %v13763_v31  ;;  %v6950_v51 = vld [vmem:[#allocation2 + $0x8] sm:$0xfe] }
 0x697   :  { %7826 = vmatpush.bf16.msra.mxu1 %v13796_v54  ;;  %7864 = vmatpush.bf16.msra.mxu0 %v14052_v15  ;;  %v14147_v57 = vld [vmem:[%s24912_s7 + $0x720] sm:$0xf]  ;;  %v16283_v35 = vld [vmem:[%s24912_s7 + $0x72c] sm:$0xf0]  ;;  %v14020_v4 = vor.u32 %v16251_v26, %v14019_v38  ;;  %v6954_v61 = vld [vmem:[#allocation2 + $0x48] sm:$0x1] }
 0x698   :  { %7883 = vmatpush.bf16.msra.mxu2 %v14180_v53  ;;  %7846 = vmatpush.bf16.msra.mxu3 %v13908_v40  ;;  %v13875_v25 = vld [vmem:[%s24912_s7 + $0x500] sm:$0xf]  ;;  %v16215_v43 = vld [vmem:[%s24912_s7 + $0x50c] sm:$0xf0]  ;;  %v14148_v59 = vor.u32 %v16283_v35, %v14147_v57  ;;  %v6992_v1 = vrot.slane %v6950_v51, 1  ;;  %v7003_v32 = vrot.slane %v6954_v61, 1 }
 0x699   :  { %v22185_v46 = vld [vmem:[%s24912_s7 + $0x400] sm:$0xf]  ;;  %v22190_v19 = vld [vmem:[%s24912_s7 + $0x40c] sm:$0xf0]  ;;  %v13876_v63 = vor.u32 %v16215_v43, %v13875_v25  ;;  %6789 = vst [vmem:[#allocation2 + $0x80] sm:$0xff] %v22217_v14  ;;  %vm25078_vm14 = vcmask 1046528  }
 0x69a   :  { %v22195_v56 = vld [vmem:[%s24912_s7 + $0x600] sm:$0xf]  ;;  %v22200_v5 = vld [vmem:[%s24912_s7 + $0x60c] sm:$0xf0]  ;;  %v13748_v7 = vor.u32 %v22190_v19, %v22185_v46  ;;  %vm25079_vm15 = vmmov %vm25078_vm14  ;;  %6790 = vst [vmem:[#allocation2 + $0x88] sm:$0xff] %v22224_v23 }
 0x69b   :  { %v22205_v44 = vld [vmem:[%s24912_s7 + $0x700] sm:$0xf]  ;;  %v22210_v10 = vld [vmem:[%s24912_s7 + $0x70c] sm:$0xf0]  ;;  %7827 = vmatpush.bf16.msra.mxu1 %v13780_v12  ;;  %7865 = vmatpush.bf16.msra.mxu0 %v14036_v47  ;;  %v14004_v16 = vor.u32 %v22200_v5, %v22195_v56  ;;  %v6994_v49 = vsel %vm25079_vm15, %v6992_v1, %v6993_v50  ;;  %v6952_v39 = vld [vmem:[#allocation2 + $0x18] sm:$0xfe] }
 0x69c   :  { %v6949_v9 = vld [vmem:[#allocation2] sm:$0xfe]  ;;  %v6953_v8 = vld [vmem:[#allocation2 + $0x40] sm:$0x1]  ;;  %7884 = vmatpush.bf16.msra.mxu2 %v14164_v3  ;;  %7847 = vmatpush.bf16.msra.mxu3 %v13892_v45  ;;  %v6951_v60 = vld [vmem:[#allocation2 + $0x10] sm:$0xfe]  ;;  %v14132_v58 = vor.u32 %v22210_v10, %v22205_v44 }
 0x69d   :  { %v6989_v20 = vrot.slane %v6949_v9, 1  ;;  %v7001_v13 = vrot.slane %v6953_v8, 1  ;;  %v6955_v17 = vld [vmem:[#allocation2 + $0x50] sm:$0x1]  ;;  %v6995_v15 = vrot.slane %v6951_v60, 1  ;;  %vm25080_vm1 = vmmov %vm25078_vm14  ;;  %v6998_v55 = vrot.slane %v6952_v39, 1 }
 0x69e   :  { %v6956_v28 = vld [vmem:[#allocation2 + $0x58] sm:$0x1]  ;;  %vm25081_vm3 = vmmov %vm25080_vm1  ;;  %v7005_v18 = vrot.slane %v6955_v17, 1  ;;  %v16241_v29 = vld [vmem:[%s24912_s7 + $0x5e4] sm:$0xf] }
 0x69f   :  { %v6991_v54 = vsel %vm25078_vm14, %v6989_v20, %v6990_v6  ;;  %7828 = vmatpush.bf16.msra.mxu1 %v13764_v24  ;;  %7866 = vmatpush.bf16.msra.mxu0 %v14020_v4  ;;  %v7002_v53 = vsel %vm25080_vm1, %v6990_v6, %v7001_v13  ;;  %v7004_v40 = vsel %vm25081_vm3, %v6993_v50, %v7003_v32  ;;  %v13989_v42 = vld [vmem:[%s24912_s7 + $0x5f0] sm:$0xf0]  ;;  %vm25082_vm4 = vmmov %vm25080_vm1  ;;  %v7007_v62 = vrot.slane %v6956_v28, 1  ;;  %v16209_v50 = vld [vmem:[%s24912_s7 + $0x4e4] sm:$0xf] }
 0x6a0   :  { %7885 = vmatpush.bf16.msra.mxu2 %v14148_v59  ;;  %7848 = vmatpush.bf16.msra.mxu3 %v13876_v63  ;;  %v22253_v11 = vpack.c.bf16 %v7004_v40, %v6994_v49  ;;  %v6997_v34 = vsel %vm25082_vm4, %v6995_v15, %v6996_v27  ;;  %v13992_v6 = vor.u32 %v16241_v29, %v13989_v42  ;;  %v13861_v31 = vld [vmem:[%s24912_s7 + $0x4f0] sm:$0xf0]  ;;  %vm25083_vm5 = vmmov %vm25080_vm1  ;;  %v16273_v38 = vld [vmem:[%s24912_s7 + $0x6e4] sm:$0xf] }
 0x6a1   :  { %v7006_v37 = vsel %vm25083_vm5, %v6996_v27, %v7005_v18  ;;  %vm25084_vm6 = vmmov %vm25080_vm1  ;;  %v13864_v47 = vor.u32 %v16209_v50, %v13861_v31  ;;  %v14117_v26 = vld [vmem:[%s24912_s7 + $0x6f0] sm:$0xf0]  ;;  %v16305_v57 = vld [vmem:[%s24912_s7 + $0x7e4] sm:$0xf]  ;;  %v22277_v3 = vpack.c.bf16 %v7002_v53, %v6991_v54  ;;  %v6748_v28 = vsel %vm25087_vm2, %v6740_v41, %v6747_v52 }
 0x6a2   :  { %v7000_v12 = vsel %vm25084_vm6, %v6998_v55, %v6999_v30  ;;  %v22279_v2 = vpack.c.bf16 %v7006_v37, %v6997_v34  ;;  %vm25085_vm10 = vmmov %vm25080_vm1  ;;  %v14120_v45 = vor.u32 %v16273_v38, %v14117_v26  ;;  %v14245_v35 = vld [vmem:[%s24912_s7 + $0x7f0] sm:$0xf0]  ;;  %v16237_v25 = vld [vmem:[%s24912_s7 + $0x5c4] sm:$0xf]  ;;  %v7013_v41 = vrot.slane %v22224_v23, 1  ;;  %6792 = vst [vmem:[#allocation2 + $0x98] sm:$0xff] %v6748_v28 }
 0x6a3   :  { %v7008_v27 = vsel %vm25085_vm10, %v6999_v30, %v7007_v62  ;;  %v13973_v43 = vld [vmem:[%s24912_s7 + $0x5d0] sm:$0xf0]  ;;  %7829 = vmatpush.bf16.msra.mxu1 %v13748_v7  ;;  %7867 = vmatpush.bf16.msra.mxu0 %v14004_v16  ;;  %v16205_v56 = vld [vmem:[%s24912_s7 + $0x4c4] sm:$0xf]  ;;  %v14248_v44 = vor.u32 %v16305_v57, %v14245_v35  ;;  %v6958_v42 = vld [vmem:[#allocation2 + $0x68] sm:$0xfe] }
 0x6a4   :  { %7917 = vmatpush.bf16.msrb.mxu3 %v13992_v6  ;;  %v22291_v46 = vpack.c.bf16 %v7008_v27, %v7000_v12  ;;  %v13976_v19 = vor.u32 %v16237_v25, %v13973_v43  ;;  %v13845_v24 = vld [vmem:[%s24912_s7 + $0x4d0] sm:$0xf0]  ;;  %v16269_v5 = vld [vmem:[%s24912_s7 + $0x6c4] sm:$0xf]  ;;  %7886 = vmatpush.bf16.msra.mxu2 %v14132_v58  ;;  %v6746_v58 = vsel %vm25086_vm0, %v6739_v36, %v6745_v22  ;;  %v6961_v22 = vld [vmem:[#allocation2 + $0xa0] sm:$0x1] }
 0x6a5   :  { %7849 = vmatmul.bf16.vlgmr.msra.gmra.mxu3 %v22253_v11  ;;  %v14101_v10 = vld [vmem:[%s24912_s7 + $0x6d0] sm:$0xf0]  ;;  %v16301_v4 = vld [vmem:[%s24912_s7 + $0x7c4] sm:$0xf]  ;;  %v13848_v63 = vor.u32 %v16205_v56, %v13845_v24  ;;  %v7021_v29 = vrot.slane %v6961_v22, 1  ;;  %6791 = vst [vmem:[#allocation2 + $0x90] sm:$0xff] %v6746_v58  ;;  %vm25088_vm7 = vmmov %vm25080_vm1 }
 0x6a6   :  { %v14229_v59 = vld [vmem:[%s24912_s7 + $0x7d0] sm:$0xf0]  ;;  %v14104_v9 = vor.u32 %v16269_v5, %v14101_v10  ;;  %v16233_v8 = vld [vmem:[%s24912_s7 + $0x5a4] sm:$0xf]  ;;  %7830 = vmatmul.bf16.vlgmr.msra.gmra.mxu1 %v22277_v3  ;;  %7868 = vmatmul.bf16.vlgmr.msra.gmra.mxu0 %v22279_v2  ;;  %v6962_v33 = vld [vmem:[#allocation2 + $0xa8] sm:$0x1] }
 0x6a7   :  { %7898 = vmatpush.bf16.msrb.mxu1 %v13864_v47  ;;  %7936 = vmatpush.bf16.msrb.mxu0 %v14120_v45  ;;  %v13957_v51 = vld [vmem:[%s24912_s7 + $0x5b0] sm:$0xf0]  ;;  %v16201_v20 = vld [vmem:[%s24912_s7 + $0x4a4] sm:$0xf]  ;;  %v14232_v16 = vor.u32 %v16301_v4, %v14229_v59  ;;  %v7012_v62 = vrot.slane %v6958_v42, 1  ;;  %v7010_v50 = vrot.slane %v22217_v14, 1  ;;  %vm25089_vm8 = vmmov %vm25080_vm1 }
 0x6a8   :  { %v13829_v13 = vld [vmem:[%s24912_s7 + $0x4b0] sm:$0xf0]  ;;  %v16265_v61 = vld [vmem:[%s24912_s7 + $0x6a4] sm:$0xf]  ;;  %7887 = vmatmul.bf16.vlgmr.msra.gmra.mxu2 %v22291_v46  ;;  %7918 = vmatpush.bf16.msrb.mxu3 %v13976_v19  ;;  %v13960_v30 = vor.u32 %v16233_v8, %v13957_v51  ;;  %v7023_v31 = vrot.slane %v6962_v33, 1  ;;  %v7016_v38 = vrot.slane %v6746_v58, 1  ;;  %vm25090_vm9 = vmmov %vm25080_vm1 }
 0x6a9   :  { %v14085_v1 = vld [vmem:[%s24912_s7 + $0x6b0] sm:$0xf0]  ;;  %v16297_v7 = vld [vmem:[%s24912_s7 + $0x7a4] sm:$0xf]  ;;  %7955 = vmatpush.bf16.msrb.mxu2 %v14248_v44  ;;  %v13832_v54 = vor.u32 %v16201_v20, %v13829_v13  ;;  %v6963_v37 = vld [vmem:[#allocation2 + $0xb0] sm:$0x1]  ;;  %v7014_v47 = vsel %vm25088_vm7, %v7012_v62, %v7013_v41 }
 0x6aa   :  { %v14213_v32 = vld [vmem:[%s24912_s7 + $0x7b0] sm:$0xf0]  ;;  %v16229_v60 = vld [vmem:[%s24912_s7 + $0x584] sm:$0xf]  ;;  %v14088_v49 = vor.u32 %v16265_v61, %v14085_v1  ;;  %v7025_v26 = vrot.slane %v6963_v37, 1  ;;  %v7024_v45 = vsel %vm25089_vm8, %v7013_v41, %v7023_v31  ;;  %v7019_v35 = vrot.slane %v6748_v28, 1  ;;  %vm25091_vm11 = vmmov %vm25080_vm1 }
 0x6ab   :  { %v13941_v17 = vld [vmem:[%s24912_s7 + $0x590] sm:$0xf0]  ;;  %7899 = vmatpush.bf16.msrb.mxu1 %v13848_v63  ;;  %7937 = vmatpush.bf16.msrb.mxu0 %v14104_v9  ;;  %v16197_v15 = vld [vmem:[%s24912_s7 + $0x484] sm:$0xf]  ;;  %v14216_v48 = vor.u32 %v16297_v7, %v14213_v32  ;;  %v6960_v57 = vld [vmem:[#allocation2 + $0x78] sm:$0xfe]  ;;  %v7022_v56 = vsel %vm25091_vm11, %v7010_v50, %v7021_v29  ;;  %v22391_v10 = vpack.c.bf16 %v7024_v45, %v7014_v47 }
 0x6ac   :  { %v13813_v39 = vld [vmem:[%s24912_s7 + $0x490] sm:$0xf0]  ;;  %v16261_v21 = vld [vmem:[%s24912_s7 + $0x684] sm:$0xf]  ;;  %7919 = vmatpush.bf16.msrb.mxu3 %v13960_v30  ;;  %v13944_v53 = vor.u32 %v16229_v60, %v13941_v17  ;;  %v6964_v27 = vld [vmem:[#allocation2 + $0xb8] sm:$0x1] }
 0x6ad   :  { %v14069_v0 = vld [vmem:[%s24912_s7 + $0x690] sm:$0xf0]  ;;  %v6957_v36 = vld [vmem:[#allocation2 + $0x60] sm:$0xfe]  ;;  %7956 = vmatpush.bf16.msrb.mxu2 %v14232_v16  ;;  %v13816_v34 = vor.u32 %v16197_v15, %v13813_v39  ;;  %v7018_v23 = vrot.slane %v6960_v57, 1  ;;  %v7027_v25 = vrot.slane %v6964_v27, 1  ;;  %vm25092_vm12 = vmmov %vm25080_vm1 }
 0x6ae   :  { %v16293_v40 = vld [vmem:[%s24912_s7 + $0x784] sm:$0xf]  ;;  %v14197_v18 = vld [vmem:[%s24912_s7 + $0x790] sm:$0xf0]  ;;  %v7009_v55 = vrot.slane %v6957_v36, 1  ;;  %v14072_v6 = vor.u32 %v16261_v21, %v14069_v0  ;;  %vm25093_vm13 = vmmov %vm25080_vm1 }
 0x6af   :  { %v6959_v52 = vld [vmem:[#allocation2 + $0x70] sm:$0xfe]  ;;  %7900 = vmatpush.bf16.msrb.mxu1 %v13832_v54  ;;  %7938 = vmatpush.bf16.msrb.mxu0 %v14088_v49  ;;  %v16225_v14 = vld [vmem:[%s24912_s7 + $0x564] sm:$0xf]  ;;  %v14200_v43 = vor.u32 %v16293_v40, %v14197_v18  ;;  %v7026_v59 = vsel %vm25093_vm13, %v7016_v38, %v7025_v26  ;;  %vm25094_vm14 = vmmov %vm25080_vm1 }
 0x6b0   :  { %v7015_v12 = vrot.slane %v6959_v52, 1  ;;  %7920 = vmatpush.bf16.msrb.mxu3 %v13944_v53  ;;  %v7011_v19 = vsel %vm25090_vm9, %v7009_v55, %v7010_v50  ;;  %v13925_v24 = vld [vmem:[%s24912_s7 + $0x570] sm:$0xf0]  ;;  %v16193_v5 = vld [vmem:[%s24912_s7 + $0x464] sm:$0xf]  ;;  %v7020_v51 = vsel %vm25094_vm14, %v7018_v23, %v7019_v35  ;;  %vm25095_vm15 = vmmov %vm25080_vm1  ;;  %vm25096_vm1 = vcmask 1045504  }
 0x6b1   :  { %7957 = vmatpush.bf16.msrb.mxu2 %v14216_v48  ;;  %v13797_v44 = vld [vmem:[%s24912_s7 + $0x470] sm:$0xf0]  ;;  %v16257_v63 = vld [vmem:[%s24912_s7 + $0x664] sm:$0xf]  ;;  %v7028_v20 = vsel %vm25095_vm15, %v7019_v35, %v7027_v25  ;;  %v13928_v13 = vor.u32 %v16225_v14, %v13925_v24  ;;  %v22421_v17 = vpack.c.bf16 %v7022_v56, %v7011_v19  ;;  %v13995_v37 = vld [vmem:[%s24912_s7 + $0x5e8] sm:$0xf] }
 0x6b2   :  { %v7017_v4 = vsel %vm25092_vm12, %v7015_v12, %v7016_v38  ;;  %v14053_v9 = vld [vmem:[%s24912_s7 + $0x670] sm:$0xf0]  ;;  %v16289_v8 = vld [vmem:[%s24912_s7 + $0x764] sm:$0xf]  ;;  %v13800_v61 = vor.u32 %v16193_v5, %v13797_v44  ;;  %v22432_v39 = vpack.c.bf16 %v7028_v20, %v7020_v51  ;;  %v16244_v47 = vld [vmem:[%s24912_s7 + $0x5f4] sm:$0xf0] }
 0x6b3   :  { %7901 = vmatpush.bf16.msrb.mxu1 %v13816_v34  ;;  %7939 = vmatpush.bf16.msrb.mxu0 %v14072_v6  ;;  %v14181_v1 = vld [vmem:[%s24912_s7 + $0x770] sm:$0xf0]  ;;  %v16221_v30 = vld [vmem:[%s24912_s7 + $0x544] sm:$0xf]  ;;  %v14056_v16 = vor.u32 %v16257_v63, %v14053_v9  ;;  %v22424_v58 = vpack.c.bf16 %v7026_v59, %v7017_v4  ;;  %v13867_v38 = vld [vmem:[%s24912_s7 + $0x4e8] sm:$0xf]  ;;  %v13996_v19 = vor.u32 %v16244_v47, %v13995_v37 }
 0x6b4   :  { %v13909_v7 = vld [vmem:[%s24912_s7 + $0x550] sm:$0xf0]  ;;  %v16189_v32 = vld [vmem:[%s24912_s7 + $0x444] sm:$0xf]  ;;  %v14184_v54 = vor.u32 %v16289_v8, %v14181_v1  ;;  %7921 = vmatpush.bf16.msrb.mxu3 %v13928_v13  ;;  %v16212_v26 = vld [vmem:[%s24912_s7 + $0x4f4] sm:$0xf0] }
 0x6b5   :  { %v13781_v60 = vld [vmem:[%s24912_s7 + $0x450] sm:$0xf0]  ;;  %7958 = vmatpush.bf16.msrb.mxu2 %v14200_v43  ;;  %7854 = vmatmul.bf16.gmra.mxu3 %v22391_v10  ;;  %v16253_v49 = vld [vmem:[%s24912_s7 + $0x644] sm:$0xf]  ;;  %v13912_v21 = vor.u32 %v16221_v30, %v13909_v7  ;;  %v14123_v43 = vld [vmem:[%s24912_s7 + $0x6e8] sm:$0xf]  ;;  %v13868_v56 = vor.u32 %v16212_v26, %v13867_v38 }
 0x6b6   :  { %v14037_v15 = vld [vmem:[%s24912_s7 + $0x650] sm:$0xf0]  ;;  %v13784_v0 = vor.u32 %v16189_v32, %v13781_v60  ;;  %v16285_v36 = vld [vmem:[%s24912_s7 + $0x744] sm:$0xf]  ;;  %7835 = vmatmul.bf16.gmra.mxu1 %v22421_v17  ;;  %7873 = vmatmul.bf16.gmra.mxu0 %v22424_v58  ;;  %v16276_v24 = vld [vmem:[%s24912_s7 + $0x6f4] sm:$0xf0] }
 0x6b7   :  { %7902 = vmatpush.bf16.msrb.mxu1 %v13800_v61  ;;  %v14165_v22 = vld [vmem:[%s24912_s7 + $0x750] sm:$0xf0]  ;;  %v16217_v28 = vld [vmem:[%s24912_s7 + $0x524] sm:$0xf]  ;;  %7940 = vmatpush.bf16.msrb.mxu0 %v14056_v16  ;;  %v14040_v55 = vor.u32 %v16253_v49, %v14037_v15  ;;  %v14251_v5 = vld [vmem:[%s24912_s7 + $0x7e8] sm:$0xf]  ;;  %v14124_v8 = vor.u32 %v16276_v24, %v14123_v43 }
 0x6b8   :  { %v13893_v53 = vld [vmem:[%s24912_s7 + $0x530] sm:$0xf0]  ;;  %v16185_v40 = vld [vmem:[%s24912_s7 + $0x424] sm:$0xf]  ;;  %7892 = vmatmul.bf16.gmra.mxu2 %v22432_v39  ;;  %v14168_v29 = vor.u32 %v16285_v36, %v14165_v22  ;;  %7922 = vmatpush.bf16.msrb.mxu3 %v13912_v21  ;;  %v16308_v44 = vld [vmem:[%s24912_s7 + $0x7f4] sm:$0xf0] }
 0x6b9   :  { %v13765_v18 = vld [vmem:[%s24912_s7 + $0x430] sm:$0xf0]  ;;  %7959 = vmatpush.bf16.msrb.mxu2 %v14184_v54  ;;  %v16249_v42 = vld [vmem:[%s24912_s7 + $0x624] sm:$0xf]  ;;  %v13896_v33 = vor.u32 %v16217_v28, %v13893_v53  ;;  %v13979_v63 = vld [vmem:[%s24912_s7 + $0x5c8] sm:$0xf]  ;;  %v14252_v51 = vor.u32 %v16308_v44, %v14251_v5 }
 0x6ba   :  { %v14021_v48 = vld [vmem:[%s24912_s7 + $0x630] sm:$0xf0]  ;;  %v16281_v34 = vld [vmem:[%s24912_s7 + $0x724] sm:$0xf]  ;;  %v13768_v62 = vor.u32 %v16185_v40, %v13765_v18  ;;  %v16240_v9 = vld [vmem:[%s24912_s7 + $0x5d4] sm:$0xf0] }
 0x6bb   :  { %7903 = vmatpush.bf16.msrb.mxu1 %v13784_v0  ;;  %v14149_v41 = vld [vmem:[%s24912_s7 + $0x730] sm:$0xf0]  ;;  %v16213_v52 = vld [vmem:[%s24912_s7 + $0x504] sm:$0xf]  ;;  %7941 = vmatpush.bf16.msrb.mxu0 %v14040_v55  ;;  %v14024_v12 = vor.u32 %v16249_v42, %v14021_v48  ;;  %v13851_v20 = vld [vmem:[%s24912_s7 + $0x4c8] sm:$0xf]  ;;  %v13980_v16 = vor.u32 %v16240_v9, %v13979_v63 }
 0x6bc   :  { %v13877_v6 = vld [vmem:[%s24912_s7 + $0x510] sm:$0xf0]  ;;  %v16181_v50 = vld [vmem:[%s24912_s7 + $0x404] sm:$0xf]  ;;  %v14152_v57 = vor.u32 %v16281_v34, %v14149_v41  ;;  %7923 = vmatpush.bf16.msrb.mxu3 %v13896_v33  ;;  %v16208_v13 = vld [vmem:[%s24912_s7 + $0x4d4] sm:$0xf0] }
 0x6bd   :  { %v13749_v31 = vld [vmem:[%s24912_s7 + $0x410] sm:$0xf0]  ;;  %7960 = vmatpush.bf16.msrb.mxu2 %v14168_v29  ;;  %v16245_v27 = vld [vmem:[%s24912_s7 + $0x604] sm:$0xf]  ;;  %v13880_v23 = vor.u32 %v16213_v52, %v13877_v6  ;;  %v14107_v61 = vld [vmem:[%s24912_s7 + $0x6c8] sm:$0xf]  ;;  %v13852_v32 = vor.u32 %v16208_v13, %v13851_v20 }
 0x6be   :  { %v14005_v45 = vld [vmem:[%s24912_s7 + $0x610] sm:$0xf0]  ;;  %v13752_v35 = vor.u32 %v16181_v50, %v13749_v31  ;;  %v16277_v25 = vld [vmem:[%s24912_s7 + $0x704] sm:$0xf]  ;;  %v16272_v1 = vld [vmem:[%s24912_s7 + $0x6d4] sm:$0xf0] }
 0x6bf   :  { %7904 = vmatpush.bf16.msrb.mxu1 %v13768_v62  ;;  %v14133_v14 = vld [vmem:[%s24912_s7 + $0x710] sm:$0xf0]  ;;  %7942 = vmatpush.bf16.msrb.mxu0 %v14024_v12  ;;  %v14008_v4 = vor.u32 %v16245_v27, %v14005_v45  ;;  %v14235_v30 = vld [vmem:[%s24912_s7 + $0x7c8] sm:$0xf]  ;;  %v16304_v7 = vld [vmem:[%s24912_s7 + $0x7d4] sm:$0xf0]  ;;  %v14108_v49 = vor.u32 %v16272_v1, %v14107_v61 }
 0x6c0   :  { %v14136_v59 = vor.u32 %v16277_v25, %v14133_v14  ;;  %7924 = vmatpush.bf16.msrb.mxu3 %v13880_v23  ;;  %v13963_v60 = vld [vmem:[%s24912_s7 + $0x5a8] sm:$0xf]  ;;  %v16236_v54 = vld [vmem:[%s24912_s7 + $0x5b4] sm:$0xf0]  ;;  %v14236_v15 = vor.u32 %v16304_v7, %v14235_v30  ;;  %vm25097_vm3 = vmmov %vm25096_vm1 }
 0x6c1   :  { %7961 = vmatpush.bf16.msrb.mxu2 %v14152_v57  ;;  %v13835_v21 = vld [vmem:[%s24912_s7 + $0x4a8] sm:$0xf]  ;;  %v16204_v0 = vld [vmem:[%s24912_s7 + $0x4b4] sm:$0xf0]  ;;  %v13964_v40 = vor.u32 %v16236_v54, %v13963_v60  ;;  %vm25098_vm4 = vmmov %vm25096_vm1 }
 0x6c2   :  { %v14091_v36 = vld [vmem:[%s24912_s7 + $0x6a8] sm:$0xf]  ;;  %v16268_v22 = vld [vmem:[%s24912_s7 + $0x6b4] sm:$0xf0]  ;;  %v13836_v18 = vor.u32 %v16204_v0, %v13835_v21  ;;  %vm25099_vm5 = vmmov %vm25096_vm1 }
 0x6c3   :  { %7905 = vmatpush.bf16.msrb.mxu1 %v13752_v35  ;;  %7943 = vmatpush.bf16.msrb.mxu0 %v14008_v4  ;;  %v14219_v28 = vld [vmem:[%s24912_s7 + $0x7a8] sm:$0xf]  ;;  %v16300_v53 = vld [vmem:[%s24912_s7 + $0x7b4] sm:$0xf0]  ;;  %v14092_v42 = vor.u32 %v16268_v22, %v14091_v36  ;;  %vm25100_vm6 = vmmov %vm25096_vm1 }
 0x6c4   :  { %7993 = vmatpush.bf16.msra.mxu3 %v13996_v19  ;;  %v13947_v55 = vld [vmem:[%s24912_s7 + $0x588] sm:$0xf]  ;;  %v16232_v29 = vld [vmem:[%s24912_s7 + $0x594] sm:$0xf0]  ;;  %v14220_v48 = vor.u32 %v16300_v53, %v14219_v28  ;;  %vm25101_vm10 = vmmov %vm25096_vm1 }
 0x6c5   :  { %7962 = vmatpush.bf16.msrb.mxu2 %v14136_v59  ;;  %7925 = vmatmul.bf16.vlgmr.msrb.gmra.mxu3 %v22253_v11  ;;  %v13819_v34 = vld [vmem:[%s24912_s7 + $0x488] sm:$0xf]  ;;  %v16200_v33 = vld [vmem:[%s24912_s7 + $0x494] sm:$0xf0]  ;;  %v13948_v50 = vor.u32 %v16232_v29, %v13947_v55  ;;  %v16242_v55 = vld [vmem:[%s24912_s7 + $0x5ec] sm:$0xf] }
 0x6c6   :  { %7906 = vmatmul.bf16.vlgmr.msrb.gmra.mxu1 %v22277_v3  ;;  %7944 = vmatmul.bf16.vlgmr.msrb.gmra.mxu0 %v22279_v2  ;;  %v14075_v62 = vld [vmem:[%s24912_s7 + $0x688] sm:$0xf]  ;;  %v16264_v41 = vld [vmem:[%s24912_s7 + $0x694] sm:$0xf0]  ;;  %v13820_v31 = vor.u32 %v16200_v33, %v13819_v34  ;;  %v13997_v29 = vld [vmem:[%s24912_s7 + $0x5f8] sm:$0xf0] }
 0x6c7   :  { %7974 = vmatpush.bf16.msra.mxu1 %v13868_v56  ;;  %8012 = vmatpush.bf16.msra.mxu0 %v14124_v8  ;;  %v14203_v52 = vld [vmem:[%s24912_s7 + $0x788] sm:$0xf]  ;;  %v16296_v6 = vld [vmem:[%s24912_s7 + $0x794] sm:$0xf0]  ;;  %v14076_v47 = vor.u32 %v16264_v41, %v14075_v62  ;;  %v16210_v34 = vld [vmem:[%s24912_s7 + $0x4ec] sm:$0xf] }
 0x6c8   :  { %7963 = vmatmul.bf16.vlgmr.msrb.gmra.mxu2 %v22291_v46  ;;  %7994 = vmatpush.bf16.msra.mxu3 %v13980_v16  ;;  %v13931_v37 = vld [vmem:[%s24912_s7 + $0x568] sm:$0xf]  ;;  %v16228_v12 = vld [vmem:[%s24912_s7 + $0x574] sm:$0xf0]  ;;  %v14204_v38 = vor.u32 %v16296_v6, %v14203_v52  ;;  %v13869_v62 = vld [vmem:[%s24912_s7 + $0x4f8] sm:$0xf0] }
 0x6c9   :  { %8031 = vmatpush.bf16.msra.mxu2 %v14252_v51  ;;  %v13803_v26 = vld [vmem:[%s24912_s7 + $0x468] sm:$0xf]  ;;  %v16196_v57 = vld [vmem:[%s24912_s7 + $0x474] sm:$0xf0]  ;;  %v13932_v25 = vor.u32 %v16228_v12, %v13931_v37  ;;  %v16274_v41 = vld [vmem:[%s24912_s7 + $0x6ec] sm:$0xf] }
 0x6ca   :  { %v14059_v27 = vld [vmem:[%s24912_s7 + $0x668] sm:$0xf]  ;;  %v16260_v45 = vld [vmem:[%s24912_s7 + $0x674] sm:$0xf0]  ;;  %v13804_v14 = vor.u32 %v16196_v57, %v13803_v26  ;;  %v14125_v52 = vld [vmem:[%s24912_s7 + $0x6f8] sm:$0xf0] }
 0x6cb   :  { %7975 = vmatpush.bf16.msra.mxu1 %v13852_v32  ;;  %8013 = vmatpush.bf16.msra.mxu0 %v14108_v49  ;;  %v14187_v23 = vld [vmem:[%s24912_s7 + $0x768] sm:$0xf]  ;;  %v16292_v35 = vld [vmem:[%s24912_s7 + $0x774] sm:$0xf0]  ;;  %v14060_v56 = vor.u32 %v16260_v45, %v14059_v27  ;;  %v14253_v37 = vld [vmem:[%s24912_s7 + $0x7f8] sm:$0xf0]  ;;  %v14128_v26 = vor.u32 %v16274_v41, %v14125_v52 }
 0x6cc   :  { %7995 = vmatpush.bf16.msra.mxu3 %v13964_v40  ;;  %v13915_v43 = vld [vmem:[%s24912_s7 + $0x548] sm:$0xf]  ;;  %v16224_v19 = vld [vmem:[%s24912_s7 + $0x554] sm:$0xf0]  ;;  %v14188_v24 = vor.u32 %v16292_v35, %v14187_v23  ;;  %v16238_v57 = vld [vmem:[%s24912_s7 + $0x5cc] sm:$0xf] }
 0x6cd   :  { %8032 = vmatpush.bf16.msra.mxu2 %v14236_v15  ;;  %v13787_v5 = vld [vmem:[%s24912_s7 + $0x448] sm:$0xf]  ;;  %v16192_v44 = vld [vmem:[%s24912_s7 + $0x454] sm:$0xf0]  ;;  %v13916_v8 = vor.u32 %v16224_v19, %v13915_v43  ;;  %v13981_v27 = vld [vmem:[%s24912_s7 + $0x5d8] sm:$0xf0] }
 0x6ce   :  { %v14043_v4 = vld [vmem:[%s24912_s7 + $0x648] sm:$0xf]  ;;  %v16256_v59 = vld [vmem:[%s24912_s7 + $0x654] sm:$0xf0]  ;;  %v13788_v51 = vor.u32 %v16192_v44, %v13787_v5  ;;  %v16206_v23 = vld [vmem:[%s24912_s7 + $0x4cc] sm:$0xf] }
 0x6cf   :  { %7976 = vmatpush.bf16.msra.mxu1 %v13836_v18  ;;  %8014 = vmatpush.bf16.msra.mxu0 %v14092_v42  ;;  %v14171_v63 = vld [vmem:[%s24912_s7 + $0x748] sm:$0xf]  ;;  %v16288_v9 = vld [vmem:[%s24912_s7 + $0x754] sm:$0xf0]  ;;  %v14044_v61 = vor.u32 %v16256_v59, %v14043_v4  ;;  %v13853_v35 = vld [vmem:[%s24912_s7 + $0x4d8] sm:$0xf0] }
 0x6d0   :  { %7996 = vmatpush.bf16.msra.mxu3 %v13948_v50  ;;  %v13899_v20 = vld [vmem:[%s24912_s7 + $0x528] sm:$0xf]  ;;  %v16220_v13 = vld [vmem:[%s24912_s7 + $0x534] sm:$0xf0]  ;;  %v14172_v1 = vor.u32 %v16288_v9, %v14171_v63  ;;  %v14000_v50 = vor.u32 %v16242_v55, %v13997_v29  ;;  %v14109_v43 = vld [vmem:[%s24912_s7 + $0x6d8] sm:$0xf0]  ;;  %v13856_v44 = vor.u32 %v16206_v23, %v13853_v35 }
 0x6d1   :  { %8033 = vmatpush.bf16.msra.mxu2 %v14220_v48  ;;  %v13771_v30 = vld [vmem:[%s24912_s7 + $0x428] sm:$0xf]  ;;  %v16188_v7 = vld [vmem:[%s24912_s7 + $0x434] sm:$0xf0]  ;;  %v13900_v49 = vor.u32 %v16220_v13, %v13899_v20  ;;  %v16302_v19 = vld [vmem:[%s24912_s7 + $0x7cc] sm:$0xf] }
 0x6d2   :  { %v14027_v16 = vld [vmem:[%s24912_s7 + $0x628] sm:$0xf]  ;;  %v16252_v32 = vld [vmem:[%s24912_s7 + $0x634] sm:$0xf0]  ;;  %v13772_v0 = vor.u32 %v16188_v7, %v13771_v30  ;;  %v13965_v5 = vld [vmem:[%s24912_s7 + $0x5b8] sm:$0xf0] }
 0x6d3   :  { %7977 = vmatpush.bf16.msra.mxu1 %v13820_v31  ;;  %8015 = vmatpush.bf16.msra.mxu0 %v14076_v47  ;;  %v14155_v60 = vld [vmem:[%s24912_s7 + $0x728] sm:$0xf]  ;;  %v16284_v54 = vld [vmem:[%s24912_s7 + $0x734] sm:$0xf0]  ;;  %v14028_v53 = vor.u32 %v16252_v32, %v14027_v16  ;;  %v16306_v31 = vld [vmem:[%s24912_s7 + $0x7ec] sm:$0xf] }
 0x6d4   :  { %7997 = vmatpush.bf16.msra.mxu3 %v13932_v25  ;;  %v13883_v15 = vld [vmem:[%s24912_s7 + $0x508] sm:$0xf]  ;;  %v16216_v21 = vld [vmem:[%s24912_s7 + $0x514] sm:$0xf0]  ;;  %v14156_v40 = vor.u32 %v16284_v54, %v14155_v60  ;;  %v14256_v45 = vor.u32 %v16306_v31, %v14253_v37  ;;  %v16270_v25 = vld [vmem:[%s24912_s7 + $0x6cc] sm:$0xf] }
 0x6d5   :  { %8034 = vmatpush.bf16.msra.mxu2 %v14204_v38  ;;  %7930 = vmatmul.bf16.gmra.mxu3 %v22391_v10  ;;  %v13755_v36 = vld [vmem:[%s24912_s7 + $0x408] sm:$0xf]  ;;  %v16184_v22 = vld [vmem:[%s24912_s7 + $0x414] sm:$0xf0]  ;;  %v13884_v33 = vor.u32 %v16216_v21, %v13883_v15  ;;  %v13872_v38 = vor.u32 %v16210_v34, %v13869_v62  ;;  %v14112_v4 = vor.u32 %v16270_v25, %v14109_v43  ;;  %v16202_v63 = vld [vmem:[%s24912_s7 + $0x4ac] sm:$0xf] }
 0x6d6   :  { %7911 = vmatmul.bf16.gmra.mxu1 %v22421_v17  ;;  %7949 = vmatmul.bf16.gmra.mxu0 %v22424_v58  ;;  %v14011_v28 = vld [vmem:[%s24912_s7 + $0x608] sm:$0xf]  ;;  %v16248_v18 = vld [vmem:[%s24912_s7 + $0x614] sm:$0xf0]  ;;  %v13756_v6 = vor.u32 %v16184_v22, %v13755_v36  ;;  %v13837_v9 = vld [vmem:[%s24912_s7 + $0x4b8] sm:$0xf0] }
 0x6d7   :  { %7978 = vmatpush.bf16.msra.mxu1 %v13804_v14  ;;  %8016 = vmatpush.bf16.msra.mxu0 %v14060_v56  ;;  %v14139_v42 = vld [vmem:[%s24912_s7 + $0x708] sm:$0xf]  ;;  %v16280_v48 = vld [vmem:[%s24912_s7 + $0x714] sm:$0xf0]  ;;  %v14012_v12 = vor.u32 %v16248_v18, %v14011_v28  ;;  %v13984_v14 = vor.u32 %v16238_v57, %v13981_v27  ;;  %v14237_v56 = vld [vmem:[%s24912_s7 + $0x7d8] sm:$0xf0]  ;;  %v13840_v7 = vor.u32 %v16202_v63, %v13837_v9 }
 0x6d8   :  { %7968 = vmatmul.bf16.gmra.mxu2 %v22432_v39  ;;  %7998 = vmatpush.bf16.msra.mxu3 %v13916_v8  ;;  %v14140_v47 = vor.u32 %v16280_v48, %v14139_v42  ;;  %v14240_v59 = vor.u32 %v16302_v19, %v14237_v56  ;;  %v16266_v8 = vld [vmem:[%s24912_s7 + $0x6ac] sm:$0xf]  ;;  %v14093_v20 = vld [vmem:[%s24912_s7 + $0x6b8] sm:$0xf0]  ;;  %vm25102_vm0 = vmmov %vm25096_vm1 }
 0x6d9   :  { %8035 = vmatpush.bf16.msra.mxu2 %v14188_v24  ;;  %v16234_v24 = vld [vmem:[%s24912_s7 + $0x5ac] sm:$0xf]  ;;  %v13949_v30 = vld [vmem:[%s24912_s7 + $0x598] sm:$0xf0]  ;;  %v14096_v16 = vor.u32 %v16266_v8, %v14093_v20  ;;  %v14499_v20 = vld [vmem:[%s24912_s7 + $0x1e0] sm:$0xf] }
 0x6da   :  { %v16298_v13 = vld [vmem:[%s24912_s7 + $0x7ac] sm:$0xf]  ;;  %v13821_v54 = vld [vmem:[%s24912_s7 + $0x498] sm:$0xf0]  ;;  %vm25103_vm2 = vmmov %vm25102_vm0 }
 0x6db   :  { %7979 = vmatpush.bf16.msra.mxu1 %v13788_v51  ;;  %8017 = vmatpush.bf16.msra.mxu0 %v14044_v61  ;;  %v13968_v51 = vor.u32 %v16234_v24, %v13965_v5  ;;  %v14221_v61 = vld [vmem:[%s24912_s7 + $0x7b8] sm:$0xf0]  ;;  %v16198_v60 = vld [vmem:[%s24912_s7 + $0x48c] sm:$0xf]  ;;  %vm25104_vm7 = vmmov %vm25102_vm0 }
 0x6dc   :  { %7999 = vmatpush.bf16.msra.mxu3 %v13900_v49  ;;  %v14224_v32 = vor.u32 %v16298_v13, %v14221_v61  ;;  %v16262_v49 = vld [vmem:[%s24912_s7 + $0x68c] sm:$0xf]  ;;  %v14077_v21 = vld [vmem:[%s24912_s7 + $0x698] sm:$0xf0]  ;;  %v16115_v13 = vld [vmem:[%s24912_s7 + $0x1ec] sm:$0xf0] }
 0x6dd   :  { %8036 = vmatpush.bf16.msra.mxu2 %v14172_v1  ;;  %v16230_v1 = vld [vmem:[%s24912_s7 + $0x58c] sm:$0xf]  ;;  %v14205_v36 = vld [vmem:[%s24912_s7 + $0x798] sm:$0xf0]  ;;  %vm25105_vm8 = vmmov %vm25102_vm0 }
 0x6de   :  { %v13952_v15 = vor.u32 %v16230_v1, %v13949_v30  ;;  %v16226_v22 = vld [vmem:[%s24912_s7 + $0x56c] sm:$0xf]  ;;  %v13933_v28 = vld [vmem:[%s24912_s7 + $0x578] sm:$0xf0]  ;;  %vm25106_vm9 = vmmov %vm25102_vm0 }
 0x6df   :  { %7980 = vmatpush.bf16.msra.mxu1 %v13772_v0  ;;  %8018 = vmatpush.bf16.msra.mxu0 %v14028_v53  ;;  %v16294_v0 = vld [vmem:[%s24912_s7 + $0x78c] sm:$0xf]  ;;  %v13824_v53 = vor.u32 %v16198_v60, %v13821_v54  ;;  %v13805_v29 = vld [vmem:[%s24912_s7 + $0x478] sm:$0xf0]  ;;  %v13936_v42 = vor.u32 %v16226_v22, %v13933_v28  ;;  %v14371_v54 = vld [vmem:[%s24912_s7 + $0xe0] sm:$0xf] }
 0x6e0   :  { %8000 = vmatpush.bf16.msra.mxu3 %v13884_v33  ;;  %v14208_v18 = vor.u32 %v16294_v0, %v14205_v36  ;;  %v16194_v55 = vld [vmem:[%s24912_s7 + $0x46c] sm:$0xf]  ;;  %v14061_v34 = vld [vmem:[%s24912_s7 + $0x678] sm:$0xf0]  ;;  %v16147_v0 = vld [vmem:[%s24912_s7 + $0x2ec] sm:$0xf0] }
 0x6e1   :  { %8037 = vmatpush.bf16.msra.mxu2 %v14156_v40  ;;  %v14080_v40 = vor.u32 %v16262_v49, %v14077_v21  ;;  %v16258_v48 = vld [vmem:[%s24912_s7 + $0x66c] sm:$0xf]  ;;  %v14189_v62 = vld [vmem:[%s24912_s7 + $0x778] sm:$0xf0]  ;;  %v16083_v49 = vld [vmem:[%s24912_s7 + $0xec] sm:$0xf0] }
 0x6e2   :  { %v16290_v33 = vld [vmem:[%s24912_s7 + $0x76c] sm:$0xf]  ;;  %v13917_v52 = vld [vmem:[%s24912_s7 + $0x558] sm:$0xf0]  ;;  %v14627_v21 = vld [vmem:[%s24912_s7 + $0x2e0] sm:$0xf] }
 0x6e3   :  { %7981 = vmatpush.bf16.msra.mxu1 %v13756_v6  ;;  %8019 = vmatpush.bf16.msra.mxu0 %v14012_v12  ;;  %v16222_v41 = vld [vmem:[%s24912_s7 + $0x54c] sm:$0xf]  ;;  %v13808_v6 = vor.u32 %v16194_v55, %v13805_v29  ;;  %v13789_v37 = vld [vmem:[%s24912_s7 + $0x458] sm:$0xf0]  ;;  %v14192_v12 = vor.u32 %v16290_v33, %v14189_v62  ;;  %v14755_v36 = vld [vmem:[%s24912_s7 + $0x3e0] sm:$0xf]  ;;  %v14372_v55 = vor.u32 %v16083_v49, %v14371_v54 }
 0x6e4   :  { %8069 = vmatpush.bf16.msrb.mxu3 %v14000_v50  ;;  %v14064_v50 = vor.u32 %v16258_v48, %v14061_v34  ;;  %v16190_v31 = vld [vmem:[%s24912_s7 + $0x44c] sm:$0xf]  ;;  %v14173_v27 = vld [vmem:[%s24912_s7 + $0x758] sm:$0xf0]  ;;  %v16179_v28 = vld [vmem:[%s24912_s7 + $0x3ec] sm:$0xf0] }
 0x6e5   :  { %8038 = vmatpush.bf16.msra.mxu2 %v14140_v47  ;;  %8001 = vmatmul.bf16.vlgmr.msra.gmra.mxu3 %v22253_v11  ;;  %v13920_v47 = vor.u32 %v16222_v41, %v13917_v52  ;;  %v16286_v57 = vld [vmem:[%s24912_s7 + $0x74c] sm:$0xf]  ;;  %v13901_v23 = vld [vmem:[%s24912_s7 + $0x538] sm:$0xf0]  ;;  %v13792_v35 = vor.u32 %v16190_v31, %v13789_v37  ;;  %v14355_v48 = vld [vmem:[%s24912_s7 + $0xc0] sm:$0xf]  ;;  %v14756_v33 = vor.u32 %v16179_v28, %v14755_v36 }
 0x6e6   :  { %7982 = vmatmul.bf16.vlgmr.msra.gmra.mxu1 %v22277_v3  ;;  %8020 = vmatmul.bf16.vlgmr.msra.gmra.mxu0 %v22279_v2  ;;  %v13773_v43 = vld [vmem:[%s24912_s7 + $0x438] sm:$0xf0]  ;;  %v16250_v19 = vld [vmem:[%s24912_s7 + $0x62c] sm:$0xf]  ;;  %v14176_v56 = vor.u32 %v16286_v57, %v14173_v27  ;;  %v16079_v34 = vld [vmem:[%s24912_s7 + $0xcc] sm:$0xf0] }
 0x6e7   :  { %8050 = vmatpush.bf16.msrb.mxu1 %v13872_v38  ;;  %8088 = vmatpush.bf16.msrb.mxu0 %v14128_v26  ;;  %v16254_v38 = vld [vmem:[%s24912_s7 + $0x64c] sm:$0xf]  ;;  %v14045_v26 = vld [vmem:[%s24912_s7 + $0x658] sm:$0xf0]  ;;  %v14611_v41 = vld [vmem:[%s24912_s7 + $0x2c0] sm:$0xf] }
 0x6e8   :  { %8070 = vmatpush.bf16.msrb.mxu3 %v13984_v14  ;;  %8039 = vmatmul.bf16.vlgmr.msra.gmra.mxu2 %v22291_v46  ;;  %v14048_v25 = vor.u32 %v16254_v38, %v14045_v26  ;;  %v16186_v14 = vld [vmem:[%s24912_s7 + $0x42c] sm:$0xf]  ;;  %v14029_v5 = vld [vmem:[%s24912_s7 + $0x638] sm:$0xf0]  ;;  %v16143_v52 = vld [vmem:[%s24912_s7 + $0x2cc] sm:$0xf0] }
 0x6e9   :  { %8107 = vmatpush.bf16.msrb.mxu2 %v14256_v45  ;;  %v16218_v45 = vld [vmem:[%s24912_s7 + $0x52c] sm:$0xf]  ;;  %v13885_v63 = vld [vmem:[%s24912_s7 + $0x518] sm:$0xf0]  ;;  %v13776_v8 = vor.u32 %v16186_v14, %v13773_v43  ;;  %v14032_v61 = vor.u32 %v16250_v19, %v14029_v5  ;;  %v14467_v31 = vld [vmem:[%s24912_s7 + $0x1a0] sm:$0xf] }
 0x6ea   :  { %v13904_v24 = vor.u32 %v16218_v45, %v13901_v23  ;;  %v16182_v9 = vld [vmem:[%s24912_s7 + $0x40c] sm:$0xf]  ;;  %v14013_v30 = vld [vmem:[%s24912_s7 + $0x618] sm:$0xf0]  ;;  %v16107_v37 = vld [vmem:[%s24912_s7 + $0x1ac] sm:$0xf0] }
 0x6eb   :  { %8051 = vmatpush.bf16.msrb.mxu1 %v13856_v44  ;;  %8089 = vmatpush.bf16.msrb.mxu0 %v14112_v4  ;;  %v16282_v44 = vld [vmem:[%s24912_s7 + $0x72c] sm:$0xf]  ;;  %v14157_v4 = vld [vmem:[%s24912_s7 + $0x738] sm:$0xf0]  ;;  %v14339_v38 = vld [vmem:[%s24912_s7 + $0xa0] sm:$0xf]  ;;  %v14468_v45 = vor.u32 %v16107_v37, %v14467_v31 }
 0x6ec   :  { %8071 = vmatpush.bf16.msrb.mxu3 %v13968_v51  ;;  %v13757_v51 = vld [vmem:[%s24912_s7 + $0x418] sm:$0xf0]  ;;  %v16246_v1 = vld [vmem:[%s24912_s7 + $0x60c] sm:$0xf]  ;;  %v16075_v26 = vld [vmem:[%s24912_s7 + $0xac] sm:$0xf0] }
 0x6ed   :  { %8108 = vmatpush.bf16.msrb.mxu2 %v14240_v59  ;;  %v16214_v59 = vld [vmem:[%s24912_s7 + $0x50c] sm:$0xf]  ;;  %v14141_v60 = vld [vmem:[%s24912_s7 + $0x718] sm:$0xf0]  ;;  %v13760_v22 = vor.u32 %v16182_v9, %v13757_v51  ;;  %v14595_v57 = vld [vmem:[%s24912_s7 + $0x2a0] sm:$0xf] }
 0x6ee   :  { %v16139_v27 = vld [vmem:[%s24912_s7 + $0x2ac] sm:$0xf0]  ;;  %v14451_v14 = vld [vmem:[%s24912_s7 + $0x180] sm:$0xf]  ;;  %vm25107_vm11 = vmmov %vm25102_vm0 }
 0x6ef   :  { %8052 = vmatpush.bf16.msrb.mxu1 %v13840_v7  ;;  %8090 = vmatpush.bf16.msrb.mxu0 %v14096_v16  ;;  %v16278_v7 = vld [vmem:[%s24912_s7 + $0x70c] sm:$0xf]  ;;  %v14160_v16 = vor.u32 %v16282_v44, %v14157_v4  ;;  %v16103_v43 = vld [vmem:[%s24912_s7 + $0x18c] sm:$0xf0]  ;;  %v14596_v19 = vor.u32 %v16139_v27, %v14595_v57  ;;  %v14579_v5 = vld [vmem:[%s24912_s7 + $0x280] sm:$0xf] }
 0x6f0   :  { %8072 = vmatpush.bf16.msrb.mxu3 %v13952_v15  ;;  %v14500_v15 = vor.u32 %v16115_v13, %v14499_v20  ;;  %v14144_v29 = vor.u32 %v16278_v7, %v14141_v60  ;;  %v16135_v44 = vld [vmem:[%s24912_s7 + $0x28c] sm:$0xf0]  ;;  %v14452_v4 = vor.u32 %v16103_v43, %v14451_v14  ;;  %v14307_v51 = vld [vmem:[%s24912_s7 + $0x60] sm:$0xf]  ;;  %v14501_v57 = vld [vmem:[%s24912_s7 + $0x1f0] sm:$0xf0] }
 0x6f1   :  { %8109 = vmatpush.bf16.msrb.mxu2 %v14224_v32  ;;  %v13888_v32 = vor.u32 %v16214_v59, %v13885_v63  ;;  %v16099_v9 = vld [vmem:[%s24912_s7 + $0x16c] sm:$0xf0]  ;;  %v14563_v13 = vld [vmem:[%s24912_s7 + $0x260] sm:$0xf]  ;;  %vm25108_vm12 = vmmov %vm25102_vm0 }
 0x6f2   :  { %v16067_v20 = vld [vmem:[%s24912_s7 + $0x6c] sm:$0xf0]  ;;  %v14691_v54 = vld [vmem:[%s24912_s7 + $0x360] sm:$0xf]  ;;  %vm25109_vm13 = vmmov %vm25102_vm0 }
 0x6f3   :  { %8053 = vmatpush.bf16.msrb.mxu1 %v13824_v53  ;;  %8091 = vmatpush.bf16.msrb.mxu0 %v14080_v40  ;;  %v14483_v53 = vld [vmem:[%s24912_s7 + $0x1c0] sm:$0xf]  ;;  %v16111_v40 = vld [vmem:[%s24912_s7 + $0x1cc] sm:$0xf0]  ;;  %v14308_v7 = vor.u32 %v16067_v20, %v14307_v51  ;;  %vm25110_vm14 = vmmov %vm25102_vm0 }
 0x6f4   :  { %8073 = vmatpush.bf16.msrb.mxu3 %v13936_v42  ;;  %v14628_v42 = vor.u32 %v16147_v0, %v14627_v21  ;;  %v14484_v62 = vor.u32 %v16111_v40, %v14483_v53  ;;  %v16163_v49 = vld [vmem:[%s24912_s7 + $0x36c] sm:$0xf0]  ;;  %v14547_v0 = vld [vmem:[%s24912_s7 + $0x240] sm:$0xf]  ;;  %vm25111_vm15 = vmmov %vm25102_vm0 }
 0x6f5   :  { %8110 = vmatpush.bf16.msrb.mxu2 %v14208_v18  ;;  %8006 = vmatmul.bf16.gmra.mxu3 %v22391_v10  ;;  %v14016_v18 = vor.u32 %v16246_v1, %v14013_v30  ;;  %v16063_v21 = vld [vmem:[%s24912_s7 + $0x4c] sm:$0xf0]  ;;  %v14692_v28 = vor.u32 %v16163_v49, %v14691_v54  ;;  %v14403_v53 = vld [vmem:[%s24912_s7 + $0x120] sm:$0xf]  ;;  %v6800_v49 = vld [vmem:[#allocation2 + $0x18] sm:$0xff] }
 0x6f6   :  { %7987 = vmatmul.bf16.gmra.mxu1 %v22421_v17  ;;  %8025 = vmatmul.bf16.gmra.mxu0 %v22424_v58  ;;  %v16127_v36 = vld [vmem:[%s24912_s7 + $0x24c] sm:$0xf0]  ;;  %v14387_v31 = vld [vmem:[%s24912_s7 + $0x100] sm:$0xf] }
 0x6f7   :  { %8054 = vmatpush.bf16.msrb.mxu1 %v13808_v6  ;;  %8092 = vmatpush.bf16.msrb.mxu0 %v14064_v50  ;;  %v14356_v6 = vor.u32 %v16079_v34, %v14355_v48  ;;  %v14739_v50 = vld [vmem:[%s24912_s7 + $0x3c0] sm:$0xf]  ;;  %v16091_v40 = vld [vmem:[%s24912_s7 + $0x12c] sm:$0xf0] }
 0x6f8   :  { %8074 = vmatpush.bf16.msrb.mxu3 %v13920_v47  ;;  %8044 = vmatmul.bf16.gmra.mxu2 %v22432_v39  ;;  %v16175_v47 = vld [vmem:[%s24912_s7 + $0x3cc] sm:$0xf0]  ;;  %v14275_v48 = vld [vmem:[%s24912_s7 + $0x20] sm:$0xf] }
 0x6f9   :  { %8111 = vmatpush.bf16.msrb.mxu2 %v14192_v12  ;;  %v14612_v12 = vor.u32 %v16143_v52, %v14611_v41  ;;  %v14740_v23 = vor.u32 %v16175_v47, %v14739_v50  ;;  %v16059_v34 = vld [vmem:[%s24912_s7 + $0x2c] sm:$0xf0]  ;;  %v14404_v41 = vor.u32 %v16091_v40, %v14403_v53  ;;  %v14659_v52 = vld [vmem:[%s24912_s7 + $0x320] sm:$0xf]  ;;  %v16169_v53 = vld [vmem:[%s24912_s7 + $0x3a4] sm:$0xf] }
 0x6fa   :  { %v16087_v37 = vld [vmem:[%s24912_s7 + $0x10c] sm:$0xf0]  ;;  %v14276_v47 = vor.u32 %v16059_v34, %v14275_v48  ;;  %v14515_v27 = vld [vmem:[%s24912_s7 + $0x200] sm:$0xf]  ;;  %v16453_v40 = vld [vmem:[#allocation2 + $0x28] sm:$0xff] }
 0x6fb   :  { %8055 = vmatpush.bf16.msrb.mxu1 %v13792_v35  ;;  %8093 = vmatpush.bf16.msrb.mxu0 %v14048_v25  ;;  %v14340_v35 = vor.u32 %v16075_v26, %v14339_v38  ;;  %v14723_v25 = vld [vmem:[%s24912_s7 + $0x3a0] sm:$0xf]  ;;  %v16113_v26 = vld [vmem:[%s24912_s7 + $0x1e4] sm:$0xf]  ;;  %v6799_v54 = vld [vmem:[#allocation2 + $0x10] sm:$0xff] }
 0x6fc   :  { %8075 = vmatpush.bf16.msrb.mxu3 %v13904_v24  ;;  %v16071_v24 = vld [vmem:[%s24912_s7 + $0x8c] sm:$0xf0]  ;;  %v14504_v43 = vor.u32 %v16113_v26, %v14501_v57  ;;  %v16133_v26 = vld [vmem:[%s24912_s7 + $0x284] sm:$0xf]  ;;  %v14581_v57 = vld [vmem:[%s24912_s7 + $0x290] sm:$0xf0] }
 0x6fd   :  { %8112 = vmatpush.bf16.msrb.mxu2 %v14176_v56  ;;  %v14323_v56 = vld [vmem:[%s24912_s7 + $0x80] sm:$0xf] }
 0x6fe   :  { %v14324_v63 = vor.u32 %v16071_v24, %v14323_v56  ;;  %v16151_v56 = vld [vmem:[%s24912_s7 + $0x30c] sm:$0xf0]  ;;  %v16109_v24 = vld [vmem:[%s24912_s7 + $0x1c4] sm:$0xf] }
 0x6ff   :  { %8056 = vmatpush.bf16.msrb.mxu1 %v13776_v8  ;;  %8094 = vmatpush.bf16.msrb.mxu0 %v14032_v61  ;;  %v16167_v8 = vld [vmem:[%s24912_s7 + $0x38c] sm:$0xf0] }
 0x700   :  { %8076 = vmatpush.bf16.msrb.mxu3 %v13888_v32  ;;  %v16131_v61 = vld [vmem:[%s24912_s7 + $0x26c] sm:$0xf0] }
 0x701   :  { %8113 = vmatpush.bf16.msrb.mxu2 %v14160_v16  ;;  %v14419_v16 = vld [vmem:[%s24912_s7 + $0x140] sm:$0xf]  ;;  %v16095_v32 = vld [vmem:[%s24912_s7 + $0x14c] sm:$0xf0]  ;;  %v14564_v60 = vor.u32 %v16131_v61, %v14563_v13  ;;  %v16173_v13 = vld [vmem:[%s24912_s7 + $0x3c4] sm:$0xf] }
 0x703   :  { %8057 = vmatpush.bf16.msrb.mxu1 %v13760_v22  ;;  %8095 = vmatpush.bf16.msrb.mxu0 %v14016_v18  ;;  %v14420_v22 = vor.u32 %v16095_v32, %v14419_v16  ;;  %v14469_v16 = vld [vmem:[%s24912_s7 + $0x1b0] sm:$0xf0]  ;;  %v6797_v32 = vld [vmem:[#allocation2] sm:$0xff] }
 0x704   :  { %8785 = vmatpush.bf16.msra.mxu3 %v14500_v15  ;;  %v14291_v15 = vld [vmem:[%s24912_s7 + $0x40] sm:$0xf] }
 0x705   :  { %8114 = vmatpush.bf16.msrb.mxu2 %v14144_v29  ;;  %8077 = vmatmul.bf16.vlgmr.msrb.gmra.mxu3 %v22253_v11  ;;  %v16171_v11 = vld [vmem:[%s24912_s7 + $0x3ac] sm:$0xf0]  ;;  %v14292_v18 = vor.u32 %v16063_v21, %v14291_v15  ;;  %v14675_v29 = vld [vmem:[%s24912_s7 + $0x340] sm:$0xf]  ;;  %v16073_v15 = vld [vmem:[%s24912_s7 + $0xa4] sm:$0xf] }
 0x706   :  { %8058 = vmatmul.bf16.vlgmr.msrb.gmra.mxu1 %v22277_v3  ;;  %8096 = vmatmul.bf16.vlgmr.msrb.gmra.mxu0 %v22279_v2  ;;  %v14724_v59 = vor.u32 %v16171_v11, %v14723_v25  ;;  %v14707_v3 = vld [vmem:[%s24912_s7 + $0x380] sm:$0xf]  ;;  %v14629_v25 = vld [vmem:[%s24912_s7 + $0x2f0] sm:$0xf0] }
 0x707   :  { %8766 = vmatpush.bf16.msra.mxu1 %v14372_v55  ;;  %8804 = vmatpush.bf16.msra.mxu0 %v14628_v42  ;;  %v14435_v2 = vld [vmem:[%s24912_s7 + $0x160] sm:$0xf]  ;;  %v14708_v30 = vor.u32 %v16167_v8, %v14707_v3  ;;  %v14548_v55 = vor.u32 %v16127_v36, %v14547_v0  ;;  %v16159_v42 = vld [vmem:[%s24912_s7 + $0x34c] sm:$0xf0]  ;;  %v16077_v3 = vld [vmem:[%s24912_s7 + $0xc4] sm:$0xf] }
 0x708   :  { %8786 = vmatpush.bf16.msra.mxu3 %v14484_v62  ;;  %8115 = vmatmul.bf16.vlgmr.msrb.gmra.mxu2 %v22291_v46  ;;  %v14580_v46 = vor.u32 %v16135_v44, %v14579_v5  ;;  %v14436_v1 = vor.u32 %v16099_v9, %v14435_v2  ;;  %v16123_v62 = vld [vmem:[%s24912_s7 + $0x22c] sm:$0xf0]  ;;  %v14676_v50 = vor.u32 %v16159_v42, %v14675_v29  ;;  %v14485_v5 = vld [vmem:[%s24912_s7 + $0x1d0] sm:$0xf0]  ;;  %v16141_v9 = vld [vmem:[%s24912_s7 + $0x2c4] sm:$0xf] }
 0x709   :  { %8823 = vmatpush.bf16.msra.mxu2 %v14756_v33  ;;  %v14531_v33 = vld [vmem:[%s24912_s7 + $0x220] sm:$0xf]  ;;  %v14357_v2 = vld [vmem:[%s24912_s7 + $0xd0] sm:$0xf0]  ;;  %v14488_v51 = vor.u32 %v16109_v24, %v14485_v5  ;;  %v16101_v29 = vld [vmem:[%s24912_s7 + $0x184] sm:$0xf] }
 0x70a   :  { %v14532_v38 = vor.u32 %v16123_v62, %v14531_v33  ;;  %v14360_v61 = vor.u32 %v16077_v3, %v14357_v2  ;;  %v14341_v21 = vld [vmem:[%s24912_s7 + $0xb0] sm:$0xf0]  ;;  %v16454_v62 = vld [vmem:[#allocation2 + $0x20] sm:$0xff] }
 0x70b   :  { %8767 = vmatpush.bf16.msra.mxu1 %v14356_v6  ;;  %8805 = vmatpush.bf16.msra.mxu0 %v14612_v12  ;;  %v16155_v6 = vld [vmem:[%s24912_s7 + $0x32c] sm:$0xf0]  ;;  %v14259_v12 = vld [vmem:[%s24912_s7] sm:$0xf]  ;;  %v14453_v42 = vld [vmem:[%s24912_s7 + $0x190] sm:$0xf0]  ;;  %v14344_v33 = vor.u32 %v16073_v15, %v14341_v21 }
 0x70c   :  { %8787 = vmatpush.bf16.msra.mxu3 %v14468_v45  ;;  %v16119_v45 = vld [vmem:[%s24912_s7 + $0x20c] sm:$0xf0]  ;;  %v14660_v14 = vor.u32 %v16155_v6, %v14659_v52  ;;  %v14565_v24 = vld [vmem:[%s24912_s7 + $0x270] sm:$0xf0]  ;;  %v16161_v5 = vld [vmem:[%s24912_s7 + $0x364] sm:$0xf] }
 0x70d   :  { %8824 = vmatpush.bf16.msra.mxu2 %v14740_v23  ;;  %v16081_v23 = vld [vmem:[%s24912_s7 + $0xe4] sm:$0xf]  ;;  %v14516_v11 = vor.u32 %v16119_v45, %v14515_v27  ;;  %v16455_v52 = vld [vmem:[#allocation2 + $0x30] sm:$0xff]  ;;  %v6806_v21 = vld [vmem:[#allocation2 + $0x68] sm:$0xff] }
 0x70e   :  { %v23174_v6 = vpack.c.bf16 %v16455_v52, %v6799_v54  ;;  %v16165_v27 = vld [vmem:[%s24912_s7 + $0x384] sm:$0xf]  ;;  %v14709_v45 = vld [vmem:[%s24912_s7 + $0x390] sm:$0xf0] }
 0x70f   :  { %8768 = vmatpush.bf16.msra.mxu1 %v14340_v35  ;;  %8806 = vmatpush.bf16.msra.mxu0 %v14596_v19  ;;  %v14388_v35 = vor.u32 %v16087_v37, %v14387_v31  ;;  %v16069_v31 = vld [vmem:[%s24912_s7 + $0x84] sm:$0xf]  ;;  %v14325_v37 = vld [vmem:[%s24912_s7 + $0x90] sm:$0xf0] }
 0x710   :  { %8788 = vmatpush.bf16.msra.mxu3 %v14452_v4  ;;  %v14421_v3 = vld [vmem:[%s24912_s7 + $0x150] sm:$0xf0]  ;;  %v6805_v15 = vld [vmem:[#allocation2 + $0x60] sm:$0xff] }
 0x711   :  { %8825 = vmatpush.bf16.msra.mxu2 %v14724_v59  ;;  %v16177_v59 = vld [vmem:[%s24912_s7 + $0x3e4] sm:$0xf]  ;;  %v14405_v54 = vld [vmem:[%s24912_s7 + $0x130] sm:$0xf0] }
 0x713   :  { %8769 = vmatpush.bf16.msra.mxu1 %v14324_v63  ;;  %8807 = vmatpush.bf16.msra.mxu0 %v14580_v46  ;;  %v14757_v63 = vld [vmem:[%s24912_s7 + $0x3f0] sm:$0xf0] }
 0x714   :  { %8789 = vmatpush.bf16.msra.mxu3 %v14436_v1  ;;  %v14613_v46 = vld [vmem:[%s24912_s7 + $0x2d0] sm:$0xf0]  ;;  %v14760_v20 = vor.u32 %v16177_v59, %v14757_v63  ;;  %v16093_v63 = vld [vmem:[%s24912_s7 + $0x144] sm:$0xf] }
 0x715   :  { %8826 = vmatpush.bf16.msra.mxu2 %v14708_v30  ;;  %8082 = vmatmul.bf16.gmra.mxu3 %v22391_v10  ;;  %v16055_v10 = vld [vmem:[%s24912_s7 + $0xc] sm:$0xf0]  ;;  %v14616_v1 = vor.u32 %v16141_v9, %v14613_v46  ;;  %v14741_v30 = vld [vmem:[%s24912_s7 + $0x3d0] sm:$0xf0] }
 0x716   :  { %8063 = vmatmul.bf16.gmra.mxu1 %v22421_v17  ;;  %8101 = vmatmul.bf16.gmra.mxu0 %v22424_v58  ;;  %v14373_v17 = vld [vmem:[%s24912_s7 + $0xf0] sm:$0xf0]  ;;  %v16145_v58 = vld [vmem:[%s24912_s7 + $0x2e4] sm:$0xf]  ;;  %v14260_v19 = vor.u32 %v16055_v10, %v14259_v12  ;;  %v14744_v0 = vor.u32 %v16173_v13, %v14741_v30  ;;  %v16456_v12 = vld [vmem:[#allocation2 + $0x38] sm:$0xff]  ;;  %v14456_v10 = vor.u32 %v16101_v29, %v14453_v42 }
 0x717   :  { %8770 = vmatpush.bf16.msra.mxu1 %v14308_v7  ;;  %8808 = vmatpush.bf16.msra.mxu0 %v14564_v60  ;;  %v14376_v44 = vor.u32 %v16081_v23, %v14373_v17  ;;  %v14632_v4 = vor.u32 %v16145_v58, %v14629_v25  ;;  %v16105_v7 = vld [vmem:[%s24912_s7 + $0x1a4] sm:$0xf]  ;;  %v6798_v60 = vld [vmem:[#allocation2 + $0x8] sm:$0xff]  ;;  %v14328_v58 = vor.u32 %v16069_v31, %v14325_v37  ;;  %v14693_v59 = vld [vmem:[%s24912_s7 + $0x370] sm:$0xf0] }
 0x718   :  { %8790 = vmatpush.bf16.msra.mxu3 %v14420_v22  ;;  %8120 = vmatmul.bf16.gmra.mxu2 %v22432_v39  ;;  %v14643_v39 = vld [vmem:[%s24912_s7 + $0x300] sm:$0xf]  ;;  %v14472_v36 = vor.u32 %v16105_v7, %v14469_v16  ;;  %v16137_v22 = vld [vmem:[%s24912_s7 + $0x2a4] sm:$0xf]  ;;  %v14293_v13 = vld [vmem:[%s24912_s7 + $0x50] sm:$0xf0] }
 0x719   :  { %8827 = vmatpush.bf16.msra.mxu2 %v14692_v28  ;;  %v14644_v8 = vor.u32 %v16151_v56, %v14643_v39  ;;  %v14597_v28 = vld [vmem:[%s24912_s7 + $0x2b0] sm:$0xf0]  ;;  %v16097_v23 = vld [vmem:[%s24912_s7 + $0x164] sm:$0xf]  ;;  %v16457_v31 = vld [vmem:[#allocation2 + $0x88] sm:$0xff] }
 0x71a   :  { %v16065_v39 = vld [vmem:[%s24912_s7 + $0x64] sm:$0xf]  ;;  %v14549_v7 = vld [vmem:[%s24912_s7 + $0x250] sm:$0xf0]  ;;  %v23273_v37 = vpack.c.bf16 %v16457_v31, %v6806_v21  ;;  %v16076_v31 = vld [vmem:[%s24912_s7 + $0xb4] sm:$0xf0] }
 0x71b   :  { %8771 = vmatpush.bf16.msra.mxu1 %v14292_v18  ;;  %8809 = vmatpush.bf16.msra.mxu0 %v14548_v55  ;;  %v23160_v18 = vpack.c.bf16 %v16453_v40, %v6798_v60  ;;  %v14725_v55 = vld [vmem:[%s24912_s7 + $0x3b0] sm:$0xf0]  ;;  %v16129_v56 = vld [vmem:[%s24912_s7 + $0x264] sm:$0xf] }
 0x71c   :  { %8791 = vmatpush.bf16.msra.mxu3 %v14404_v41  ;;  %v23171_v41 = vpack.c.bf16 %v16454_v62, %v6797_v32  ;;  %v16125_v30 = vld [vmem:[%s24912_s7 + $0x244] sm:$0xf]  ;;  %v14677_v32 = vld [vmem:[%s24912_s7 + $0x350] sm:$0xf0] }
 0x71d   :  { %8828 = vmatpush.bf16.msra.mxu2 %v14676_v50  ;;  %v14600_v50 = vor.u32 %v16137_v22, %v14597_v28  ;;  %v16157_v16 = vld [vmem:[%s24912_s7 + $0x344] sm:$0xf]  ;;  %v6808_v28 = vld [vmem:[#allocation2 + $0x78] sm:$0xff]  ;;  %v14661_v62 = vld [vmem:[%s24912_s7 + $0x330] sm:$0xf0] }
 0x71e   :  { %v16089_v60 = vld [vmem:[%s24912_s7 + $0x124] sm:$0xf]  ;;  %v14680_v42 = vor.u32 %v16157_v16, %v14677_v32 }
 0x71f   :  { %8772 = vmatpush.bf16.msra.mxu1 %v14276_v47  ;;  %8810 = vmatpush.bf16.msra.mxu0 %v14532_v38  ;;  %v23182_v47 = vpack.c.bf16 %v16456_v12, %v6800_v49  ;;  %v14728_v38 = vor.u32 %v16169_v53, %v14725_v55  ;;  %v14552_v53 = vor.u32 %v16125_v30, %v14549_v7  ;;  %v16057_v40 = vld [vmem:[%s24912_s7 + $0x24] sm:$0xf]  ;;  %v14277_v55 = vld [vmem:[%s24912_s7 + $0x30] sm:$0xf0]  ;;  %v16112_v30 = vld [vmem:[%s24912_s7 + $0x1d4] sm:$0xf0] }
 0x720   :  { %8792 = vmatpush.bf16.msra.mxu3 %v14388_v35  ;;  %v14437_v35 = vld [vmem:[%s24912_s7 + $0x170] sm:$0xf0]  ;;  %v16121_v29 = vld [vmem:[%s24912_s7 + $0x224] sm:$0xf] }
 0x721   :  { %8829 = vmatpush.bf16.msra.mxu2 %v14660_v14  ;;  %v14584_v14 = vor.u32 %v16133_v26, %v14581_v57  ;;  %v16085_v12 = vld [vmem:[%s24912_s7 + $0x104] sm:$0xf] }
 0x723   :  { %8773 = vmatpush.bf16.msra.mxu1 %v14260_v19  ;;  %8811 = vmatpush.bf16.msra.mxu0 %v14516_v11  ;;  %v7831_v48 = vpop.f32.mrf.mxu1  ;;  %v7869_v34 = vpop.f32.mrf.mxu0  ;;  %v14712_v19 = vor.u32 %v16165_v27, %v14709_v45  ;;  %v14440_v11 = vor.u32 %v16097_v23, %v14437_v35  ;;  %v16458_v27 = vld [vmem:[#allocation2 + $0x80] sm:$0xff]  ;;  %v14280_v23 = vor.u32 %v16057_v40, %v14277_v55  ;;  %v14261_v35 = vld [vmem:[%s24912_s7 + $0x10] sm:$0xf0]  ;;  %v14747_v40 = vld [vmem:[%s24912_s7 + $0x3c8] sm:$0xf] }
 0x724   :  { %8861 = vmatpush.bf16.msrb.mxu3 %v14504_v43  ;;  %v14309_v43 = vld [vmem:[%s24912_s7 + $0x70] sm:$0xf0]  ;;  %v23284_v45 = vpack.c.bf16 %v16458_v27, %v6805_v15  ;;  %v16080_v15 = vld [vmem:[%s24912_s7 + $0xd4] sm:$0xf0] }
 0x725   :  { %8830 = vmatpush.bf16.msra.mxu2 %v14644_v8  ;;  %8793 = vmatmul.bf16.vlgmr.msra.gmra.mxu3 %v23160_v18  ;;  %v14312_v46 = vor.u32 %v16065_v39, %v14309_v43 }
 0x726   :  { %8774 = vmatmul.bf16.vlgmr.msra.gmra.mxu1 %v23171_v41  ;;  %8812 = vmatmul.bf16.vlgmr.msra.gmra.mxu0 %v23174_v6 }
 0x727   :  { %8842 = vmatpush.bf16.msrb.mxu1 %v14376_v44  ;;  %8880 = vmatpush.bf16.msrb.mxu0 %v14632_v4 }
 0x728   :  { %8862 = vmatpush.bf16.msrb.mxu3 %v14488_v51  ;;  %8831 = vmatmul.bf16.vlgmr.msra.gmra.mxu2 %v23182_v47  ;;  %v7850_v17 = vpop.f32.mrf.mxu3  ;;  %v14568_v51 = vor.u32 %v16129_v56, %v14565_v24  ;;  %v16149_v56 = vld [vmem:[%s24912_s7 + $0x304] sm:$0xf]  ;;  %v16460_v24 = vld [vmem:[#allocation2 + $0x98] sm:$0xff] }
 0x729   :  { %8899 = vmatpush.bf16.msrb.mxu2 %v14760_v20  ;;  %v7851_v25 = vadd.f32 %v7850_v17, %v7831_v48  ;;  %v16061_v20 = vld [vmem:[%s24912_s7 + $0x44] sm:$0xf]  ;;  %v14408_v48 = vor.u32 %v16089_v60, %v14405_v54  ;;  %v14507_v17 = vld [vmem:[%s24912_s7 + $0x1e8] sm:$0xf] }
 0x72b   :  { %8843 = vmatpush.bf16.msrb.mxu1 %v14360_v61  ;;  %8881 = vmatpush.bf16.msrb.mxu0 %v14616_v1  ;;  %v7870_v44 = vadd.f32 %v7869_v34, %v7851_v25  ;;  %v7888_v4 = vpop.f32.mrf.mxu2  ;;  %v7833_v2 = vpop.f32.mrf.mxu1  ;;  %v14696_v61 = vor.u32 %v16161_v5, %v14693_v59  ;;  %v14424_v1 = vor.u32 %v16093_v63, %v14421_v3  ;;  %v14533_v34 = vld [vmem:[%s24912_s7 + $0x230] sm:$0xf0]  ;;  %v14379_v63 = vld [vmem:[%s24912_s7 + $0xe8] sm:$0xf]  ;;  %v16084_v3 = vld [vmem:[%s24912_s7 + $0xf4] sm:$0xf0] }
 0x72c   :  { %8863 = vmatpush.bf16.msrb.mxu3 %v14472_v36  ;;  %v7871_v9 = vpop.f32.mrf.mxu0  ;;  %v14296_v36 = vor.u32 %v16061_v20, %v14293_v13  ;;  %v14536_v43 = vor.u32 %v16121_v29, %v14533_v34  ;;  %v23309_v5 = vpack.c.bf16 %v16460_v24, %v6808_v28  ;;  %v14645_v59 = vld [vmem:[%s24912_s7 + $0x310] sm:$0xf0]  ;;  %v14380_v32 = vor.u32 %v16084_v3, %v14379_v63  ;;  %v14619_v28 = vld [vmem:[%s24912_s7 + $0x2c8] sm:$0xf]  ;;  %v16108_v34 = vld [vmem:[%s24912_s7 + $0x1b4] sm:$0xf0] }
 0x72d   :  { %8900 = vmatpush.bf16.msrb.mxu2 %v14744_v0  ;;  %v23229_v8 = vadd.f32 %v7888_v4, %v7870_v44  ;;  %v6807_v0 = vld [vmem:[#allocation2 + $0x70] sm:$0xff]  ;;  %v14648_v60 = vor.u32 %v16149_v56, %v14645_v59 }
 0x72f   :  { %8844 = vmatpush.bf16.msrb.mxu1 %v14344_v33  ;;  %8882 = vmatpush.bf16.msrb.mxu0 %v14600_v50  ;;  %v16153_v33 = vld [vmem:[%s24912_s7 + $0x324] sm:$0xf] }
 0x730   :  { %8864 = vmatpush.bf16.msrb.mxu3 %v14456_v10  ;;  %v7852_v49 = vpop.f32.mrf.mxu3  ;;  %v16053_v10 = vld [vmem:[%s24912_s7 + $0x4] sm:$0xf]  ;;  %v14664_v44 = vor.u32 %v16153_v33, %v14661_v62 }
 0x731   :  { %8901 = vmatpush.bf16.msrb.mxu2 %v14728_v38  ;;  %v7853_v22 = vadd.f32 %v7852_v49, %v7833_v2  ;;  %v14389_v38 = vld [vmem:[%s24912_s7 + $0x110] sm:$0xf0]  ;;  %v14264_v13 = vor.u32 %v16053_v10, %v14261_v35  ;;  %v14363_v49 = vld [vmem:[%s24912_s7 + $0xc8] sm:$0xf] }
 0x732   :  { %v14392_v4 = vor.u32 %v16085_v12, %v14389_v38  ;;  %v14364_v62 = vor.u32 %v16080_v15, %v14363_v49  ;;  %v14603_v10 = vld [vmem:[%s24912_s7 + $0x2a8] sm:$0xf] }
 0x733   :  { %8845 = vmatpush.bf16.msrb.mxu1 %v14328_v58  ;;  %8883 = vmatpush.bf16.msrb.mxu0 %v14584_v14  ;;  %v7872_v52 = vadd.f32 %v7871_v9, %v7853_v22  ;;  %v7890_v50 = vpop.f32.mrf.mxu2  ;;  %v7836_v26 = vpop.f32.mrf.mxu1  ;;  %v16116_v58 = vld [vmem:[%s24912_s7 + $0x1f4] sm:$0xf0]  ;;  %v16459_v14 = vld [vmem:[#allocation2 + $0x90] sm:$0xff]  ;;  %v14635_v9 = vld [vmem:[%s24912_s7 + $0x2e8] sm:$0xf] }
 0x734   :  { %8865 = vmatpush.bf16.msrb.mxu3 %v14440_v11  ;;  %v7874_v57 = vpop.f32.mrf.mxu0  ;;  %v23298_v39 = vpack.c.bf16 %v16459_v14, %v6807_v0  ;;  %v14517_v11 = vld [vmem:[%s24912_s7 + $0x210] sm:$0xf0]  ;;  %v14508_v2 = vor.u32 %v16116_v58, %v14507_v17  ;;  %v14731_v35 = vld [vmem:[%s24912_s7 + $0x3a8] sm:$0xf]  ;;  %v16104_v58 = vld [vmem:[%s24912_s7 + $0x194] sm:$0xf0] }
 0x735   :  { %8902 = vmatpush.bf16.msrb.mxu2 %v14712_v19  ;;  %v23295_v25 = vadd.f32 %v7890_v50, %v7872_v52  ;;  %8798 = vmatmul.bf16.gmra.mxu3 %v23273_v37  ;;  %v16117_v19 = vld [vmem:[%s24912_s7 + $0x204] sm:$0xf]  ;;  %v14347_v50 = vld [vmem:[%s24912_s7 + $0xa8] sm:$0xf] }
 0x736   :  { %8779 = vmatmul.bf16.gmra.mxu1 %v23284_v45  ;;  %8817 = vmatmul.bf16.gmra.mxu0 %v23298_v39  ;;  %v14520_v16 = vor.u32 %v16117_v19, %v14517_v11  ;;  %v14459_v17 = vld [vmem:[%s24912_s7 + $0x188] sm:$0xf]  ;;  %v16072_v11 = vld [vmem:[%s24912_s7 + $0x94] sm:$0xf0] }
 0x737   :  { %8846 = vmatpush.bf16.msrb.mxu1 %v14312_v46  ;;  %8884 = vmatpush.bf16.msrb.mxu0 %v14568_v51  ;;  %v16148_v46 = vld [vmem:[%s24912_s7 + $0x2f4] sm:$0xf0]  ;;  %v14763_v51 = vld [vmem:[%s24912_s7 + $0x3e8] sm:$0xf]  ;;  %v14460_v3 = vor.u32 %v16104_v58, %v14459_v17 }
 0x738   :  { %8866 = vmatpush.bf16.msrb.mxu3 %v14424_v1  ;;  %8836 = vmatmul.bf16.gmra.mxu2 %v23309_v5  ;;  %v7855_v20 = vpop.f32.mrf.mxu3  ;;  %v14491_v1 = vld [vmem:[%s24912_s7 + $0x1c8] sm:$0xf]  ;;  %v14636_v54 = vor.u32 %v16148_v46, %v14635_v9  ;;  %v16060_v17 = vld [vmem:[%s24912_s7 + $0x34] sm:$0xf0] }
 0x739   :  { %8903 = vmatpush.bf16.msrb.mxu2 %v14696_v61  ;;  %v16180_v61 = vld [vmem:[%s24912_s7 + $0x3f4] sm:$0xf0]  ;;  %v7856_v7 = vadd.f32 %v7855_v20, %v7836_v26  ;;  %v14492_v22 = vor.u32 %v16112_v30, %v14491_v1  ;;  %v14331_v19 = vld [vmem:[%s24912_s7 + $0x88] sm:$0xf] }
 0x73a   :  { %v16140_v26 = vld [vmem:[%s24912_s7 + $0x2b4] sm:$0xf0]  ;;  %v14332_v46 = vor.u32 %v16072_v11, %v14331_v19  ;;  %v14443_v20 = vld [vmem:[%s24912_s7 + $0x168] sm:$0xf] }
 0x73b   :  { %8847 = vmatpush.bf16.msrb.mxu1 %v14296_v36  ;;  %8885 = vmatpush.bf16.msrb.mxu0 %v14552_v53  ;;  %v7875_v21 = vadd.f32 %v7874_v57, %v7856_v7  ;;  %v7893_v0 = vpop.f32.mrf.mxu2  ;;  %v14764_v36 = vor.u32 %v16180_v61, %v14763_v51  ;;  %v16144_v53 = vld [vmem:[%s24912_s7 + $0x2d4] sm:$0xf0]  ;;  %v7838_v55 = vpop.f32.mrf.mxu1  ;;  %v14604_v14 = vor.u32 %v16140_v26, %v14603_v10  ;;  %v14715_v51 = vld [vmem:[%s24912_s7 + $0x388] sm:$0xf] }
 0x73c   :  { %8867 = vmatpush.bf16.msrb.mxu3 %v14408_v48  ;;  %v7876_v29 = vpop.f32.mrf.mxu0  ;;  %v14475_v48 = vld [vmem:[%s24912_s7 + $0x1a8] sm:$0xf]  ;;  %v14620_v52 = vor.u32 %v16144_v53, %v14619_v28  ;;  %v16168_v1 = vld [vmem:[%s24912_s7 + $0x394] sm:$0xf0] }
 0x73d   :  { %8904 = vmatpush.bf16.msrb.mxu2 %v14680_v42  ;;  %v16176_v42 = vld [vmem:[%s24912_s7 + $0x3d4] sm:$0xf0]  ;;  %v23365_v33 = vadd.f32 %v7893_v0, %v7875_v21  ;;  %v14476_v38 = vor.u32 %v16108_v34, %v14475_v48  ;;  %v14315_v30 = vld [vmem:[%s24912_s7 + $0x68] sm:$0xf]  ;;  %v14716_v15 = vor.u32 %v16168_v1, %v14715_v51  ;;  %v16114_v51 = vld [vmem:[%s24912_s7 + $0x1ec] sm:$0xf] }
 0x73e   :  { %v14748_v12 = vor.u32 %v16176_v42, %v14747_v40  ;;  %v16068_v7 = vld [vmem:[%s24912_s7 + $0x74] sm:$0xf0]  ;;  %v14699_v0 = vld [vmem:[%s24912_s7 + $0x368] sm:$0xf] }
 0x73f   :  { %8848 = vmatpush.bf16.msrb.mxu1 %v14280_v23  ;;  %8886 = vmatpush.bf16.msrb.mxu0 %v14536_v43  ;;  %v14348_v23 = vor.u32 %v16076_v31, %v14347_v50  ;;  %v16172_v43 = vld [vmem:[%s24912_s7 + $0x3b4] sm:$0xf0]  ;;  %v14316_v21 = vor.u32 %v16068_v7, %v14315_v30  ;;  %v14299_v40 = vld [vmem:[%s24912_s7 + $0x48] sm:$0xf]  ;;  %v16082_v7 = vld [vmem:[%s24912_s7 + $0xec] sm:$0xf] }
 0x740   :  { %8868 = vmatpush.bf16.msrb.mxu3 %v14392_v4  ;;  %v7857_v57 = vpop.f32.mrf.mxu3  ;;  %v16136_v4 = vld [vmem:[%s24912_s7 + $0x294] sm:$0xf0]  ;;  %v14732_v9 = vor.u32 %v16172_v43, %v14731_v35  ;;  %v14555_v48 = vld [vmem:[%s24912_s7 + $0x248] sm:$0xf] }
 0x741   :  { %8905 = vmatpush.bf16.msrb.mxu2 %v14664_v44  ;;  %v7858_v27 = vadd.f32 %v7857_v57, %v7838_v55  ;;  %v14587_v44 = vld [vmem:[%s24912_s7 + $0x288] sm:$0xf]  ;;  %v16164_v53 = vld [vmem:[%s24912_s7 + $0x374] sm:$0xf0] }
 0x742   :  { %v14588_v61 = vor.u32 %v16136_v4, %v14587_v44  ;;  %v16064_v55 = vld [vmem:[%s24912_s7 + $0x54] sm:$0xf0]  ;;  %v14411_v10 = vld [vmem:[%s24912_s7 + $0x128] sm:$0xf] }
 0x743   :  { %8849 = vmatpush.bf16.msrb.mxu1 %v14264_v13  ;;  %8887 = vmatpush.bf16.msrb.mxu0 %v14520_v16  ;;  %v7877_v56 = vadd.f32 %v7876_v29, %v7858_v27  ;;  %v7895_v24 = vpop.f32.mrf.mxu2  ;;  %v7907_v59 = vpop.f32.mrf.mxu1  ;;  %v16100_v13 = vld [vmem:[%s24912_s7 + $0x174] sm:$0xf0]  ;;  %v14571_v16 = vld [vmem:[%s24912_s7 + $0x268] sm:$0xf] }
 0x744   :  { %8937 = vmatpush.bf16.msra.mxu3 %v14508_v2  ;;  %v7945_v63 = vpop.f32.mrf.mxu0  ;;  %v16128_v34 = vld [vmem:[%s24912_s7 + $0x254] sm:$0xf0]  ;;  %v14683_v27 = vld [vmem:[%s24912_s7 + $0x348] sm:$0xf] }
 0x745   :  { %8906 = vmatpush.bf16.msrb.mxu2 %v14648_v60  ;;  %v23403_v2 = vadd.f32 %v7895_v24, %v7877_v56  ;;  %8869 = vmatmul.bf16.vlgmr.msrb.gmra.mxu3 %v23160_v18  ;;  %v16092_v26 = vld [vmem:[%s24912_s7 + $0x134] sm:$0xf0]  ;;  %v14556_v57 = vor.u32 %v16128_v34, %v14555_v48  ;;  %v14283_v35 = vld [vmem:[%s24912_s7 + $0x28] sm:$0xf]  ;;  %v16178_v34 = vld [vmem:[%s24912_s7 + $0x3ec] sm:$0xf] }
 0x746   :  { %8850 = vmatmul.bf16.vlgmr.msrb.gmra.mxu1 %v23171_v41  ;;  %8888 = vmatmul.bf16.vlgmr.msrb.gmra.mxu0 %v23174_v6  ;;  %v14539_v58 = vld [vmem:[%s24912_s7 + $0x228] sm:$0xf]  ;;  %v14412_v19 = vor.u32 %v16092_v26, %v14411_v10  ;;  %v16156_v56 = vld [vmem:[%s24912_s7 + $0x334] sm:$0xf0]  ;;  %v14621_v10 = vld [vmem:[%s24912_s7 + $0x2d8] sm:$0xf0] }
 0x747   :  { %8918 = vmatpush.bf16.msra.mxu1 %v14380_v32  ;;  %8956 = vmatpush.bf16.msra.mxu0 %v14636_v54  ;;  %v16132_v32 = vld [vmem:[%s24912_s7 + $0x274] sm:$0xf0]  ;;  %v14444_v54 = vor.u32 %v16100_v13, %v14443_v20  ;;  %v14667_v11 = vld [vmem:[%s24912_s7 + $0x328] sm:$0xf]  ;;  %v14509_v20 = vld [vmem:[%s24912_s7 + $0x1f8] sm:$0xf0] }
 0x748   :  { %8938 = vmatpush.bf16.msra.mxu3 %v14492_v22  ;;  %8907 = vmatmul.bf16.vlgmr.msrb.gmra.mxu2 %v23182_v47  ;;  %v7926_v60 = vpop.f32.mrf.mxu3  ;;  %v16096_v22 = vld [vmem:[%s24912_s7 + $0x154] sm:$0xf0]  ;;  %v14572_v28 = vor.u32 %v16132_v32, %v14571_v16  ;;  %v14395_v4 = vld [vmem:[%s24912_s7 + $0x108] sm:$0xf] }
 0x749   :  { %8975 = vmatpush.bf16.msra.mxu2 %v14764_v36  ;;  %v7927_v49 = vadd.f32 %v7926_v60, %v7907_v59  ;;  %v14427_v36 = vld [vmem:[%s24912_s7 + $0x148] sm:$0xf]  ;;  %v16088_v59 = vld [vmem:[%s24912_s7 + $0x114] sm:$0xf0] }
 0x74a   :  { %v14428_v50 = vor.u32 %v16096_v22, %v14427_v36  ;;  %v14523_v1 = vld [vmem:[%s24912_s7 + $0x208] sm:$0xf]  ;;  %v16120_v30 = vld [vmem:[%s24912_s7 + $0x214] sm:$0xf0]  ;;  %v14396_v60 = vor.u32 %v16088_v59, %v14395_v4  ;;  %v14512_v22 = vor.u32 %v16114_v51, %v14509_v20  ;;  %v14349_v59 = vld [vmem:[%s24912_s7 + $0xb8] sm:$0xf0] }
 0x74b   :  { %8919 = vmatpush.bf16.msra.mxu1 %v14364_v62  ;;  %8957 = vmatpush.bf16.msra.mxu0 %v14620_v52  ;;  %v7946_v29 = vadd.f32 %v7945_v63, %v7927_v49  ;;  %v7964_v42 = vpop.f32.mrf.mxu2  ;;  %v7909_v62 = vpop.f32.mrf.mxu1  ;;  %v14267_v63 = vld [vmem:[%s24912_s7 + $0x8] sm:$0xf]  ;;  %v16146_v49 = vld [vmem:[%s24912_s7 + $0x2ec] sm:$0xf] }
 0x74c   :  { %8939 = vmatpush.bf16.msra.mxu3 %v14476_v38  ;;  %v7947_v52 = vpop.f32.mrf.mxu0  ;;  %v14300_v38 = vor.u32 %v16064_v55, %v14299_v40  ;;  %v14651_v36 = vld [vmem:[%s24912_s7 + $0x308] sm:$0xf]  ;;  %v16152_v40 = vld [vmem:[%s24912_s7 + $0x314] sm:$0xf0]  ;;  %v16110_v55 = vld [vmem:[%s24912_s7 + $0x1cc] sm:$0xf] }
 0x74d   :  { %8976 = vmatpush.bf16.msra.mxu2 %v14748_v12  ;;  %v23457_v31 = vadd.f32 %v7964_v42, %v7946_v29  ;;  %v14700_v12 = vor.u32 %v16164_v53, %v14699_v0  ;;  %v14668_v0 = vor.u32 %v16156_v56, %v14667_v11  ;;  %v14524_v53 = vor.u32 %v16120_v30, %v14523_v1  ;;  %v14493_v29 = vld [vmem:[%s24912_s7 + $0x1d8] sm:$0xf0]  ;;  %v16174_v11 = vld [vmem:[%s24912_s7 + $0x3cc] sm:$0xf] }
 0x74e   :  { %v14749_v56 = vld [vmem:[%s24912_s7 + $0x3d8] sm:$0xf0]  ;;  %v16170_v20 = vld [vmem:[%s24912_s7 + $0x3ac] sm:$0xf] }
 0x74f   :  { %8920 = vmatpush.bf16.msra.mxu1 %v14348_v23  ;;  %8958 = vmatpush.bf16.msra.mxu0 %v14604_v14  ;;  %v16160_v23 = vld [vmem:[%s24912_s7 + $0x354] sm:$0xf0]  ;;  %v14752_v51 = vor.u32 %v16174_v11, %v14749_v56  ;;  %v14733_v1 = vld [vmem:[%s24912_s7 + $0x3b8] sm:$0xf0]  ;;  %v16102_v30 = vld [vmem:[%s24912_s7 + $0x18c] sm:$0xf] }
 0x750   :  { %8940 = vmatpush.bf16.msra.mxu3 %v14460_v3  ;;  %v16124_v14 = vld [vmem:[%s24912_s7 + $0x234] sm:$0xf0]  ;;  %v7928_v43 = vpop.f32.mrf.mxu3  ;;  %v14684_v44 = vor.u32 %v16160_v23, %v14683_v27  ;;  %v14284_v3 = vor.u32 %v16060_v17, %v14283_v35  ;;  %v14496_v27 = vor.u32 %v16110_v55, %v14493_v29  ;;  %v16106_v35 = vld [vmem:[%s24912_s7 + $0x1ac] sm:$0xf]  ;;  %v14477_v17 = vld [vmem:[%s24912_s7 + $0x1b8] sm:$0xf0] }
 0x751   :  { %8977 = vmatpush.bf16.msra.mxu2 %v14732_v9  ;;  %v7929_v24 = vadd.f32 %v7928_v43, %v7909_v62  ;;  %v14540_v9 = vor.u32 %v16124_v14, %v14539_v58  ;;  %v14765_v62 = vld [vmem:[%s24912_s7 + $0x3f8] sm:$0xf0]  ;;  %v16098_v55 = vld [vmem:[%s24912_s7 + $0x16c] sm:$0xf] }
 0x752   :  { %v14768_v23 = vor.u32 %v16178_v34, %v14765_v62  ;;  %v14445_v29 = vld [vmem:[%s24912_s7 + $0x178] sm:$0xf0]  ;;  %v16062_v11 = vld [vmem:[%s24912_s7 + $0x4c] sm:$0xf] }
 0x753   :  { %8921 = vmatpush.bf16.msra.mxu1 %v14332_v46  ;;  %8959 = vmatpush.bf16.msra.mxu0 %v14588_v61  ;;  %v16056_v46 = vld [vmem:[%s24912_s7 + $0x14] sm:$0xf0]  ;;  %v7948_v13 = vadd.f32 %v7947_v52, %v7929_v24  ;;  %v7966_v61 = vpop.f32.mrf.mxu2  ;;  %v7912_v16 = vpop.f32.mrf.mxu1  ;;  %v16078_v52 = vld [vmem:[%s24912_s7 + $0xcc] sm:$0xf]  ;;  %v14301_v56 = vld [vmem:[%s24912_s7 + $0x58] sm:$0xf0] }
 0x754   :  { %8941 = vmatpush.bf16.msra.mxu3 %v14444_v54  ;;  %v7950_v32 = vpop.f32.mrf.mxu0  ;;  %v14381_v54 = vld [vmem:[%s24912_s7 + $0xf8] sm:$0xf0]  ;;  %v16074_v24 = vld [vmem:[%s24912_s7 + $0xac] sm:$0xf] }
 0x755   :  { %8978 = vmatpush.bf16.msra.mxu2 %v14716_v15  ;;  %v14637_v15 = vld [vmem:[%s24912_s7 + $0x2f8] sm:$0xf0]  ;;  %8874 = vmatmul.bf16.gmra.mxu3 %v23273_v37  ;;  %v14384_v42 = vor.u32 %v16082_v7, %v14381_v54 }
 0x756   :  { %8855 = vmatmul.bf16.gmra.mxu1 %v23284_v45  ;;  %8893 = vmatmul.bf16.gmra.mxu0 %v23298_v39  ;;  %v14640_v48 = vor.u32 %v16146_v49, %v14637_v15  ;;  %v14461_v7 = vld [vmem:[%s24912_s7 + $0x198] sm:$0xf0]  ;;  %v14736_v49 = vor.u32 %v16170_v20, %v14733_v1  ;;  %v16090_v20 = vld [vmem:[%s24912_s7 + $0x12c] sm:$0xf] }
 0x757   :  { %8922 = vmatpush.bf16.msra.mxu1 %v14316_v21  ;;  %8960 = vmatpush.bf16.msra.mxu0 %v14572_v28  ;;  %v23525_v21 = vadd.f32 %v7966_v61, %v7948_v13  ;;  %v14268_v28 = vor.u32 %v16056_v46, %v14267_v63  ;;  %v16138_v63 = vld [vmem:[%s24912_s7 + $0x2ac] sm:$0xf]  ;;  %v14480_v46 = vor.u32 %v16106_v35, %v14477_v17  ;;  %v14333_v54 = vld [vmem:[%s24912_s7 + $0x98] sm:$0xf0] }
 0x758   :  { %8942 = vmatpush.bf16.msra.mxu3 %v14428_v50  ;;  %8912 = vmatmul.bf16.gmra.mxu2 %v23309_v5  ;;  %v7931_v50 = vpop.f32.mrf.mxu3  ;;  %v14352_v13 = vor.u32 %v16074_v24, %v14349_v59  ;;  %v14464_v15 = vor.u32 %v16102_v30, %v14461_v7  ;;  %v16094_v35 = vld [vmem:[%s24912_s7 + $0x14c] sm:$0xf]  ;;  %v14429_v17 = vld [vmem:[%s24912_s7 + $0x158] sm:$0xf0]  ;;  %v14304_v30 = vor.u32 %v16062_v11, %v14301_v56  ;;  %v16403_v56 = vld [vmem:[%s24912_s7 + $0xaec] sm:$0xf0] }
 0x759   :  { %8979 = vmatpush.bf16.msra.mxu2 %v14700_v12  ;;  %v14365_v12 = vld [vmem:[%s24912_s7 + $0xd8] sm:$0xf0]  ;;  %v7932_v26 = vadd.f32 %v7931_v50, %v7912_v16  ;;  %v16066_v50 = vld [vmem:[%s24912_s7 + $0x6c] sm:$0xf] }
 0x75a   :  { %v14368_v43 = vor.u32 %v16078_v52, %v14365_v12  ;;  %v14317_v12 = vld [vmem:[%s24912_s7 + $0x78] sm:$0xf0] }
 0x75b   :  { %8923 = vmatpush.bf16.msra.mxu1 %v14300_v38  ;;  %8961 = vmatpush.bf16.msra.mxu0 %v14556_v57  ;;  %v16142_v38 = vld [vmem:[%s24912_s7 + $0x2cc] sm:$0xf]  ;;  %v14652_v57 = vor.u32 %v16152_v40, %v14651_v36  ;;  %v7951_v58 = vadd.f32 %v7950_v32, %v7932_v26  ;;  %v7969_v14 = vpop.f32.mrf.mxu2  ;;  %v14589_v36 = vld [vmem:[%s24912_s7 + $0x298] sm:$0xf0] }
 0x75c   :  { %8943 = vmatpush.bf16.msra.mxu3 %v14412_v19  ;;  %v14624_v19 = vor.u32 %v16142_v38, %v14621_v10  ;;  %v7952_v4 = vpop.f32.mrf.mxu0  ;;  %v14717_v40 = vld [vmem:[%s24912_s7 + $0x398] sm:$0xf0]  ;;  %v14448_v10 = vor.u32 %v16098_v55, %v14445_v29  ;;  %v16130_v26 = vld [vmem:[%s24912_s7 + $0x26c] sm:$0xf] }
 0x75d   :  { %8980 = vmatpush.bf16.msra.mxu2 %v14684_v44  ;;  %v7914_v44 = vpop.f32.mrf.mxu1  ;;  %v14557_v59 = vld [vmem:[%s24912_s7 + $0x258] sm:$0xf0]  ;;  %v16054_v29 = vld [vmem:[%s24912_s7 + $0xc] sm:$0xf] }
 0x75f   :  { %8924 = vmatpush.bf16.msra.mxu1 %v14284_v3  ;;  %8962 = vmatpush.bf16.msra.mxu0 %v14540_v9  ;;  %v14605_v3 = vld [vmem:[%s24912_s7 + $0x2b8] sm:$0xf0]  ;;  %v23585_v9 = vadd.f32 %v7969_v14, %v7951_v58  ;;  %v14320_v14 = vor.u32 %v16066_v50, %v14317_v12  ;;  %v16150_v12 = vld [vmem:[%s24912_s7 + $0x30c] sm:$0xf] }
 0x760   :  { %8944 = vmatpush.bf16.msra.mxu3 %v14396_v60  ;;  %v14608_v61 = vor.u32 %v16138_v63, %v14605_v3  ;;  %v7933_v16 = vpop.f32.mrf.mxu3  ;;  %v16070_v60 = vld [vmem:[%s24912_s7 + $0x8c] sm:$0xf]  ;;  %v14525_v50 = vld [vmem:[%s24912_s7 + $0x218] sm:$0xf0] }
 0x761   :  { %8981 = vmatpush.bf16.msra.mxu2 %v14668_v0  ;;  %v7934_v32 = vadd.f32 %v7933_v16, %v7914_v44  ;;  %v16134_v0 = vld [vmem:[%s24912_s7 + $0x28c] sm:$0xf]  ;;  %v14336_v34 = vor.u32 %v16070_v60, %v14333_v54  ;;  %v14432_v44 = vor.u32 %v16094_v35, %v14429_v17  ;;  %v14285_v60 = vld [vmem:[%s24912_s7 + $0x38] sm:$0xf0]  ;;  %v15011_v17 = vld [vmem:[%s24912_s7 + $0x8e0] sm:$0xf] }
 0x762   :  { %v14592_v52 = vor.u32 %v16134_v0, %v14589_v36  ;;  %v16158_v63 = vld [vmem:[%s24912_s7 + $0x34c] sm:$0xf]  ;;  %v14541_v0 = vld [vmem:[%s24912_s7 + $0x238] sm:$0xf0] }
 0x763   :  { %8925 = vmatpush.bf16.msra.mxu1 %v14268_v28  ;;  %8963 = vmatpush.bf16.msra.mxu0 %v14524_v53  ;;  %v7953_v28 = vadd.f32 %v7952_v4, %v7934_v32  ;;  %v7971_v53 = vpop.f32.mrf.mxu2  ;;  %v16126_v4 = vld [vmem:[%s24912_s7 + $0x24c] sm:$0xf] }
 0x764   :  { %9013 = vmatpush.bf16.msrb.mxu3 %v14512_v22  ;;  %v16166_v22 = vld [vmem:[%s24912_s7 + $0x38c] sm:$0xf]  ;;  %v14560_v16 = vor.u32 %v16126_v4, %v14557_v59 }
 0x765   :  { %8982 = vmatpush.bf16.msra.mxu2 %v14652_v57  ;;  %v23623_v62 = vadd.f32 %v7971_v53, %v7953_v28  ;;  %8945 = vmatmul.bf16.vlgmr.msra.gmra.mxu3 %v23160_v18  ;;  %v14720_v38 = vor.u32 %v16166_v22, %v14717_v40  ;;  %v14573_v57 = vld [vmem:[%s24912_s7 + $0x278] sm:$0xf0]  ;;  %v16058_v32 = vld [vmem:[%s24912_s7 + $0x2c] sm:$0xf] }
 0x766   :  { %8926 = vmatmul.bf16.vlgmr.msra.gmra.mxu1 %v23171_v41  ;;  %8964 = vmatmul.bf16.vlgmr.msra.gmra.mxu0 %v23174_v6  ;;  %v16154_v36 = vld [vmem:[%s24912_s7 + $0x32c] sm:$0xf]  ;;  %v14669_v22 = vld [vmem:[%s24912_s7 + $0x338] sm:$0xf0]  ;;  %v14288_v55 = vor.u32 %v16058_v32, %v14285_v60  ;;  %v16399_v60 = vld [vmem:[%s24912_s7 + $0xacc] sm:$0xf0] }
 0x767   :  { %8994 = vmatpush.bf16.msrb.mxu1 %v14384_v42  ;;  %9032 = vmatpush.bf16.msrb.mxu0 %v14640_v48  ;;  %v7983_v42 = vpop.f32.mrf.mxu1  ;;  %v8021_v48 = vpop.f32.mrf.mxu0  ;;  %v16086_v28 = vld [vmem:[%s24912_s7 + $0x10c] sm:$0xf]  ;;  %v14397_v53 = vld [vmem:[%s24912_s7 + $0x118] sm:$0xf0] }
 0x768   :  { %9014 = vmatpush.bf16.msrb.mxu3 %v14496_v27  ;;  %v16162_v27 = vld [vmem:[%s24912_s7 + $0x36c] sm:$0xf]  ;;  %8983 = vmatmul.bf16.vlgmr.msra.gmra.mxu2 %v23182_v47  ;;  %v8002_v58 = vpop.f32.mrf.mxu3 }
 0x769   :  { %9051 = vmatpush.bf16.msrb.mxu2 %v14768_v23  ;;  %v14701_v23 = vld [vmem:[%s24912_s7 + $0x378] sm:$0xf0] }
 0x76a   :  { %v14704_v24 = vor.u32 %v16162_v27, %v14701_v23  ;;  %v16371_v27 = vld [vmem:[%s24912_s7 + $0x9ec] sm:$0xf0] }
 0x76b   :  { %8995 = vmatpush.bf16.msrb.mxu1 %v14368_v43  ;;  %9033 = vmatpush.bf16.msrb.mxu0 %v14624_v19  ;;  %v8003_v43 = vadd.f32 %v8002_v58, %v7983_v42  ;;  %v14576_v19 = vor.u32 %v16130_v26, %v14573_v57  ;;  %v14269_v42 = vld [vmem:[%s24912_s7 + $0x18] sm:$0xf0]  ;;  %v15139_v57 = vld [vmem:[%s24912_s7 + $0x9e0] sm:$0xf]  ;;  %v16339_v58 = vld [vmem:[%s24912_s7 + $0x8ec] sm:$0xf0] }
 0x76c   :  { %9015 = vmatpush.bf16.msrb.mxu3 %v14480_v46  ;;  %v8040_v46 = vpop.f32.mrf.mxu2  ;;  %v14653_v26 = vld [vmem:[%s24912_s7 + $0x318] sm:$0xf0]  ;;  %v14272_v11 = vor.u32 %v16054_v29, %v14269_v42  ;;  %v14979_v42 = vld [vmem:[%s24912_s7 + $0x8a0] sm:$0xf] }
 0x76d   :  { %9052 = vmatpush.bf16.msrb.mxu2 %v14752_v51  ;;  %v8022_v3 = vadd.f32 %v8021_v48, %v8003_v43  ;;  %v14685_v51 = vld [vmem:[%s24912_s7 + $0x358] sm:$0xf0] }
 0x76e   :  { %v14688_v54 = vor.u32 %v16158_v63, %v14685_v51  ;;  %v15140_v63 = vor.u32 %v16371_v27, %v15139_v57  ;;  %v15123_v51 = vld [vmem:[%s24912_s7 + $0x9c0] sm:$0xf] }
 0x76f   :  { %8996 = vmatpush.bf16.msrb.mxu1 %v14352_v13  ;;  %9034 = vmatpush.bf16.msrb.mxu0 %v14608_v61  ;;  %v14413_v13 = vld [vmem:[%s24912_s7 + $0x138] sm:$0xf0]  ;;  %v7985_v61 = vpop.f32.mrf.mxu1  ;;  %v8023_v1 = vpop.f32.mrf.mxu0  ;;  %v23677_v7 = vadd.f32 %v8040_v46, %v8022_v3  ;;  %v14656_v3 = vor.u32 %v16150_v12, %v14653_v26  ;;  %v15012_v46 = vor.u32 %v16339_v58, %v15011_v17  ;;  %v16395_v12 = vld [vmem:[%s24912_s7 + $0xaac] sm:$0xf0] }
 0x770   :  { %9016 = vmatpush.bf16.msrb.mxu3 %v14464_v15  ;;  %v16122_v15 = vld [vmem:[%s24912_s7 + $0x22c] sm:$0xf]  ;;  %v8004_v40 = vpop.f32.mrf.mxu3  ;;  %v16359_v58 = vld [vmem:[%s24912_s7 + $0x98c] sm:$0xf0] }
 0x771   :  { %9053 = vmatpush.bf16.msrb.mxu2 %v14736_v49  ;;  %v14416_v49 = vor.u32 %v16090_v20, %v14413_v13  ;;  %v8005_v48 = vadd.f32 %v8004_v40, %v7985_v61  ;;  %v16367_v20 = vld [vmem:[%s24912_s7 + $0x9cc] sm:$0xf0] }
 0x773   :  { %8997 = vmatpush.bf16.msrb.mxu1 %v14336_v34  ;;  %9035 = vmatpush.bf16.msrb.mxu0 %v14592_v52  ;;  %v14544_v34 = vor.u32 %v16122_v15, %v14541_v0  ;;  %v16118_v52 = vld [vmem:[%s24912_s7 + $0x20c] sm:$0xf]  ;;  %v8024_v23 = vadd.f32 %v8023_v1, %v8005_v48  ;;  %v14995_v1 = vld [vmem:[%s24912_s7 + $0x8c0] sm:$0xf]  ;;  %v15124_v0 = vor.u32 %v16367_v20, %v15123_v51  ;;  %v16331_v48 = vld [vmem:[%s24912_s7 + $0x8ac] sm:$0xf0] }
 0x774   :  { %9017 = vmatpush.bf16.msrb.mxu3 %v14448_v10  ;;  %v14400_v10 = vor.u32 %v16086_v28, %v14397_v53  ;;  %v8042_v35 = vpop.f32.mrf.mxu2  ;;  %v14528_v59 = vor.u32 %v16118_v52, %v14525_v50  ;;  %v16363_v28 = vld [vmem:[%s24912_s7 + $0x9ac] sm:$0xf0]  ;;  %v14980_v27 = vor.u32 %v16331_v48, %v14979_v42  ;;  %v15187_v48 = vld [vmem:[%s24912_s7 + $0xa40] sm:$0xf] }
 0x775   :  { %9054 = vmatpush.bf16.msrb.mxu2 %v14720_v38  ;;  %v14672_v38 = vor.u32 %v16154_v36, %v14669_v22  ;;  %v23745_v4 = vadd.f32 %v8042_v35, %v8024_v23  ;;  %8950 = vmatmul.bf16.gmra.mxu3 %v23273_v37  ;;  %v15107_v22 = vld [vmem:[%s24912_s7 + $0x9a0] sm:$0xf] }
 0x776   :  { %8931 = vmatmul.bf16.gmra.mxu1 %v23284_v45  ;;  %8969 = vmatmul.bf16.gmra.mxu0 %v23298_v39  ;;  %v15108_v57 = vor.u32 %v16363_v28, %v15107_v22  ;;  %v15091_v23 = vld [vmem:[%s24912_s7 + $0x980] sm:$0xf] }
 0x777   :  { %8998 = vmatpush.bf16.msrb.mxu1 %v14320_v14  ;;  %9036 = vmatpush.bf16.msrb.mxu0 %v14576_v19  ;;  %v15267_v14 = vld [vmem:[%s24912_s7 + $0xae0] sm:$0xf]  ;;  %v7988_v43 = vpop.f32.mrf.mxu1  ;;  %v8026_v19 = vpop.f32.mrf.mxu0 }
 0x778   :  { %9018 = vmatpush.bf16.msrb.mxu3 %v14432_v44  ;;  %v16435_v44 = vld [vmem:[%s24912_s7 + $0xbec] sm:$0xf0]  ;;  %v15268_v13 = vor.u32 %v16403_v56, %v15267_v14  ;;  %8988 = vmatmul.bf16.gmra.mxu2 %v23309_v5  ;;  %v8007_v32 = vpop.f32.mrf.mxu3  ;;  %v14963_v14 = vld [vmem:[%s24912_s7 + $0x880] sm:$0xf] }
 0x779   :  { %9055 = vmatpush.bf16.msrb.mxu2 %v14704_v24  ;;  %v15395_v24 = vld [vmem:[%s24912_s7 + $0xbe0] sm:$0xf]  ;;  %v8008_v15 = vadd.f32 %v8007_v32, %v7988_v43  ;;  %v16327_v43 = vld [vmem:[%s24912_s7 + $0x88c] sm:$0xf0] }
 0x77a   :  { %v15396_v61 = vor.u32 %v16435_v44, %v15395_v24  ;;  %v15219_v56 = vld [vmem:[%s24912_s7 + $0xa80] sm:$0xf]  ;;  %v16391_v24 = vld [vmem:[%s24912_s7 + $0xa8c] sm:$0xf0]  ;;  %v15092_v44 = vor.u32 %v16359_v58, %v15091_v23 }
 0x77b   :  { %8999 = vmatpush.bf16.msrb.mxu1 %v14304_v30  ;;  %9037 = vmatpush.bf16.msrb.mxu0 %v14560_v16  ;;  %v16335_v30 = vld [vmem:[%s24912_s7 + $0x8cc] sm:$0xf0]  ;;  %v15251_v16 = vld [vmem:[%s24912_s7 + $0xac0] sm:$0xf]  ;;  %v8027_v53 = vadd.f32 %v8026_v19, %v8008_v15  ;;  %v15220_v32 = vor.u32 %v16391_v24, %v15219_v56 }
 0x77c   :  { %9019 = vmatpush.bf16.msrb.mxu3 %v14416_v49  ;;  %v16431_v49 = vld [vmem:[%s24912_s7 + $0xbcc] sm:$0xf0]  ;;  %v14996_v36 = vor.u32 %v16335_v30, %v14995_v1  ;;  %v8045_v40 = vpop.f32.mrf.mxu2  ;;  %v15331_v22 = vld [vmem:[%s24912_s7 + $0xb60] sm:$0xf] }
 0x77d   :  { %9056 = vmatpush.bf16.msrb.mxu2 %v14688_v54  ;;  %v15379_v54 = vld [vmem:[%s24912_s7 + $0xbc0] sm:$0xf]  ;;  %v23799_v26 = vadd.f32 %v8045_v40, %v8027_v53  ;;  %v16323_v1 = vld [vmem:[%s24912_s7 + $0x86c] sm:$0xf0] }
 0x77e   :  { %v15380_v29 = vor.u32 %v16431_v49, %v15379_v54  ;;  %v15203_v49 = vld [vmem:[%s24912_s7 + $0xa60] sm:$0xf]  ;;  %v16387_v15 = vld [vmem:[%s24912_s7 + $0xa6c] sm:$0xf0] }
 0x77f   :  { %9000 = vmatpush.bf16.msrb.mxu1 %v14288_v55  ;;  %9038 = vmatpush.bf16.msrb.mxu0 %v14544_v34  ;;  %v15252_v55 = vor.u32 %v16399_v60, %v15251_v16  ;;  %v15235_v34 = vld [vmem:[%s24912_s7 + $0xaa0] sm:$0xf]  ;;  %v7990_v52 = vpop.f32.mrf.mxu1  ;;  %v8028_v50 = vpop.f32.mrf.mxu0  ;;  %v16351_v53 = vld [vmem:[%s24912_s7 + $0x94c] sm:$0xf0]  ;;  %v15204_v42 = vor.u32 %v16387_v15, %v15203_v49 }
 0x780   :  { %9020 = vmatpush.bf16.msrb.mxu3 %v14400_v10  ;;  %v16427_v10 = vld [vmem:[%s24912_s7 + $0xbac] sm:$0xf0]  ;;  %v15236_v35 = vor.u32 %v16395_v12, %v15235_v34  ;;  %v8009_v19 = vpop.f32.mrf.mxu3  ;;  %v15059_v28 = vld [vmem:[%s24912_s7 + $0x940] sm:$0xf] }
 0x781   :  { %9057 = vmatpush.bf16.msrb.mxu2 %v14672_v38  ;;  %v15363_v38 = vld [vmem:[%s24912_s7 + $0xba0] sm:$0xf]  ;;  %v16383_v34 = vld [vmem:[%s24912_s7 + $0xa4c] sm:$0xf0] }
 0x782   :  { %v15364_v17 = vor.u32 %v16427_v10, %v15363_v38  ;;  %v14931_v40 = vld [vmem:[%s24912_s7 + $0x840] sm:$0xf]  ;;  %v16415_v12 = vld [vmem:[%s24912_s7 + $0xb4c] sm:$0xf0] }
 0x783   :  { %9001 = vmatpush.bf16.msrb.mxu1 %v14272_v11  ;;  %9039 = vmatpush.bf16.msrb.mxu0 %v14528_v59  ;;  %v8010_v11 = vadd.f32 %v8009_v19, %v7990_v52  ;;  %v14964_v59 = vor.u32 %v16327_v43, %v14963_v14  ;;  %v15060_v52 = vor.u32 %v16351_v53, %v15059_v28  ;;  %v15043_v38 = vld [vmem:[%s24912_s7 + $0x920] sm:$0xf]  ;;  %v16375_v28 = vld [vmem:[%s24912_s7 + $0xa0c] sm:$0xf0] }
 0x784   :  { %9954 = vmatpush.bf16.msra.mxu3 %v15140_v63  ;;  %v15347_v63 = vld [vmem:[%s24912_s7 + $0xb80] sm:$0xf]  ;;  %v8047_v20 = vpop.f32.mrf.mxu2  ;;  %v15188_v14 = vor.u32 %v16383_v34, %v15187_v48 }
 0x785   :  { %9058 = vmatpush.bf16.msrb.mxu2 %v14656_v3  ;;  %v16423_v3 = vld [vmem:[%s24912_s7 + $0xb8c] sm:$0xf0]  ;;  %v8029_v51 = vadd.f32 %v8028_v50, %v8010_v11  ;;  %9021 = vmatmul.bf16.vlgmr.msrb.gmra.mxu3 %v23160_v18  ;;  %v14915_v23 = vld [vmem:[%s24912_s7 + $0x820] sm:$0xf] }
 0x786   :  { %v15348_v54 = vor.u32 %v16423_v3, %v15347_v63  ;;  %v16419_v18 = vld [vmem:[%s24912_s7 + $0xb6c] sm:$0xf0]  ;;  %9002 = vmatmul.bf16.vlgmr.msrb.gmra.mxu1 %v23171_v41  ;;  %9040 = vmatmul.bf16.vlgmr.msrb.gmra.mxu0 %v23174_v6  ;;  %v23891_v43 = vld [vmem:[#allocation2 + $0x20] sm:$0xff] }
 0x787   :  { %9935 = vmatpush.bf16.msra.mxu1 %v15012_v46  ;;  %9973 = vmatpush.bf16.msra.mxu0 %v15268_v13  ;;  %v15075_v46 = vld [vmem:[%s24912_s7 + $0x960] sm:$0xf]  ;;  %v16355_v13 = vld [vmem:[%s24912_s7 + $0x96c] sm:$0xf0]  ;;  %v8059_v30 = vpop.f32.mrf.mxu1  ;;  %v8097_v16 = vpop.f32.mrf.mxu0  ;;  %v23837_v60 = vadd.f32 %v8047_v20, %v8029_v51  ;;  %v15332_v6 = vor.u32 %v16419_v18, %v15331_v22  ;;  %v9103_v19 = vrot.slane %v23891_v43, 2 }
 0x788   :  { %9955 = vmatpush.bf16.msra.mxu3 %v15124_v0  ;;  %v15076_v0 = vor.u32 %v16355_v13, %v15075_v46  ;;  %9059 = vmatmul.bf16.vlgmr.msrb.gmra.mxu2 %v23182_v47  ;;  %v15315_v47 = vld [vmem:[%s24912_s7 + $0xb40] sm:$0xf]  ;;  %v23905_v3 = vld [vmem:[#allocation2 + $0x30] sm:$0xff] }
 0x789   :  { %9992 = vmatpush.bf16.msra.mxu2 %v15396_v61  ;;  %v14947_v61 = vld [vmem:[%s24912_s7 + $0x860] sm:$0xf]  ;;  %v15316_v56 = vor.u32 %v16415_v12, %v15315_v47  ;;  %v9109_v46 = vrot.slane %v23905_v3, 2  ;;  %v15269_v47 = vld [vmem:[%s24912_s7 + $0xaf0] sm:$0xf0] }
 0x78a   :  { %v15171_v24 = vld [vmem:[%s24912_s7 + $0xa20] sm:$0xf] }
 0x78b   :  { %9936 = vmatpush.bf16.msra.mxu1 %v14996_v36  ;;  %9974 = vmatpush.bf16.msra.mxu0 %v15252_v55  ;;  %v14948_v36 = vor.u32 %v16323_v1, %v14947_v61  ;;  %v16319_v55 = vld [vmem:[%s24912_s7 + $0x84c] sm:$0xf0]  ;;  %v15299_v13 = vld [vmem:[%s24912_s7 + $0xb20] sm:$0xf] }
 0x78c   :  { %9956 = vmatpush.bf16.msra.mxu3 %v15108_v57  ;;  %v14932_v50 = vor.u32 %v16319_v55, %v14931_v40  ;;  %v8116_v57 = vpop.f32.mrf.mxu2  ;;  %v16411_v61 = vld [vmem:[%s24912_s7 + $0xb2c] sm:$0xf0]  ;;  %v15027_v1 = vld [vmem:[%s24912_s7 + $0x900] sm:$0xf] }
 0x78d   :  { %9993 = vmatpush.bf16.msra.mxu2 %v15380_v29  ;;  %v8078_v29 = vpop.f32.mrf.mxu3  ;;  %v15155_v15 = vld [vmem:[%s24912_s7 + $0xa00] sm:$0xf]  ;;  %v15300_v18 = vor.u32 %v16411_v61, %v15299_v13  ;;  %v16407_v40 = vld [vmem:[%s24912_s7 + $0xb0c] sm:$0xf0]  ;;  %v15125_v13 = vld [vmem:[%s24912_s7 + $0x9d0] sm:$0xf0] }
 0x78e   :  { %v8079_v41 = vadd.f32 %v8078_v29, %v8059_v30  ;;  %v16343_v30 = vld [vmem:[%s24912_s7 + $0x90c] sm:$0xf0]  ;;  %v15283_v53 = vld [vmem:[%s24912_s7 + $0xb00] sm:$0xf]  ;;  %v9071_v61 = vld [vmem:[#allocation2 + $0x8] sm:$0xfc] }
 0x78f   :  { %9937 = vmatpush.bf16.msra.mxu1 %v14980_v27  ;;  %9975 = vmatpush.bf16.msra.mxu0 %v15236_v35  ;;  %v16347_v27 = vld [vmem:[%s24912_s7 + $0x92c] sm:$0xf0]  ;;  %v8099_v58 = vpop.f32.mrf.mxu0  ;;  %v15028_v55 = vor.u32 %v16343_v30, %v15027_v1  ;;  %v9075_v1 = vld [vmem:[#allocation2 + $0x48] sm:$0x3] }
 0x790   :  { %9957 = vmatpush.bf16.msra.mxu3 %v15092_v44  ;;  %v8098_v10 = vadd.f32 %v8097_v16, %v8079_v41  ;;  %v16315_v35 = vld [vmem:[%s24912_s7 + $0x82c] sm:$0xf0]  ;;  %v15044_v51 = vor.u32 %v16347_v27, %v15043_v38  ;;  %v14899_v16 = vld [vmem:[%s24912_s7 + $0x800] sm:$0xf]  ;;  %v15141_v41 = vld [vmem:[%s24912_s7 + $0x9f0] sm:$0xf0] }
 0x791   :  { %9994 = vmatpush.bf16.msra.mxu2 %v15364_v17  ;;  %v8061_v17 = vpop.f32.mrf.mxu1  ;;  %v16379_v44 = vld [vmem:[%s24912_s7 + $0xa2c] sm:$0xf0]  ;;  %v14916_v20 = vor.u32 %v16315_v35, %v14915_v23  ;;  %v23961_v27 = vld [vmem:[#allocation2 + $0x38] sm:$0xff]  ;;  %v16433_v35 = vld [vmem:[%s24912_s7 + $0xbe4] sm:$0xf] }
 0x792   :  { %v23894_v11 = vadd.f32 %v8116_v57, %v8098_v10  ;;  %v15172_v49 = vor.u32 %v16379_v44, %v15171_v24  ;;  %v15156_v10 = vor.u32 %v16375_v28, %v15155_v15  ;;  %v9112_v23 = vrot.slane %v23961_v27, 2  ;;  %v15381_v15 = vld [vmem:[%s24912_s7 + $0xbd0] sm:$0xf0] }
 0x793   :  { %9938 = vmatpush.bf16.msra.mxu1 %v14964_v59  ;;  %9976 = vmatpush.bf16.msra.mxu0 %v15220_v32  ;;  %v23902_v59 = vld [vmem:[#allocation2 + $0x28] sm:$0xff]  ;;  %v16311_v32 = vld [vmem:[%s24912_s7 + $0x80c] sm:$0xf0] }
 0x794   :  { %9958 = vmatpush.bf16.msra.mxu3 %v15076_v0  ;;  %v9106_v63 = vrot.slane %v23902_v59, 2  ;;  %v23929_v0 = vld [vmem:[#allocation2] sm:$0xfc]  ;;  %v14900_v29 = vor.u32 %v16311_v32, %v14899_v16  ;;  %v8118_v34 = vpop.f32.mrf.mxu2  ;;  %v14997_v16 = vld [vmem:[%s24912_s7 + $0x8d0] sm:$0xf0] }
 0x795   :  { %9995 = vmatpush.bf16.msra.mxu2 %v15348_v54  ;;  %v8080_v54 = vpop.f32.mrf.mxu3  ;;  %v9102_v57 = vrot.slane %v23929_v0, 2  ;;  %9026 = vmatmul.bf16.gmra.mxu3 %v23273_v37  ;;  %v16333_v37 = vld [vmem:[%s24912_s7 + $0x8c4] sm:$0xf] }
 0x796   :  { %v8081_v22 = vadd.f32 %v8080_v54, %v8061_v17  ;;  %v15397_v17 = vld [vmem:[%s24912_s7 + $0xbf0] sm:$0xf0]  ;;  %9007 = vmatmul.bf16.gmra.mxu1 %v23284_v45  ;;  %9045 = vmatmul.bf16.gmra.mxu0 %v23298_v39  ;;  %v16397_v32 = vld [vmem:[%s24912_s7 + $0xac4] sm:$0xf]  ;;  %v15000_v28 = vor.u32 %v16333_v37, %v14997_v16 }
 0x797   :  { %9939 = vmatpush.bf16.msra.mxu1 %v14948_v36  ;;  %9977 = vmatpush.bf16.msra.mxu0 %v15204_v42  ;;  %v23931_v36 = vld [vmem:[#allocation2 + $0x40] sm:$0x3]  ;;  %v16369_v42 = vld [vmem:[%s24912_s7 + $0x9e4] sm:$0xf]  ;;  %v8102_v38 = vpop.f32.mrf.mxu0  ;;  %v15400_v30 = vor.u32 %v16433_v35, %v15397_v17  ;;  %v15253_v54 = vld [vmem:[%s24912_s7 + $0xad0] sm:$0xf0] }
 0x798   :  { %9959 = vmatpush.bf16.msra.mxu3 %v15060_v52  ;;  %v8100_v48 = vadd.f32 %v8099_v58, %v8081_v22  ;;  %v15013_v52 = vld [vmem:[%s24912_s7 + $0x8f0] sm:$0xf0]  ;;  %v15144_v24 = vor.u32 %v16369_v42, %v15141_v41  ;;  %9064 = vmatmul.bf16.gmra.mxu2 %v23309_v5  ;;  %v24001_v22 = vld [vmem:[#allocation2 + $0x18] sm:$0xfc]  ;;  %v9116_v35 = vrot.slane %v9075_v1, 2 }
 0x799   :  { %9996 = vmatpush.bf16.msra.mxu2 %v15332_v6  ;;  %v16337_v6 = vld [vmem:[%s24912_s7 + $0x8e4] sm:$0xf]  ;;  %v8064_v12 = vpop.f32.mrf.mxu1  ;;  %v9072_v39 = vld [vmem:[#allocation2 + $0x10] sm:$0xfc]  ;;  %v9111_v43 = vrot.slane %v24001_v22, 2 }
 0x79a   :  { %v23970_v58 = vadd.f32 %v8118_v34, %v8100_v48  ;;  %v15016_v44 = vor.u32 %v16337_v6, %v15013_v52  ;;  %v14981_v48 = vld [vmem:[%s24912_s7 + $0x8b0] sm:$0xf0]  ;;  %v16393_v34 = vld [vmem:[%s24912_s7 + $0xaa4] sm:$0xf] }
 0x79b   :  { %9940 = vmatpush.bf16.msra.mxu1 %v14932_v50  ;;  %9978 = vmatpush.bf16.msra.mxu0 %v15188_v14  ;;  %v16401_v50 = vld [vmem:[%s24912_s7 + $0xae4] sm:$0xf]  ;;  %v15284_v14 = vor.u32 %v16407_v40, %v15283_v53  ;;  %v15256_v53 = vor.u32 %v16397_v32, %v15253_v54  ;;  %v15237_v52 = vld [vmem:[%s24912_s7 + $0xab0] sm:$0xf0] }
 0x79c   :  { %9960 = vmatpush.bf16.msra.mxu3 %v15044_v51  ;;  %v15272_v51 = vor.u32 %v16401_v50, %v15269_v47  ;;  %v16361_v40 = vld [vmem:[%s24912_s7 + $0x9a4] sm:$0xf]  ;;  %v8121_v41 = vpop.f32.mrf.mxu2  ;;  %v15093_v1 = vld [vmem:[%s24912_s7 + $0x990] sm:$0xf0] }
 0x79d   :  { %9997 = vmatpush.bf16.msra.mxu2 %v15316_v56  ;;  %v9114_v56 = vrot.slane %v23931_v36, 2  ;;  %v8083_v45 = vpop.f32.mrf.mxu3  ;;  %v9076_v36 = vld [vmem:[#allocation2 + $0x50] sm:$0x3]  ;;  %v16425_v17 = vld [vmem:[%s24912_s7 + $0xba4] sm:$0xf] }
 0x79e   :  { %v8084_v0 = vadd.f32 %v8083_v45, %v8064_v12  ;;  %v9104_v12 = vsel %vm25096_vm1, %v9102_v57, %v9103_v19  ;;  %v16357_v37 = vld [vmem:[%s24912_s7 + $0x984] sm:$0xf]  ;;  %v14965_v16 = vld [vmem:[%s24912_s7 + $0x890] sm:$0xf0]  ;;  %v9117_v45 = vsel %vm25099_vm5, %v9106_v63, %v9116_v35  ;;  %v24111_v35 = vld [vmem:[#allocation2 + $0x88] sm:$0xff]  ;;  %vm25112_vm5 = vcmask 1040384  }
 0x79f   :  { %9941 = vmatpush.bf16.msra.mxu1 %v14916_v20  ;;  %9979 = vmatpush.bf16.msra.mxu0 %v15172_v49  ;;  %v16365_v20 = vld [vmem:[%s24912_s7 + $0x9c4] sm:$0xf]  ;;  %v8104_v47 = vpop.f32.mrf.mxu0 }
 0x7a0   :  { %9961 = vmatpush.bf16.msra.mxu3 %v15028_v55  ;;  %v16429_v49 = vld [vmem:[%s24912_s7 + $0xbc4] sm:$0xf]  ;;  %v15128_v5 = vor.u32 %v16365_v20, %v15125_v13  ;;  %v15109_v55 = vld [vmem:[%s24912_s7 + $0x9b0] sm:$0xf0]  ;;  %v8103_v42 = vadd.f32 %v8102_v38, %v8084_v0  ;;  %v9115_v38 = vsel %vm25097_vm3, %v9103_v19, %v9114_v56  ;;  %v15240_v13 = vor.u32 %v16393_v34, %v15237_v52 }
 0x7a1   :  { %9998 = vmatpush.bf16.msra.mxu2 %v15300_v18  ;;  %v24003_v18 = vld [vmem:[#allocation2 + $0x58] sm:$0x3]  ;;  %v15384_v6 = vor.u32 %v16429_v49, %v15381_v15  ;;  %v8066_v50 = vpop.f32.mrf.mxu1  ;;  %v15112_v57 = vor.u32 %v16361_v40, %v15109_v55  ;;  %v24037_v20 = vld [vmem:[#allocation2 + $0x60] sm:$0xfc]  ;;  %v24065_v22 = vpack.c.bf16 %v9115_v38, %v9104_v12  ;;  %v15077_v34 = vld [vmem:[%s24912_s7 + $0x970] sm:$0xf0] }
 0x7a2   :  { %v9120_v19 = vrot.slane %v24003_v18, 2  ;;  %v9122_v49 = vrot.slane %v24037_v20, 2  ;;  %v24062_v15 = vld [vmem:[#allocation2 + $0x80] sm:$0xff]  ;;  %v14901_v20 = vld [vmem:[%s24912_s7 + $0x810] sm:$0xf0] }
 0x7a3   :  { %9942 = vmatpush.bf16.msra.mxu1 %v14900_v29  ;;  %9980 = vmatpush.bf16.msra.mxu0 %v15156_v10  ;;  %v16329_v29 = vld [vmem:[%s24912_s7 + $0x8a4] sm:$0xf]  ;;  %v9105_v10 = vrot.slane %v9071_v61, 2  ;;  %v9123_v0 = vrot.slane %v24062_v15, 2  ;;  %v16468_v15 = vld [vmem:[#allocation2 + $0x98] sm:$0xff] }
 0x7a4   :  { %10030 = vmatpush.bf16.msrb.mxu3 %v15144_v24  ;;  %v24035_v24 = vadd.f32 %v8121_v41, %v8103_v42  ;;  %v14984_v56 = vor.u32 %v16329_v29, %v14981_v48  ;;  %v16389_v59 = vld [vmem:[%s24912_s7 + $0xa84] sm:$0xf]  ;;  %v15349_v29 = vld [vmem:[%s24912_s7 + $0xb90] sm:$0xf0]  ;;  %v8123_v3 = vpop.f32.mrf.mxu2  ;;  %v9121_v48 = vsel %vm25103_vm2, %v9112_v23, %v9120_v19 }
 0x7a5   :  { %9999 = vmatpush.bf16.msra.mxu2 %v15284_v14  ;;  %v15365_v14 = vld [vmem:[%s24912_s7 + $0xbb0] sm:$0xf0]  ;;  %v8085_v32 = vpop.f32.mrf.mxu3  ;;  %v9107_v54 = vsel %vm25098_vm4, %v9105_v10, %v9106_v63  ;;  %v16421_v55 = vld [vmem:[%s24912_s7 + $0xb84] sm:$0xf]  ;;  %v24108_v10 = vld [vmem:[#allocation2 + $0xa8] sm:$0x3] }
 0x7a6   :  { %v15368_v61 = vor.u32 %v16425_v17, %v15365_v14  ;;  %v15221_v63 = vld [vmem:[%s24912_s7 + $0xa90] sm:$0xf0]  ;;  %v16353_v42 = vld [vmem:[%s24912_s7 + $0x964] sm:$0xf]  ;;  %v9126_v17 = vrot.slane %v24111_v35, 2  ;;  %9943 = vmatmul.bf16.vlgmr.msra.gmra.mxu1 %v24065_v22 }
 0x7a7   :  { %10011 = vmatpush.bf16.msrb.mxu1 %v15016_v44  ;;  %10049 = vmatpush.bf16.msrb.mxu0 %v15272_v51  ;;  %v9108_v44 = vrot.slane %v9072_v39, 2  ;;  %v9118_v51 = vrot.slane %v9076_v36, 2  ;;  %v24059_v39 = vld [vmem:[#allocation2 + $0xa0] sm:$0x3]  ;;  %v8086_v36 = vadd.f32 %v8085_v32, %v8066_v50  ;;  %v16321_v52 = vld [vmem:[%s24912_s7 + $0x864] sm:$0xf]  ;;  %v8813_v12 = vpop.f32.mrf.mxu0  ;;  %v15224_v38 = vor.u32 %v16389_v59, %v15221_v63 }
 0x7a8   :  { %10031 = vmatpush.bf16.msrb.mxu3 %v15128_v5  ;;  %v24076_v5 = vld [vmem:[#allocation2 + $0x68] sm:$0xfc]  ;;  %v14949_v50 = vld [vmem:[%s24912_s7 + $0x870] sm:$0xf0]  ;;  %v9134_v27 = vrot.slane %v24059_v39, 2 }
 0x7a9   :  { %10068 = vmatpush.bf16.msrb.mxu2 %v15400_v30  ;;  %v16325_v30 = vld [vmem:[%s24912_s7 + $0x884] sm:$0xf]  ;;  %v9110_v18 = vsel %vm25100_vm6, %v9108_v44, %v9109_v46  ;;  %v8105_v41 = vadd.f32 %v8104_v47, %v8086_v36  ;;  %v8775_v47 = vpop.f32.mrf.mxu1  ;;  %v9136_v36 = vrot.slane %v24108_v10, 2  ;;  %v24153_v63 = vld [vmem:[#allocation2 + $0x78] sm:$0xfc]  ;;  %vm25113_vm6 = vcmask 1042434  }
 0x7aa   :  { %v14968_v40 = vor.u32 %v16325_v30, %v14965_v16  ;;  %v8776_v44 = vadd.f32 %v8775_v47, %v23229_v8  ;;  %v16385_v19 = vld [vmem:[%s24912_s7 + $0xa64] sm:$0xf]  ;;  %v15080_v8 = vor.u32 %v16353_v42, %v15077_v34  ;;  %v15061_v16 = vld [vmem:[%s24912_s7 + $0x950] sm:$0xf0]  ;;  %vm25116_vm2 = vmmov %vm25113_vm6 }
 0x7ab   :  { %10012 = vmatpush.bf16.msrb.mxu1 %v15000_v28  ;;  %10050 = vmatpush.bf16.msrb.mxu0 %v15256_v53  ;;  %v9119_v28 = vsel %vm25101_vm10, %v9109_v46, %v9118_v51  ;;  %v15096_v53 = vor.u32 %v16357_v37, %v15093_v1  ;;  %v9113_v46 = vsel %vm25102_vm0, %v9111_v43, %v9112_v23  ;;  %v9125_v23 = vrot.slane %v24076_v5, 2  ;;  %v24120_v43 = vld [vmem:[#allocation2 + $0x70] sm:$0xfc]  ;;  %v16349_v30 = vld [vmem:[%s24912_s7 + $0x944] sm:$0xf]  ;;  %vm25115_vm0 = vmmov %vm25112_vm5 }
 0x7ac   :  { %10032 = vmatpush.bf16.msrb.mxu3 %v15112_v57  ;;  %v24114_v14 = vadd.f32 %v8123_v3, %v8105_v41  ;;  %v24118_v51 = vpack.c.bf16 %v9119_v28, %v9110_v18  ;;  %v15352_v57 = vor.u32 %v16421_v55, %v15349_v29  ;;  %v14952_v37 = vor.u32 %v16321_v52, %v14949_v50  ;;  %v15333_v1 = vld [vmem:[%s24912_s7 + $0xb70] sm:$0xf0]  ;;  %v16317_v32 = vld [vmem:[%s24912_s7 + $0x844] sm:$0xf]  ;;  %v9084_v18 = vld [vmem:[#allocation2 + $0xb0] sm:$0x3]  ;;  %v8832_v50 = vpop.f32.mrf.mxu2 }
 0x7ad   :  { %10069 = vmatpush.bf16.msrb.mxu2 %v15384_v6  ;;  %v24090_v6 = vpack.c.bf16 %v9117_v45, %v9107_v54  ;;  %v14933_v54 = vld [vmem:[%s24912_s7 + $0x850] sm:$0xf0]  ;;  %v8794_v45 = vpop.f32.mrf.mxu3  ;;  %v9128_v59 = vrot.slane %v24120_v43, 2  ;;  %v16381_v29 = vld [vmem:[%s24912_s7 + $0xa44] sm:$0xf]  ;;  %v15064_v41 = vor.u32 %v16349_v30, %v15061_v16  ;;  %v9127_v39 = vsel %vm25106_vm9, %v9125_v23, %v9126_v17 }
 0x7ae   :  { %9981 = vmatmul.bf16.vlgmr.msra.gmra.mxu0 %v24118_v51  ;;  %v15189_v42 = vld [vmem:[%s24912_s7 + $0xa50] sm:$0xf0]  ;;  %v14936_v3 = vor.u32 %v16317_v32, %v14933_v54  ;;  %v16345_v34 = vld [vmem:[%s24912_s7 + $0x924] sm:$0xf]  ;;  %vm25114_vm10 = vcmask 1041408  }
 0x7af   :  { %10013 = vmatpush.bf16.msrb.mxu1 %v14984_v56  ;;  %10051 = vmatpush.bf16.msrb.mxu0 %v15240_v13  ;;  %v15205_v56 = vld [vmem:[%s24912_s7 + $0xa70] sm:$0xf0]  ;;  %v24128_v13 = vpack.c.bf16 %v9121_v48, %v9113_v46  ;;  %v16413_v46 = vld [vmem:[%s24912_s7 + $0xb44] sm:$0xf] }
 0x7b0   :  { %9962 = vmatmul.bf16.vlgmr.msra.gmra.mxu3 %v24090_v6  ;;  %v15208_v28 = vor.u32 %v16385_v19, %v15205_v56  ;;  %v15317_v48 = vld [vmem:[%s24912_s7 + $0xb50] sm:$0xf0]  ;;  %v9138_v56 = vrot.slane %v9084_v18, 2  ;;  %v16377_v16 = vld [vmem:[%s24912_s7 + $0xa24] sm:$0xf] }
 0x7b1   :  { %10070 = vmatpush.bf16.msrb.mxu2 %v15368_v61  ;;  %10033 = vmatpush.bf16.msrb.mxu3 %v15096_v53  ;;  %v16417_v61 = vld [vmem:[%s24912_s7 + $0xb64] sm:$0xf]  ;;  %v8795_v53 = vadd.f32 %v8794_v45, %v8776_v44  ;;  %v15045_v47 = vld [vmem:[%s24912_s7 + $0x930] sm:$0xf0]  ;;  %v8777_v44 = vpop.f32.mrf.mxu1  ;;  %v15320_v30 = vor.u32 %v16413_v46, %v15317_v48  ;;  %v15147_v48 = vld [vmem:[%s24912_s7 + $0x9e8] sm:$0xf] }
 0x7b2   :  { %10000 = vmatmul.bf16.vlgmr.msra.gmra.mxu2 %v24128_v13  ;;  %v15336_v55 = vor.u32 %v16417_v61, %v15333_v1  ;;  %v14917_v10 = vld [vmem:[%s24912_s7 + $0x830] sm:$0xf0]  ;;  %v8778_v61 = vadd.f32 %v8777_v44, %v23295_v25  ;;  %v15048_v54 = vor.u32 %v16345_v34, %v15045_v47  ;;  %v16409_v25 = vld [vmem:[%s24912_s7 + $0xb24] sm:$0xf]  ;;  %v16372_v34 = vld [vmem:[%s24912_s7 + $0x9f4] sm:$0xf0] }
 0x7b3   :  { %10014 = vmatpush.bf16.msrb.mxu1 %v14968_v40  ;;  %10052 = vmatpush.bf16.msrb.mxu0 %v15224_v38  ;;  %v24155_v40 = vld [vmem:[#allocation2 + $0xb8] sm:$0x3]  ;;  %v8814_v52 = vadd.f32 %v8813_v12, %v8795_v53  ;;  %v16313_v38 = vld [vmem:[%s24912_s7 + $0x824] sm:$0xf]  ;;  %v16467_v43 = vld [vmem:[#allocation2 + $0x90] sm:$0xff]  ;;  %v9131_v12 = vrot.slane %v24153_v63, 2  ;;  %v9135_v53 = vsel %vm25105_vm8, %v9123_v0, %v9134_v27 }
 0x7b4   :  { %v9129_v19 = vrot.slane %v16467_v43, 2  ;;  %v9140_v1 = vrot.slane %v24155_v40, 2  ;;  %v15173_v32 = vld [vmem:[%s24912_s7 + $0xa30] sm:$0xf0]  ;;  %v14920_v45 = vor.u32 %v16313_v38, %v14917_v10  ;;  %v16341_v63 = vld [vmem:[%s24912_s7 + $0x904] sm:$0xf]  ;;  %v8834_v47 = vpop.f32.mrf.mxu2 }
 0x7b5   :  { %10071 = vmatpush.bf16.msrb.mxu2 %v15352_v57  ;;  %10034 = vmatpush.bf16.msrb.mxu3 %v15080_v8  ;;  %v8815_v57 = vpop.f32.mrf.mxu0  ;;  %v15192_v8 = vor.u32 %v16381_v29, %v15189_v42  ;;  %v15301_v18 = vld [vmem:[%s24912_s7 + $0xb30] sm:$0xf0]  ;;  %v8796_v29 = vpop.f32.mrf.mxu3  ;;  %v15176_v27 = vor.u32 %v16377_v16, %v15173_v32  ;;  %v16373_v42 = vld [vmem:[%s24912_s7 + $0xa04] sm:$0xf]  ;;  %v16340_v43 = vld [vmem:[%s24912_s7 + $0x8f4] sm:$0xf0] }
 0x7b6   :  { %v15029_v40 = vld [vmem:[%s24912_s7 + $0x910] sm:$0xf0]  ;;  %v9139_v46 = vsel %vm25109_vm13, %v9129_v19, %v9138_v56  ;;  %v15304_v5 = vor.u32 %v16409_v25, %v15301_v18  ;;  %v16405_v35 = vld [vmem:[%s24912_s7 + $0xb04] sm:$0xf]  ;;  %v16404_v56 = vld [vmem:[%s24912_s7 + $0xaf4] sm:$0xf0]  ;;  %v15148_v25 = vor.u32 %v16372_v34, %v15147_v48 }
 0x7b7   :  { %10015 = vmatpush.bf16.msrb.mxu1 %v14952_v37  ;;  %10053 = vmatpush.bf16.msrb.mxu0 %v15208_v28  ;;  %v24182_v37 = vadd.f32 %v8832_v50, %v8814_v52  ;;  %v9124_v28 = vsel %vm25104_vm7, %v9122_v49, %v9123_v0  ;;  %v9137_v49 = vsel %vm25107_vm11, %v9126_v17, %v9136_v36  ;;  %v9132_v0 = vrot.slane %v16468_v15, 2  ;;  %v15157_v23 = vld [vmem:[%s24912_s7 + $0xa10] sm:$0xf0]  ;;  %v15019_v52 = vld [vmem:[%s24912_s7 + $0x8e8] sm:$0xf]  ;;  %vm25117_vm7 = vmmov %vm25114_vm10 }
 0x7b8   :  { %v15285_v17 = vld [vmem:[%s24912_s7 + $0xb10] sm:$0xf0]  ;;  %v15032_v36 = vor.u32 %v16341_v63, %v15029_v40  ;;  %v24251_v38 = vpack.c.bf16 %v9137_v49, %v9127_v39  ;;  %v15403_v16 = vld [vmem:[%s24912_s7 + $0xbe8] sm:$0xf]  ;;  %v16436_v32 = vld [vmem:[%s24912_s7 + $0xbf4] sm:$0xf0]  ;;  %v15020_v63 = vor.u32 %v16340_v43, %v15019_v52 }
 0x7b9   :  { %10072 = vmatpush.bf16.msrb.mxu2 %v15336_v55  ;;  %10035 = vmatpush.bf16.msrb.mxu3 %v15064_v41  ;;  %v16309_v55 = vld [vmem:[%s24912_s7 + $0x804] sm:$0xf]  ;;  %v8797_v41 = vadd.f32 %v8796_v29, %v8778_v61  ;;  %v9133_v10 = vsel %vm25110_vm14, %v9131_v12, %v9132_v0  ;;  %v9141_v44 = vsel %vm25111_vm15, %v9132_v0, %v9140_v1  ;;  %v16368_v40 = vld [vmem:[%s24912_s7 + $0x9d4] sm:$0xf0]  ;;  %v15259_v29 = vld [vmem:[%s24912_s7 + $0xac8] sm:$0xf] }
 0x7ba   :  { %v24264_v61 = vpack.c.bf16 %v9135_v53, %v9124_v28  ;;  %v15160_v12 = vor.u32 %v16373_v42, %v15157_v23  ;;  %v15288_v1 = vor.u32 %v16405_v35, %v15285_v17  ;;  %v24278_v18 = vpack.c.bf16 %v9141_v44, %v9133_v10  ;;  %v15131_v53 = vld [vmem:[%s24912_s7 + $0x9c8] sm:$0xf]  ;;  %v16400_v39 = vld [vmem:[%s24912_s7 + $0xad4] sm:$0xf0] }
 0x7bb   :  { %10016 = vmatpush.bf16.msrb.mxu1 %v14936_v3  ;;  %10054 = vmatpush.bf16.msrb.mxu0 %v15192_v8  ;;  %v9130_v3 = vsel %vm25108_vm12, %v9128_v59, %v9129_v19  ;;  %v14904_v59 = vor.u32 %v16309_v55, %v14901_v20  ;;  %v8816_v50 = vadd.f32 %v8815_v57, %v8797_v41  ;;  %v15275_v19 = vld [vmem:[%s24912_s7 + $0xae8] sm:$0xf]  ;;  %v8780_v57 = vpop.f32.mrf.mxu1  ;;  %v16336_v20 = vld [vmem:[%s24912_s7 + $0x8d4] sm:$0xf0] }
 0x7bc   :  { %v15276_v28 = vor.u32 %v16404_v56, %v15275_v19  ;;  %9948 = vmatmul.bf16.gmra.mxu1 %v24264_v61  ;;  %v15404_v55 = vor.u32 %v16436_v32, %v15403_v16  ;;  %v15387_v15 = vld [vmem:[%s24912_s7 + $0xbc8] sm:$0xf]  ;;  %v16432_v0 = vld [vmem:[%s24912_s7 + $0xbd4] sm:$0xf0]  ;;  %v15132_v42 = vor.u32 %v16368_v40, %v15131_v53  ;;  %v8837_v17 = vpop.f32.mrf.mxu2 }
 0x7bd   :  { %10073 = vmatpush.bf16.msrb.mxu2 %v15320_v30  ;;  %10036 = vmatpush.bf16.msrb.mxu3 %v15048_v54  ;;  %v8818_v8 = vpop.f32.mrf.mxu0  ;;  %v24266_v30 = vpack.c.bf16 %v9139_v46, %v9130_v3  ;;  %v24274_v54 = vadd.f32 %v8834_v47, %v8816_v50  ;;  %v8799_v49 = vpop.f32.mrf.mxu3  ;;  %v15260_v3 = vor.u32 %v16400_v39, %v15259_v29  ;;  %v15115_v46 = vld [vmem:[%s24912_s7 + $0x9a8] sm:$0xf]  ;;  %v16396_v34 = vld [vmem:[%s24912_s7 + $0xab4] sm:$0xf0] }
 0x7be   :  { %v14987_v23 = vld [vmem:[%s24912_s7 + $0x8a8] sm:$0xf]  ;;  %v16428_v10 = vld [vmem:[%s24912_s7 + $0xbb4] sm:$0xf0] }
 0x7bf   :  { %10017 = vmatpush.bf16.msrb.mxu1 %v14920_v45  ;;  %10055 = vmatpush.bf16.msrb.mxu0 %v15176_v27  ;;  %v8781_v45 = vadd.f32 %v8780_v57, %v23365_v33  ;;  %v15003_v33 = vld [vmem:[%s24912_s7 + $0x8c8] sm:$0xf]  ;;  %v16328_v16 = vld [vmem:[%s24912_s7 + $0x894] sm:$0xf0] }
 0x7c0   :  { %9967 = vmatmul.bf16.gmra.mxu3 %v24251_v38  ;;  %9986 = vmatmul.bf16.gmra.mxu0 %v24266_v30  ;;  %v15004_v41 = vor.u32 %v16336_v20, %v15003_v33  ;;  %v15243_v48 = vld [vmem:[%s24912_s7 + $0xaa8] sm:$0xf]  ;;  %v16424_v33 = vld [vmem:[%s24912_s7 + $0xb94] sm:$0xf0] }
 0x7c1   :  { %10074 = vmatpush.bf16.msrb.mxu2 %v15304_v5  ;;  %10037 = vmatpush.bf16.msrb.mxu3 %v15032_v36  ;;  %v8800_v27 = vadd.f32 %v8799_v49, %v8781_v45  ;;  %v16364_v5 = vld [vmem:[%s24912_s7 + $0x9b4] sm:$0xf0]  ;;  %v15388_v36 = vor.u32 %v16432_v0, %v15387_v15  ;;  %v15371_v47 = vld [vmem:[%s24912_s7 + $0xba8] sm:$0xf]  ;;  %v15244_v57 = vor.u32 %v16396_v34, %v15243_v48 }
 0x7c2   :  { %10005 = vmatmul.bf16.gmra.mxu2 %v24278_v18  ;;  %v15116_v19 = vor.u32 %v16364_v5, %v15115_v46  ;;  %v15355_v40 = vld [vmem:[%s24912_s7 + $0xb88] sm:$0xf]  ;;  %v16356_v39 = vld [vmem:[%s24912_s7 + $0x974] sm:$0xf0] }
 0x7c3   :  { %10018 = vmatpush.bf16.msrb.mxu1 %v14904_v59  ;;  %10056 = vmatpush.bf16.msrb.mxu0 %v15160_v12  ;;  %v8819_v35 = vadd.f32 %v8818_v8, %v8800_v27  ;;  %v16332_v59 = vld [vmem:[%s24912_s7 + $0x8b4] sm:$0xf0]  ;;  %v8782_v52 = vpop.f32.mrf.mxu1  ;;  %v15099_v8 = vld [vmem:[%s24912_s7 + $0x988] sm:$0xf]  ;;  %v15372_v12 = vor.u32 %v16428_v10, %v15371_v47  ;;  %v15356_v46 = vor.u32 %v16424_v33, %v15355_v40 }
 0x7c4   :  { %v8783_v43 = vadd.f32 %v8782_v52, %v23403_v2  ;;  %v14988_v56 = vor.u32 %v16332_v59, %v14987_v23  ;;  %v14971_v2 = vld [vmem:[%s24912_s7 + $0x888] sm:$0xf]  ;;  %v8839_v29 = vpop.f32.mrf.mxu2  ;;  %v16324_v15 = vld [vmem:[%s24912_s7 + $0x874] sm:$0xf0] }
 0x7c5   :  { %10075 = vmatpush.bf16.msrb.mxu2 %v15288_v1  ;;  %10106 = vmatpush.bf16.msra.mxu3 %v15148_v25  ;;  %v8820_v50 = vpop.f32.mrf.mxu0  ;;  %v24331_v44 = vadd.f32 %v8837_v17, %v8819_v35  ;;  %v16360_v1 = vld [vmem:[%s24912_s7 + $0x994] sm:$0xf0]  ;;  %v8801_v32 = vpop.f32.mrf.mxu3  ;;  %v15227_v25 = vld [vmem:[%s24912_s7 + $0xa88] sm:$0xf]  ;;  %v14972_v53 = vor.u32 %v16328_v16, %v14971_v2 }
 0x7c6   :  { %v8802_v45 = vadd.f32 %v8801_v32, %v8783_v43  ;;  %v14955_v49 = vld [vmem:[%s24912_s7 + $0x868] sm:$0xf]  ;;  %v16388_v23 = vld [vmem:[%s24912_s7 + $0xa74] sm:$0xf0] }
 0x7c7   :  { %10087 = vmatpush.bf16.msra.mxu1 %v15020_v63  ;;  %10125 = vmatpush.bf16.msra.mxu0 %v15276_v28  ;;  %v16392_v63 = vld [vmem:[%s24912_s7 + $0xa94] sm:$0xf0]  ;;  %v15100_v28 = vor.u32 %v16360_v1, %v15099_v8  ;;  %v15211_v5 = vld [vmem:[%s24912_s7 + $0xa68] sm:$0xf]  ;;  %v14956_v17 = vor.u32 %v16324_v15, %v14955_v49 }
 0x7c8   :  { %v8821_v20 = vadd.f32 %v8820_v50, %v8802_v45  ;;  %v15067_v59 = vld [vmem:[%s24912_s7 + $0x948] sm:$0xf]  ;;  %v16352_v48 = vld [vmem:[%s24912_s7 + $0x954] sm:$0xf0]  ;;  %v15212_v47 = vor.u32 %v16388_v23, %v15211_v5 }
 0x7c9   :  { %10144 = vmatpush.bf16.msra.mxu2 %v15404_v55  ;;  %10107 = vmatpush.bf16.msra.mxu3 %v15132_v42  ;;  %v15083_v55 = vld [vmem:[%s24912_s7 + $0x968] sm:$0xf]  ;;  %v15228_v42 = vor.u32 %v16392_v63, %v15227_v25  ;;  %v16320_v52 = vld [vmem:[%s24912_s7 + $0x854] sm:$0xf0] }
 0x7ca   :  { %v15084_v35 = vor.u32 %v16356_v39, %v15083_v55  ;;  %v14939_v34 = vld [vmem:[%s24912_s7 + $0x848] sm:$0xf]  ;;  %v16416_v1 = vld [vmem:[%s24912_s7 + $0xb54] sm:$0xf0] }
 0x7cb   :  { %10088 = vmatpush.bf16.msra.mxu1 %v15004_v41  ;;  %10126 = vmatpush.bf16.msra.mxu0 %v15260_v3  ;;  %v8851_v0 = vpop.f32.mrf.mxu1  ;;  %v24370_v41 = vadd.f32 %v8839_v29, %v8821_v20  ;;  %v14940_v8 = vor.u32 %v16320_v52, %v14939_v34  ;;  %v15051_v2 = vld [vmem:[%s24912_s7 + $0x928] sm:$0xf]  ;;  %v16348_v45 = vld [vmem:[%s24912_s7 + $0x934] sm:$0xf0] }
 0x7cc   :  { %v8852_v3 = vadd.f32 %v8851_v0, %v23457_v31  ;;  %v16420_v31 = vld [vmem:[%s24912_s7 + $0xb74] sm:$0xf0]  ;;  %10019 = vmatmul.bf16.vlgmr.msrb.gmra.mxu1 %v24065_v22  ;;  %v8908_v32 = vpop.f32.mrf.mxu2  ;;  %v14923_v25 = vld [vmem:[%s24912_s7 + $0x828] sm:$0xf]  ;;  %v15052_v49 = vor.u32 %v16348_v45, %v15051_v2  ;;  %v15405_v45 = vld [vmem:[%s24912_s7 + $0xbf8] sm:$0xf0] }
 0x7cd   :  { %10145 = vmatpush.bf16.msra.mxu2 %v15388_v36  ;;  %10108 = vmatpush.bf16.msra.mxu3 %v15116_v19  ;;  %v8889_v27 = vpop.f32.mrf.mxu0  ;;  %v15339_v36 = vld [vmem:[%s24912_s7 + $0xb68] sm:$0xf]  ;;  %v8870_v50 = vpop.f32.mrf.mxu3  ;;  %v16316_v63 = vld [vmem:[%s24912_s7 + $0x834] sm:$0xf0] }
 0x7ce   :  { %v8871_v10 = vadd.f32 %v8870_v50, %v8852_v3  ;;  %v15340_v43 = vor.u32 %v16420_v31, %v15339_v36  ;;  %v15195_v19 = vld [vmem:[%s24912_s7 + $0xa48] sm:$0xf]  ;;  %v16380_v39 = vld [vmem:[%s24912_s7 + $0xa34] sm:$0xf0]  ;;  %v14924_v15 = vor.u32 %v16316_v63, %v14923_v25  ;;  %v16370_v50 = vld [vmem:[%s24912_s7 + $0x9ec] sm:$0xf] }
 0x7cf   :  { %10089 = vmatpush.bf16.msra.mxu1 %v14988_v56  ;;  %10127 = vmatpush.bf16.msra.mxu0 %v15244_v57  ;;  %v16384_v56 = vld [vmem:[%s24912_s7 + $0xa54] sm:$0xf0]  ;;  %v15068_v57 = vor.u32 %v16352_v48, %v15067_v59  ;;  %v15179_v29 = vld [vmem:[%s24912_s7 + $0xa28] sm:$0xf] }
 0x7d0   :  { %10038 = vmatmul.bf16.vlgmr.msrb.gmra.mxu3 %v24090_v6  ;;  %10057 = vmatmul.bf16.vlgmr.msrb.gmra.mxu0 %v24118_v51  ;;  %v8890_v16 = vadd.f32 %v8889_v27, %v8871_v10  ;;  %v15196_v40 = vor.u32 %v16384_v56, %v15195_v19  ;;  %v15307_v0 = vld [vmem:[%s24912_s7 + $0xb28] sm:$0xf]  ;;  %v15180_v23 = vor.u32 %v16380_v39, %v15179_v29  ;;  %v16376_v31 = vld [vmem:[%s24912_s7 + $0xa14] sm:$0xf0]  ;;  %v16338_v10 = vld [vmem:[%s24912_s7 + $0x8ec] sm:$0xf] }
 0x7d1   :  { %10146 = vmatpush.bf16.msra.mxu2 %v15372_v12  ;;  %10109 = vmatpush.bf16.msra.mxu3 %v15100_v28  ;;  %v15323_v12 = vld [vmem:[%s24912_s7 + $0xb48] sm:$0xf]  ;;  %v16408_v48 = vld [vmem:[%s24912_s7 + $0xb14] sm:$0xf0]  ;;  %v15021_v56 = vld [vmem:[%s24912_s7 + $0x8f8] sm:$0xf0] }
 0x7d2   :  { %10076 = vmatmul.bf16.vlgmr.msrb.gmra.mxu2 %v24128_v13  ;;  %v24425_v33 = vadd.f32 %v8908_v32, %v8890_v16  ;;  %v15324_v20 = vor.u32 %v16416_v1, %v15323_v12  ;;  %v15035_v27 = vld [vmem:[%s24912_s7 + $0x908] sm:$0xf]  ;;  %v16434_v32 = vld [vmem:[%s24912_s7 + $0xbec] sm:$0xf]  ;;  %v15005_v39 = vld [vmem:[%s24912_s7 + $0x8d8] sm:$0xf0] }
 0x7d3   :  { %10090 = vmatpush.bf16.msra.mxu1 %v14972_v53  ;;  %10128 = vmatpush.bf16.msra.mxu0 %v15228_v42  ;;  %v8853_v28 = vpop.f32.mrf.mxu1  ;;  %v16344_v42 = vld [vmem:[%s24912_s7 + $0x914] sm:$0xf0]  ;;  %v14907_v3 = vld [vmem:[%s24912_s7 + $0x808] sm:$0xf]  ;;  %v15408_v29 = vor.u32 %v16434_v32, %v15405_v45  ;;  %v14973_v32 = vld [vmem:[%s24912_s7 + $0x898] sm:$0xf0] }
 0x7d4   :  { %v8854_v55 = vadd.f32 %v8853_v28, %v23525_v21  ;;  %v16412_v21 = vld [vmem:[%s24912_s7 + $0xb34] sm:$0xf0]  ;;  %v15291_v59 = vld [vmem:[%s24912_s7 + $0xb08] sm:$0xf]  ;;  %v15036_v34 = vor.u32 %v16344_v42, %v15035_v27  ;;  %v8910_v19 = vpop.f32.mrf.mxu2  ;;  %v15389_v27 = vld [vmem:[%s24912_s7 + $0xbd8] sm:$0xf0] }
 0x7d5   :  { %10147 = vmatpush.bf16.msra.mxu2 %v15356_v46  ;;  %10110 = vmatpush.bf16.msra.mxu3 %v15084_v35  ;;  %v8891_v53 = vpop.f32.mrf.mxu0  ;;  %v16312_v46 = vld [vmem:[%s24912_s7 + $0x814] sm:$0xf0]  ;;  %v8872_v5 = vpop.f32.mrf.mxu3  ;;  %v15163_v35 = vld [vmem:[%s24912_s7 + $0xa08] sm:$0xf]  ;;  %v15308_v36 = vor.u32 %v16412_v21, %v15307_v0  ;;  %v15292_v16 = vor.u32 %v16408_v48, %v15291_v59  ;;  %v16430_v21 = vld [vmem:[%s24912_s7 + $0xbcc] sm:$0xf] }
 0x7d6   :  { %v14908_v52 = vor.u32 %v16312_v46, %v14907_v3  ;;  %v15164_v2 = vor.u32 %v16376_v31, %v15163_v35  ;;  %v15117_v35 = vld [vmem:[%s24912_s7 + $0x9b8] sm:$0xf0]  ;;  %v15392_v59 = vor.u32 %v16430_v21, %v15389_v27 }
 0x7d7   :  { %10091 = vmatpush.bf16.msra.mxu1 %v14956_v17  ;;  %10129 = vmatpush.bf16.msra.mxu0 %v15212_v47  ;;  %v8873_v17 = vadd.f32 %v8872_v5, %v8854_v55  ;;  %v15149_v47 = vld [vmem:[%s24912_s7 + $0x9f8] sm:$0xf0]  ;;  %v16366_v55 = vld [vmem:[%s24912_s7 + $0x9cc] sm:$0xf] }
 0x7d8   :  { %v15152_v28 = vor.u32 %v16370_v50, %v15149_v47  ;;  %v14989_v48 = vld [vmem:[%s24912_s7 + $0x8b8] sm:$0xf0] }
 0x7d9   :  { %10148 = vmatpush.bf16.msra.mxu2 %v15340_v43  ;;  %10111 = vmatpush.bf16.msra.mxu3 %v15068_v57  ;;  %v8892_v43 = vadd.f32 %v8891_v53, %v8873_v17  ;;  %v16402_v57 = vld [vmem:[%s24912_s7 + $0xaec] sm:$0xf]  ;;  %v15024_v53 = vor.u32 %v16338_v10, %v15021_v56  ;;  %v14957_v21 = vld [vmem:[%s24912_s7 + $0x878] sm:$0xf0] }
 0x7da   :  { %v16330_v17 = vld [vmem:[%s24912_s7 + $0x8ac] sm:$0xf] }
 0x7db   :  { %10092 = vmatpush.bf16.msra.mxu1 %v14940_v8  ;;  %10130 = vmatpush.bf16.msra.mxu0 %v15196_v40  ;;  %v15277_v8 = vld [vmem:[%s24912_s7 + $0xaf8] sm:$0xf0]  ;;  %v8856_v12 = vpop.f32.mrf.mxu1  ;;  %v24488_v25 = vadd.f32 %v8910_v19, %v8892_v43  ;;  %v16426_v10 = vld [vmem:[%s24912_s7 + $0xbac] sm:$0xf] }
 0x7dc   :  { %v8857_v63 = vadd.f32 %v8856_v12, %v23585_v9  ;;  %v15280_v40 = vor.u32 %v16402_v57, %v15277_v8  ;;  %v16334_v9 = vld [vmem:[%s24912_s7 + $0x8cc] sm:$0xf]  ;;  %10024 = vmatmul.bf16.gmra.mxu1 %v24264_v61  ;;  %v8913_v31 = vpop.f32.mrf.mxu2  ;;  %v15373_v43 = vld [vmem:[%s24912_s7 + $0xbb8] sm:$0xf0]  ;;  %v14992_v8 = vor.u32 %v16330_v17, %v14989_v48 }
 0x7dd   :  { %10149 = vmatpush.bf16.msra.mxu2 %v15324_v20  ;;  %10112 = vmatpush.bf16.msra.mxu3 %v15052_v49  ;;  %v8894_v1 = vpop.f32.mrf.mxu0  ;;  %v15133_v20 = vld [vmem:[%s24912_s7 + $0x9d8] sm:$0xf0]  ;;  %v16398_v49 = vld [vmem:[%s24912_s7 + $0xacc] sm:$0xf]  ;;  %v8875_v0 = vpop.f32.mrf.mxu3  ;;  %v15008_v46 = vor.u32 %v16334_v9, %v15005_v39 }
 0x7de   :  { %v8876_v42 = vadd.f32 %v8875_v0, %v8857_v63  ;;  %v15136_v3 = vor.u32 %v16366_v55, %v15133_v20  ;;  %v16422_v20 = vld [vmem:[%s24912_s7 + $0xb8c] sm:$0xf]  ;;  %v15357_v9 = vld [vmem:[%s24912_s7 + $0xb98] sm:$0xf0] }
 0x7df   :  { %10093 = vmatpush.bf16.msra.mxu1 %v14924_v15  ;;  %10131 = vmatpush.bf16.msra.mxu0 %v15180_v23  ;;  %v15261_v15 = vld [vmem:[%s24912_s7 + $0xad8] sm:$0xf0]  ;;  %v16362_v23 = vld [vmem:[%s24912_s7 + $0x9ac] sm:$0xf] }
 0x7e0   :  { %10043 = vmatmul.bf16.gmra.mxu3 %v24251_v38  ;;  %10062 = vmatmul.bf16.gmra.mxu0 %v24266_v30  ;;  %v15264_v5 = vor.u32 %v16398_v49, %v15261_v15  ;;  %v15120_v57 = vor.u32 %v16362_v23, %v15117_v35  ;;  %v15085_v15 = vld [vmem:[%s24912_s7 + $0x978] sm:$0xf0]  ;;  %v16322_v0 = vld [vmem:[%s24912_s7 + $0x86c] sm:$0xf]  ;;  %v15360_v23 = vor.u32 %v16422_v20, %v15357_v9 }
 0x7e1   :  { %10150 = vmatpush.bf16.msra.mxu2 %v15308_v36  ;;  %10113 = vmatpush.bf16.msra.mxu3 %v15036_v34  ;;  %v8895_v36 = vadd.f32 %v8894_v1, %v8876_v42  ;;  %v16394_v34 = vld [vmem:[%s24912_s7 + $0xaac] sm:$0xf]  ;;  %v15213_v17 = vld [vmem:[%s24912_s7 + $0xa78] sm:$0xf0] }
 0x7e2   :  { %10081 = vmatmul.bf16.gmra.mxu2 %v24278_v18  ;;  %v16358_v1 = vld [vmem:[%s24912_s7 + $0x98c] sm:$0xf] }
 0x7e3   :  { %10094 = vmatpush.bf16.msra.mxu1 %v14908_v52  ;;  %10132 = vmatpush.bf16.msra.mxu0 %v15164_v2  ;;  %v15245_v52 = vld [vmem:[%s24912_s7 + $0xab8] sm:$0xf0]  ;;  %v8858_v50 = vpop.f32.mrf.mxu1  ;;  %v24543_v19 = vadd.f32 %v8913_v31, %v8895_v36  ;;  %v15376_v2 = vor.u32 %v16426_v10, %v15373_v43  ;;  %v16386_v35 = vld [vmem:[%s24912_s7 + $0xa6c] sm:$0xf]  ;;  %v14960_v31 = vor.u32 %v16322_v0, %v14957_v21 }
 0x7e4   :  { %v8859_v56 = vadd.f32 %v8858_v50, %v23623_v62  ;;  %v15248_v12 = vor.u32 %v16394_v34, %v15245_v52  ;;  %v16326_v62 = vld [vmem:[%s24912_s7 + $0x88c] sm:$0xf]  ;;  %v8915_v49 = vpop.f32.mrf.mxu2  ;;  %v15069_v34 = vld [vmem:[%s24912_s7 + $0x958] sm:$0xf0]  ;;  %v15216_v10 = vor.u32 %v16386_v35, %v15213_v17 }
 0x7e5   :  { %10151 = vmatpush.bf16.msra.mxu2 %v15292_v16  ;;  %10182 = vmatpush.bf16.msrb.mxu3 %v15152_v28  ;;  %v8896_v47 = vpop.f32.mrf.mxu0  ;;  %v15101_v16 = vld [vmem:[%s24912_s7 + $0x998] sm:$0xf0]  ;;  %v8877_v45 = vpop.f32.mrf.mxu3  ;;  %v16390_v28 = vld [vmem:[%s24912_s7 + $0xa8c] sm:$0xf]  ;;  %v14976_v55 = vor.u32 %v16326_v62, %v14973_v32 }
 0x7e6   :  { %v8878_v63 = vadd.f32 %v8877_v45, %v8859_v56  ;;  %v16350_v48 = vld [vmem:[%s24912_s7 + $0x94c] sm:$0xf]  ;;  %v14941_v50 = vld [vmem:[%s24912_s7 + $0x858] sm:$0xf0] }
 0x7e7   :  { %10163 = vmatpush.bf16.msrb.mxu1 %v15024_v53  ;;  %10201 = vmatpush.bf16.msrb.mxu0 %v15280_v40  ;;  %v15229_v53 = vld [vmem:[%s24912_s7 + $0xa98] sm:$0xf0]  ;;  %v15104_v40 = vor.u32 %v16358_v1, %v15101_v16  ;;  %v16318_v52 = vld [vmem:[%s24912_s7 + $0x84c] sm:$0xf] }
 0x7e8   :  { %v8897_v39 = vadd.f32 %v8896_v47, %v8878_v63  ;;  %v14944_v1 = vor.u32 %v16318_v52, %v14941_v50  ;;  %v15325_v16 = vld [vmem:[%s24912_s7 + $0xb58] sm:$0xf0]  ;;  %v16346_v62 = vld [vmem:[%s24912_s7 + $0x92c] sm:$0xf] }
 0x7e9   :  { %10220 = vmatpush.bf16.msrb.mxu2 %v15408_v29  ;;  %10183 = vmatpush.bf16.msrb.mxu3 %v15136_v3  ;;  %v16354_v29 = vld [vmem:[%s24912_s7 + $0x96c] sm:$0xf]  ;;  %v15232_v3 = vor.u32 %v16390_v28, %v15229_v53  ;;  %v15053_v63 = vld [vmem:[%s24912_s7 + $0x938] sm:$0xf0] }
 0x7ea   :  { %v15088_v36 = vor.u32 %v16354_v29, %v15085_v15  ;;  %v16314_v28 = vld [vmem:[%s24912_s7 + $0x82c] sm:$0xf]  ;;  %v14925_v53 = vld [vmem:[%s24912_s7 + $0x838] sm:$0xf0]  ;;  %v15056_v0 = vor.u32 %v16346_v62, %v15053_v63 }
 0x7eb   :  { %10164 = vmatpush.bf16.msrb.mxu1 %v15008_v46  ;;  %10202 = vmatpush.bf16.msrb.mxu0 %v15264_v5  ;;  %v8927_v27 = vpop.f32.mrf.mxu1  ;;  %v24582_v46 = vadd.f32 %v8915_v49, %v8897_v39  ;;  %v16378_v49 = vld [vmem:[%s24912_s7 + $0xa2c] sm:$0xf]  ;;  %v15181_v15 = vld [vmem:[%s24912_s7 + $0xa38] sm:$0xf0]  ;;  %v14928_v21 = vor.u32 %v16314_v28, %v14925_v53 }
 0x7ec   :  { %v8928_v5 = vadd.f32 %v8927_v27, %v23677_v7  ;;  %v15341_v7 = vld [vmem:[%s24912_s7 + $0xb78] sm:$0xf0]  ;;  %10095 = vmatmul.bf16.vlgmr.msra.gmra.mxu1 %v24065_v22  ;;  %v8984_v45 = vpop.f32.mrf.mxu2  ;;  %v16410_v27 = vld [vmem:[%s24912_s7 + $0xb2c] sm:$0xf]  ;;  %v15184_v17 = vor.u32 %v16378_v49, %v15181_v15 }
 0x7ed   :  { %10221 = vmatpush.bf16.msrb.mxu2 %v15392_v59  ;;  %10184 = vmatpush.bf16.msrb.mxu3 %v15120_v57  ;;  %v8965_v42 = vpop.f32.mrf.mxu0  ;;  %v16418_v59 = vld [vmem:[%s24912_s7 + $0xb6c] sm:$0xf]  ;;  %v8946_v47 = vpop.f32.mrf.mxu3  ;;  %v15293_v50 = vld [vmem:[%s24912_s7 + $0xb18] sm:$0xf0] }
 0x7ee   :  { %v8947_v43 = vadd.f32 %v8946_v47, %v8928_v5  ;;  %v15344_v56 = vor.u32 %v16418_v59, %v15341_v7  ;;  %v16382_v57 = vld [vmem:[%s24912_s7 + $0xa4c] sm:$0xf]  ;;  %v15165_v7 = vld [vmem:[%s24912_s7 + $0xa18] sm:$0xf0] }
 0x7ef   :  { %10165 = vmatpush.bf16.msrb.mxu1 %v14992_v8  ;;  %10203 = vmatpush.bf16.msrb.mxu0 %v15248_v12  ;;  %v15197_v8 = vld [vmem:[%s24912_s7 + $0xa58] sm:$0xf0]  ;;  %v15072_v12 = vor.u32 %v16350_v48, %v15069_v34  ;;  %v16310_v5 = vld [vmem:[%s24912_s7 + $0x80c] sm:$0xf] }
 0x7f0   :  { %10114 = vmatmul.bf16.vlgmr.msra.gmra.mxu3 %v24090_v6  ;;  %10133 = vmatmul.bf16.vlgmr.msra.gmra.mxu0 %v24118_v51  ;;  %v8966_v32 = vadd.f32 %v8965_v42, %v8947_v43  ;;  %v15200_v20 = vor.u32 %v16382_v57, %v15197_v8  ;;  %v16342_v42 = vld [vmem:[%s24912_s7 + $0x90c] sm:$0xf] }
 0x7f1   :  { %10222 = vmatpush.bf16.msrb.mxu2 %v15376_v2  ;;  %10185 = vmatpush.bf16.msrb.mxu3 %v15104_v40  ;;  %v16414_v2 = vld [vmem:[%s24912_s7 + $0xb4c] sm:$0xf] }
 0x7f2   :  { %10152 = vmatmul.bf16.vlgmr.msra.gmra.mxu2 %v24128_v13  ;;  %v24637_v9 = vadd.f32 %v8984_v45, %v8966_v32  ;;  %v15328_v39 = vor.u32 %v16414_v2, %v15325_v16  ;;  %v16374_v59 = vld [vmem:[%s24912_s7 + $0xa0c] sm:$0xf] }
 0x7f3   :  { %10166 = vmatpush.bf16.msrb.mxu1 %v14976_v55  ;;  %10204 = vmatpush.bf16.msrb.mxu0 %v15232_v3  ;;  %v8929_v40 = vpop.f32.mrf.mxu1  ;;  %v15037_v3 = vld [vmem:[%s24912_s7 + $0x918] sm:$0xf0]  ;;  %v16406_v52 = vld [vmem:[%s24912_s7 + $0xb0c] sm:$0xf]  ;;  %v15168_v57 = vor.u32 %v16374_v59, %v15165_v7 }
 0x7f4   :  { %v8930_v29 = vadd.f32 %v8929_v40, %v23745_v4  ;;  %v15309_v4 = vld [vmem:[%s24912_s7 + $0xb38] sm:$0xf0]  ;;  %v15040_v48 = vor.u32 %v16342_v42, %v15037_v3 }
 0x7f5   :  { %10223 = vmatpush.bf16.msrb.mxu2 %v15360_v23  ;;  %10186 = vmatpush.bf16.msrb.mxu3 %v15088_v36  ;;  %v8967_v55 = vpop.f32.mrf.mxu0  ;;  %v14909_v23 = vld [vmem:[%s24912_s7 + $0x818] sm:$0xf0]  ;;  %v8948_v35 = vpop.f32.mrf.mxu3 }
 0x7f6   :  { %v8949_v36 = vadd.f32 %v8948_v35, %v8930_v29  ;;  %v14912_v34 = vor.u32 %v16310_v5, %v14909_v23 }
 0x7f7   :  { %10167 = vmatpush.bf16.msrb.mxu1 %v14960_v31  ;;  %10205 = vmatpush.bf16.msrb.mxu0 %v15216_v10  ;;  %v15312_v31 = vor.u32 %v16410_v27, %v15309_v4  ;;  %v8986_v10 = vpop.f32.mrf.mxu2 }
 0x7f8   :  { %v8968_v47 = vadd.f32 %v8967_v55, %v8949_v36 }
 0x7f9   :  { %10224 = vmatpush.bf16.msrb.mxu2 %v15344_v56  ;;  %10187 = vmatpush.bf16.msrb.mxu3 %v15072_v12 }
 0x7fa   :  { %v24676_v8 = vadd.f32 %v8986_v10, %v8968_v47 }
 0x7fb   :  { %10168 = vmatpush.bf16.msrb.mxu1 %v14944_v1  ;;  %10206 = vmatpush.bf16.msrb.mxu0 %v15200_v20  ;;  %v8932_v43 = vpop.f32.mrf.mxu1  ;;  %v15296_v1 = vor.u32 %v16406_v52, %v15293_v50 }
 0x7fc   :  { %v8933_v12 = vadd.f32 %v8932_v43, %v23799_v26  ;;  %10100 = vmatmul.bf16.gmra.mxu1 %v24264_v61 }
 0x7fd   :  { %10225 = vmatpush.bf16.msrb.mxu2 %v15328_v39  ;;  %10188 = vmatpush.bf16.msrb.mxu3 %v15056_v0  ;;  %v8970_v56 = vpop.f32.mrf.mxu0  ;;  %v8951_v2 = vpop.f32.mrf.mxu3 }
 0x7fe   :  { %v8952_v16 = vadd.f32 %v8951_v2, %v8933_v12 }
 0x7ff   :  { %10169 = vmatpush.bf16.msrb.mxu1 %v14928_v21  ;;  %10207 = vmatpush.bf16.msrb.mxu0 %v15184_v17  ;;  %v8989_v32 = vpop.f32.mrf.mxu2 }
 0x800   :  { %10119 = vmatmul.bf16.gmra.mxu3 %v24251_v38  ;;  %10138 = vmatmul.bf16.gmra.mxu0 %v24266_v30  ;;  %v8971_v62 = vadd.f32 %v8970_v56, %v8952_v16 }
 0x801   :  { %10226 = vmatpush.bf16.msrb.mxu2 %v15312_v31  ;;  %10189 = vmatpush.bf16.msrb.mxu3 %v15040_v48 }
 0x802   :  { %10157 = vmatmul.bf16.gmra.mxu2 %v24278_v18  ;;  %v24683_v63 = vadd.f32 %v8989_v32, %v8971_v62 }
 0x803   :  { %10170 = vmatpush.bf16.msrb.mxu1 %v14912_v34  ;;  %10208 = vmatpush.bf16.msrb.mxu0 %v15168_v57  ;;  %v8934_v45 = vpop.f32.mrf.mxu1 }
 0x804   :  { %v8935_v28 = vadd.f32 %v8934_v45, %v23837_v60 }
 0x805   :  { %10227 = vmatpush.bf16.msrb.mxu2 %v15296_v1  ;;  %v8972_v26 = vpop.f32.mrf.mxu0  ;;  %v8953_v53 = vpop.f32.mrf.mxu3 }
 0x806   :  { %v8954_v40 = vadd.f32 %v8953_v53, %v8935_v28 }
 0x807   :  { %v8991_v20 = vpop.f32.mrf.mxu2 }
 0x808   :  { %v8973_v55 = vadd.f32 %v8972_v26, %v8954_v40 }
 0x80a   :  { %v24686_v49 = vadd.f32 %v8991_v20, %v8973_v55 }
 0x80b   :  { %v9003_v29 = vpop.f32.mrf.mxu1 }
 0x80c   :  { %v9004_v15 = vadd.f32 %v9003_v29, %v23894_v11  ;;  %10171 = vmatmul.bf16.vlgmr.msrb.gmra.mxu1 %v24065_v22 }
 0x80d   :  { %v9041_v39 = vpop.f32.mrf.mxu0  ;;  %v9022_v0 = vpop.f32.mrf.mxu3 }
 0x80e   :  { %v9023_v60 = vadd.f32 %v9022_v0, %v9004_v15 }
 0x80f   :  { %v9060_v27 = vpop.f32.mrf.mxu2 }
 0x810   :  { %10190 = vmatmul.bf16.vlgmr.msrb.gmra.mxu3 %v24090_v6  ;;  %10209 = vmatmul.bf16.vlgmr.msrb.gmra.mxu0 %v24118_v51  ;;  %v9042_v21 = vadd.f32 %v9041_v39, %v9023_v60 }
 0x812   :  { %10228 = vmatmul.bf16.vlgmr.msrb.gmra.mxu2 %v24128_v13  ;;  %v24693_v3 = vadd.f32 %v9060_v27, %v9042_v21 }
 0x813   :  { %v9005_v4 = vpop.f32.mrf.mxu1 }
 0x814   :  { %v9006_v5 = vadd.f32 %v9005_v4, %v23970_v58 }
 0x815   :  { %v9043_v42 = vpop.f32.mrf.mxu0  ;;  %v9024_v23 = vpop.f32.mrf.mxu3 }
 0x816   :  { %v9025_v11 = vadd.f32 %v9024_v23, %v9006_v5 }
 0x817   :  { %v9062_v6 = vpop.f32.mrf.mxu2 }
 0x818   :  { %v9044_v35 = vadd.f32 %v9043_v42, %v9025_v11 }
 0x81a   :  { %v24696_v36 = vadd.f32 %v9062_v6, %v9044_v35 }
 0x81b   :  { %v9008_v17 = vpop.f32.mrf.mxu1 }
 0x81c   :  { %v9009_v51 = vadd.f32 %v9008_v17, %v24035_v24  ;;  %10176 = vmatmul.bf16.gmra.mxu1 %v24264_v61 }
 0x81d   :  { %v9046_v22 = vpop.f32.mrf.mxu0  ;;  %v9027_v13 = vpop.f32.mrf.mxu3 }
 0x81e   :  { %v9028_v58 = vadd.f32 %v9027_v13, %v9009_v51 }
 0x81f   :  { %v9065_v59 = vpop.f32.mrf.mxu2 }
 0x820   :  { %10195 = vmatmul.bf16.gmra.mxu3 %v24251_v38  ;;  %10214 = vmatmul.bf16.gmra.mxu0 %v24266_v30  ;;  %v9047_v31 = vadd.f32 %v9046_v22, %v9028_v58 }
 0x822   :  { %10233 = vmatmul.bf16.gmra.mxu2 %v24278_v18  ;;  %v24703_v34 = vadd.f32 %v9065_v59, %v9047_v31 }
 0x823   :  { %v9010_v7 = vpop.f32.mrf.mxu1 }
 0x824   :  { %v9011_v52 = vadd.f32 %v9010_v7, %v24114_v14 }
 0x825   :  { %v9048_v48 = vpop.f32.mrf.mxu0  ;;  %v9029_v50 = vpop.f32.mrf.mxu3 }
 0x826   :  { %v9030_v24 = vadd.f32 %v9029_v50, %v9011_v52 }
 0x827   :  { %v9067_v38 = vpop.f32.mrf.mxu2 }
 0x828   :  { %v9049_v47 = vadd.f32 %v9048_v48, %v9030_v24 }
 0x82a   :  { %v24706_v43 = vadd.f32 %v9067_v38, %v9049_v47 }
 0x82b   :  { %v9944_v10 = vpop.f32.mrf.mxu1 }
 0x82d   :  { %v9982_v61 = vpop.f32.mrf.mxu0 }
 0x833   :  { %v9963_v30 = vpop.f32.mrf.mxu3  ;;  %v9946_v12 = vpop.f32.mrf.mxu1 }
 0x834   :  { %v9964_v18 = vadd.f32 %v9963_v30, %v9944_v10 }
 0x835   :  { %v10001_v57 = vpop.f32.mrf.mxu2  ;;  %v9984_v1 = vpop.f32.mrf.mxu0 }
 0x836   :  { %v9983_v56 = vadd.f32 %v9982_v61, %v9964_v18 }
 0x838   :  { %v10002_v2 = vadd.f32 %v10001_v57, %v9983_v56 }
 0x83a   :  { %v24709_v16 = vadd.f32 %v10002_v2, %v24182_v37 }
 0x83b   :  { %v9965_v62 = vpop.f32.mrf.mxu3  ;;  %v9949_v26 = vpop.f32.mrf.mxu1 }
 0x83c   :  { %v9966_v14 = vadd.f32 %v9965_v62, %v9946_v12 }
 0x83d   :  { %v10003_v45 = vpop.f32.mrf.mxu2  ;;  %v9987_v28 = vpop.f32.mrf.mxu0 }
 0x83e   :  { %v9985_v32 = vadd.f32 %v9984_v1, %v9966_v14 }
 0x840   :  { %v10004_v53 = vadd.f32 %v10003_v45, %v9985_v32 }
 0x842   :  { %v24712_v40 = vadd.f32 %v10004_v53, %v24274_v54 }
 0x843   :  { %v9968_v55 = vpop.f32.mrf.mxu3  ;;  %v9951_v15 = vpop.f32.mrf.mxu1 }
 0x844   :  { %v9969_v20 = vadd.f32 %v9968_v55, %v9949_v26 }
 0x845   :  { %v10006_v39 = vpop.f32.mrf.mxu2  ;;  %v9989_v0 = vpop.f32.mrf.mxu0 }
 0x846   :  { %v9988_v29 = vadd.f32 %v9987_v28, %v9969_v20 }
 0x848   :  { %v10007_v60 = vadd.f32 %v10006_v39, %v9988_v29 }
 0x84a   :  { %v24715_v37 = vadd.f32 %v10007_v60, %v24331_v44 }
 0x84b   :  { %v9970_v21 = vpop.f32.mrf.mxu3  ;;  %v10020_v5 = vpop.f32.mrf.mxu1 }
 0x84c   :  { %v9971_v27 = vadd.f32 %v9970_v21, %v9951_v15 }
 0x84d   :  { %v10008_v42 = vpop.f32.mrf.mxu2  ;;  %v10058_v23 = vpop.f32.mrf.mxu0 }
 0x84e   :  { %v9990_v4 = vadd.f32 %v9989_v0, %v9971_v27 }
 0x850   :  { %v10009_v11 = vadd.f32 %v10008_v42, %v9990_v4 }
 0x852   :  { %v24718_v54 = vadd.f32 %v10009_v11, %v24370_v41 }
 0x853   :  { %v10039_v35 = vpop.f32.mrf.mxu3  ;;  %v10022_v51 = vpop.f32.mrf.mxu1 }
 0x854   :  { %v10040_v6 = vadd.f32 %v10039_v35, %v10020_v5 }
 0x855   :  { %v10077_v22 = vpop.f32.mrf.mxu2  ;;  %v10060_v13 = vpop.f32.mrf.mxu0 }
 0x856   :  { %v10059_v17 = vadd.f32 %v10058_v23, %v10040_v6 }
 0x858   :  { %v10078_v58 = vadd.f32 %v10077_v22, %v10059_v17 }
 0x85a   :  { %v24721_v44 = vadd.f32 %v10078_v58, %v24425_v33 }
 0x85b   :  { %v10041_v31 = vpop.f32.mrf.mxu3  ;;  %v10025_v52 = vpop.f32.mrf.mxu1 }
 0x85c   :  { %v10042_v59 = vadd.f32 %v10041_v31, %v10022_v51 }
 0x85d   :  { %v10079_v48 = vpop.f32.mrf.mxu2  ;;  %v10063_v50 = vpop.f32.mrf.mxu0 }
 0x85e   :  { %v10061_v7 = vadd.f32 %v10060_v13, %v10042_v59 }
 0x860   :  { %v10080_v24 = vadd.f32 %v10079_v48, %v10061_v7 }
 0x862   :  { %v24724_v41 = vadd.f32 %v10080_v24, %v24488_v25 }
 0x863   :  { %v10044_v47 = vpop.f32.mrf.mxu3  ;;  %v10027_v30 = vpop.f32.mrf.mxu1 }
 0x864   :  { %v10045_v38 = vadd.f32 %v10044_v47, %v10025_v52  ;;  %v10297_v47 = vmul.f32 %v24712_v40, %v24712_v40 }
 0x865   :  { %v10082_v61 = vpop.f32.mrf.mxu2  ;;  %v10065_v18 = vpop.f32.mrf.mxu0 }
 0x866   :  { %v10064_v10 = vadd.f32 %v10063_v50, %v10045_v38 }
 0x868   :  { %v10083_v56 = vadd.f32 %v10082_v61, %v10064_v10 }
 0x86a   :  { %v24727_v33 = vadd.f32 %v10083_v56, %v24543_v19 }
 0x86b   :  { %v10046_v57 = vpop.f32.mrf.mxu3  ;;  %v10096_v62 = vpop.f32.mrf.mxu1 }
 0x86c   :  { %v10047_v12 = vadd.f32 %v10046_v57, %v10027_v30  ;;  %v10257_v57 = vadd.f32 %v24712_v40, %v24709_v16 }
 0x86d   :  { %v10084_v2 = vpop.f32.mrf.mxu2  ;;  %v10134_v14 = vpop.f32.mrf.mxu0 }
 0x86e   :  { %v10066_v1 = vadd.f32 %v10065_v18, %v10047_v12  ;;  %v10293_v18 = vmul.f32 %v24709_v16, %v24709_v16 }
 0x870   :  { %v10085_v32 = vadd.f32 %v10084_v2, %v10066_v1 }
 0x872   :  { %v24730_v25 = vadd.f32 %v10085_v32, %v24582_v46  ;;  %v10298_v32 = vmul.f32 %v24724_v41, %v24724_v41 }
 0x873   :  { %v10115_v45 = vpop.f32.mrf.mxu3  ;;  %v10098_v28 = vpop.f32.mrf.mxu1 }
 0x874   :  { %v10116_v23 = vadd.f32 %v10115_v45, %v10096_v62 }
 0x875   :  { %v10153_v26 = vpop.f32.mrf.mxu2  ;;  %v10136_v53 = vpop.f32.mrf.mxu0 }
 0x876   :  { %v10135_v17 = vadd.f32 %v10134_v14, %v10116_v23  ;;  %v10258_v14 = vadd.f32 %v10257_v57, %v24715_v37  ;;  %v10306_v23 = vmul.f32 %v24730_v25, %v24730_v25 }
 0x878   :  { %v10154_v59 = vadd.f32 %v10153_v26, %v10135_v17  ;;  %v10266_v26 = vadd.f32 %v24724_v41, %v24721_v44  ;;  %v10259_v17 = vadd.f32 %v10258_v14, %v24718_v54 }
 0x87a   :  { %v24738_v38 = vadd.f32 %v10154_v59, %v24637_v9  ;;  %v10309_v9 = vadd.f32 %v10297_v47, %v10293_v18 }
 0x87b   :  { %v10117_v55 = vpop.f32.mrf.mxu3  ;;  %v10101_v29 = vpop.f32.mrf.mxu1 }
 0x87c   :  { %v10118_v4 = vadd.f32 %v10117_v55, %v10098_v28 }
 0x87d   :  { %v10155_v20 = vpop.f32.mrf.mxu2  ;;  %v10139_v39 = vpop.f32.mrf.mxu0 }
 0x87e   :  { %v10137_v11 = vadd.f32 %v10136_v53, %v10118_v4 }
 0x880   :  { %v10156_v13 = vadd.f32 %v10155_v20, %v10137_v11 }
 0x882   :  { %v24733_v52 = vadd.f32 %v10156_v13, %v24676_v8 }
 0x883   :  { %v10120_v19 = vpop.f32.mrf.mxu3  ;;  %v10103_v0 = vpop.f32.mrf.mxu1 }
 0x884   :  { %v10121_v46 = vadd.f32 %v10120_v19, %v10101_v29  ;;  %v10299_v8 = vmul.f32 %v24733_v52, %v24733_v52  ;;  %v10275_v1 = vadd.f32 %v24733_v52, %v24738_v38  ;;  %v10302_v19 = vmul.f32 %v24727_v33, %v24727_v33 }
 0x885   :  { %v10158_v15 = vpop.f32.mrf.mxu2  ;;  %v10141_v60 = vpop.f32.mrf.mxu0 }
 0x886   :  { %v10140_v22 = vadd.f32 %v10139_v39, %v10121_v46  ;;  %v10294_v39 = vmul.f32 %v24721_v44, %v24721_v44 }
 0x888   :  { %v10159_v7 = vadd.f32 %v10158_v15, %v10140_v22 }
 0x88a   :  { %v24741_v10 = vadd.f32 %v10159_v7, %v24683_v63  ;;  %v10295_v63 = vmul.f32 %v24738_v38, %v24738_v38 }
 0x88b   :  { %v10122_v21 = vpop.f32.mrf.mxu3  ;;  %v10172_v42 = vpop.f32.mrf.mxu1 }
 0x88c   :  { %v10123_v35 = vadd.f32 %v10122_v21, %v10103_v0  ;;  %v10303_v2 = vmul.f32 %v24741_v10, %v24741_v10  ;;  %v10327_v28 = vadd.f32 %v10299_v8, %v10295_v63  ;;  %v10276_v53 = vadd.f32 %v10275_v1, %v24741_v10 }
 0x88d   :  { %v10160_v27 = vpop.f32.mrf.mxu2  ;;  %v10210_v5 = vpop.f32.mrf.mxu0  ;;  %v10267_v21 = vadd.f32 %v10266_v26, %v24727_v33 }
 0x88e   :  { %v10142_v58 = vadd.f32 %v10141_v60, %v10123_v35  ;;  %v10305_v60 = vmul.f32 %v24718_v54, %v24718_v54 }
 0x890   :  { %v10161_v50 = vadd.f32 %v10160_v27, %v10142_v58  ;;  %v10328_v27 = vadd.f32 %v10327_v28, %v10303_v2 }
 0x892   :  { %v24748_v56 = vadd.f32 %v10161_v50, %v24686_v49  ;;  %v10301_v49 = vmul.f32 %v24715_v37, %v24715_v37 }
 0x893   :  { %v10191_v6 = vpop.f32.mrf.mxu3  ;;  %v10174_v31 = vpop.f32.mrf.mxu1 }
 0x894   :  { %v10192_v12 = vadd.f32 %v10191_v6, %v10172_v42  ;;  %v10307_v55 = vmul.f32 %v24748_v56, %v24748_v56  ;;  %v10277_v4 = vadd.f32 %v10276_v53, %v24748_v56  ;;  %v10318_v42 = vadd.f32 %v10298_v32, %v10294_v39 }
 0x895   :  { %v10229_v51 = vpop.f32.mrf.mxu2  ;;  %v10212_v48 = vpop.f32.mrf.mxu0  ;;  %v10310_v6 = vadd.f32 %v10309_v9, %v10301_v49 }
 0x896   :  { %v10211_v15 = vadd.f32 %v10210_v5, %v10192_v12  ;;  %v10268_v5 = vadd.f32 %v10267_v21, %v24730_v25  ;;  %v10329_v22 = vadd.f32 %v10328_v27, %v10307_v55  ;;  %v10319_v13 = vadd.f32 %v10318_v42, %v10302_v19 }
 0x897   :  { %v10311_v59 = vadd.f32 %v10310_v6, %v10305_v60  ;;  %v10278_v7 = vrot.slane %v10277_v4, 4 }
 0x898   :  { %v10230_v58 = vadd.f32 %v10229_v51, %v10211_v15  ;;  %v10269_v47 = vrot.slane %v10268_v5, 4 }
 0x899   :  { %v10312_v51 = vrot.slane %v10311_v59, 4  ;;  %v10279_v9 = vadd.f32 %v10278_v7, %v10277_v4 }
 0x89a   :  { %v24784_v8 = vadd.f32 %v10230_v58, %v24693_v3  ;;  %v10270_v14 = vadd.f32 %v10269_v47, %v10268_v5 }
 0x89b   :  { %v10193_v24 = vpop.f32.mrf.mxu3  ;;  %v10177_v62 = vpop.f32.mrf.mxu1  ;;  %v10313_v28 = vadd.f32 %v10312_v51, %v10311_v59  ;;  %v10280_v53 = vrot.slane %v10279_v9, 2 }
 0x89c   :  { %v10194_v61 = vadd.f32 %v10193_v24, %v10174_v31  ;;  %v10260_v24 = vrot.slane %v10259_v17, 4  ;;  %v10296_v3 = vmul.f32 %v24784_v8, %v24784_v8  ;;  %v10271_v15 = vrot.slane %v10270_v14, 2 }
 0x89d   :  { %v10231_v30 = vpop.f32.mrf.mxu2  ;;  %v10215_v20 = vpop.f32.mrf.mxu0  ;;  %v10281_v4 = vadd.f32 %v10280_v53, %v10279_v9 }
 0x89e   :  { %v10213_v45 = vadd.f32 %v10212_v48, %v10194_v61  ;;  %v10320_v48 = vadd.f32 %v10319_v13, %v10306_v23  ;;  %v10330_v61 = vrot.slane %v10329_v22, 4  ;;  %v10272_v5 = vadd.f32 %v10271_v15, %v10270_v14 }
 0x8a0   :  { %v10232_v46 = vadd.f32 %v10231_v30, %v10213_v45  ;;  %v10321_v1 = vrot.slane %v10320_v48, 4  ;;  %v10331_v49 = vadd.f32 %v10330_v61, %v10329_v22  ;;  %v10282_v22 = vrot.slane %v10281_v4, 1 }
 0x8a2   :  { %v24781_v50 = vadd.f32 %v10232_v46, %v24696_v36  ;;  %v10322_v55 = vadd.f32 %v10321_v1, %v10320_v48  ;;  %v10332_v27 = vrot.slane %v10331_v49, 2  ;;  %v10314_v46 = vrot.slane %v10313_v28, 2 }
 0x8a3   :  { %v10196_v29 = vpop.f32.mrf.mxu3  ;;  %v10179_v30 = vpop.f32.mrf.mxu1  ;;  %v10273_v48 = vrot.slane %v10272_v5, 1 }
 0x8a4   :  { %v10197_v0 = vadd.f32 %v10196_v29, %v10177_v62  ;;  %v10300_v36 = vmul.f32 %v24781_v50, %v24781_v50  ;;  %v10261_v62 = vadd.f32 %v10260_v24, %v10259_v17 }
 0x8a5   :  { %v10234_v35 = vpop.f32.mrf.mxu2  ;;  %v10217_v63 = vpop.f32.mrf.mxu0  ;;  %v10274_v1 = vadd.f32 %v10273_v48, %v10272_v5 }
 0x8a6   :  { %v10216_v11 = vadd.f32 %v10215_v20, %v10197_v0  ;;  %v10336_v20 = vadd.f32 %v10300_v36, %v10296_v3  ;;  %v10262_v19 = vrot.slane %v10261_v62, 2 }
 0x8a8   :  { %v10235_v31 = vadd.f32 %v10234_v35, %v10216_v11  ;;  %v10323_v11 = vrot.slane %v10322_v55, 2  ;;  %v10263_v35 = vadd.f32 %v10262_v19, %v10261_v62 }
 0x8aa   :  { %v24787_v57 = vadd.f32 %v10235_v31, %v24703_v34  ;;  %v10284_v34 = vadd.f32 %v24781_v50, %v24784_v8  ;;  %v10315_v31 = vadd.f32 %v10314_v46, %v10313_v28  ;;  %v10324_v59 = vadd.f32 %v10323_v11, %v10322_v55 }
 0x8ab   :  { %v10198_v18 = vpop.f32.mrf.mxu3  ;;  %v10264_v7 = vrot.slane %v10263_v35, 1 }
 0x8ac   :  { %v10199_v12 = vadd.f32 %v10198_v18, %v10179_v30  ;;  %v10304_v45 = vmul.f32 %v24787_v57, %v24787_v57  ;;  %v10285_v29 = vadd.f32 %v10284_v34, %v24787_v57  ;;  %v10283_v30 = vadd.f32 %v10282_v22, %v10281_v4 }
 0x8ad   :  { %v10236_v32 = vpop.f32.mrf.mxu2  ;;  %v10325_v51 = vrot.slane %v10324_v59, 1 }
 0x8ae   :  { %v10218_v2 = vadd.f32 %v10217_v63, %v10199_v12  ;;  %v10337_v0 = vadd.f32 %v10336_v20, %v10304_v45  ;;  %v10316_v12 = vrot.slane %v10315_v31, 1  ;;  %v10265_v63 = vadd.f32 %v10264_v7, %v10263_v35 }
 0x8af   :  { %v10326_v3 = vadd.f32 %v10325_v51, %v10324_v59  ;;  %v10255_v59 = vld [vmem:[%s24913_s8] sm:$0xf] }
 0x8b0   :  { %v10237_v26 = vadd.f32 %v10236_v32, %v10218_v2  ;;  %v10345_v14 = vadd.f32 %v10283_v30, %v10265_v63  ;;  %v10317_v32 = vadd.f32 %v10316_v12, %v10315_v31 }
 0x8b2   :  { %v24799_v39 = vadd.f32 %v10237_v26, %v24706_v43  ;;  %v10333_v43 = vadd.f32 %v10332_v27, %v10331_v49 }
 0x8b4   :  { %v10286_v60 = vadd.f32 %v10285_v29, %v24799_v39  ;;  %v10308_v21 = vmul.f32 %v24799_v39, %v24799_v39  ;;  %v10334_v47 = vrot.slane %v10333_v43, 1 }
 0x8b6   :  { %v10287_v42 = vrot.slane %v10286_v60, 4  ;;  %v10338_v23 = vadd.f32 %v10337_v0, %v10308_v21  ;;  %v10335_v2 = vadd.f32 %v10334_v47, %v10333_v43 }
 0x8b8   :  { %v10288_v6 = vadd.f32 %v10287_v42, %v10286_v60  ;;  %v10339_v17 = vrot.slane %v10338_v23, 4  ;;  %v10347_v26 = vadd.f32 %v10335_v2, %v10317_v32 }
 0x8ba   :  { %v10289_v13 = vrot.slane %v10288_v6, 2  ;;  %v10340_v58 = vadd.f32 %v10339_v17, %v10338_v23 }
 0x8bc   :  { %v10290_v24 = vadd.f32 %v10289_v13, %v10288_v6  ;;  %v10341_v61 = vrot.slane %v10340_v58, 2 }
 0x8be   :  { %v10291_v18 = vrot.slane %v10290_v24, 1  ;;  %v10342_v9 = vadd.f32 %v10341_v61, %v10340_v58 }
 0x8c0   :  { %v10292_v36 = vadd.f32 %v10291_v18, %v10290_v24  ;;  %v10343_v62 = vrot.slane %v10342_v9, 1 }
 0x8c2   :  { %v10346_v49 = vadd.f32 %v10292_v36, %v10274_v1  ;;  %v10344_v34 = vadd.f32 %v10343_v62, %v10342_v9 }
 0x8c4   :  { %v10349_v45 = vadd.f32 %v10346_v49, %v10345_v14  ;;  %v10348_v28 = vadd.f32 %v10344_v34, %v10326_v3  ;;  %v10256_v14 = vld [vmem:[%s24914_s9] sm:$0xf] }
 0x8c6   :  { %10351 = vrot.lane.b32.xlu2 %v10349_v45, %s16469_s1  ;;  %v10350_v53 = vadd.f32 %v10348_v28, %v10347_v26 }
 0x8c8   :  { %10354 = vrot.lane.b32.xlu0 %v10350_v53, %s16469_s1 }
 0x920   :  { %v10352_v55 = vpop.permute.xlu2 %10351 }
 0x921   :  { %v10353_v20 = vadd.f32 %v10352_v55, %v10349_v45 }
 0x923   :  { %10357 = vrot.lane.b32.xlu1 %v10353_v20, %s16470_s26 }
 0x93a   :  { %v10355_v29 = vpop.permute.xlu0 %10354 }
 0x93b   :  { %v10356_v19 = vadd.f32 %v10355_v29, %v10350_v53 }
 0x93d   :  { %10360 = vrot.lane.b32.xlu2 %v10356_v19, %s16470_s26 }
 0x995   :  { %v10358_v15 = vpop.permute.xlu1 %10357 }
 0x996   :  { %v10359_v0 = vadd.f32 %v10358_v15, %v10353_v20 }
 0x997   :  { %v10361_v60 = vpop.permute.xlu2 %10360 }
 0x998   :  { %v10363_v21 = vmul.f32 0.001953125, %v10359_v0  ;;  %v10362_v27 = vadd.f32 %v10361_v60, %v10356_v19 }
 0x99a   :  { %v10365_v4 = vmul.f32 %v10363_v21, %v10363_v21  ;;  %v10364_v42 = vmul.f32 0.001953125, %v10362_v27 }
 0x99c   :  { %v10366_v23 = vsub.f32 %v10364_v42, %v10365_v4 }
 0x99e   :  { %v10367_v46 = vadd.f32 1e-05, %v10366_v23 }
 0x9a0   :  { %16444 = vrsqrt.f32 %v10367_v46  ;;  %vm10374_vm3 = vweird.f32 %v10367_v46 }
 0x9a6   :  { %v16445_v11 = vpop.eup %16444 }
 0x9a7   :  { %v10369_v35 = vmul.f32 %v16445_v11, %v10367_v46  ;;  %vm10375_vm1 = vweird.f32 %v16445_v11 }
 0x9a8   :  { %vm10376_vm4 = vmor %vm10374_vm3, %vm10375_vm1 }
 0x9a9   :  { %v10370_v6 = vmul.f32 %v16445_v11, %v10369_v35 }
 0x9ab   :  { %v10371_v17 = vmul.f32 0.5, %v10370_v6 }
 0x9ad   :  { %v10372_v5 = vsub.f32 1.5, %v10371_v17 }
 0x9af   :  { %v10373_v43 = vmul.f32 %v16445_v11, %v10372_v5 }
 0x9b1   :  { %v10377_v22 = vsel %vm10376_vm4, %v16445_v11, %v10373_v43 }
 0x9b2   :  { %v10379_v13 = vrot.slane %v10377_v22, 7  ;;  %v10380_v58 = vrot.slane %v10377_v22, 6  ;;  %v10381_v31 = vrot.slane %v10377_v22, 5 }
 0x9b4   :  { %v10382_v7 = vsel %vm25112_vm5, %v10377_v22, %v10379_v13  ;;  %v10383_v48 = vsel %vm25113_vm6, %v10380_v58, %v10381_v31  ;;  %v25121_v31 = vld [vmem:[#allocation11_spill] sm:$0xff] }
 0x9b5   :  { %v10384_v24 = vsel %vm25114_vm10, %v10382_v7, %v10383_v48 }
 0x9b6   :  { %v10386_v47 = vmul.f32 %v10384_v24, %v10255_v59  ;;  %v25123_v24 = vld [vmem:[#allocation7_spill] sm:$0xff] }
 0x9b8   :  { %v10388_v61 = vperm.slane %v10386_v47, 0  ;;  %v10389_v30 = vperm.slane %v10386_v47, 1  ;;  %v10390_v18 = vperm.slane %v10386_v47, 2  ;;  %v10391_v12 = vperm.slane %v10386_v47, 3 }
 0x9ba   :  { %v10397_v51 = vmul.f32 %v10389_v30, %v10363_v21  ;;  %v10398_v9 = vmul.f32 %v10390_v18, %v10363_v21  ;;  %v10399_v63 = vmul.f32 %v10391_v12, %v10363_v21  ;;  %v10396_v1 = vmul.f32 %v10388_v61, %v10363_v21 }
 0x9bb   :  { %v10412_v53 = vmul.f32 %v10388_v61, %v24709_v16  ;;  %v10413_v55 = vmul.f32 %v10389_v30, %v24721_v44  ;;  %v10414_v20 = vmul.f32 %v10390_v18, %v24738_v38  ;;  %v10415_v19 = vmul.f32 %v10391_v12, %v24784_v8 }
 0x9bc   :  { %v10404_v36 = vrot.slane %v10397_v51, 7  ;;  %v10405_v2 = vrot.slane %v10398_v9, 6  ;;  %v10406_v62 = vrot.slane %v10399_v63, 5  ;;  %v10416_v15 = vmul.f32 %v10388_v61, %v24712_v40  ;;  %v25126_v51 = vld [vmem:[#allocation14_spill] sm:$0xff]  ;;  %v25127_v63 = vld [vmem:[#allocation9_spill] sm:$0xff] }
 0x9bd   :  { %v10417_v0 = vmul.f32 %v10389_v30, %v24724_v41  ;;  %v10418_v60 = vmul.f32 %v10390_v18, %v24733_v52  ;;  %v10419_v21 = vmul.f32 %v10391_v12, %v24781_v50  ;;  %v10420_v27 = vmul.f32 %v10388_v61, %v24715_v37 }
 0x9be   :  { %v10407_v49 = vsel %vm25115_vm0, %v10396_v1, %v10404_v36  ;;  %v10408_v32 = vsel %vm25116_vm2, %v10405_v2, %v10406_v62  ;;  %v10421_v16 = vmul.f32 %v10389_v30, %v24727_v33  ;;  %v10422_v44 = vmul.f32 %v10390_v18, %v24741_v10  ;;  %v25118_v33 = vld [vmem:[#allocation4_spill] sm:$0xff]  ;;  %v25119_v10 = vld [vmem:[#allocation5_spill] sm:$0xff] }
 0x9bf   :  { %v10409_v3 = vsel %vm25117_vm7, %v10407_v49, %v10408_v32  ;;  %v10423_v38 = vmul.f32 %v10391_v12, %v24787_v57  ;;  %v10424_v8 = vmul.f32 %v10388_v61, %v24718_v54  ;;  %v10425_v40 = vmul.f32 %v10389_v30, %v24730_v25  ;;  %v25120_v54 = vld [vmem:[#allocation6_spill] sm:$0xff]  ;;  %v25124_v61 = vld [vmem:[#allocation8_spill] sm:$0xff] }
 0x9c0   :  { %v10411_v34 = vsub.f32 %v10256_v14, %v10409_v3  ;;  %v10426_v52 = vmul.f32 %v10390_v18, %v24748_v56  ;;  %v10427_v50 = vmul.f32 %v10391_v12, %v24799_v39  ;;  %v25122_v56 = vld [vmem:[#allocation13_spill] sm:$0xff]  ;;  %v25125_v18 = vld [vmem:[#allocation10_spill] sm:$0xff]  ;;  %v25128_v14 = vld [vmem:[#allocation12_spill] sm:$0xff] }
 0x9c2   :  { %v10429_v45 = vperm.slane %v10411_v34, 0  ;;  %v10430_v26 = vperm.slane %v10411_v34, 1  ;;  %v10431_v28 = vperm.slane %v10411_v34, 2  ;;  %v10432_v29 = vperm.slane %v10411_v34, 3 }
 0x9c4   :  { %v10437_v4 = vadd.f32 %v10429_v45, %v10412_v53  ;;  %v10438_v42 = vadd.f32 %v10430_v26, %v10413_v55  ;;  %v10439_v23 = vadd.f32 %v10431_v28, %v10414_v20  ;;  %v10440_v41 = vadd.f32 %v10432_v29, %v10415_v19  ;;  %v25130_v20 = vld [vmem:[#allocation15_spill] sm:$0xff] }
 0x9c5   :  { %v10441_v46 = vadd.f32 %v10429_v45, %v10416_v15  ;;  %v10442_v37 = vadd.f32 %v10430_v26, %v10417_v0  ;;  %v10443_v11 = vadd.f32 %v10431_v28, %v10418_v60  ;;  %v10444_v35 = vadd.f32 %v10432_v29, %v10419_v21 }
 0x9c6   :  { %v10445_v6 = vadd.f32 %v10429_v45, %v10420_v27  ;;  %v10453_v17 = vadd.f32 %v10437_v4, %v25118_v33  ;;  %v10454_v5 = vadd.f32 %v10438_v42, %v25119_v10  ;;  %v10446_v57 = vadd.f32 %v10430_v26, %v10421_v16  ;;  %v25131_v27 = vld [vmem:[#allocation16_spill] sm:$0xff] }
 0x9c7   :  { %v10447_v43 = vadd.f32 %v10431_v28, %v10422_v44  ;;  %v10448_v22 = vadd.f32 %v10432_v29, %v10423_v38  ;;  %v10455_v13 = vadd.f32 %v10439_v23, %v25120_v54  ;;  %v10449_v25 = vadd.f32 %v10429_v45, %v10424_v8  ;;  %v25132_v44 = vld [vmem:[#allocation17_spill] sm:$0xff] }
 0x9c8   :  { %v10450_v58 = vadd.f32 %v10430_v26, %v10425_v40  ;;  %v10456_v59 = vadd.f32 %v10440_v41, %v25121_v31  ;;  %v10457_v7 = vadd.f32 %v10441_v46, %v25122_v56  ;;  %v10451_v39 = vadd.f32 %v10431_v28, %v10426_v52  ;;  %v25129_v26 = vld [vmem:[#allocation3_spill] sm:$0xff]  ;;  %v25133_v40 = vld [vmem:[#allocation18_spill] sm:$0xff] }
 0x9c9   :  { %v10452_v48 = vadd.f32 %v10432_v29, %v10427_v50  ;;  %v10458_v47 = vadd.f32 %v10442_v37, %v25123_v24  ;;  %v10459_v30 = vadd.f32 %v10443_v11, %v25124_v61  ;;  %v10460_v12 = vadd.f32 %v10444_v35, %v25125_v18 }
 0x9ca   :  { %v10461_v9 = vadd.f32 %v10445_v6, %v25126_v51  ;;  %vm10469_vm8 = vcmp.gt.f32.partialorder %v10453_v17, 0.0  ;;  %vm10470_vm9 = vcmp.gt.f32.partialorder %v10454_v5, 0.0  ;;  %v10462_v1 = vadd.f32 %v10446_v57, %v25127_v63 }
 0x9cb   :  { %v10485_v36 = vmul.f32 0.2, %v10453_v17  ;;  %v10486_v2 = vmul.f32 0.2, %v10454_v5  ;;  %v10487_v62 = vmul.f32 0.2, %v10455_v13  ;;  %v10463_v49 = vadd.f32 %v10447_v43, %v25128_v14 }
 0x9cc   :  { %vm10471_vm11 = vcmp.gt.f32.partialorder %v10455_v13, 0.0  ;;  %v10488_v32 = vmul.f32 0.2, %v10456_v59  ;;  %v10489_v3 = vmul.f32 0.2, %v10457_v7  ;;  %vm10472_vm12 = vcmp.gt.f32.partialorder %v10456_v59, 0.0 }
 0x9cd   :  { %vm10473_vm13 = vcmp.gt.f32.partialorder %v10457_v7, 0.0  ;;  %v10490_v34 = vmul.f32 0.2, %v10458_v47  ;;  %v10501_v45 = vsel %vm10469_vm8, %v10453_v17, %v10485_v36  ;;  %v10464_v28 = vadd.f32 %v10448_v22, %v25129_v26 }
 0x9ce   :  { %vm10474_vm14 = vcmp.gt.f32.partialorder %v10458_v47, 0.0  ;;  %v10491_v53 = vmul.f32 0.2, %v10459_v30  ;;  %v10502_v55 = vsel %vm10470_vm9, %v10454_v5, %v10486_v2  ;;  %10517 = vst [vmem:[%s24915_s10] sm:$0xff] %v10501_v45  ;;  %v10465_v29 = vadd.f32 %v10449_v25, %v25130_v20 }
 0x9cf   :  { %vm10475_vm15 = vcmp.gt.f32.partialorder %v10459_v30, 0.0  ;;  %v10492_v19 = vmul.f32 0.2, %v10460_v12  ;;  %v10503_v15 = vsel %vm10471_vm11, %v10455_v13, %v10487_v62  ;;  %vm10476_vm1 = vcmp.gt.f32.partialorder %v10460_v12, 0.0  ;;  %10518 = vst [vmem:[%s24915_s10 + $0x8] sm:$0xff] %v10502_v55 }
 0x9d0   :  { %v10493_v0 = vmul.f32 0.2, %v10461_v9  ;;  %v10504_v60 = vsel %vm10472_vm12, %v10456_v59, %v10488_v32  ;;  %v10505_v21 = vsel %vm10473_vm13, %v10457_v7, %v10489_v3  ;;  %v10466_v4 = vadd.f32 %v10450_v58, %v25131_v27  ;;  %10519 = vst [vmem:[%s24915_s10 + $0x10] sm:$0xff] %v10503_v15 }
 0x9d1   :  { %vm10477_vm3 = vcmp.gt.f32.partialorder %v10461_v9, 0.0  ;;  %v10494_v42 = vmul.f32 0.2, %v10462_v1  ;;  %v10506_v16 = vsel %vm10474_vm14, %v10458_v47, %v10490_v34  ;;  %v10467_v38 = vadd.f32 %v10451_v39, %v25132_v44  ;;  %10520 = vst [vmem:[%s24915_s10 + $0x18] sm:$0xff] %v10504_v60 }
 0x9d2   :  { %vm10478_vm4 = vcmp.gt.f32.partialorder %v10462_v1, 0.0  ;;  %v10495_v23 = vmul.f32 0.2, %v10463_v49  ;;  %v10507_v8 = vsel %vm10475_vm15, %v10459_v30, %v10491_v53  ;;  %v10468_v41 = vadd.f32 %v10452_v48, %v25133_v40  ;;  %10521 = vst [vmem:[%s24915_s10 + $0x20] sm:$0xff] %v10505_v21 }
 0x9d3   :  { %vm10479_vm5 = vcmp.gt.f32.partialorder %v10463_v49, 0.0  ;;  %v10496_v46 = vmul.f32 0.2, %v10464_v28  ;;  %v10508_v52 = vsel %vm10476_vm1, %v10460_v12, %v10492_v19  ;;  %vm10480_vm6 = vcmp.gt.f32.partialorder %v10464_v28, 0.0  ;;  %10522 = vst [vmem:[%s24915_s10 + $0x28] sm:$0xff] %v10506_v16 }
 0x9d4   :  { %v10497_v50 = vmul.f32 0.2, %v10465_v29  ;;  %v10509_v37 = vsel %vm10477_vm3, %v10461_v9, %v10493_v0  ;;  %vm10481_vm10 = vcmp.gt.f32.partialorder %v10465_v29, 0.0  ;;  %v10498_v11 = vmul.f32 0.2, %v10466_v4  ;;  %10523 = vst [vmem:[%s24915_s10 + $0x30] sm:$0xff] %v10507_v8 }
 0x9d5   :  { %v10510_v35 = vsel %vm10478_vm4, %v10462_v1, %v10494_v42  ;;  %vm10482_vm0 = vcmp.gt.f32.partialorder %v10466_v4, 0.0  ;;  %v10499_v6 = vmul.f32 0.2, %v10467_v38  ;;  %v10511_v33 = vsel %vm10479_vm5, %v10463_v49, %v10495_v23  ;;  %10524 = vst [vmem:[%s24915_s10 + $0x38] sm:$0xff] %v10508_v52 }
 0x9d6   :  { %vm10483_vm2 = vcmp.gt.f32.partialorder %v10467_v38, 0.0  ;;  %v10500_v17 = vmul.f32 0.2, %v10468_v41  ;;  %v10512_v10 = vsel %vm10480_vm6, %v10464_v28, %v10496_v46  ;;  %10525 = vst [vmem:[%s24915_s10 + $0x40] sm:$0xff] %v10509_v37  ;;  %vm10484_vm7 = vcmp.gt.f32.partialorder %v10468_v41, 0.0 }
 0x9d7   :  { %v10513_v5 = vsel %vm10481_vm10, %v10465_v29, %v10497_v50  ;;  %10526 = vst [vmem:[%s24915_s10 + $0x48] sm:$0xff] %v10510_v35  ;;  %v10514_v57 = vsel %vm10482_vm0, %v10466_v4, %v10498_v11  ;;  %v10515_v43 = vsel %vm10483_vm2, %v10467_v38, %v10499_v6 }
 0x9d8   :  { %10527 = vst [vmem:[%s24915_s10 + $0x50] sm:$0xff] %v10511_v33  ;;  %v10516_v22 = vsel %vm10484_vm7, %v10468_v41, %v10500_v17 }
 0x9d9   :  { %10528 = vst [vmem:[%s24915_s10 + $0x58] sm:$0xff] %v10512_v10 }
 0x9da   :  { %10529 = vst [vmem:[%s24915_s10 + $0x60] sm:$0xff] %v10513_v5 }
 0x9db   :  { %10530 = vst [vmem:[%s24915_s10 + $0x68] sm:$0xff] %v10514_v57 }
 0x9dc   :  { %10531 = vst [vmem:[%s24915_s10 + $0x70] sm:$0xff] %v10515_v43 }
 0x9dd   :  { %10532 = vst [vmem:[%s24915_s10 + $0x78] sm:$0xff] %v10516_v22 }

</bundles_post_ra>
